<compile_context>
chip_gen: v6e
topology: v6e:2x2x1
jax: 0.10.0
libtpu: 0.0.40
codegen_flags: <defaults>
</compile_context>

<pallas_src>
import jax
import jax.numpy as jnp
import numpy as np
from jax.experimental import pallas as pl
from jax.experimental.pallas import tpu as pltpu

KH = KW = 5
PAD = 2
C_IN, C_MID, C_OUT = 3, 64, 8
K1 = KH * KW * C_IN           # 75  : im2col contraction dim of conv1
K1_PAD = 128                  # zero-padded to one full lane tile
N2 = KH * KW * C_OUT          # 200 : kn2row output columns of conv2


def net_kernel(p_ref, w1_ref, w2_ref, o_ref, s_ref, acc_ref):
    """One image per grid step.

    p_ref  : (1, H*W, K1_PAD) bf16  im2col patches of the padded input
    w1_ref : (K1_PAD, C_MID)  bf16  conv1 weights, im2col layout (rows = (a,b,c))
    w2_ref : (C_MID, N2)      bf16  conv2 weights, kn2row layout (cols = (a,b,co))
    o_ref  : (1, H, W, C_OUT) f32   NHWC output tile
    s_ref  : (H*W, N2)        f32   VMEM scratch: kn2row matmul result
    acc_ref: (H+4, W+4, C_OUT) f32  VMEM scratch: padded conv2 accumulator
    """
    H = o_ref.shape[1]
    W = o_ref.shape[2]

    # ---- conv1: one MXU matmul (M=H*W, K=128, N=64), then ReLU --------------
    y1 = jnp.dot(p_ref[0], w1_ref[...], preferred_element_type=jnp.float32)
    y1 = jnp.maximum(y1, 0.0).astype(jnp.bfloat16)            # (H*W, 64)

    # ---- conv2 channel mixing: one MXU matmul (M=H*W, K=64, N=200) ----------
    # S[p*W+q, t*8 + co] = sum_ci y1[p, q, ci] * w2[co, ci, a, b],  t = a*5 + b
    s_ref[...] = jnp.dot(y1, w2_ref[...], preferred_element_type=jnp.float32)

    # ---- conv2 spatial scatter (kn2row): 25 statically shifted adds ---------
    # acc[i+2, j+2, :] accumulates output pixel (i, j); border cells are dead.
    # Source pixel (p, q) of tap (a, b) contributes to output (p-a+2, q-b+2),
    # i.e. accumulator cell (p-a+4, q-b+4), which is always in range, so each
    # tap is a full, unclipped slab add.
    acc_ref[...] = jnp.zeros_like(acc_ref)
    for a in range(KH):
        for b in range(KW):
            t = a * KW + b
            slab = s_ref[:, t * C_OUT:(t + 1) * C_OUT].reshape(H, W, C_OUT)
            acc_ref[2 * PAD - a:2 * PAD - a + H,
                    2 * PAD - b:2 * PAD - b + W, :] += slab

    # ---- write the H x W interior (== NHWC-contiguous PyTorch output) -------
    o_ref[0] = acc_ref[PAD:PAD + H, PAD:PAD + W, :]


def _im2col_patches(x_nchw):
    """(N, 3, H, W) f32 -> (N, H*W, K1_PAD) bf16 conv1 patch matrix."""
    N, _, H, W = x_nchw.shape
    x_nhwc = jnp.transpose(x_nchw, (0, 2, 3, 1))
    xp = jnp.pad(x_nhwc, ((0, 0), (PAD, PAD), (PAD, PAD), (0, 0)))
    taps = [xp[:, a:a + H, b:b + W, :] for a in range(KH) for b in range(KW)]
    patches = jnp.concatenate(taps, axis=-1)          # (N, H, W, 75), col = t*3 + c
    patches = patches.reshape(N, H * W, K1)
    patches = jnp.pad(patches, ((0, 0), (0, 0), (0, K1_PAD - K1)))
    return patches.astype(jnp.bfloat16)


def net_forward(x_nchw, w1_pt, w2_pt):
    """x_nchw: (N, 3, H, W) f32.  Returns (N, H, W, 8) f32 == PyTorch Net(x)."""
    N, _, H, W = x_nchw.shape

    patches = _im2col_patches(x_nchw)

    # conv1 weights -> im2col matrix, rows ordered (a, b, c); K padded 75 -> 128.
    w1_mat = jnp.transpose(w1_pt, (2, 3, 1, 0)).reshape(K1, C_MID)
    w1_mat = jnp.pad(w1_mat, ((0, K1_PAD - K1), (0, 0))).astype(jnp.bfloat16)

    # conv2 weights -> kn2row matrix (C_MID, 25*C_OUT), cols ordered (a, b, co).
    w2_mat = jnp.transpose(w2_pt, (1, 2, 3, 0)).reshape(C_MID, N2).astype(jnp.bfloat16)

    return pl.pallas_call(
        net_kernel,
        out_shape=jax.ShapeDtypeStruct((N, H, W, C_OUT), jnp.float32),
        grid_spec=pltpu.PrefetchScalarGridSpec(
            num_scalar_prefetch=0,
            grid=(N,),
            in_specs=[
                pl.BlockSpec((1, H * W, K1_PAD), lambda n: (n, 0, 0)),
                pl.BlockSpec((K1_PAD, C_MID), lambda n: (0, 0)),
                pl.BlockSpec((C_MID, N2), lambda n: (0, 0)),
            ],
            out_specs=pl.BlockSpec((1, H, W, C_OUT), lambda n: (n, 0, 0, 0)),
            scratch_shapes=[
                pltpu.VMEM((H * W, N2), jnp.float32),
                pltpu.VMEM((H + 2 * PAD, W + 2 * PAD, C_OUT), jnp.float32),
            ],
        ),
        compiler_params=pltpu.CompilerParams(
            dimension_semantics=("parallel",)),
    )(patches, w1_mat, w2_mat)


def net_reference(x_nchw, w1_pt, w2_pt):
    """Plain-JAX reference mirroring the PyTorch forward at the kernel's
    precision (bf16 matmul operands, f32 accumulation)."""
    x = x_nchw.astype(jnp.bfloat16)
    w1 = w1_pt.astype(jnp.bfloat16)
    w2 = w2_pt.astype(jnp.bfloat16)
    dn = jax.lax.conv_dimension_numbers(x.shape, w1.shape, ("NCHW", "OIHW", "NCHW"))
    y = jax.lax.conv_general_dilated(
        x, w1, (1, 1), ((PAD, PAD), (PAD, PAD)), dimension_numbers=dn,
        preferred_element_type=jnp.float32)
    y = jnp.maximum(y, 0.0).astype(jnp.bfloat16)
    dn2 = jax.lax.conv_dimension_numbers(y.shape, w2.shape, ("NCHW", "OIHW", "NCHW"))
    y = jax.lax.conv_general_dilated(
        y, w2, (1, 1), ((PAD, PAD), (PAD, PAD)), dimension_numbers=dn2,
        preferred_element_type=jnp.float32)
    return jnp.transpose(y, (0, 2, 3, 1))   # NCHW -> NHWC (the .permute)


if __name__ == "__main__":
    # Deterministic parameters: init.ones_ on both conv weights (no bias).
    w1 = jnp.ones((C_MID, C_IN, KH, KW), jnp.float32)   # conv1.weight
    w2 = jnp.ones((C_OUT, C_MID, KH, KW), jnp.float32)  # conv2.weight

    # Small deterministic input, NCHW as the PyTorch module expects (C must be 3).
    key = jax.random.PRNGKey(0)
    x = jax.random.normal(key, (2, C_IN, 16, 16), dtype=jnp.float32)

    out = jax.block_until_ready(net_forward(x, w1, w2))
    ref = jax.block_until_ready(net_reference(x, w1, w2))

    # Outputs are O(1e3); rtol dominates.  Tolerance accounts for bf16-operand /
    # f32-accumulate precision with differing summation order.
    np.testing.assert_allclose(np.asarray(out), np.asarray(ref),
                               rtol=1e-3, atol=1.0)
    print("KERNEL_OK")
</pallas_src>

<mosaic_0001>
module attributes {stable_mosaic.version = 11 : i64} {
  func.func @net_kernel(%arg0: i32, %arg1: memref<1x256x128xbf16, #tpu.memory_space<vmem>>, %arg2: memref<128x64xbf16, #tpu.memory_space<vmem>>, %arg3: memref<64x200xbf16, #tpu.memory_space<vmem>>, %arg4: memref<1x16x16x8xf32, #tpu.memory_space<vmem>>, %arg5: memref<256x200xf32, #tpu.memory_space<vmem>>, %arg6: memref<20x20x8xf32, #tpu.memory_space<vmem>>) attributes {dimension_semantics = [#tpu.dimension_semantics<parallel>], iteration_bounds = array<i64: 2>, scalar_prefetch = 0 : i64, scratch_operands = 2 : i64, tpu.core_type = #tpu.core_type<tc>, window_params = [{transform_indices = @transform_0, window_bounds = array<i64: 1, 256, 128>}, {pipeline_mode = #tpu.pipeline_mode<synchronous>, transform_indices = @transform_1, window_bounds = array<i64: 128, 64>}, {pipeline_mode = #tpu.pipeline_mode<synchronous>, transform_indices = @transform_2, window_bounds = array<i64: 64, 200>}, {transform_indices = @transform_3, window_bounds = array<i64: 1, 16, 16, 8>}]} {
    %c0 = arith.constant 0 : index
    %c0_0 = arith.constant 0 : index
    %c0_1 = arith.constant 0 : index
    %0 = vector.load %arg1[%c0, %c0_0, %c0_1] : memref<1x256x128xbf16, #tpu.memory_space<vmem>>, vector<1x256x128xbf16>
    %1 = vector.shape_cast %0 : vector<1x256x128xbf16> to vector<256x128xbf16>
    %c0_2 = arith.constant 0 : index
    %c0_3 = arith.constant 0 : index
    %2 = vector.load %arg2[%c0_2, %c0_3] : memref<128x64xbf16, #tpu.memory_space<vmem>>, vector<128x64xbf16>
    %cst = arith.constant dense<0.000000e+00> : vector<256x64xf32>
    %3 = tpu.matmul %1, %2, %cst {dimension_numbers = #tpu.dot_dimension_numbers<[1], [0], [0], [1], [0, 0, 1, 1], [], []>} : vector<256x128xbf16>, vector<128x64xbf16>, vector<256x64xf32> -> vector<256x64xf32>
    %cst_4 = arith.constant 0.000000e+00 : f32
    %4 = vector.broadcast %cst_4 : f32 to vector<256x64xf32>
    %5 = arith.maximumf %3, %4 : vector<256x64xf32>
    %6 = arith.truncf %5 : vector<256x64xf32> to vector<256x64xbf16>
    %c0_5 = arith.constant 0 : index
    %c0_6 = arith.constant 0 : index
    %7 = vector.load %arg3[%c0_5, %c0_6] : memref<64x200xbf16, #tpu.memory_space<vmem>>, vector<64x200xbf16>
    %cst_7 = arith.constant dense<0.000000e+00> : vector<256x200xf32>
    %8 = tpu.matmul %6, %7, %cst_7 {dimension_numbers = #tpu.dot_dimension_numbers<[1], [0], [0], [1], [0, 0, 1, 1], [], []>} : vector<256x64xbf16>, vector<64x200xbf16>, vector<256x200xf32> -> vector<256x200xf32>
    %c0_8 = arith.constant 0 : index
    %c0_9 = arith.constant 0 : index
    %9 = vector.load %arg5[%c0_8, %c0_9] : memref<256x200xf32, #tpu.memory_space<vmem>>, vector<256x200xf32>
    tpu.vector_store %arg5[%c0_8, %c0_9], %8 {strides = array<i32>} : memref<256x200xf32, #tpu.memory_space<vmem>>, vector<256x200xf32>,
    %cst_10 = arith.constant 0.000000e+00 : f32
    %10 = vector.broadcast %cst_10 : f32 to vector<20x20x8xf32>
    %c0_11 = arith.constant 0 : index
    %c0_12 = arith.constant 0 : index
    %c0_13 = arith.constant 0 : index
    %11 = vector.load %arg6[%c0_11, %c0_12, %c0_13] : memref<20x20x8xf32, #tpu.memory_space<vmem>>, vector<20x20x8xf32>
    tpu.vector_store %arg6[%c0_11, %c0_12, %c0_13], %10 {strides = array<i32>} : memref<20x20x8xf32, #tpu.memory_space<vmem>>, vector<20x20x8xf32>,
    %c0_14 = arith.constant 0 : index
    %c0_15 = arith.constant 0 : index
    %12 = vector.load %arg5[%c0_14, %c0_15] : memref<256x200xf32, #tpu.memory_space<vmem>>, vector<256x8xf32>
    %13 = vector.shape_cast %12 : vector<256x8xf32> to vector<16x16x8xf32>
    %c4 = arith.constant 4 : index
    %c4_16 = arith.constant 4 : index
    %c0_17 = arith.constant 0 : index
    %14 = vector.load %arg6[%c4, %c4_16, %c0_17] : memref<20x20x8xf32, #tpu.memory_space<vmem>>, vector<16x16x8xf32>
    %15 = arith.addf %14, %13 : vector<16x16x8xf32>
    %c4_18 = arith.constant 4 : index
    %c4_19 = arith.constant 4 : index
    %c0_20 = arith.constant 0 : index
    %16 = vector.load %arg6[%c4_18, %c4_19, %c0_20] : memref<20x20x8xf32, #tpu.memory_space<vmem>>, vector<16x16x8xf32>
    tpu.vector_store %arg6[%c4_18, %c4_19, %c0_20], %15 {strides = array<i32>} : memref<20x20x8xf32, #tpu.memory_space<vmem>>, vector<16x16x8xf32>,
    %c0_21 = arith.constant 0 : index
    %c8 = arith.constant 8 : index
    %17 = vector.load %arg5[%c0_21, %c8] : memref<256x200xf32, #tpu.memory_space<vmem>>, vector<256x8xf32>
    %18 = vector.shape_cast %17 : vector<256x8xf32> to vector<16x16x8xf32>
    %c4_22 = arith.constant 4 : index
    %c3 = arith.constant 3 : index
    %c0_23 = arith.constant 0 : index
    %19 = vector.load %arg6[%c4_22, %c3, %c0_23] : memref<20x20x8xf32, #tpu.memory_space<vmem>>, vector<16x16x8xf32>
    %20 = arith.addf %19, %18 : vector<16x16x8xf32>
    %c4_24 = arith.constant 4 : index
    %c3_25 = arith.constant 3 : index
    %c0_26 = arith.constant 0 : index
    %21 = vector.load %arg6[%c4_24, %c3_25, %c0_26] : memref<20x20x8xf32, #tpu.memory_space<vmem>>, vector<16x16x8xf32>
    tpu.vector_store %arg6[%c4_24, %c3_25, %c0_26], %20 {strides = array<i32>} : memref<20x20x8xf32, #tpu.memory_space<vmem>>, vector<16x16x8xf32>,
    %c0_27 = arith.constant 0 : index
    %c16 = arith.constant 16 : index
    %22 = vector.load %arg5[%c0_27, %c16] : memref<256x200xf32, #tpu.memory_space<vmem>>, vector<256x8xf32>
    %23 = vector.shape_cast %22 : vector<256x8xf32> to vector<16x16x8xf32>
    %c4_28 = arith.constant 4 : index
    %c2 = arith.constant 2 : index
    %c0_29 = arith.constant 0 : index
    %24 = vector.load %arg6[%c4_28, %c2, %c0_29] : memref<20x20x8xf32, #tpu.memory_space<vmem>>, vector<16x16x8xf32>
    %25 = arith.addf %24, %23 : vector<16x16x8xf32>
    %c4_30 = arith.constant 4 : index
    %c2_31 = arith.constant 2 : index
    %c0_32 = arith.constant 0 : index
    %26 = vector.load %arg6[%c4_30, %c2_31, %c0_32] : memref<20x20x8xf32, #tpu.memory_space<vmem>>, vector<16x16x8xf32>
    tpu.vector_store %arg6[%c4_30, %c2_31, %c0_32], %25 {strides = array<i32>} : memref<20x20x8xf32, #tpu.memory_space<vmem>>, vector<16x16x8xf32>,
    %c0_33 = arith.constant 0 : index
    %c24 = arith.constant 24 : index
    %27 = vector.load %arg5[%c0_33, %c24] : memref<256x200xf32, #tpu.memory_space<vmem>>, vector<256x8xf32>
    %28 = vector.shape_cast %27 : vector<256x8xf32> to vector<16x16x8xf32>
    %c4_34 = arith.constant 4 : index
    %c1 = arith.constant 1 : index
    %c0_35 = arith.constant 0 : index
    %29 = vector.load %arg6[%c4_34, %c1, %c0_35] : memref<20x20x8xf32, #tpu.memory_space<vmem>>, vector<16x16x8xf32>
    %30 = arith.addf %29, %28 : vector<16x16x8xf32>
    %c4_36 = arith.constant 4 : index
    %c1_37 = arith.constant 1 : index
    %c0_38 = arith.constant 0 : index
    %31 = vector.load %arg6[%c4_36, %c1_37, %c0_38] : memref<20x20x8xf32, #tpu.memory_space<vmem>>, vector<16x16x8xf32>
    tpu.vector_store %arg6[%c4_36, %c1_37, %c0_38], %30 {strides = array<i32>} : memref<20x20x8xf32, #tpu.memory_space<vmem>>, vector<16x16x8xf32>,
    %c0_39 = arith.constant 0 : index
    %c32 = arith.constant 32 : index
    %32 = vector.load %arg5[%c0_39, %c32] : memref<256x200xf32, #tpu.memory_space<vmem>>, vector<256x8xf32>
    %33 = vector.shape_cast %32 : vector<256x8xf32> to vector<16x16x8xf32>
    %c4_40 = arith.constant 4 : index
    %c0_41 = arith.constant 0 : index
    %c0_42 = arith.constant 0 : index
    %34 = vector.load %arg6[%c4_40, %c0_41, %c0_42] : memref<20x20x8xf32, #tpu.memory_space<vmem>>, vector<16x16x8xf32>
    %35 = arith.addf %34, %33 : vector<16x16x8xf32>
    %c4_43 = arith.constant 4 : index
    %c0_44 = arith.constant 0 : index
    %c0_45 = arith.constant 0 : index
    %36 = vector.load %arg6[%c4_43, %c0_44, %c0_45] : memref<20x20x8xf32, #tpu.memory_space<vmem>>, vector<16x16x8xf32>
    tpu.vector_store %arg6[%c4_43, %c0_44, %c0_45], %35 {strides = array<i32>} : memref<20x20x8xf32, #tpu.memory_space<vmem>>, vector<16x16x8xf32>,
    %c0_46 = arith.constant 0 : index
    %c40 = arith.constant 40 : index
    %37 = vector.load %arg5[%c0_46, %c40] : memref<256x200xf32, #tpu.memory_space<vmem>>, vector<256x8xf32>
    %38 = vector.shape_cast %37 : vector<256x8xf32> to vector<16x16x8xf32>
    %c3_47 = arith.constant 3 : index
    %c4_48 = arith.constant 4 : index
    %c0_49 = arith.constant 0 : index
    %39 = vector.load %arg6[%c3_47, %c4_48, %c0_49] : memref<20x20x8xf32, #tpu.memory_space<vmem>>, vector<16x16x8xf32>
    %40 = arith.addf %39, %38 : vector<16x16x8xf32>
    %c3_50 = arith.constant 3 : index
    %c4_51 = arith.constant 4 : index
    %c0_52 = arith.constant 0 : index
    %41 = vector.load %arg6[%c3_50, %c4_51, %c0_52] : memref<20x20x8xf32, #tpu.memory_space<vmem>>, vector<16x16x8xf32>
    tpu.vector_store %arg6[%c3_50, %c4_51, %c0_52], %40 {strides = array<i32>} : memref<20x20x8xf32, #tpu.memory_space<vmem>>, vector<16x16x8xf32>,
    %c0_53 = arith.constant 0 : index
    %c48 = arith.constant 48 : index
    %42 = vector.load %arg5[%c0_53, %c48] : memref<256x200xf32, #tpu.memory_space<vmem>>, vector<256x8xf32>
    %43 = vector.shape_cast %42 : vector<256x8xf32> to vector<16x16x8xf32>
    %c3_54 = arith.constant 3 : index
    %c3_55 = arith.constant 3 : index
    %c0_56 = arith.constant 0 : index
    %44 = vector.load %arg6[%c3_54, %c3_55, %c0_56] : memref<20x20x8xf32, #tpu.memory_space<vmem>>, vector<16x16x8xf32>
    %45 = arith.addf %44, %43 : vector<16x16x8xf32>
    %c3_57 = arith.constant 3 : index
    %c3_58 = arith.constant 3 : index
    %c0_59 = arith.constant 0 : index
    %46 = vector.load %arg6[%c3_57, %c3_58, %c0_59] : memref<20x20x8xf32, #tpu.memory_space<vmem>>, vector<16x16x8xf32>
    tpu.vector_store %arg6[%c3_57, %c3_58, %c0_59], %45 {strides = array<i32>} : memref<20x20x8xf32, #tpu.memory_space<vmem>>, vector<16x16x8xf32>,
    %c0_60 = arith.constant 0 : index
    %c56 = arith.constant 56 : index
    %47 = vector.load %arg5[%c0_60, %c56] : memref<256x200xf32, #tpu.memory_space<vmem>>, vector<256x8xf32>
    %48 = vector.shape_cast %47 : vector<256x8xf32> to vector<16x16x8xf32>
    %c3_61 = arith.constant 3 : index
    %c2_62 = arith.constant 2 : index
    %c0_63 = arith.constant 0 : index
    %49 = vector.load %arg6[%c3_61, %c2_62, %c0_63] : memref<20x20x8xf32, #tpu.memory_space<vmem>>, vector<16x16x8xf32>
    %50 = arith.addf %49, %48 : vector<16x16x8xf32>
    %c3_64 = arith.constant 3 : index
    %c2_65 = arith.constant 2 : index
    %c0_66 = arith.constant 0 : index
    %51 = vector.load %arg6[%c3_64, %c2_65, %c0_66] : memref<20x20x8xf32, #tpu.memory_space<vmem>>, vector<16x16x8xf32>
    tpu.vector_store %arg6[%c3_64, %c2_65, %c0_66], %50 {strides = array<i32>} : memref<20x20x8xf32, #tpu.memory_space<vmem>>, vector<16x16x8xf32>,
    %c0_67 = arith.constant 0 : index
    %c64 = arith.constant 64 : index
    %52 = vector.load %arg5[%c0_67, %c64] : memref<256x200xf32, #tpu.memory_space<vmem>>, vector<256x8xf32>
    %53 = vector.shape_cast %52 : vector<256x8xf32> to vector<16x16x8xf32>
    %c3_68 = arith.constant 3 : index
    %c1_69 = arith.constant 1 : index
    %c0_70 = arith.constant 0 : index
    %54 = vector.load %arg6[%c3_68, %c1_69, %c0_70] : memref<20x20x8xf32, #tpu.memory_space<vmem>>, vector<16x16x8xf32>
    %55 = arith.addf %54, %53 : vector<16x16x8xf32>
    %c3_71 = arith.constant 3 : index
    %c1_72 = arith.constant 1 : index
    %c0_73 = arith.constant 0 : index
    %56 = vector.load %arg6[%c3_71, %c1_72, %c0_73] : memref<20x20x8xf32, #tpu.memory_space<vmem>>, vector<16x16x8xf32>
    tpu.vector_store %arg6[%c3_71, %c1_72, %c0_73], %55 {strides = array<i32>} : memref<20x20x8xf32, #tpu.memory_space<vmem>>, vector<16x16x8xf32>,
    %c0_74 = arith.constant 0 : index
    %c72 = arith.constant 72 : index
    %57 = vector.load %arg5[%c0_74, %c72] : memref<256x200xf32, #tpu.memory_space<vmem>>, vector<256x8xf32>
    %58 = vector.shape_cast %57 : vector<256x8xf32> to vector<16x16x8xf32>
    %c3_75 = arith.constant 3 : index
    %c0_76 = arith.constant 0 : index
    %c0_77 = arith.constant 0 : index
    %59 = vector.load %arg6[%c3_75, %c0_76, %c0_77] : memref<20x20x8xf32, #tpu.memory_space<vmem>>, vector<16x16x8xf32>
    %60 = arith.addf %59, %58 : vector<16x16x8xf32>
    %c3_78 = arith.constant 3 : index
    %c0_79 = arith.constant 0 : index
    %c0_80 = arith.constant 0 : index
    %61 = vector.load %arg6[%c3_78, %c0_79, %c0_80] : memref<20x20x8xf32, #tpu.memory_space<vmem>>, vector<16x16x8xf32>
    tpu.vector_store %arg6[%c3_78, %c0_79, %c0_80], %60 {strides = array<i32>} : memref<20x20x8xf32, #tpu.memory_space<vmem>>, vector<16x16x8xf32>,
    %c0_81 = arith.constant 0 : index
    %c80 = arith.constant 80 : index
    %62 = vector.load %arg5[%c0_81, %c80] : memref<256x200xf32, #tpu.memory_space<vmem>>, vector<256x8xf32>
    %63 = vector.shape_cast %62 : vector<256x8xf32> to vector<16x16x8xf32>
    %c2_82 = arith.constant 2 : index
    %c4_83 = arith.constant 4 : index
    %c0_84 = arith.constant 0 : index
    %64 = vector.load %arg6[%c2_82, %c4_83, %c0_84] : memref<20x20x8xf32, #tpu.memory_space<vmem>>, vector<16x16x8xf32>
    %65 = arith.addf %64, %63 : vector<16x16x8xf32>
    %c2_85 = arith.constant 2 : index
    %c4_86 = arith.constant 4 : index
    %c0_87 = arith.constant 0 : index
    %66 = vector.load %arg6[%c2_85, %c4_86, %c0_87] : memref<20x20x8xf32, #tpu.memory_space<vmem>>, vector<16x16x8xf32>
    tpu.vector_store %arg6[%c2_85, %c4_86, %c0_87], %65 {strides = array<i32>} : memref<20x20x8xf32, #tpu.memory_space<vmem>>, vector<16x16x8xf32>,
    %c0_88 = arith.constant 0 : index
    %c88 = arith.constant 88 : index
    %67 = vector.load %arg5[%c0_88, %c88] : memref<256x200xf32, #tpu.memory_space<vmem>>, vector<256x8xf32>
    %68 = vector.shape_cast %67 : vector<256x8xf32> to vector<16x16x8xf32>
    %c2_89 = arith.constant 2 : index
    %c3_90 = arith.constant 3 : index
    %c0_91 = arith.constant 0 : index
    %69 = vector.load %arg6[%c2_89, %c3_90, %c0_91] : memref<20x20x8xf32, #tpu.memory_space<vmem>>, vector<16x16x8xf32>
    %70 = arith.addf %69, %68 : vector<16x16x8xf32>
    %c2_92 = arith.constant 2 : index
    %c3_93 = arith.constant 3 : index
    %c0_94 = arith.constant 0 : index
    %71 = vector.load %arg6[%c2_92, %c3_93, %c0_94] : memref<20x20x8xf32, #tpu.memory_space<vmem>>, vector<16x16x8xf32>
    tpu.vector_store %arg6[%c2_92, %c3_93, %c0_94], %70 {strides = array<i32>} : memref<20x20x8xf32, #tpu.memory_space<vmem>>, vector<16x16x8xf32>,
    %c0_95 = arith.constant 0 : index
    %c96 = arith.constant 96 : index
    %72 = vector.load %arg5[%c0_95, %c96] : memref<256x200xf32, #tpu.memory_space<vmem>>, vector<256x8xf32>
    %73 = vector.shape_cast %72 : vector<256x8xf32> to vector<16x16x8xf32>
    %c2_96 = arith.constant 2 : index
    %c2_97 = arith.constant 2 : index
    %c0_98 = arith.constant 0 : index
    %74 = vector.load %arg6[%c2_96, %c2_97, %c0_98] : memref<20x20x8xf32, #tpu.memory_space<vmem>>, vector<16x16x8xf32>
    %75 = arith.addf %74, %73 : vector<16x16x8xf32>
    %c2_99 = arith.constant 2 : index
    %c2_100 = arith.constant 2 : index
    %c0_101 = arith.constant 0 : index
    %76 = vector.load %arg6[%c2_99, %c2_100, %c0_101] : memref<20x20x8xf32, #tpu.memory_space<vmem>>, vector<16x16x8xf32>
    tpu.vector_store %arg6[%c2_99, %c2_100, %c0_101], %75 {strides = array<i32>} : memref<20x20x8xf32, #tpu.memory_space<vmem>>, vector<16x16x8xf32>,
    %c0_102 = arith.constant 0 : index
    %c104 = arith.constant 104 : index
    %77 = vector.load %arg5[%c0_102, %c104] : memref<256x200xf32, #tpu.memory_space<vmem>>, vector<256x8xf32>
    %78 = vector.shape_cast %77 : vector<256x8xf32> to vector<16x16x8xf32>
    %c2_103 = arith.constant 2 : index
    %c1_104 = arith.constant 1 : index
    %c0_105 = arith.constant 0 : index
    %79 = vector.load %arg6[%c2_103, %c1_104, %c0_105] : memref<20x20x8xf32, #tpu.memory_space<vmem>>, vector<16x16x8xf32>
    %80 = arith.addf %79, %78 : vector<16x16x8xf32>
    %c2_106 = arith.constant 2 : index
    %c1_107 = arith.constant 1 : index
    %c0_108 = arith.constant 0 : index
    %81 = vector.load %arg6[%c2_106, %c1_107, %c0_108] : memref<20x20x8xf32, #tpu.memory_space<vmem>>, vector<16x16x8xf32>
    tpu.vector_store %arg6[%c2_106, %c1_107, %c0_108], %80 {strides = array<i32>} : memref<20x20x8xf32, #tpu.memory_space<vmem>>, vector<16x16x8xf32>,
    %c0_109 = arith.constant 0 : index
    %c112 = arith.constant 112 : index
    %82 = vector.load %arg5[%c0_109, %c112] : memref<256x200xf32, #tpu.memory_space<vmem>>, vector<256x8xf32>
    %83 = vector.shape_cast %82 : vector<256x8xf32> to vector<16x16x8xf32>
    %c2_110 = arith.constant 2 : index
    %c0_111 = arith.constant 0 : index
    %c0_112 = arith.constant 0 : index
    %84 = vector.load %arg6[%c2_110, %c0_111, %c0_112] : memref<20x20x8xf32, #tpu.memory_space<vmem>>, vector<16x16x8xf32>
    %85 = arith.addf %84, %83 : vector<16x16x8xf32>
    %c2_113 = arith.constant 2 : index
    %c0_114 = arith.constant 0 : index
    %c0_115 = arith.constant 0 : index
    %86 = vector.load %arg6[%c2_113, %c0_114, %c0_115] : memref<20x20x8xf32, #tpu.memory_space<vmem>>, vector<16x16x8xf32>
    tpu.vector_store %arg6[%c2_113, %c0_114, %c0_115], %85 {strides = array<i32>} : memref<20x20x8xf32, #tpu.memory_space<vmem>>, vector<16x16x8xf32>,
    %c0_116 = arith.constant 0 : index
    %c120 = arith.constant 120 : index
    %87 = vector.load %arg5[%c0_116, %c120] : memref<256x200xf32, #tpu.memory_space<vmem>>, vector<256x8xf32>
    %88 = vector.shape_cast %87 : vector<256x8xf32> to vector<16x16x8xf32>
    %c1_117 = arith.constant 1 : index
    %c4_118 = arith.constant 4 : index
    %c0_119 = arith.constant 0 : index
    %89 = vector.load %arg6[%c1_117, %c4_118, %c0_119] : memref<20x20x8xf32, #tpu.memory_space<vmem>>, vector<16x16x8xf32>
    %90 = arith.addf %89, %88 : vector<16x16x8xf32>
    %c1_120 = arith.constant 1 : index
    %c4_121 = arith.constant 4 : index
    %c0_122 = arith.constant 0 : index
    %91 = vector.load %arg6[%c1_120, %c4_121, %c0_122] : memref<20x20x8xf32, #tpu.memory_space<vmem>>, vector<16x16x8xf32>
    tpu.vector_store %arg6[%c1_120, %c4_121, %c0_122], %90 {strides = array<i32>} : memref<20x20x8xf32, #tpu.memory_space<vmem>>, vector<16x16x8xf32>,
    %c0_123 = arith.constant 0 : index
    %c128 = arith.constant 128 : index
    %92 = vector.load %arg5[%c0_123, %c128] : memref<256x200xf32, #tpu.memory_space<vmem>>, vector<256x8xf32>
    %93 = vector.shape_cast %92 : vector<256x8xf32> to vector<16x16x8xf32>
    %c1_124 = arith.constant 1 : index
    %c3_125 = arith.constant 3 : index
    %c0_126 = arith.constant 0 : index
    %94 = vector.load %arg6[%c1_124, %c3_125, %c0_126] : memref<20x20x8xf32, #tpu.memory_space<vmem>>, vector<16x16x8xf32>
    %95 = arith.addf %94, %93 : vector<16x16x8xf32>
    %c1_127 = arith.constant 1 : index
    %c3_128 = arith.constant 3 : index
    %c0_129 = arith.constant 0 : index
    %96 = vector.load %arg6[%c1_127, %c3_128, %c0_129] : memref<20x20x8xf32, #tpu.memory_space<vmem>>, vector<16x16x8xf32>
    tpu.vector_store %arg6[%c1_127, %c3_128, %c0_129], %95 {strides = array<i32>} : memref<20x20x8xf32, #tpu.memory_space<vmem>>, vector<16x16x8xf32>,
    %c0_130 = arith.constant 0 : index
    %c136 = arith.constant 136 : index
    %97 = vector.load %arg5[%c0_130, %c136] : memref<256x200xf32, #tpu.memory_space<vmem>>, vector<256x8xf32>
    %98 = vector.shape_cast %97 : vector<256x8xf32> to vector<16x16x8xf32>
    %c1_131 = arith.constant 1 : index
    %c2_132 = arith.constant 2 : index
    %c0_133 = arith.constant 0 : index
    %99 = vector.load %arg6[%c1_131, %c2_132, %c0_133] : memref<20x20x8xf32, #tpu.memory_space<vmem>>, vector<16x16x8xf32>
    %100 = arith.addf %99, %98 : vector<16x16x8xf32>
    %c1_134 = arith.constant 1 : index
    %c2_135 = arith.constant 2 : index
    %c0_136 = arith.constant 0 : index
    %101 = vector.load %arg6[%c1_134, %c2_135, %c0_136] : memref<20x20x8xf32, #tpu.memory_space<vmem>>, vector<16x16x8xf32>
    tpu.vector_store %arg6[%c1_134, %c2_135, %c0_136], %100 {strides = array<i32>} : memref<20x20x8xf32, #tpu.memory_space<vmem>>, vector<16x16x8xf32>,
    %c0_137 = arith.constant 0 : index
    %c144 = arith.constant 144 : index
    %102 = vector.load %arg5[%c0_137, %c144] : memref<256x200xf32, #tpu.memory_space<vmem>>, vector<256x8xf32>
    %103 = vector.shape_cast %102 : vector<256x8xf32> to vector<16x16x8xf32>
    %c1_138 = arith.constant 1 : index
    %c1_139 = arith.constant 1 : index
    %c0_140 = arith.constant 0 : index
    %104 = vector.load %arg6[%c1_138, %c1_139, %c0_140] : memref<20x20x8xf32, #tpu.memory_space<vmem>>, vector<16x16x8xf32>
    %105 = arith.addf %104, %103 : vector<16x16x8xf32>
    %c1_141 = arith.constant 1 : index
    %c1_142 = arith.constant 1 : index
    %c0_143 = arith.constant 0 : index
    %106 = vector.load %arg6[%c1_141, %c1_142, %c0_143] : memref<20x20x8xf32, #tpu.memory_space<vmem>>, vector<16x16x8xf32>
    tpu.vector_store %arg6[%c1_141, %c1_142, %c0_143], %105 {strides = array<i32>} : memref<20x20x8xf32, #tpu.memory_space<vmem>>, vector<16x16x8xf32>,
    %c0_144 = arith.constant 0 : index
    %c152 = arith.constant 152 : index
    %107 = vector.load %arg5[%c0_144, %c152] : memref<256x200xf32, #tpu.memory_space<vmem>>, vector<256x8xf32>
    %108 = vector.shape_cast %107 : vector<256x8xf32> to vector<16x16x8xf32>
    %c1_145 = arith.constant 1 : index
    %c0_146 = arith.constant 0 : index
    %c0_147 = arith.constant 0 : index
    %109 = vector.load %arg6[%c1_145, %c0_146, %c0_147] : memref<20x20x8xf32, #tpu.memory_space<vmem>>, vector<16x16x8xf32>
    %110 = arith.addf %109, %108 : vector<16x16x8xf32>
    %c1_148 = arith.constant 1 : index
    %c0_149 = arith.constant 0 : index
    %c0_150 = arith.constant 0 : index
    %111 = vector.load %arg6[%c1_148, %c0_149, %c0_150] : memref<20x20x8xf32, #tpu.memory_space<vmem>>, vector<16x16x8xf32>
    tpu.vector_store %arg6[%c1_148, %c0_149, %c0_150], %110 {strides = array<i32>} : memref<20x20x8xf32, #tpu.memory_space<vmem>>, vector<16x16x8xf32>,
    %c0_151 = arith.constant 0 : index
    %c160 = arith.constant 160 : index
    %112 = vector.load %arg5[%c0_151, %c160] : memref<256x200xf32, #tpu.memory_space<vmem>>, vector<256x8xf32>
    %113 = vector.shape_cast %112 : vector<256x8xf32> to vector<16x16x8xf32>
    %c0_152 = arith.constant 0 : index
    %c4_153 = arith.constant 4 : index
    %c0_154 = arith.constant 0 : index
    %114 = vector.load %arg6[%c0_152, %c4_153, %c0_154] : memref<20x20x8xf32, #tpu.memory_space<vmem>>, vector<16x16x8xf32>
    %115 = arith.addf %114, %113 : vector<16x16x8xf32>
    %c0_155 = arith.constant 0 : index
    %c4_156 = arith.constant 4 : index
    %c0_157 = arith.constant 0 : index
    %116 = vector.load %arg6[%c0_155, %c4_156, %c0_157] : memref<20x20x8xf32, #tpu.memory_space<vmem>>, vector<16x16x8xf32>
    tpu.vector_store %arg6[%c0_155, %c4_156, %c0_157], %115 {strides = array<i32>} : memref<20x20x8xf32, #tpu.memory_space<vmem>>, vector<16x16x8xf32>,
    %c0_158 = arith.constant 0 : index
    %c168 = arith.constant 168 : index
    %117 = vector.load %arg5[%c0_158, %c168] : memref<256x200xf32, #tpu.memory_space<vmem>>, vector<256x8xf32>
    %118 = vector.shape_cast %117 : vector<256x8xf32> to vector<16x16x8xf32>
    %c0_159 = arith.constant 0 : index
    %c3_160 = arith.constant 3 : index
    %c0_161 = arith.constant 0 : index
    %119 = vector.load %arg6[%c0_159, %c3_160, %c0_161] : memref<20x20x8xf32, #tpu.memory_space<vmem>>, vector<16x16x8xf32>
    %120 = arith.addf %119, %118 : vector<16x16x8xf32>
    %c0_162 = arith.constant 0 : index
    %c3_163 = arith.constant 3 : index
    %c0_164 = arith.constant 0 : index
    %121 = vector.load %arg6[%c0_162, %c3_163, %c0_164] : memref<20x20x8xf32, #tpu.memory_space<vmem>>, vector<16x16x8xf32>
    tpu.vector_store %arg6[%c0_162, %c3_163, %c0_164], %120 {strides = array<i32>} : memref<20x20x8xf32, #tpu.memory_space<vmem>>, vector<16x16x8xf32>,
    %c0_165 = arith.constant 0 : index
    %c176 = arith.constant 176 : index
    %122 = vector.load %arg5[%c0_165, %c176] : memref<256x200xf32, #tpu.memory_space<vmem>>, vector<256x8xf32>
    %123 = vector.shape_cast %122 : vector<256x8xf32> to vector<16x16x8xf32>
    %c0_166 = arith.constant 0 : index
    %c2_167 = arith.constant 2 : index
    %c0_168 = arith.constant 0 : index
    %124 = vector.load %arg6[%c0_166, %c2_167, %c0_168] : memref<20x20x8xf32, #tpu.memory_space<vmem>>, vector<16x16x8xf32>
    %125 = arith.addf %124, %123 : vector<16x16x8xf32>
    %c0_169 = arith.constant 0 : index
    %c2_170 = arith.constant 2 : index
    %c0_171 = arith.constant 0 : index
    %126 = vector.load %arg6[%c0_169, %c2_170, %c0_171] : memref<20x20x8xf32, #tpu.memory_space<vmem>>, vector<16x16x8xf32>
    tpu.vector_store %arg6[%c0_169, %c2_170, %c0_171], %125 {strides = array<i32>} : memref<20x20x8xf32, #tpu.memory_space<vmem>>, vector<16x16x8xf32>,
    %c0_172 = arith.constant 0 : index
    %c184 = arith.constant 184 : index
    %127 = vector.load %arg5[%c0_172, %c184] : memref<256x200xf32, #tpu.memory_space<vmem>>, vector<256x8xf32>
    %128 = vector.shape_cast %127 : vector<256x8xf32> to vector<16x16x8xf32>
    %c0_173 = arith.constant 0 : index
    %c1_174 = arith.constant 1 : index
    %c0_175 = arith.constant 0 : index
    %129 = vector.load %arg6[%c0_173, %c1_174, %c0_175] : memref<20x20x8xf32, #tpu.memory_space<vmem>>, vector<16x16x8xf32>
    %130 = arith.addf %129, %128 : vector<16x16x8xf32>
    %c0_176 = arith.constant 0 : index
    %c1_177 = arith.constant 1 : index
    %c0_178 = arith.constant 0 : index
    %131 = vector.load %arg6[%c0_176, %c1_177, %c0_178] : memref<20x20x8xf32, #tpu.memory_space<vmem>>, vector<16x16x8xf32>
    tpu.vector_store %arg6[%c0_176, %c1_177, %c0_178], %130 {strides = array<i32>} : memref<20x20x8xf32, #tpu.memory_space<vmem>>, vector<16x16x8xf32>,
    %c0_179 = arith.constant 0 : index
    %c192 = arith.constant 192 : index
    %132 = vector.load %arg5[%c0_179, %c192] : memref<256x200xf32, #tpu.memory_space<vmem>>, vector<256x8xf32>
    %133 = vector.shape_cast %132 : vector<256x8xf32> to vector<16x16x8xf32>
    %c0_180 = arith.constant 0 : index
    %c0_181 = arith.constant 0 : index
    %c0_182 = arith.constant 0 : index
    %134 = vector.load %arg6[%c0_180, %c0_181, %c0_182] : memref<20x20x8xf32, #tpu.memory_space<vmem>>, vector<16x16x8xf32>
    %135 = arith.addf %134, %133 : vector<16x16x8xf32>
    %c0_183 = arith.constant 0 : index
    %c0_184 = arith.constant 0 : index
    %c0_185 = arith.constant 0 : index
    %136 = vector.load %arg6[%c0_183, %c0_184, %c0_185] : memref<20x20x8xf32, #tpu.memory_space<vmem>>, vector<16x16x8xf32>
    tpu.vector_store %arg6[%c0_183, %c0_184, %c0_185], %135 {strides = array<i32>} : memref<20x20x8xf32, #tpu.memory_space<vmem>>, vector<16x16x8xf32>,
    %c2_186 = arith.constant 2 : index
    %c2_187 = arith.constant 2 : index
    %c0_188 = arith.constant 0 : index
    %137 = vector.load %arg6[%c2_186, %c2_187, %c0_188] : memref<20x20x8xf32, #tpu.memory_space<vmem>>, vector<16x16x8xf32>
    %c0_189 = arith.constant 0 : index
    %c0_190 = arith.constant 0 : index
    %c0_191 = arith.constant 0 : index
    %c0_192 = arith.constant 0 : index
    %138 = vector.load %arg4[%c0_189, %c0_190, %c0_191, %c0_192] : memref<1x16x16x8xf32, #tpu.memory_space<vmem>>, vector<1x16x16x8xf32>
    %139 = vector.shape_cast %138 : vector<1x16x16x8xf32> to vector<16x16x8xf32>
    %140 = vector.shape_cast %137 : vector<16x16x8xf32> to vector<1x16x16x8xf32>
    tpu.vector_store %arg4[%c0_189, %c0_190, %c0_191, %c0_192], %140 {strides = array<i32>} : memref<1x16x16x8xf32, #tpu.memory_space<vmem>>, vector<1x16x16x8xf32>,
    return
  }
  func.func @transform_0(%arg0: i32) -> (i32, i32, i32) {
    %c0_i32 = arith.constant 0 : i32
    %c0_i32_0 = arith.constant 0 : i32
    %c0_i32_1 = arith.constant 0 : i32
    return %arg0, %c0_i32, %c0_i32_0 : i32, i32, i32
  }
  func.func @transform_1(%arg0: i32) -> (i32, i32) {
    %c0_i32 = arith.constant 0 : i32
    %c0_i32_0 = arith.constant 0 : i32
    %c0_i32_1 = arith.constant 0 : i32
    return %c0_i32, %c0_i32_0 : i32, i32
  }
  func.func @transform_2(%arg0: i32) -> (i32, i32) {
    %c0_i32 = arith.constant 0 : i32
    %c0_i32_0 = arith.constant 0 : i32
    %c0_i32_1 = arith.constant 0 : i32
    return %c0_i32, %c0_i32_0 : i32, i32
  }
  func.func @transform_3(%arg0: i32) -> (i32, i32, i32, i32) {
    %c0_i32 = arith.constant 0 : i32
    %c0_i32_0 = arith.constant 0 : i32
    %c0_i32_1 = arith.constant 0 : i32
    %c0_i32_2 = arith.constant 0 : i32
    return %arg0, %c0_i32, %c0_i32_0, %c0_i32_1 : i32, i32, i32, i32
  }
}

</mosaic_0001>

<bundles_post_ra>
// kernel: tpu_custom_call.1
= control target key start
LH: loop header
LB: loop body
LE: loop exit
PB: predicated region body
PF: predicated region fallthrough
CT: control target
= control target key end

     0   :  { %8 = vsyncpa [#allocation5], 0  ;;  %s10797_s0 = inlined_call_operand.hbm [shape: bf16[2,256,128], index: 0, kind: input, shape index: {}]   ;;  %s10798_s1 = inlined_call_operand.vmem [shape: bf16[128,64], index: 1, kind: input, shape index: {}]   ;;  %s10799_s2 = inlined_call_operand.vmem [shape: bf16[64,200], index: 2, kind: input, shape index: {}]   ;;  %s10800_s3 = inlined_call_operand.vmem [shape: f32[2,16,16,8], index: 3, kind: output, shape index: {}]  }
   0x1   :  { %10 = vsyncpa [#allocation5 + $0x1], 0  ;;  %s7631_s12 = smov 0   ;;  %s7633_s13 = smov 0  }
   0x2   :  { %s7635_s14 = smov 0   ;;  %s7637_s15 = smov 0  }
   0x3 LB: > { %s7650_s16 = sadd.s32 4294967295, %s7589_s15   ;;  %s7653_s17 = sadd.s32 1, %s7589_s15   ;;  %s7589_s15 = sphi %s7637_s15, %s10809_s15   ;;  %s7585_s14 = sphi %s7635_s14, %s10808_s14   ;;  %s7581_s13 = sphi %s7633_s13, %s10807_s13   ;;  %s7577_s12 = sphi %s7631_s12, %s10806_s12  }
   0x4   : > { %s20_s18 = ssub.s32 %s7589_s15, %s7653_s17  ;;  %s23_s19 = sadd.s32 1, %s7585_s14 }
   0x5   : > { %p21_p0 = scmp.eq.s32.totalorder %s20_s18, 0  ;;  %p30_p1 = scmp.ne.s32.totalorder %s7585_s14, %s7581_s13 }
   0x6   : > { %p31_p2 = scmp.eq.s32.totalorder %s7589_s15, 0  ;;  %p36_p3 = scmp.ne.s32.totalorder %s7581_s13, %s7577_s12 }
   0x7   : > { %s7663_s20 = scalar_select %p21_p0, %s7585_s14, %s23_s19  }
   0x8   : > { %p32_p4 = por %p31_p2, %p30_p1  ;;  %p37_p5 = scmp.eq.s32.totalorder %s7650_s16, 0 }
   0x9   : > { %p7437_p6 = scmp.lt.s32.totalorder %s7589_s15, 2  ;;  %s134_s22 = sand.u32 1, %s7585_s14  }
   0xa   : > { %p7667_p7 = por %p37_p5, %p36_p3  ;;  %s7292_s23 = sshll.u32 %s134_s22, 7 }
   0xb   : > { %s7349_s24 = sshll.u32 %s7589_s15, 11  ;;  %s138_s28 = scalar_lea.vmem [#allocation4], %s7292_s23 }
   0xc   : > { %s10802_s21 = scalar_select %p7667_p7, 1, 0 }
   0xd   : > { %s7676_s27 = scalar_lea.hbm %s10797_s0, %s7349_s24  ;;  %s145_s29 = sshll.u32 %s138_s28, 4  ;;  %s7678_s29 = int_to_ptr.vmem [resolvable:$true] %s145_s29 }
   0xe   : > { %p7680_p8 = pnand %p7437_p6, %p32_p4  ;;  %s7685_s4 = scalar_lea.sflag [#allocation5], %s134_s22 }
   0xf   : > { %s7527_s5 = scalar_lea.hbm %s7676_s27, 2048  ;;  %s7532_s8 = scalar_lea.hbm %s10797_s0, 4096 }
  0x10   : > { %p7528_p10 = scmp.ne.s32.totalorder %s7676_s27, %s7527_s5  ;;  %p7529_p11 = pneg %p7680_p8 }
  0x11   : > { %p7533_p0 = scmp.lt.s32.totalorder %s7676_s27, %s10797_s0  ;;  %p7534_p1 = scmp.lt.s32.totalorder %s7532_s8, %s7527_s5 }
  0x12   : > { %p7530_p12 = pnand %p7529_p11, %p7528_p10 }
  0x13   : > { %p7535_p2 = por %p7534_p1, %p7533_p0 }
  0x14   : > { %p7531_p13 = pneg %p7530_p12 }
  0x16   : > { %p7536_p3 = pnand %p7535_p2, %p7531_p13 }
  0x18   : > { %7539 = shalt.err (!%p7536_p3)
}
  0x19   : > { %s7540_s11 = scalar_lea.vmem %s7678_s29, 2048  ;;  %s7591_s12 = smov [#allocation4]  }
  0x1a   : > { %p7541_p4 = scmp.ne.s32.totalorder %s7678_s29, %s7540_s11  ;;  %s7545_s18 = sshll.u32 %s7591_s12, 4  ;;  %s7546_s18 = int_to_ptr.vmem [resolvable:$false] %s7545_s18 }
  0x1b   : > { %s7547_s19 = scalar_lea.vmem %s7546_s18, 4096  ;;  %p7548_p10 = scmp.lt.s32.totalorder %s7678_s29, %s7546_s18 }
  0x1c   : > { %p7543_p5 = pnand %p7541_p4, %p7529_p11  ;;  %p7549_p12 = scmp.lt.s32.totalorder %s7547_s19, %s7540_s11 }
  0x1e   : > { %p7544_p6 = pneg %p7543_p5  ;;  %p7550_p9 = por %p7549_p12, %p7548_p10 }
  0x20   : > { %p7551_p7 = pnand %p7550_p9, %p7544_p6 }
  0x22   : > { %7554 = shalt.err (!%p7551_p7)
}
  0x23   : > { %s7592_s22 = smov 64   ;;  %s7593_s23 = smov 4  }
  0x24   : > { %7436 = dma.hbm_to_vmem [thread:$0]  (!%p7680_p8), %s7676_s27, 2048, %s7678_s29, %s7685_s4, %s7592_s22, %s7592_s22, %s7593_s23  }
  0x25   : > { %p153_p11 = scmp.lt.s32.totalorder %s7589_s15, 3  ;;  %p10804_p13 = scmp.ge.s32.totalorder %s7589_s15, 1 }
  0x27   : > { %p154_p0 = pnand %p10804_p13, %p153_p11 }
  0x28   : > { %s159_s24 = sand.u32 (!%p154_p0), 1, %s7581_s13   ;;  %p10805_p7 = scmp.ne.s32.totalorder (!%p154_p0), %s10802_s21, 0 }
  0x29   : > { %157 = sbr.rel (%p154_p0) target bundleno = 2067 (0x813), region = 32  ;;  %s7296_s25 = sshll.u32 (!%p154_p0), %s159_s24, 7 }
  0x2a   : > { %s160_s26 = scalar_lea.sflag (!%p154_p0), [#allocation5], %s159_s24  ;;  %s7710_s28 = scalar_lea.vmem (!%p154_p0), [#allocation4], %s7296_s25 }
  0x2e   : > { %7572 = dma.done.wait (%p10805_p7), %s160_s26, 2048  }
  0x2f   : > { %7574 = vsyncadd (%p10805_p7), %s160_s26, 4294965248  ;;  %v7489_v0 = vld [vmem:[%s10798_s1 + $0x38] sm:$0xff]   ;;  %v7490_v1 = vld [vmem:[%s10798_s1 + $0x30] sm:$0xff]   ;;  %v7594_v32 = vmov 0   ;;  %vm641_vm0 = vcmask 523264   ;;  %vm948_vm1 = vcmask 64512  }
  0x30   : > { %7375 = vmatprep.subr.bf16.mxu0 %v7489_v0  ;;  %v7491_v2 = vld [vmem:[%s10798_s1 + $0x28] sm:$0xff]   ;;  %v7492_v3 = vld [vmem:[%s10798_s1 + $0x20] sm:$0xff]   ;;  %v7493_v5 = vld [vmem:[%s10798_s1 + $0x18] sm:$0xff]   ;;  %752 = vmatprep.mubr.bf16.mxu1 %v7594_v32  ;;  %vm951_vm2 = vcmask 60416   ;;  %vm884_vm3 = vcmask 588800   ;;  %s7597_s10 = smov 112  }
  0x31   : > { %7376 = vmatpush3.bf16.msra.mxu0 %v7489_v0  ;;  %v7497_v4 = vld [vmem:[%s7710_s28] sm:$0xff]   ;;  %v7494_v6 = vld [vmem:[%s10798_s1 + $0x10] sm:$0xff]   ;;  %v7495_v7 = vld [vmem:[%s10798_s1 + $0x8] sm:$0xff]   ;;  %s7598_s11 = smov 104   ;;  %s7599_s12 = smov 96  }
  0x32   : > { %7377 = vmatprep.subr.bf16.mxu0 %v7490_v1  ;;  %7391 = vmatprep.mubr.bf16.mxu0 %v7497_v4  ;;  %v7509_v8 = vld [vmem:[%s10799_s2 + $0x34] ss:$8 sps:$4 sm:$0xff]   ;;  %v7507_v9 = vld [vmem:[%s10799_s2 + $0x30] ss:$8 sps:$4 sm:$0xff]   ;;  %v7514_v10 = vld [vmem:[%s10799_s2 + $0x24] ss:$8 sps:$4 sm:$0xff]  }
  0x33   : > { %7423 = vmatprep.subr.bf16.mxu1 %v7509_v8  ;;  %v7496_v11 = vld [vmem:[%s10798_s1] sm:$0xff]   ;;  %v7519_v13 = vld [vmem:[%s10799_s2 + $0x14] ss:$8 sps:$4 sm:$0xff]   ;;  %v7517_v14 = vld [vmem:[%s10799_s2 + $0x10] ss:$8 sps:$4 sm:$0xff]   ;;  %s7600_s18 = smov 88  }
  0x34   : > { %7427 = vmatpush1.bf16.msra.mxu1 %v7507_v9  ;;  %v7512_v12 = vld [vmem:[%s10799_s2 + $0x20] ss:$8 sps:$4 sm:$0xff]   ;;  %v7524_v15 = vld [vmem:[%s10799_s2 + $0x4] ss:$8 sps:$4 sm:$0xff]   ;;  %v7499_v17 = vld [vmem:[%s7710_s28 + $0x10] sm:$0xff]   ;;  %s7601_s19 = smov 80  }
  0x35   : > { %7378 = vmatpush3.bf16.msra.mxu0 %v7490_v1  ;;  %7424 = vmatprep.subr.bf16.mxu1 %v7514_v10  ;;  %v7498_v16 = vld [vmem:[%s7710_s28 + $0x8] sm:$0xff]   ;;  %v7500_v19 = vld [vmem:[%s7710_s28 + $0x18] sm:$0xff]   ;;  %v7501_v20 = vld [vmem:[%s7710_s28 + $0x20] sm:$0xff]   ;;  %s7602_s22 = smov 72   ;;  %s7603_s23 = smov 64  }
  0x36   : > { %7379 = vmatprep.subr.bf16.mxu0 %v7491_v2  ;;  %v7522_v18 = vld [vmem:[%s10799_s2] ss:$8 sps:$4 sm:$0xff]   ;;  %v7503_v22 = vld [vmem:[%s7710_s28 + $0x30] sm:$0xff]   ;;  %v7504_v23 = vld [vmem:[%s7710_s28 + $0x38] sm:$0xff]   ;;  %s7604_s24 = smov 56   ;;  %s7605_s25 = smov 48  }
  0x37   : > { %v7502_v21 = vld [vmem:[%s7710_s28 + $0x28] sm:$0xff]   ;;  %v7505_v24 = vld [vmem:[%s7710_s28 + $0x40] sm:$0xff]   ;;  %v7510_v26 = vld [vmem:[%s7710_s28 + $0x50] sm:$0xff]   ;;  %s7606_s26 = smov 40   ;;  %s7607_s5 = smov 32  }
  0x38   : > { %7428 = vmatpush1.bf16.msra.mxu1 %v7512_v12  ;;  %v7506_v25 = vld [vmem:[%s7710_s28 + $0x48] sm:$0xff]   ;;  %v7511_v27 = vld [vmem:[%s7710_s28 + $0x58] sm:$0xff]   ;;  %v7515_v28 = vld [vmem:[%s7710_s28 + $0x60] sm:$0xff]   ;;  %s7608_s6 = smov 24   ;;  %s7609_s15 = smov 16  }
  0x39   : > { %7380 = vmatpush3.bf16.msra.mxu0 %v7491_v2  ;;  %7425 = vmatprep.subr.bf16.mxu1 %v7519_v13  ;;  %v7516_v29 = vld [vmem:[%s7710_s28 + $0x68] sm:$0xff]   ;;  %v7520_v30 = vld [vmem:[%s7710_s28 + $0x70] sm:$0xff]   ;;  %v7521_v31 = vld [vmem:[%s7710_s28 + $0x78] sm:$0xff]   ;;  %s7596_s28 = smov 120   ;;  %s7610_s27 = smov 8  }
  0x3a   : > { %7381 = vmatprep.subr.bf16.mxu0 %v7492_v3  ;;  %p186_p8 = scmp.lt.s32.totalorder %s7650_s16, 1 }
  0x3c   : > { %7429 = vmatpush1.bf16.msra.mxu1 %v7517_v14  ;;  %s10811_s16 = smov (!%p186_p8, %s7650_s16), 1 }
  0x3d   : > { %7382 = vmatpush3.bf16.msra.mxu0 %v7492_v3  ;;  %7426 = vmatprep.subr.bf16.mxu1 %v7524_v15  ;;  %s7350_s29 = sshll.u32 %s10811_s16, 8 }
  0x3e   : > { %7383 = vmatprep.subr.bf16.mxu0 %v7493_v5  ;;  %s9811_s16 = scalar_lea.vmem %s10800_s3, %s7350_s29 }
  0x40   : > { %7430 = vmatpush1.bf16.msra.mxu1 %v7522_v18 }
  0x41   : > { %7384 = vmatpush3.bf16.msra.mxu0 %v7493_v5 }
  0x42   : > { %7385 = vmatprep.subr.bf16.mxu0 %v7494_v6 }
  0x45   : > { %7386 = vmatpush3.bf16.msra.mxu0 %v7494_v6 }
  0x46   : > { %7387 = vmatprep.subr.bf16.mxu0 %v7495_v7 }
  0x49   : > { %7388 = vmatpush3.bf16.msra.mxu0 %v7495_v7 }
  0x4a   : > { %7389 = vmatprep.subr.bf16.mxu0 %v7496_v11 }
  0x4d   : > { %7390 = vmatpush3.bf16.msra.mxu0 %v7496_v11 }
  0x4e   : > { %698 = vmatprep.subr.bf16.mxu0 %v7509_v8 }
  0x50   : > { %7392 = vmatmul.mubr.bf16.vlgmr.msra.gmra.mxu0 %v7498_v16 }
  0x51   : > { %7395 = vmatprep.mubr.bf16.mxu0 %v7499_v17  ;;  %699 = vmatpush1.bf16.msra.mxu0 %v7507_v9 }
  0x52   : > { %700 = vmatprep.subr.bf16.mxu0 %v7514_v10 }
  0x55   : > { %701 = vmatpush1.bf16.msra.mxu0 %v7512_v12 }
  0x56   : > { %702 = vmatprep.subr.bf16.mxu0 %v7519_v13 }
  0x58   : > { %7396 = vmatmul.mubr.bf16.gmra.mxu0 %v7500_v19 }
  0x59   : > { %7399 = vmatprep.mubr.bf16.mxu0 %v7501_v20  ;;  %703 = vmatpush1.bf16.msra.mxu0 %v7517_v14 }
  0x5a   : > { %704 = vmatprep.subr.bf16.mxu0 %v7524_v15 }
  0x5d   : > { %705 = vmatpush1.bf16.msra.mxu0 %v7522_v18 }
  0x60   : > { %7400 = vmatmul.mubr.bf16.gmra.mxu0 %v7502_v21 }
  0x61   : > { %7403 = vmatprep.mubr.bf16.mxu0 %v7503_v22 }
  0x68   : > { %7404 = vmatmul.mubr.bf16.gmra.mxu0 %v7504_v23 }
  0x69   : > { %7407 = vmatprep.mubr.bf16.mxu0 %v7505_v24 }
  0x70   : > { %7408 = vmatmul.mubr.bf16.gmra.mxu0 %v7506_v25 }
  0x71   : > { %7411 = vmatprep.mubr.bf16.mxu0 %v7510_v26  ;;  %v7595_v26 = vmov 0.0  }
  0x72   : > { %962 = vst.msk [vmem:[#allocation3 + $0x60] sm:$0xff] %vm948_vm1, %v7595_v26  ;;  %963 = vst.msk [vmem:[#allocation3 + $0x68] sm:$0xff] %vm948_vm1, %v7595_v26 }
  0x73   : > { %949 = vst.msk [vmem:[#allocation3] sm:$0xff] %vm948_vm1, %v7595_v26  ;;  %950 = vst.msk [vmem:[#allocation3 + $0x8] sm:$0xff] %vm948_vm1, %v7595_v26 }
  0x74   : > { %953 = vst.msk [vmem:[#allocation3 + $0x18] sm:$0xff] %vm948_vm1, %v7595_v26  ;;  %954 = vst.msk [vmem:[#allocation3 + $0x20] sm:$0xff] %vm948_vm1, %v7595_v26 }
  0x75   : > { %956 = vst.msk [vmem:[#allocation3 + $0x30] sm:$0xff] %vm948_vm1, %v7595_v26  ;;  %957 = vst.msk [vmem:[#allocation3 + $0x38] sm:$0xff] %vm948_vm1, %v7595_v26 }
  0x76   : > { %959 = vst.msk [vmem:[#allocation3 + $0x48] sm:$0xff] %vm948_vm1, %v7595_v26  ;;  %960 = vst.msk [vmem:[#allocation3 + $0x50] sm:$0xff] %vm948_vm1, %v7595_v26 }
  0x77   : > { %965 = vst.msk [vmem:[#allocation3 + $0x78] sm:$0xff] %vm948_vm1, %v7595_v26  ;;  %966 = vst.msk [vmem:[#allocation3 + $0x80] sm:$0xff] %vm948_vm1, %v7595_v26 }
  0x78   : > { %7412 = vmatmul.mubr.bf16.gmra.mxu0 %v7511_v27  ;;  %968 = vst.msk [vmem:[#allocation3 + $0x90] sm:$0xff] %vm948_vm1, %v7595_v26  ;;  %969 = vst.msk [vmem:[#allocation3 + $0x98] sm:$0xff] %vm948_vm1, %v7595_v26 }
  0x79   : > { %7415 = vmatprep.mubr.bf16.mxu0 %v7515_v28  ;;  %971 = vst.msk [vmem:[#allocation3 + $0xa8] sm:$0xff] %vm948_vm1, %v7595_v26  ;;  %972 = vst.msk [vmem:[#allocation3 + $0xb0] sm:$0xff] %vm948_vm1, %v7595_v26 }
  0x7a   : > { %974 = vst.msk [vmem:[#allocation3 + $0xc0] sm:$0xff] %vm948_vm1, %v7595_v26  ;;  %975 = vst.msk [vmem:[#allocation3 + $0xc8] sm:$0xff] %vm948_vm1, %v7595_v26 }
  0x7b   : > { %977 = vst.msk [vmem:[#allocation3 + $0xd8] sm:$0xff] %vm948_vm1, %v7595_v26  ;;  %978 = vst.msk [vmem:[#allocation3 + $0xe0] sm:$0xff] %vm948_vm1, %v7595_v26 }
  0x7c   : > { %980 = vst.msk [vmem:[#allocation3 + $0xf0] sm:$0xff] %vm948_vm1, %v7595_v26  ;;  %981 = vst.msk [vmem:[#allocation3 + $0xf8] sm:$0xff] %vm948_vm1, %v7595_v26 }
  0x7d   : > { %983 = vst.msk [vmem:[#allocation3 + $0x108] sm:$0xff] %vm948_vm1, %v7595_v26  ;;  %984 = vst.msk [vmem:[#allocation3 + $0x110] sm:$0xff] %vm948_vm1, %v7595_v26 }
  0x7e   : > { %986 = vst.msk [vmem:[#allocation3 + $0x120] sm:$0xff] %vm948_vm1, %v7595_v26  ;;  %987 = vst.msk [vmem:[#allocation3 + $0x128] sm:$0xff] %vm948_vm1, %v7595_v26 }
  0x7f   : > { %989 = vst.msk [vmem:[#allocation3 + $0x138] sm:$0xff] %vm948_vm1, %v7595_v26  ;;  %990 = vst.msk [vmem:[#allocation3 + $0x140] sm:$0xff] %vm948_vm1, %v7595_v26 }
  0x80   : > { %7416 = vmatmul.mubr.bf16.gmra.mxu0 %v7516_v29  ;;  %992 = vst.msk [vmem:[#allocation3 + $0x150] sm:$0xff] %vm948_vm1, %v7595_v26  ;;  %993 = vst.msk [vmem:[#allocation3 + $0x158] sm:$0xff] %vm948_vm1, %v7595_v26 }
  0x81   : > { %7419 = vmatprep.mubr.bf16.mxu0 %v7520_v30  ;;  %995 = vst.msk [vmem:[#allocation3 + $0x168] sm:$0xff] %vm948_vm1, %v7595_v26  ;;  %996 = vst.msk [vmem:[#allocation3 + $0x170] sm:$0xff] %vm948_vm1, %v7595_v26 }
  0x82   : > { %998 = vst.msk [vmem:[#allocation3 + $0x180] sm:$0xff] %vm948_vm1, %v7595_v26  ;;  %999 = vst.msk [vmem:[#allocation3 + $0x188] sm:$0xff] %vm948_vm1, %v7595_v26 }
  0x83   : > { %1001 = vst.msk [vmem:[#allocation3 + $0x198] sm:$0xff] %vm948_vm1, %v7595_v26  ;;  %1002 = vst.msk [vmem:[#allocation3 + $0x1a0] sm:$0xff] %vm948_vm1, %v7595_v26 }
  0x84   : > { %1004 = vst.msk [vmem:[#allocation3 + $0x1b0] sm:$0xff] %vm948_vm1, %v7595_v26  ;;  %1005 = vst.msk [vmem:[#allocation3 + $0x1b8] sm:$0xff] %vm948_vm1, %v7595_v26 }
  0x85   : > { %1007 = vst.msk [vmem:[#allocation3 + $0x1c8] sm:$0xff] %vm948_vm1, %v7595_v26  ;;  %1008 = vst.msk [vmem:[#allocation3 + $0x1d0] sm:$0xff] %vm948_vm1, %v7595_v26 }
  0x86   : > { %964 = vst.msk [vmem:[#allocation3 + $0x70] sm:$0xf] %vm951_vm2, %v7595_v26  ;;  %952 = vst.msk [vmem:[#allocation3 + $0x10] sm:$0xf] %vm951_vm2, %v7595_v26 }
  0x87   : > { %955 = vst.msk [vmem:[#allocation3 + $0x28] sm:$0xf] %vm951_vm2, %v7595_v26  ;;  %958 = vst.msk [vmem:[#allocation3 + $0x40] sm:$0xf] %vm951_vm2, %v7595_v26 }
  0x88   : > { %7420 = vmatmul.mubr.bf16.gmra.mxu0 %v7521_v31  ;;  %961 = vst.msk [vmem:[#allocation3 + $0x58] sm:$0xf] %vm951_vm2, %v7595_v26  ;;  %967 = vst.msk [vmem:[#allocation3 + $0x88] sm:$0xf] %vm951_vm2, %v7595_v26 }
  0x89   : > { %722 = vmatprep.mubr.bf16.mxu0 %v7594_v32  ;;  %970 = vst.msk [vmem:[#allocation3 + $0xa0] sm:$0xf] %vm951_vm2, %v7595_v26  ;;  %973 = vst.msk [vmem:[#allocation3 + $0xb8] sm:$0xf] %vm951_vm2, %v7595_v26 }
  0x8a   : > { %976 = vst.msk [vmem:[#allocation3 + $0xd0] sm:$0xf] %vm951_vm2, %v7595_v26  ;;  %979 = vst.msk [vmem:[#allocation3 + $0xe8] sm:$0xf] %vm951_vm2, %v7595_v26 }
  0x8b   : > { %982 = vst.msk [vmem:[#allocation3 + $0x100] sm:$0xf] %vm951_vm2, %v7595_v26  ;;  %985 = vst.msk [vmem:[#allocation3 + $0x118] sm:$0xf] %vm951_vm2, %v7595_v26 }
  0x8c   : > { %988 = vst.msk [vmem:[#allocation3 + $0x130] sm:$0xf] %vm951_vm2, %v7595_v26  ;;  %991 = vst.msk [vmem:[#allocation3 + $0x148] sm:$0xf] %vm951_vm2, %v7595_v26 }
  0x8d   : > { %994 = vst.msk [vmem:[#allocation3 + $0x160] sm:$0xf] %vm951_vm2, %v7595_v26  ;;  %997 = vst.msk [vmem:[#allocation3 + $0x178] sm:$0xf] %vm951_vm2, %v7595_v26 }
  0x8e   : > { %1000 = vst.msk [vmem:[#allocation3 + $0x190] sm:$0xf] %vm951_vm2, %v7595_v26  ;;  %1003 = vst.msk [vmem:[#allocation3 + $0x1a8] sm:$0xf] %vm951_vm2, %v7595_v26 }
  0x8f   : > { %1006 = vst.msk [vmem:[#allocation3 + $0x1c0] sm:$0xf] %vm951_vm2, %v7595_v26  ;;  %1009 = vst.msk [vmem:[#allocation3 + $0x1d8] sm:$0xf] %vm951_vm2, %v7595_v26  ;;  %v1053_v26 = vld [vmem:[#allocation3 + $0xdc] sm:$0xff] }
 0x110   : > { %v7393_v33 = vpop.f32.mrf.mxu0 }
 0x111   : > { %v547_v47 = vmax.f32 %v7393_v33, 0.0 }
 0x112   : > { %v418_v34 = vpop.f32.mrf.mxu0 }
 0x113   : > { %v545_v37 = vmax.f32 %v418_v34, 0.0 }
 0x114   : > { %v7394_v35 = vpop.f32.mrf.mxu0 }
 0x115   : > { %v548_v44 = vmax.f32 %v7394_v35, 0.0 }
 0x116   : > { %v421_v36 = vpop.f32.mrf.mxu0 }
 0x117   : > { %v546_v38 = vmax.f32 %v421_v36, 0.0  ;;  %v578_v50 = vpack.c.bf16 %v548_v44, %v547_v47 }
 0x118   : > { %v7397_v39 = vpop.f32.mrf.mxu0 }
 0x119   : > { %v577_v40 = vpack.c.bf16 %v546_v38, %v545_v37  ;;  %v551_v42 = vmax.f32 %v7397_v39, 0.0 }
 0x11a   : > { %v434_v41 = vpop.f32.mrf.mxu0 }
 0x11b   : > { %7331 = vmatmul.mubr.msk.bf16.vlgmr.msra.gmra.mxu0 %vm641_vm0, %v577_v40  ;;  %v549_v52 = vmax.f32 %v434_v41, 0.0 }
 0x11c   : > { %732 = vmatprep.mubr.bf16.mxu0 %v7594_v32  ;;  %v7398_v43 = vpop.f32.mrf.mxu0 }
 0x11d   : > { %v552_v45 = vmax.f32 %v7398_v43, 0.0 }
 0x11e   : > { %v437_v46 = vpop.f32.mrf.mxu0 }
 0x11f   : > { %v580_v48 = vpack.c.bf16 %v552_v45, %v551_v42  ;;  %v550_v53 = vmax.f32 %v437_v46, 0.0 }
 0x120   : > { %v7401_v49 = vpop.f32.mrf.mxu0 }
 0x121   : > { %7334 = vmatmul.mubr.msk.bf16.vlgmr.msra.gmra.mxu1 %vm641_vm0, %v580_v48  ;;  %v579_v57 = vpack.c.bf16 %v550_v53, %v549_v52  ;;  %v555_v62 = vmax.f32 %v7401_v49, 0.0 }
 0x122   : > { %v450_v51 = vpop.f32.mrf.mxu0  ;;  %762 = vmatprep.mubr.bf16.mxu1 %v7594_v32 }
 0x123   : > { %7332 = vmatmul.mubr.msk.bf16.gmra.mxu0 %vm641_vm0, %v578_v50  ;;  %v553_v55 = vmax.f32 %v450_v51, 0.0  ;;  %v1043_v51 = vld [vmem:[#allocation3 + $0x64] sm:$0xff] }
 0x124   : > { %742 = vmatprep.mubr.bf16.mxu0 %v7594_v32  ;;  %v7402_v54 = vpop.f32.mrf.mxu0 }
 0x125   : > { %v556_v63 = vmax.f32 %v7402_v54, 0.0 }
 0x126   : > { %v453_v56 = vpop.f32.mrf.mxu0 }
 0x127   : > { %v554_v58 = vmax.f32 %v453_v56, 0.0  ;;  %v582_v1 = vpack.c.bf16 %v556_v63, %v555_v62  ;;  %v1049_v56 = vld [vmem:[#allocation3 + $0xac] sm:$0xff] }
 0x128   : > { %v7405_v59 = vpop.f32.mrf.mxu0 }
 0x129   : > { %v581_v60 = vpack.c.bf16 %v554_v58, %v553_v55  ;;  %v559_v8 = vmax.f32 %v7405_v59, 0.0  ;;  %v1044_v55 = vld [vmem:[#allocation3 + $0x6c] sm:$0xff]  ;;  %v1045_v59 = vld [vmem:[#allocation3 + $0x7c] sm:$0xff] }
 0x12a   : > { %v466_v61 = vpop.f32.mrf.mxu0 }
 0x12b   : > { %7333 = vmatmul.mubr.msk.bf16.gmra.mxu0 %vm641_vm0, %v579_v57  ;;  %7335 = vmatmul.mubr.msk.bf16.gmra.mxu1 %vm641_vm0, %v581_v60  ;;  %v557_v3 = vmax.f32 %v466_v61, 0.0 }
 0x12c   : > { %772 = vmatprep.mubr.bf16.mxu1 %v7594_v32  ;;  %v7406_v0 = vpop.f32.mrf.mxu0 }
 0x12d   : > { %v560_v9 = vmax.f32 %v7406_v0, 0.0  ;;  %v1050_v0 = vld [vmem:[#allocation3 + $0xb4] sm:$0xff] }
 0x12e   : > { %v469_v2 = vpop.f32.mrf.mxu0 }
 0x12f   : > { %v558_v4 = vmax.f32 %v469_v2, 0.0  ;;  %v584_v11 = vpack.c.bf16 %v560_v9, %v559_v8 }
 0x130   : > { %v7409_v5 = vpop.f32.mrf.mxu0 }
 0x131   : > { %v583_v6 = vpack.c.bf16 %v558_v4, %v557_v3  ;;  %v563_v18 = vmax.f32 %v7409_v5, 0.0  ;;  %v1046_v3 = vld [vmem:[#allocation3 + $0x84] sm:$0xff] }
 0x132   : > { %v482_v7 = vpop.f32.mrf.mxu0 }
 0x133   : > { %7336 = vmatmul.mubr.msk.bf16.gmra.mxu1 %vm641_vm0, %v582_v1  ;;  %v561_v13 = vmax.f32 %v482_v7, 0.0 }
 0x134   : > { %782 = vmatprep.mubr.bf16.mxu1 %v7594_v32  ;;  %v7410_v10 = vpop.f32.mrf.mxu0 }
 0x135   : > { %v564_v19 = vmax.f32 %v7410_v10, 0.0  ;;  %v1047_v10 = vld [vmem:[#allocation3 + $0x94] sm:$0xff] }
 0x136   : > { %v485_v12 = vpop.f32.mrf.mxu0 }
 0x137   : > { %v562_v14 = vmax.f32 %v485_v12, 0.0  ;;  %v586_v21 = vpack.c.bf16 %v564_v19, %v563_v18  ;;  %v1052_v19 = vld [vmem:[#allocation3 + $0xcc] sm:$0xff] }
 0x138   : > { %v7797_v15 = vpop.f32.mrf.mxu0 }
 0x139   : > { %v585_v16 = vpack.c.bf16 %v562_v14, %v561_v13  ;;  %v567_v29 = vmax.f32 %v7797_v15, 0.0 }
 0x13a   : > { %v498_v17 = vpop.f32.mrf.mxu0 }
 0x13b   : > { %7337 = vmatmul.mubr.msk.bf16.gmra.mxu1 %vm641_vm0, %v583_v6  ;;  %v565_v23 = vmax.f32 %v498_v17, 0.0  ;;  %v1048_v17 = vld [vmem:[#allocation3 + $0x9c] sm:$0xff] }
 0x13c   : > { %792 = vmatprep.mubr.bf16.mxu1 %v7594_v32  ;;  %v7801_v20 = vpop.f32.mrf.mxu0 }
 0x13d   : > { %v568_v30 = vmax.f32 %v7801_v20, 0.0 }
 0x13e   : > { %v501_v22 = vpop.f32.mrf.mxu0 }
 0x13f   : > { %v566_v24 = vmax.f32 %v501_v22, 0.0  ;;  %v588_v33 = vpack.c.bf16 %v568_v30, %v567_v29  ;;  %v1054_v30 = vld [vmem:[#allocation3 + $0xe4] sm:$0xff] }
 0x140   : > { %v7805_v25 = vpop.f32.mrf.mxu0 }
 0x141   : > { %v587_v27 = vpack.c.bf16 %v566_v24, %v565_v23  ;;  %v571_v40 = vmax.f32 %v7805_v25, 0.0 }
 0x142   : > { %v514_v28 = vpop.f32.mrf.mxu0 }
 0x143   : > { %7338 = vmatmul.mubr.msk.bf16.gmra.mxu1 %vm641_vm0, %v584_v11  ;;  %v569_v35 = vmax.f32 %v514_v28, 0.0  ;;  %v1051_v11 = vld [vmem:[#allocation3 + $0xc4] sm:$0xff] }
 0x144   : > { %802 = vmatprep.mubr.bf16.mxu1 %v7594_v32  ;;  %v7418_v31 = vpop.f32.mrf.mxu0 }
 0x145   : > { %v572_v41 = vmax.f32 %v7418_v31, 0.0 }
 0x146   : > { %v517_v34 = vpop.f32.mrf.mxu0 }
 0x147   : > { %v570_v36 = vmax.f32 %v517_v34, 0.0  ;;  %v590_v43 = vpack.c.bf16 %v572_v41, %v571_v40 }
 0x148   : > { %v7421_v37 = vpop.f32.mrf.mxu0 }
 0x149   : > { %v589_v38 = vpack.c.bf16 %v570_v36, %v569_v35  ;;  %v575_v48 = vmax.f32 %v7421_v37, 0.0  ;;  %v1055_v35 = vld [vmem:[#allocation3 + $0xf4] sm:$0xff] }
 0x14a   : > { %v530_v39 = vpop.f32.mrf.mxu0 }
 0x14b   : > { %7339 = vmatmul.mubr.msk.bf16.gmra.mxu1 %vm641_vm0, %v585_v16  ;;  %v573_v45 = vmax.f32 %v530_v39, 0.0  ;;  %v1056_v39 = vld [vmem:[#allocation3 + $0xfc] sm:$0xff] }
 0x14c   : > { %812 = vmatprep.mubr.bf16.mxu1 %v7594_v32  ;;  %v7422_v42 = vpop.f32.mrf.mxu0 }
 0x14d   : > { %v576_v49 = vmax.f32 %v7422_v42, 0.0 }
 0x14e   : > { %v533_v44 = vpop.f32.mrf.mxu0 }
 0x14f   : > { %v574_v46 = vmax.f32 %v533_v44, 0.0  ;;  %v592_v50 = vpack.c.bf16 %v576_v49, %v575_v48 }
 0x151   : > { %v591_v47 = vpack.c.bf16 %v574_v46, %v573_v45 }
 0x153   : > { %7340 = vmatmul.mubr.msk.bf16.gmra.mxu1 %vm641_vm0, %v586_v21 }
 0x154   : > { %822 = vmatprep.mubr.bf16.mxu1 %v7594_v32 }
 0x15b   : > { %7341 = vmatmul.mubr.msk.bf16.gmra.mxu1 %vm641_vm0, %v587_v27 }
 0x15c   : > { %832 = vmatprep.mubr.bf16.mxu1 %v7594_v32 }
 0x163   : > { %7342 = vmatmul.mubr.msk.bf16.gmra.mxu1 %vm641_vm0, %v588_v33 }
 0x164   : > { %842 = vmatprep.mubr.bf16.mxu1 %v7594_v32 }
 0x16b   : > { %7343 = vmatmul.mubr.msk.bf16.gmra.mxu1 %vm641_vm0, %v589_v38 }
 0x16c   : > { %852 = vmatprep.mubr.bf16.mxu1 %v7594_v32 }
 0x173   : > { %7344 = vmatmul.mubr.msk.bf16.gmra.mxu1 %vm641_vm0, %v590_v43  ;;  %v1057_v43 = vld [vmem:[#allocation3 + $0x10c] sm:$0xff] }
 0x174   : > { %862 = vmatprep.mubr.bf16.mxu1 %v7594_v32 }
 0x17b   : > { %7345 = vmatmul.mubr.msk.bf16.gmra.mxu1 %vm641_vm0, %v591_v47  ;;  %v1058_v47 = vld [vmem:[#allocation3 + $0x114] sm:$0xff] }
 0x17c   : > { %872 = vmatprep.mubr.bf16.mxu1 %v7594_v32 }
 0x183   : > { %7346 = vmatmul.mubr.msk.bf16.gmra.mxu1 %vm641_vm0, %v592_v50 }
 0x1db   : > { %v7941_v52 = vpop.f32.mrf.mxu0 }
 0x1dc   : > { %883 = vst [vmem:[#allocation2] sm:$0xff] %v7941_v52  ;;  %v1075_v53 = vadd.f32 %v1043_v51, %v7941_v52  ;;  %1235 = vrot.lane.b32.xlu0 %v7941_v52, %s7596_s28  ;;  %v1059_v51 = vld [vmem:[#allocation3 + $0x124] sm:$0xff] }
 0x1dd   : > { %v726_v54 = vpop.f32.mrf.mxu0 }
 0x1de   : > { %1107 = vst.msk [vmem:[#allocation3 + $0x64] sm:$0xff] %vm948_vm1, %v1075_v53 }
 0x1df   : > { %885 = vst.msk [vmem:[#allocation2 + $0x8] sm:$0xff] %vm884_vm3, %v726_v54  ;;  %v7949_v32 = vpop.f32.mrf.mxu0 }
 0x1e0   : > { %886 = vst [vmem:[#allocation2 + $0x10] sm:$0xff] %v7949_v32  ;;  %v1076_v57 = vadd.f32 %v1044_v55, %v7949_v32  ;;  %1491 = vrot.lane.b32.xlu0 %v7941_v52, %s7597_s10  ;;  %1493 = vrot.lane.b32.xlu1 %v7949_v32, %s7597_s10  ;;  %v1060_v55 = vld [vmem:[#allocation3 + $0x12c] sm:$0xff] }
 0x1e1   : > { %v730_v58 = vpop.f32.mrf.mxu0  ;;  %v7957_v60 = vpop.f32.mrf.mxu1 }
 0x1e2   : > { %1108 = vst.msk [vmem:[#allocation3 + $0x6c] sm:$0xff] %vm948_vm1, %v1076_v57  ;;  %896 = vst [vmem:[#allocation2 + $0x60] sm:$0xff] %v7957_v60  ;;  %v1081_v61 = vadd.f32 %v1049_v56, %v7957_v60 }
 0x1e3   : > { %887 = vst.msk [vmem:[#allocation2 + $0x18] sm:$0xff] %vm884_vm3, %v730_v58  ;;  %v7963_v62 = vpop.f32.mrf.mxu0  ;;  %v756_v63 = vpop.f32.mrf.mxu1  ;;  %v1061_v58 = vld [vmem:[#allocation3 + $0x13c] sm:$0xff] }
 0x1e4   : > { %888 = vst [vmem:[#allocation2 + $0x20] sm:$0xff] %v7963_v62  ;;  %v1077_v1 = vadd.f32 %v1045_v59, %v7963_v62  ;;  %1747 = vrot.lane.b32.xlu0 %v7941_v52, %s7598_s11  ;;  %1749 = vrot.lane.b32.xlu1 %v7949_v32, %s7598_s11  ;;  %1113 = vst.msk [vmem:[#allocation3 + $0xac] sm:$0xff] %vm948_vm1, %v1081_v61 }
 0x1e5   : > { %897 = vst.msk [vmem:[#allocation2 + $0x68] sm:$0xff] %vm884_vm3, %v756_v63  ;;  %v736_v2 = vpop.f32.mrf.mxu0  ;;  %v7973_v4 = vpop.f32.mrf.mxu1 }
 0x1e6   : > { %1109 = vst.msk [vmem:[#allocation3 + $0x7c] sm:$0xff] %vm948_vm1, %v1077_v1  ;;  %898 = vst [vmem:[#allocation2 + $0x70] sm:$0xff] %v7973_v4  ;;  %v1082_v5 = vadd.f32 %v1050_v0, %v7973_v4  ;;  %v1062_v0 = vld [vmem:[#allocation3 + $0x144] sm:$0xff] }
 0x1e7   : > { %889 = vst.msk [vmem:[#allocation2 + $0x28] sm:$0xff] %vm884_vm3, %v736_v2  ;;  %v7979_v6 = vpop.f32.mrf.mxu0  ;;  %v760_v7 = vpop.f32.mrf.mxu1 }
 0x1e8   : > { %890 = vst [vmem:[#allocation2 + $0x30] sm:$0xff] %v7979_v6  ;;  %v1078_v8 = vadd.f32 %v1046_v3, %v7979_v6  ;;  %2003 = vrot.lane.b32.xlu0 %v7941_v52, %s7599_s12  ;;  %2005 = vrot.lane.b32.xlu1 %v7949_v32, %s7599_s12  ;;  %1114 = vst.msk [vmem:[#allocation3 + $0xb4] sm:$0xff] %vm948_vm1, %v1082_v5  ;;  %v1063_v5 = vld [vmem:[#allocation3 + $0x154] sm:$0xff] }
 0x1e9   : > { %899 = vst.msk [vmem:[#allocation2 + $0x78] sm:$0xff] %vm884_vm3, %v760_v7  ;;  %v740_v9 = vpop.f32.mrf.mxu0 }
 0x1ea   : > { %1110 = vst.msk [vmem:[#allocation3 + $0x84] sm:$0xff] %vm948_vm1, %v1078_v8 }
 0x1eb   : > { %891 = vst.msk [vmem:[#allocation2 + $0x38] sm:$0xff] %vm884_vm3, %v740_v9  ;;  %v7991_v12 = vpop.f32.mrf.mxu0  ;;  %v7993_v13 = vpop.f32.mrf.mxu1 }
 0x1ec   : > { %2260 = vrot.lane.b32.xlu0 %v7941_v52, %s7600_s18  ;;  %2262 = vrot.lane.b32.xlu1 %v7949_v32, %s7600_s18  ;;  %892 = vst [vmem:[#allocation2 + $0x40] sm:$0xff] %v7991_v12  ;;  %v1079_v14 = vadd.f32 %v1047_v10, %v7991_v12  ;;  %900 = vst [vmem:[#allocation2 + $0x80] sm:$0xff] %v7993_v13  ;;  %v1083_v15 = vadd.f32 %v1051_v11, %v7993_v13  ;;  %v1064_v10 = vld [vmem:[#allocation3 + $0x15c] sm:$0xff] }
 0x1ed   : > { %v746_v16 = vpop.f32.mrf.mxu0  ;;  %v766_v18 = vpop.f32.mrf.mxu1 }
 0x1ee   : > { %1111 = vst.msk [vmem:[#allocation3 + $0x94] sm:$0xff] %vm948_vm1, %v1079_v14  ;;  %1115 = vst.msk [vmem:[#allocation3 + $0xc4] sm:$0xff] %vm948_vm1, %v1083_v15 }
 0x1ef   : > { %893 = vst.msk [vmem:[#allocation2 + $0x48] sm:$0xff] %vm884_vm3, %v746_v16  ;;  %901 = vst.msk [vmem:[#allocation2 + $0x88] sm:$0xff] %vm884_vm3, %v766_v18  ;;  %v8007_v20 = vpop.f32.mrf.mxu0  ;;  %v8009_v21 = vpop.f32.mrf.mxu1  ;;  %v1065_v16 = vld [vmem:[#allocation3 + $0x16c] sm:$0xff] }
 0x1f0   : > { %2516 = vrot.lane.b32.xlu0 %v7941_v52, %s7601_s19  ;;  %2518 = vrot.lane.b32.xlu1 %v7949_v32, %s7601_s19  ;;  %894 = vst [vmem:[#allocation2 + $0x50] sm:$0xff] %v8007_v20  ;;  %v1080_v22 = vadd.f32 %v1048_v17, %v8007_v20  ;;  %902 = vst [vmem:[#allocation2 + $0x90] sm:$0xff] %v8009_v21  ;;  %v1084_v23 = vadd.f32 %v1052_v19, %v8009_v21 }
 0x1f1   : > { %v750_v24 = vpop.f32.mrf.mxu0  ;;  %v770_v25 = vpop.f32.mrf.mxu1 }
 0x1f2   : > { %1112 = vst.msk [vmem:[#allocation3 + $0x9c] sm:$0xff] %vm948_vm1, %v1080_v22  ;;  %1116 = vst.msk [vmem:[#allocation3 + $0xcc] sm:$0xff] %vm948_vm1, %v1084_v23  ;;  %v1066_v22 = vld [vmem:[#allocation3 + $0x174] sm:$0xff] }
 0x1f3   : > { %895 = vst.msk [vmem:[#allocation2 + $0x58] sm:$0xff] %vm884_vm3, %v750_v24  ;;  %903 = vst.msk [vmem:[#allocation2 + $0x98] sm:$0xff] %vm884_vm3, %v770_v25  ;;  %v8023_v27 = vpop.f32.mrf.mxu1  ;;  %v1067_v25 = vld [vmem:[#allocation3 + $0x184] sm:$0xff] }
 0x1f4   : > { %2772 = vrot.lane.b32.xlu0 %v7941_v52, %s7602_s22  ;;  %2774 = vrot.lane.b32.xlu1 %v7949_v32, %s7602_s22  ;;  %904 = vst [vmem:[#allocation2 + $0xa0] sm:$0xff] %v8023_v27  ;;  %v1085_v28 = vadd.f32 %v1053_v26, %v8023_v27 }
 0x1f5   : > { %v776_v29 = vpop.f32.mrf.mxu1 }
 0x1f6   : > { %1117 = vst.msk [vmem:[#allocation3 + $0xdc] sm:$0xff] %vm948_vm1, %v1085_v28 }
 0x1f7   : > { %905 = vst.msk [vmem:[#allocation2 + $0xa8] sm:$0xff] %vm884_vm3, %v776_v29  ;;  %v8033_v31 = vpop.f32.mrf.mxu1  ;;  %v1068_v29 = vld [vmem:[#allocation3 + $0x18c] sm:$0xff] }
 0x1f8   : > { %3028 = vrot.lane.b32.xlu0 %v7941_v52, %s7603_s23  ;;  %3030 = vrot.lane.b32.xlu1 %v7949_v32, %s7603_s23  ;;  %906 = vst [vmem:[#allocation2 + $0xb0] sm:$0xff] %v8033_v31  ;;  %v1086_v33 = vadd.f32 %v1054_v30, %v8033_v31 }
 0x1f9   : > { %v780_v34 = vpop.f32.mrf.mxu1 }
 0x1fa   : > { %1118 = vst.msk [vmem:[#allocation3 + $0xe4] sm:$0xff] %vm948_vm1, %v1086_v33 }
 0x1fb   : > { %907 = vst.msk [vmem:[#allocation2 + $0xb8] sm:$0xff] %vm884_vm3, %v780_v34  ;;  %v8043_v36 = vpop.f32.mrf.mxu1 }
 0x1fc   : > { %3284 = vrot.lane.b32.xlu0 %v7941_v52, %s7604_s24  ;;  %3286 = vrot.lane.b32.xlu1 %v7949_v32, %s7604_s24  ;;  %908 = vst [vmem:[#allocation2 + $0xc0] sm:$0xff] %v8043_v36  ;;  %v1087_v37 = vadd.f32 %v1055_v35, %v8043_v36  ;;  %v1069_v35 = vld [vmem:[#allocation3 + $0x19c] sm:$0xff] }
 0x1fd   : > { %v786_v38 = vpop.f32.mrf.mxu1 }
 0x1fe   : > { %1119 = vst.msk [vmem:[#allocation3 + $0xf4] sm:$0xff] %vm948_vm1, %v1087_v37 }
 0x1ff   : > { %909 = vst.msk [vmem:[#allocation2 + $0xc8] sm:$0xff] %vm884_vm3, %v786_v38  ;;  %v8053_v40 = vpop.f32.mrf.mxu1 }
 0x200   : > { %1237 = vrot.lane.b32.xlu0 %v7949_v32, %s7596_s28  ;;  %1239 = vrot.lane.b32.xlu1 %v7963_v62, %s7596_s28  ;;  %910 = vst [vmem:[#allocation2 + $0xd0] sm:$0xff] %v8053_v40  ;;  %v1088_v41 = vadd.f32 %v1056_v39, %v8053_v40 }
 0x201   : > { %v790_v42 = vpop.f32.mrf.mxu1 }
 0x202   : > { %1120 = vst.msk [vmem:[#allocation3 + $0xfc] sm:$0xff] %vm948_vm1, %v1088_v41  ;;  %v1070_v41 = vld [vmem:[#allocation3 + $0x1a4] sm:$0xff] }
 0x203   : > { %911 = vst.msk [vmem:[#allocation2 + $0xd8] sm:$0xff] %vm884_vm3, %v790_v42  ;;  %v794_v44 = vpop.f32.mrf.mxu1 }
 0x204   : > { %1247 = vrot.lane.b32.xlu0 %v7957_v60, %s7596_s28  ;;  %1249 = vrot.lane.b32.xlu1 %v7973_v4, %s7596_s28  ;;  %912 = vst [vmem:[#allocation2 + $0xe0] sm:$0xff] %v794_v44  ;;  %v1089_v45 = vadd.f32 %v1057_v43, %v794_v44 }
 0x205   : > { %v796_v46 = vpop.f32.mrf.mxu1 }
 0x206   : > { %1121 = vst.msk [vmem:[#allocation3 + $0x10c] sm:$0xff] %vm948_vm1, %v1089_v45  ;;  %v1071_v45 = vld [vmem:[#allocation3 + $0x1b4] sm:$0xff] }
 0x207   : > { %913 = vst.msk [vmem:[#allocation2 + $0xe8] sm:$0xff] %vm884_vm3, %v796_v46  ;;  %v798_v48 = vpop.f32.mrf.mxu1 }
 0x208   : > { %1503 = vrot.lane.b32.xlu0 %v7957_v60, %s7597_s10  ;;  %1505 = vrot.lane.b32.xlu1 %v7973_v4, %s7597_s10  ;;  %914 = vst [vmem:[#allocation2 + $0xf0] sm:$0xff] %v798_v48  ;;  %v1090_v49 = vadd.f32 %v1058_v47, %v798_v48 }
 0x209   : > { %v800_v50 = vpop.f32.mrf.mxu1 }
 0x20a   : > { %1122 = vst.msk [vmem:[#allocation3 + $0x114] sm:$0xff] %vm948_vm1, %v1090_v49  ;;  %v1072_v49 = vld [vmem:[#allocation3 + $0x1bc] sm:$0xff] }
 0x20b   : > { %915 = vst.msk [vmem:[#allocation2 + $0xf8] sm:$0xff] %vm884_vm3, %v800_v50  ;;  %v804_v52 = vpop.f32.mrf.mxu1 }
 0x20c   : > { %1759 = vrot.lane.b32.xlu0 %v7957_v60, %s7598_s11  ;;  %1761 = vrot.lane.b32.xlu1 %v7973_v4, %s7598_s11  ;;  %916 = vst [vmem:[#allocation2 + $0x100] sm:$0xff] %v804_v52  ;;  %v1091_v53 = vadd.f32 %v1059_v51, %v804_v52 }
 0x20d   : > { %v806_v54 = vpop.f32.mrf.mxu1 }
 0x20e   : > { %1123 = vst.msk [vmem:[#allocation3 + $0x124] sm:$0xff] %vm948_vm1, %v1091_v53 }
 0x20f   : > { %917 = vst.msk [vmem:[#allocation2 + $0x108] sm:$0xff] %vm884_vm3, %v806_v54  ;;  %v808_v32 = vpop.f32.mrf.mxu1 }
 0x210   : > { %2015 = vrot.lane.b32.xlu0 %v7957_v60, %s7599_s12  ;;  %2017 = vrot.lane.b32.xlu1 %v7973_v4, %s7599_s12  ;;  %918 = vst [vmem:[#allocation2 + $0x110] sm:$0xff] %v808_v32  ;;  %v1092_v56 = vadd.f32 %v1060_v55, %v808_v32 }
 0x211   : > { %v810_v57 = vpop.f32.mrf.mxu1 }
 0x212   : > { %1124 = vst.msk [vmem:[#allocation3 + $0x12c] sm:$0xff] %vm948_vm1, %v1092_v56  ;;  %v1073_v56 = vld [vmem:[#allocation3 + $0x1cc] sm:$0xff] }
 0x213   : > { %919 = vst.msk [vmem:[#allocation2 + $0x118] sm:$0xff] %vm884_vm3, %v810_v57  ;;  %v814_v59 = vpop.f32.mrf.mxu1 }
 0x214   : > { %2272 = vrot.lane.b32.xlu0 %v7957_v60, %s7600_s18  ;;  %2274 = vrot.lane.b32.xlu1 %v7973_v4, %s7600_s18  ;;  %920 = vst [vmem:[#allocation2 + $0x120] sm:$0xff] %v814_v59  ;;  %v1093_v61 = vadd.f32 %v1061_v58, %v814_v59  ;;  %v1074_v58 = vld [vmem:[#allocation3 + $0x1d4] sm:$0xff] }
 0x215   : > { %v816_v63 = vpop.f32.mrf.mxu1 }
 0x216   : > { %1125 = vst.msk [vmem:[#allocation3 + $0x13c] sm:$0xff] %vm948_vm1, %v1093_v61  ;;  %v1171_v61 = vld [vmem:[#allocation3 + $0x63] sm:$0xff] }
 0x217   : > { %921 = vst.msk [vmem:[#allocation2 + $0x128] sm:$0xff] %vm884_vm3, %v816_v63  ;;  %v818_v1 = vpop.f32.mrf.mxu1 }
 0x218   : > { %2528 = vrot.lane.b32.xlu0 %v7957_v60, %s7601_s19  ;;  %2530 = vrot.lane.b32.xlu1 %v7973_v4, %s7601_s19  ;;  %922 = vst [vmem:[#allocation2 + $0x130] sm:$0xff] %v818_v1  ;;  %v1094_v2 = vadd.f32 %v1062_v0, %v818_v1 }
 0x219   : > { %v820_v3 = vpop.f32.mrf.mxu1 }
 0x21a   : > { %1126 = vst.msk [vmem:[#allocation3 + $0x144] sm:$0xff] %vm948_vm1, %v1094_v2 }
 0x21b   : > { %923 = vst.msk [vmem:[#allocation2 + $0x138] sm:$0xff] %vm884_vm3, %v820_v3  ;;  %v824_v7 = vpop.f32.mrf.mxu1 }
 0x21c   : > { %2784 = vrot.lane.b32.xlu0 %v7957_v60, %s7602_s22  ;;  %2786 = vrot.lane.b32.xlu1 %v7973_v4, %s7602_s22  ;;  %924 = vst [vmem:[#allocation2 + $0x140] sm:$0xff] %v824_v7  ;;  %v1095_v8 = vadd.f32 %v1063_v5, %v824_v7 }
 0x21d   : > { %v826_v9 = vpop.f32.mrf.mxu1 }
 0x21e   : > { %1127 = vst.msk [vmem:[#allocation3 + $0x154] sm:$0xff] %vm948_vm1, %v1095_v8 }
 0x21f   : > { %925 = vst.msk [vmem:[#allocation2 + $0x148] sm:$0xff] %vm884_vm3, %v826_v9  ;;  %v828_v11 = vpop.f32.mrf.mxu1 }
 0x220   : > { %3040 = vrot.lane.b32.xlu0 %v7957_v60, %s7603_s23  ;;  %3042 = vrot.lane.b32.xlu1 %v7973_v4, %s7603_s23  ;;  %926 = vst [vmem:[#allocation2 + $0x150] sm:$0xff] %v828_v11  ;;  %v1096_v14 = vadd.f32 %v1064_v10, %v828_v11  ;;  %v2196_v11 = vld [vmem:[#allocation3 + $0x4c] sm:$0xff] }
 0x221   : > { %v830_v15 = vpop.f32.mrf.mxu1 }
 0x222   : > { %1128 = vst.msk [vmem:[#allocation3 + $0x15c] sm:$0xff] %vm948_vm1, %v1096_v14  ;;  %v2197_v14 = vld [vmem:[#allocation3 + $0x54] sm:$0xff] }
 0x223   : > { %927 = vst.msk [vmem:[#allocation2 + $0x158] sm:$0xff] %vm884_vm3, %v830_v15  ;;  %v834_v17 = vpop.f32.mrf.mxu1 }
 0x224   : > { %3296 = vrot.lane.b32.xlu0 %v7957_v60, %s7604_s24  ;;  %3298 = vrot.lane.b32.xlu1 %v7973_v4, %s7604_s24  ;;  %928 = vst [vmem:[#allocation2 + $0x160] sm:$0xff] %v834_v17  ;;  %v1097_v18 = vadd.f32 %v1065_v16, %v834_v17 }
 0x225   : > { %v836_v19 = vpop.f32.mrf.mxu1 }
 0x226   : > { %1129 = vst.msk [vmem:[#allocation3 + $0x16c] sm:$0xff] %vm948_vm1, %v1097_v18 }
 0x227   : > { %929 = vst.msk [vmem:[#allocation2 + $0x168] sm:$0xff] %vm884_vm3, %v836_v19  ;;  %v838_v23 = vpop.f32.mrf.mxu1 }
 0x228   : > { %1495 = vrot.lane.b32.xlu0 %v7963_v62, %s7597_s10  ;;  %1241 = vrot.lane.b32.xlu1 %v7979_v6, %s7596_s28  ;;  %930 = vst [vmem:[#allocation2 + $0x170] sm:$0xff] %v838_v23  ;;  %v1098_v60 = vadd.f32 %v1066_v22, %v838_v23 }
 0x229   : > { %v840_v24 = vpop.f32.mrf.mxu1 }
 0x22a   : > { %1130 = vst.msk [vmem:[#allocation3 + $0x174] sm:$0xff] %vm948_vm1, %v1098_v60 }
 0x22b   : > { %931 = vst.msk [vmem:[#allocation2 + $0x178] sm:$0xff] %vm884_vm3, %v840_v24  ;;  %v844_v4 = vpop.f32.mrf.mxu1 }
 0x22c   : > { %1751 = vrot.lane.b32.xlu0 %v7963_v62, %s7598_s11  ;;  %1497 = vrot.lane.b32.xlu1 %v7979_v6, %s7597_s10  ;;  %932 = vst [vmem:[#allocation2 + $0x180] sm:$0xff] %v844_v4  ;;  %v1099_v26 = vadd.f32 %v1067_v25, %v844_v4 }
 0x22d   : > { %v846_v28 = vpop.f32.mrf.mxu1 }
 0x22e   : > { %1131 = vst.msk [vmem:[#allocation3 + $0x184] sm:$0xff] %vm948_vm1, %v1099_v26 }
 0x22f   : > { %933 = vst.msk [vmem:[#allocation2 + $0x188] sm:$0xff] %vm884_vm3, %v846_v28  ;;  %v848_v30 = vpop.f32.mrf.mxu1 }
 0x230   : > { %2007 = vrot.lane.b32.xlu0 %v7963_v62, %s7599_s12  ;;  %1753 = vrot.lane.b32.xlu1 %v7979_v6, %s7598_s11  ;;  %934 = vst [vmem:[#allocation2 + $0x190] sm:$0xff] %v848_v30  ;;  %v1100_v33 = vadd.f32 %v1068_v29, %v848_v30 }
 0x231   : > { %v850_v34 = vpop.f32.mrf.mxu1 }
 0x232   : > { %1132 = vst.msk [vmem:[#allocation3 + $0x18c] sm:$0xff] %vm948_vm1, %v1100_v33 }
 0x233   : > { %935 = vst.msk [vmem:[#allocation2 + $0x198] sm:$0xff] %vm884_vm3, %v850_v34  ;;  %v854_v37 = vpop.f32.mrf.mxu1 }
 0x234   : > { %2264 = vrot.lane.b32.xlu0 %v7963_v62, %s7600_s18  ;;  %2009 = vrot.lane.b32.xlu1 %v7979_v6, %s7599_s12  ;;  %936 = vst [vmem:[#allocation2 + $0x1a0] sm:$0xff] %v854_v37  ;;  %v1101_v38 = vadd.f32 %v1069_v35, %v854_v37 }
 0x235   : > { %v856_v39 = vpop.f32.mrf.mxu1 }
 0x236   : > { %1133 = vst.msk [vmem:[#allocation3 + $0x19c] sm:$0xff] %vm948_vm1, %v1101_v38 }
 0x237   : > { %937 = vst.msk [vmem:[#allocation2 + $0x1a8] sm:$0xff] %vm884_vm3, %v856_v39  ;;  %v858_v42 = vpop.f32.mrf.mxu1  ;;  %v1172_v39 = vld [vmem:[#allocation3 + $0x6b] sm:$0xff] }
 0x238   : > { %2520 = vrot.lane.b32.xlu0 %v7963_v62, %s7601_s19  ;;  %2266 = vrot.lane.b32.xlu1 %v7979_v6, %s7600_s18  ;;  %938 = vst [vmem:[#allocation2 + $0x1b0] sm:$0xff] %v858_v42  ;;  %v1102_v43 = vadd.f32 %v1070_v41, %v858_v42 }
 0x239   : > { %v860_v44 = vpop.f32.mrf.mxu1 }
 0x23a   : > { %1134 = vst.msk [vmem:[#allocation3 + $0x1a4] sm:$0xff] %vm948_vm1, %v1102_v43 }
 0x23b   : > { %939 = vst.msk [vmem:[#allocation2 + $0x1b8] sm:$0xff] %vm884_vm3, %v860_v44  ;;  %v864_v46 = vpop.f32.mrf.mxu1 }
 0x23c   : > { %2776 = vrot.lane.b32.xlu0 %v7963_v62, %s7602_s22  ;;  %2522 = vrot.lane.b32.xlu1 %v7979_v6, %s7601_s19  ;;  %940 = vst [vmem:[#allocation2 + $0x1c0] sm:$0xff] %v864_v46  ;;  %v1103_v47 = vadd.f32 %v1071_v45, %v864_v46  ;;  %v1173_v45 = vld [vmem:[#allocation3 + $0x7b] sm:$0xff] }
 0x23d   : > { %v866_v48 = vpop.f32.mrf.mxu1 }
 0x23e   : > { %1135 = vst.msk [vmem:[#allocation3 + $0x1b4] sm:$0xff] %vm948_vm1, %v1103_v47 }
 0x23f   : > { %941 = vst.msk [vmem:[#allocation2 + $0x1c8] sm:$0xff] %vm884_vm3, %v866_v48  ;;  %v868_v50 = vpop.f32.mrf.mxu1 }
 0x240   : > { %3032 = vrot.lane.b32.xlu0 %v7963_v62, %s7603_s23  ;;  %2778 = vrot.lane.b32.xlu1 %v7979_v6, %s7602_s22  ;;  %942 = vst [vmem:[#allocation2 + $0x1d0] sm:$0xff] %v868_v50  ;;  %v1104_v51 = vadd.f32 %v1072_v49, %v868_v50  ;;  %v1177_v50 = vld [vmem:[#allocation3 + $0xab] sm:$0xff] }
 0x241   : > { %v870_v52 = vpop.f32.mrf.mxu1 }
 0x242   : > { %1136 = vst.msk [vmem:[#allocation3 + $0x1bc] sm:$0xff] %vm948_vm1, %v1104_v51 }
 0x243   : > { %943 = vst.msk [vmem:[#allocation2 + $0x1d8] sm:$0xff] %vm884_vm3, %v870_v52  ;;  %v874_v53 = vpop.f32.mrf.mxu1  ;;  %v1178_v52 = vld [vmem:[#allocation3 + $0xb3] sm:$0xff] }
 0x244   : > { %3288 = vrot.lane.b32.xlu0 %v7963_v62, %s7604_s24  ;;  %3034 = vrot.lane.b32.xlu1 %v7979_v6, %s7603_s23  ;;  %944 = vst [vmem:[#allocation2 + $0x1e0] sm:$0xff] %v874_v53 }
 0x245   : > { %v876_v54 = vpop.f32.mrf.mxu1 }
 0x246   : > { %945 = vst.msk [vmem:[#allocation2 + $0x1e8] sm:$0xff] %vm884_vm3, %v876_v54 }
 0x247   : > { %v878_v55 = vpop.f32.mrf.mxu1 }
 0x248   : > { %3290 = vrot.lane.b32.xlu1 %v7979_v6, %s7604_s24  ;;  %1243 = vrot.lane.b32.xlu0 %v7991_v12, %s7596_s28  ;;  %946 = vst [vmem:[#allocation2 + $0x1f0] sm:$0xff] %v878_v55 }
 0x249   : > { %v880_v32 = vpop.f32.mrf.mxu1 }
 0x24a   : > { %947 = vst.msk [vmem:[#allocation2 + $0x1f8] sm:$0xff] %vm884_vm3, %v880_v32 }
 0x24b   : > { %v1169_v62 = vld [vmem:[#allocation2 + $0x1e0] sm:$0xff] }
 0x24c   : > { %1251 = vrot.lane.b32.xlu0 %v7993_v13, %s7596_s28  ;;  %1245 = vrot.lane.b32.xlu1 %v8007_v20, %s7596_s28  ;;  %v1105_v57 = vadd.f32 %v1169_v62, %v1073_v56 }
 0x24e   : > { %v1236_v59 = vpop.permute.xlu0 %1235  ;;  %1137 = vst.msk [vmem:[#allocation3 + $0x1cc] sm:$0xff] %vm948_vm1, %v1105_v57 }
 0x24f   : > { %v1331_v6 = vadd.f32 %v1236_v59, %v1171_v61  ;;  %v1170_v63 = vld [vmem:[#allocation2 + $0x1f0] sm:$0xff] }
 0x250   : > { %1499 = vrot.lane.b32.xlu0 %v7991_v12, %s7597_s10  ;;  %1253 = vrot.lane.b32.xlu1 %v8009_v21, %s7596_s28  ;;  %v1106_v0 = vadd.f32 %v1170_v63, %v1074_v58 }
 0x251   : > { %1363 = vst.msk [vmem:[#allocation3 + $0x63] sm:$0xff] %vm948_vm1, %v1331_v6 }
 0x252   : > { %v1492_v1 = vpop.permute.xlu0 %1491  ;;  %v8179_v2 = vpop.permute.xlu1 %1493  ;;  %1138 = vst.msk [vmem:[#allocation3 + $0x1d4] sm:$0xff] %vm948_vm1, %v1106_v0 }
 0x254   : > { %1507 = vrot.lane.b32.xlu0 %v7993_v13, %s7597_s10  ;;  %1501 = vrot.lane.b32.xlu1 %v8007_v20, %s7597_s10 }
 0x256   : > { %v1748_v3 = vpop.permute.xlu0 %1747  ;;  %v8186_v5 = vpop.permute.xlu1 %1749 }
 0x258   : > { %v1427_v7 = vld [vmem:[#allocation3 + $0x62] sm:$0xff]  ;;  %1755 = vrot.lane.b32.xlu0 %v7991_v12, %s7598_s11  ;;  %1509 = vrot.lane.b32.xlu1 %v8009_v21, %s7597_s10 }
 0x259   : > { %v1587_v8 = vadd.f32 %v1492_v1, %v1427_v7 }
 0x25a   : > { %v2004_v9 = vpop.permute.xlu0 %2003  ;;  %v8192_v10 = vpop.permute.xlu1 %2005 }
 0x25b   : > { %1619 = vst.msk [vmem:[#allocation3 + $0x62] sm:$0xff] %vm948_vm1, %v1587_v8 }
 0x25c   : > { %1763 = vrot.lane.b32.xlu0 %v7993_v13, %s7598_s11  ;;  %1757 = vrot.lane.b32.xlu1 %v8007_v20, %s7598_s11 }
 0x25e   : > { %v2261_v15 = vpop.permute.xlu0 %2260  ;;  %v2263_v16 = vpop.permute.xlu1 %2262 }
 0x25f   : > { %v2356_v17 = vadd.f32 %v2261_v15, %v2196_v11  ;;  %v2357_v18 = vadd.f32 %v2263_v16, %v2197_v14 }
 0x260   : > { %2011 = vrot.lane.b32.xlu0 %v7991_v12, %s7599_s12  ;;  %1765 = vrot.lane.b32.xlu1 %v8009_v21, %s7598_s11 }
 0x261   : > { %2388 = vst.msk [vmem:[#allocation3 + $0x4c] sm:$0xff] %vm948_vm1, %v2356_v17  ;;  %2389 = vst.msk [vmem:[#allocation3 + $0x54] sm:$0xff] %vm948_vm1, %v2357_v18 }
 0x262   : > { %v1683_v19 = vld [vmem:[#allocation3 + $0x61] sm:$0xff]  ;;  %v2517_v22 = vpop.permute.xlu0 %2516  ;;  %v2519_v23 = vpop.permute.xlu1 %2518 }
 0x263   : > { %v1843_v60 = vadd.f32 %v1748_v3, %v1683_v19 }
 0x264   : > { %2019 = vrot.lane.b32.xlu0 %v7993_v13, %s7599_s12  ;;  %2013 = vrot.lane.b32.xlu1 %v8007_v20, %s7599_s12 }
 0x265   : > { %1875 = vst.msk [vmem:[#allocation3 + $0x61] sm:$0xff] %vm948_vm1, %v1843_v60 }
 0x266   : > { %v2773_v24 = vpop.permute.xlu0 %2772  ;;  %v2775_v25 = vpop.permute.xlu1 %2774 }
 0x268   : > { %v2452_v4 = vld [vmem:[#allocation3 + $0x4b] sm:$0xff]  ;;  %v2453_v26 = vld [vmem:[#allocation3 + $0x53] sm:$0xff]  ;;  %2268 = vrot.lane.b32.xlu0 %v7991_v12, %s7600_s18  ;;  %2021 = vrot.lane.b32.xlu1 %v8009_v21, %s7599_s12 }
 0x269   : > { %v2612_v28 = vadd.f32 %v2517_v22, %v2452_v4  ;;  %v2613_v29 = vadd.f32 %v2519_v23, %v2453_v26 }
 0x26a   : > { %v3029_v30 = vpop.permute.xlu0 %3028  ;;  %v3031_v33 = vpop.permute.xlu1 %3030 }
 0x26b   : > { %2644 = vst.msk [vmem:[#allocation3 + $0x4b] sm:$0xff] %vm948_vm1, %v2612_v28  ;;  %2645 = vst.msk [vmem:[#allocation3 + $0x53] sm:$0xff] %vm948_vm1, %v2613_v29 }
 0x26c   : > { %v1939_v34 = vld [vmem:[#allocation3 + $0x60] sm:$0xff]  ;;  %2276 = vrot.lane.b32.xlu0 %v7993_v13, %s7600_s18  ;;  %2270 = vrot.lane.b32.xlu1 %v8007_v20, %s7600_s18 }
 0x26d   : > { %v2099_v35 = vadd.f32 %v2004_v9, %v1939_v34 }
 0x26e   : > { %v8220_v37 = vpop.permute.xlu0 %3284  ;;  %v8222_v38 = vpop.permute.xlu1 %3286 }
 0x26f   : > { %2131 = vst.msk [vmem:[#allocation3 + $0x60] sm:$0xff] %vm948_vm1, %v2099_v35 }
 0x270   : > { %2524 = vrot.lane.b32.xlu0 %v7991_v12, %s7601_s19  ;;  %2278 = vrot.lane.b32.xlu1 %v8009_v21, %s7600_s18 }
 0x272   : > { %v2708_v41 = vld [vmem:[#allocation3 + $0x4a] sm:$0xff]  ;;  %v2709_v42 = vld [vmem:[#allocation3 + $0x52] sm:$0xff]  ;;  %v1238_v43 = vpop.permute.xlu0 %1237  ;;  %v1240_v44 = vpop.permute.xlu1 %1239 }
 0x273   : > { %v2868_v46 = vadd.f32 %v2773_v24, %v2708_v41  ;;  %v2869_v47 = vadd.f32 %v2775_v25, %v2709_v42  ;;  %v1332_v48 = vadd.f32 %v1238_v43, %v1172_v39  ;;  %v1333_v49 = vadd.f32 %v1240_v44, %v1173_v45  ;;  %v1174_v41 = vld [vmem:[#allocation3 + $0x83] sm:$0xff] }
 0x274   : > { %2532 = vrot.lane.b32.xlu0 %v7993_v13, %s7601_s19  ;;  %2526 = vrot.lane.b32.xlu1 %v8007_v20, %s7601_s19 }
 0x275   : > { %2900 = vst.msk [vmem:[#allocation3 + $0x4a] sm:$0xff] %vm948_vm1, %v2868_v46  ;;  %2901 = vst.msk [vmem:[#allocation3 + $0x52] sm:$0xff] %vm948_vm1, %v2869_v47 }
 0x276   : > { %1364 = vst.msk [vmem:[#allocation3 + $0x6b] sm:$0xff] %vm948_vm1, %v1332_v48  ;;  %1365 = vst.msk [vmem:[#allocation3 + $0x7b] sm:$0xff] %vm948_vm1, %v1333_v49  ;;  %v1248_v51 = vpop.permute.xlu0 %1247  ;;  %v1250_v53 = vpop.permute.xlu1 %1249 }
 0x277   : > { %v1337_v54 = vadd.f32 %v1248_v51, %v1177_v50  ;;  %v1338_v55 = vadd.f32 %v1250_v53, %v1178_v52 }
 0x278   : > { %2780 = vrot.lane.b32.xlu0 %v7991_v12, %s7602_s22  ;;  %2534 = vrot.lane.b32.xlu1 %v8009_v21, %s7601_s19 }
 0x279   : > { %1369 = vst.msk [vmem:[#allocation3 + $0xab] sm:$0xff] %vm948_vm1, %v1337_v54  ;;  %1370 = vst.msk [vmem:[#allocation3 + $0xb3] sm:$0xff] %vm948_vm1, %v1338_v55 }
 0x27a   : > { %v1504_v32 = vpop.permute.xlu0 %1503  ;;  %v1506_v56 = vpop.permute.xlu1 %1505 }
 0x27c   : > { %v2964_v62 = vld [vmem:[#allocation3 + $0x49] sm:$0xff]  ;;  %v2965_v57 = vld [vmem:[#allocation3 + $0x51] sm:$0xff]  ;;  %2788 = vrot.lane.b32.xlu0 %v7993_v13, %s7602_s22  ;;  %2782 = vrot.lane.b32.xlu1 %v8007_v20, %s7602_s22 }
 0x27d   : > { %v1428_v58 = vld [vmem:[#allocation3 + $0x6a] sm:$0xff]  ;;  %v3124_v59 = vadd.f32 %v3029_v30, %v2964_v62  ;;  %v3125_v61 = vadd.f32 %v3031_v33, %v2965_v57 }
 0x27e   : > { %v1588_v6 = vadd.f32 %v8179_v2, %v1428_v58  ;;  %v1760_v63 = vpop.permute.xlu0 %1759  ;;  %v1762_v0 = vpop.permute.xlu1 %1761 }
 0x27f   : > { %3156 = vst.msk [vmem:[#allocation3 + $0x49] sm:$0xff] %vm948_vm1, %v3124_v59  ;;  %3157 = vst.msk [vmem:[#allocation3 + $0x51] sm:$0xff] %vm948_vm1, %v3125_v61 }
 0x280   : > { %1620 = vst.msk [vmem:[#allocation3 + $0x6a] sm:$0xff] %vm948_vm1, %v1588_v6  ;;  %v1433_v1 = vld [vmem:[#allocation3 + $0xaa] sm:$0xff]  ;;  %v1434_v3 = vld [vmem:[#allocation3 + $0xb2] sm:$0xff]  ;;  %3036 = vrot.lane.b32.xlu0 %v7991_v12, %s7603_s23  ;;  %2790 = vrot.lane.b32.xlu1 %v8009_v21, %s7602_s22 }
 0x281   : > { %v1593_v7 = vadd.f32 %v1504_v32, %v1433_v1  ;;  %v1594_v8 = vadd.f32 %v1506_v56, %v1434_v3 }
 0x282   : > { %v2016_v9 = vpop.permute.xlu0 %2015  ;;  %v2018_v2 = vpop.permute.xlu1 %2017 }
 0x283   : > { %1625 = vst.msk [vmem:[#allocation3 + $0xaa] sm:$0xff] %vm948_vm1, %v1593_v7  ;;  %1626 = vst.msk [vmem:[#allocation3 + $0xb2] sm:$0xff] %vm948_vm1, %v1594_v8 }
 0x284   : > { %3044 = vrot.lane.b32.xlu0 %v7993_v13, %s7603_s23  ;;  %3038 = vrot.lane.b32.xlu1 %v8007_v20, %s7603_s23 }
 0x286   : > { %v3220_v11 = vld [vmem:[#allocation3 + $0x48] sm:$0xff]  ;;  %v3221_v14 = vld [vmem:[#allocation3 + $0x50] sm:$0xff]  ;;  %v8261_v15 = vpop.permute.xlu0 %2272  ;;  %v8263_v16 = vpop.permute.xlu1 %2274 }
 0x287   : > { %v1684_v17 = vld [vmem:[#allocation3 + $0x69] sm:$0xff]  ;;  %v3380_v18 = vadd.f32 %v8220_v37, %v3220_v11  ;;  %v3381_v19 = vadd.f32 %v8222_v38, %v3221_v14  ;;  %v1429_v38 = vld [vmem:[#allocation3 + $0x7a] sm:$0xff] }
 0x288   : > { %v1844_v22 = vadd.f32 %v8186_v5, %v1684_v17  ;;  %3292 = vrot.lane.b32.xlu0 %v7991_v12, %s7604_s24  ;;  %3046 = vrot.lane.b32.xlu1 %v8009_v21, %s7603_s23 }
 0x289   : > { %3412 = vst.msk [vmem:[#allocation3 + $0x48] sm:$0xff] %vm948_vm1, %v3380_v18  ;;  %3413 = vst.msk [vmem:[#allocation3 + $0x50] sm:$0xff] %vm948_vm1, %v3381_v19 }
 0x28a   : > { %1876 = vst.msk [vmem:[#allocation3 + $0x69] sm:$0xff] %vm948_vm1, %v1844_v22  ;;  %v1689_v23 = vld [vmem:[#allocation3 + $0xa9] sm:$0xff]  ;;  %v1690_v60 = vld [vmem:[#allocation3 + $0xb1] sm:$0xff]  ;;  %v8275_v24 = vpop.permute.xlu0 %2528  ;;  %v8277_v25 = vpop.permute.xlu1 %2530 }
 0x28b   : > { %v1849_v4 = vadd.f32 %v1760_v63, %v1689_v23  ;;  %v1850_v5 = vadd.f32 %v1762_v0, %v1690_v60  ;;  %v1175_v23 = vld [vmem:[#allocation3 + $0x93] sm:$0xff] }
 0x28c   : > { %3300 = vrot.lane.b32.xlu0 %v7993_v13, %s7604_s24  ;;  %3294 = vrot.lane.b32.xlu1 %v8007_v20, %s7604_s24 }
 0x28d   : > { %1881 = vst.msk [vmem:[#allocation3 + $0xa9] sm:$0xff] %vm948_vm1, %v1849_v4  ;;  %1882 = vst.msk [vmem:[#allocation3 + $0xb1] sm:$0xff] %vm948_vm1, %v1850_v5  ;;  %v1179_v5 = vld [vmem:[#allocation3 + $0xc3] sm:$0xff] }
 0x28e   : > { %v8285_v12 = vpop.permute.xlu0 %2784  ;;  %v8287_v26 = vpop.permute.xlu1 %2786 }
 0x290   : > { %1255 = vrot.lane.b32.xlu0 %v8023_v27, %s7596_s28  ;;  %3302 = vrot.lane.b32.xlu1 %v8009_v21, %s7604_s24 }
 0x291   : > { %v1940_v28 = vld [vmem:[#allocation3 + $0x68] sm:$0xff] }
 0x292   : > { %v2100_v13 = vadd.f32 %v8192_v10, %v1940_v28  ;;  %v8294_v29 = vpop.permute.xlu0 %3040  ;;  %v8296_v20 = vpop.permute.xlu1 %3042 }
 0x294   : > { %2132 = vst.msk [vmem:[#allocation3 + $0x68] sm:$0xff] %vm948_vm1, %v2100_v13  ;;  %v1945_v30 = vld [vmem:[#allocation3 + $0xa8] sm:$0xff]  ;;  %v1946_v33 = vld [vmem:[#allocation3 + $0xb0] sm:$0xff]  ;;  %1511 = vrot.lane.b32.xlu0 %v8023_v27, %s7597_s10  ;;  %1257 = vrot.lane.b32.xlu1 %v8033_v31, %s7596_s28 }
 0x295   : > { %v2105_v34 = vadd.f32 %v2016_v9, %v1945_v30  ;;  %v2106_v35 = vadd.f32 %v2018_v2, %v1946_v33  ;;  %v1176_v30 = vld [vmem:[#allocation3 + $0x9b] sm:$0xff] }
 0x296   : > { %v8303_v21 = vpop.permute.xlu0 %3296  ;;  %v8305_v37 = vpop.permute.xlu1 %3298 }
 0x297   : > { %2137 = vst.msk [vmem:[#allocation3 + $0xa8] sm:$0xff] %vm948_vm1, %v2105_v34  ;;  %2138 = vst.msk [vmem:[#allocation3 + $0xb0] sm:$0xff] %vm948_vm1, %v2106_v35 }
 0x298   : > { %1767 = vrot.lane.b32.xlu0 %v8023_v27, %s7598_s11  ;;  %1513 = vrot.lane.b32.xlu1 %v8033_v31, %s7597_s10 }
 0x29a   : > { %v1496_v10 = vpop.permute.xlu0 %1495  ;;  %v1242_v39 = vpop.permute.xlu1 %1241 }
 0x29b   : > { %v1589_v42 = vadd.f32 %v1496_v10, %v1429_v38  ;;  %v1334_v43 = vadd.f32 %v1242_v39, %v1174_v41  ;;  %v2198_v52 = vld [vmem:[#allocation3 + $0x64] sm:$0xff]  ;;  %v2199_v56 = vld [vmem:[#allocation3 + $0x6c] sm:$0xff] }
 0x29c   : > { %2023 = vrot.lane.b32.xlu0 %v8023_v27, %s7599_s12  ;;  %1769 = vrot.lane.b32.xlu1 %v8033_v31, %s7598_s11  ;;  %v1180_v38 = vld [vmem:[#allocation3 + $0xcb] sm:$0xff] }
 0x29d   : > { %1621 = vst.msk [vmem:[#allocation3 + $0x7a] sm:$0xff] %vm948_vm1, %v1589_v42  ;;  %1366 = vst.msk [vmem:[#allocation3 + $0x83] sm:$0xff] %vm948_vm1, %v1334_v43 }
 0x29e   : > { %v1752_v44 = vpop.permute.xlu0 %1751  ;;  %v1498_v45 = vpop.permute.xlu1 %1497 }
 0x2a0   : > { %2280 = vrot.lane.b32.xlu0 %v8023_v27, %s7600_s18  ;;  %2025 = vrot.lane.b32.xlu1 %v8033_v31, %s7599_s12 }
 0x2a2   : > { %v2008_v46 = vpop.permute.xlu0 %2007  ;;  %v1754_v47 = vpop.permute.xlu1 %1753 }
 0x2a4   : > { %v1685_v48 = vld [vmem:[#allocation3 + $0x79] sm:$0xff]  ;;  %v1430_v49 = vld [vmem:[#allocation3 + $0x82] sm:$0xff]  ;;  %2536 = vrot.lane.b32.xlu0 %v8023_v27, %s7601_s19  ;;  %2282 = vrot.lane.b32.xlu1 %v8033_v31, %s7600_s18 }
 0x2a5   : > { %v1845_v50 = vadd.f32 %v1752_v44, %v1685_v48  ;;  %v1590_v51 = vadd.f32 %v1498_v45, %v1430_v49  ;;  %v2432_v48 = vld [vmem:[#allocation2 + $0xc0] sm:$0xff] }
 0x2a6   : > { %v2265_v53 = vpop.permute.xlu0 %2264  ;;  %v2010_v54 = vpop.permute.xlu1 %2009 }
 0x2a7   : > { %1877 = vst.msk [vmem:[#allocation3 + $0x79] sm:$0xff] %vm948_vm1, %v1845_v50  ;;  %1622 = vst.msk [vmem:[#allocation3 + $0x82] sm:$0xff] %vm948_vm1, %v1590_v51  ;;  %v2358_v55 = vadd.f32 %v2265_v53, %v2198_v52 }
 0x2a8   : > { %2792 = vrot.lane.b32.xlu0 %v8023_v27, %s7602_s22  ;;  %2538 = vrot.lane.b32.xlu1 %v8033_v31, %s7601_s19 }
 0x2a9   : > { %2390 = vst.msk [vmem:[#allocation3 + $0x64] sm:$0xff] %vm948_vm1, %v2358_v55 }
 0x2aa   : > { %v2521_v32 = vpop.permute.xlu0 %2520  ;;  %v2267_v62 = vpop.permute.xlu1 %2266 }
 0x2ab   : > { %v2359_v57 = vadd.f32 %v2267_v62, %v2199_v56 }
 0x2ac   : > { %3048 = vrot.lane.b32.xlu0 %v8023_v27, %s7603_s23  ;;  %2794 = vrot.lane.b32.xlu1 %v8033_v31, %s7602_s22 }
 0x2ad   : > { %2391 = vst.msk [vmem:[#allocation3 + $0x6c] sm:$0xff] %vm948_vm1, %v2359_v57 }
 0x2ae   : > { %v1941_v58 = vld [vmem:[#allocation3 + $0x78] sm:$0xff]  ;;  %v1686_v59 = vld [vmem:[#allocation3 + $0x81] sm:$0xff]  ;;  %v2777_v61 = vpop.permute.xlu0 %2776  ;;  %v2523_v6 = vpop.permute.xlu1 %2522 }
 0x2af   : > { %v2101_v63 = vadd.f32 %v2008_v46, %v1941_v58  ;;  %v1846_v0 = vadd.f32 %v1754_v47, %v1686_v59 }
 0x2b0   : > { %v2454_v1 = vld [vmem:[#allocation3 + $0x63] sm:$0xff]  ;;  %3304 = vrot.lane.b32.xlu0 %v8023_v27, %s7604_s24  ;;  %3050 = vrot.lane.b32.xlu1 %v8033_v31, %s7603_s23 }
 0x2b1   : > { %2133 = vst.msk [vmem:[#allocation3 + $0x78] sm:$0xff] %vm948_vm1, %v2101_v63  ;;  %1878 = vst.msk [vmem:[#allocation3 + $0x81] sm:$0xff] %vm948_vm1, %v1846_v0  ;;  %v2614_v3 = vadd.f32 %v2521_v32, %v2454_v1  ;;  %v2433_v32 = vld [vmem:[#allocation2 + $0xd0] sm:$0xff] }
 0x2b2   : > { %v3033_v7 = vpop.permute.xlu0 %3032  ;;  %v2779_v8 = vpop.permute.xlu1 %2778 }
 0x2b3   : > { %2646 = vst.msk [vmem:[#allocation3 + $0x63] sm:$0xff] %vm948_vm1, %v2614_v3 }
 0x2b4   : > { %v2455_v9 = vld [vmem:[#allocation3 + $0x6b] sm:$0xff]  ;;  %1259 = vrot.lane.b32.xlu0 %v8043_v36, %s7596_s28  ;;  %3306 = vrot.lane.b32.xlu1 %v8033_v31, %s7604_s24 }
 0x2b5   : > { %v2615_v27 = vadd.f32 %v2523_v6, %v2455_v9 }
 0x2b6   : > { %v8350_v2 = vpop.permute.xlu0 %3288  ;;  %v3035_v11 = vpop.permute.xlu1 %3034 }
 0x2b7   : > { %2647 = vst.msk [vmem:[#allocation3 + $0x6b] sm:$0xff] %vm948_vm1, %v2615_v27 }
 0x2b8   : > { %v1942_v14 = vld [vmem:[#allocation3 + $0x80] sm:$0xff]  ;;  %1515 = vrot.lane.b32.xlu0 %v8043_v36, %s7597_s10  ;;  %1261 = vrot.lane.b32.xlu1 %v8053_v40, %s7596_s28 }
 0x2b9   : > { %v2102_v17 = vadd.f32 %v2010_v54, %v1942_v14 }
 0x2ba   : > { %v2710_v18 = vld [vmem:[#allocation3 + $0x62] sm:$0xff]  ;;  %v8357_v19 = vpop.permute.xlu1 %3290  ;;  %v1244_v22 = vpop.permute.xlu0 %1243 }
 0x2bb   : > { %2134 = vst.msk [vmem:[#allocation3 + $0x80] sm:$0xff] %vm948_vm1, %v2102_v17  ;;  %v2870_v31 = vadd.f32 %v2777_v61, %v2710_v18  ;;  %v1335_v60 = vadd.f32 %v1244_v22, %v1175_v23  ;;  %v8400_v18 = vld [vmem:[#allocation2 + $0xe0] sm:$0xff] }
 0x2bc   : > { %1771 = vrot.lane.b32.xlu0 %v8043_v36, %s7598_s11  ;;  %1517 = vrot.lane.b32.xlu1 %v8053_v40, %s7597_s10 }
 0x2bd   : > { %2902 = vst.msk [vmem:[#allocation3 + $0x62] sm:$0xff] %vm948_vm1, %v2870_v31  ;;  %1367 = vst.msk [vmem:[#allocation3 + $0x93] sm:$0xff] %vm948_vm1, %v1335_v60 }
 0x2be   : > { %v2711_v4 = vld [vmem:[#allocation3 + $0x6a] sm:$0xff]  ;;  %v1252_v28 = vpop.permute.xlu0 %1251  ;;  %v1246_v13 = vpop.permute.xlu1 %1245 }
 0x2bf   : > { %v2871_v33 = vadd.f32 %v2779_v8, %v2711_v4  ;;  %v1339_v34 = vadd.f32 %v1252_v28, %v1179_v5  ;;  %v1336_v35 = vadd.f32 %v1246_v13, %v1176_v30  ;;  %v8407_v5 = vld [vmem:[#allocation2 + $0xf0] sm:$0xff] }
 0x2c0   : > { %2027 = vrot.lane.b32.xlu0 %v8043_v36, %s7599_s12  ;;  %1773 = vrot.lane.b32.xlu1 %v8053_v40, %s7598_s11 }
 0x2c1   : > { %2903 = vst.msk [vmem:[#allocation3 + $0x6a] sm:$0xff] %vm948_vm1, %v2871_v33  ;;  %1371 = vst.msk [vmem:[#allocation3 + $0xc3] sm:$0xff] %vm948_vm1, %v1339_v34  ;;  %v2204_v34 = vld [vmem:[#allocation3 + $0xac] sm:$0xff] }
 0x2c2   : > { %1368 = vst.msk [vmem:[#allocation3 + $0x9b] sm:$0xff] %vm948_vm1, %v1336_v35  ;;  %v1500_v10 = vpop.permute.xlu0 %1499  ;;  %v1254_v39 = vpop.permute.xlu1 %1253  ;;  %v2200_v23 = vld [vmem:[#allocation3 + $0x7c] sm:$0xff] }
 0x2c3   : > { %v1340_v41 = vadd.f32 %v1254_v39, %v1180_v38 }
 0x2c4   : > { %v2966_v42 = vld [vmem:[#allocation3 + $0x61] sm:$0xff]  ;;  %v1431_v43 = vld [vmem:[#allocation3 + $0x92] sm:$0xff]  ;;  %2284 = vrot.lane.b32.xlu0 %v8043_v36, %s7600_s18  ;;  %2029 = vrot.lane.b32.xlu1 %v8053_v40, %s7599_s12 }
 0x2c5   : > { %v3126_v44 = vadd.f32 %v3033_v7, %v2966_v42  ;;  %v1591_v45 = vadd.f32 %v1500_v10, %v1431_v43  ;;  %1372 = vst.msk [vmem:[#allocation3 + $0xcb] sm:$0xff] %vm948_vm1, %v1340_v41  ;;  %v2201_v10 = vld [vmem:[#allocation3 + $0x84] sm:$0xff] }
 0x2c6   : > { %v1508_v46 = vpop.permute.xlu0 %1507  ;;  %v1502_v47 = vpop.permute.xlu1 %1501 }
 0x2c7   : > { %3158 = vst.msk [vmem:[#allocation3 + $0x61] sm:$0xff] %vm948_vm1, %v3126_v44  ;;  %1623 = vst.msk [vmem:[#allocation3 + $0x92] sm:$0xff] %vm948_vm1, %v1591_v45  ;;  %v2205_v45 = vld [vmem:[#allocation3 + $0xb4] sm:$0xff] }
 0x2c8   : > { %v2967_v49 = vld [vmem:[#allocation3 + $0x69] sm:$0xff]  ;;  %2540 = vrot.lane.b32.xlu0 %v2432_v48, %s7601_s19  ;;  %2286 = vrot.lane.b32.xlu1 %v8053_v40, %s7600_s18 }
 0x2c9   : > { %v1435_v50 = vld [vmem:[#allocation3 + $0xc2] sm:$0xff]  ;;  %v1432_v51 = vld [vmem:[#allocation3 + $0x9a] sm:$0xff]  ;;  %v3127_v36 = vadd.f32 %v3035_v11, %v2967_v49 }
 0x2ca   : > { %v1595_v52 = vadd.f32 %v1508_v46, %v1435_v50  ;;  %v1592_v53 = vadd.f32 %v1502_v47, %v1432_v51  ;;  %v1756_v54 = vpop.permute.xlu0 %1755  ;;  %v1510_v55 = vpop.permute.xlu1 %1509 }
 0x2cb   : > { %3159 = vst.msk [vmem:[#allocation3 + $0x69] sm:$0xff] %vm948_vm1, %v3127_v36 }
 0x2cc   : > { %1627 = vst.msk [vmem:[#allocation3 + $0xc2] sm:$0xff] %vm948_vm1, %v1595_v52  ;;  %1624 = vst.msk [vmem:[#allocation3 + $0x9a] sm:$0xff] %vm948_vm1, %v1592_v53  ;;  %v1436_v56 = vld [vmem:[#allocation3 + $0xca] sm:$0xff]  ;;  %2796 = vrot.lane.b32.xlu0 %v2432_v48, %s7602_s22  ;;  %2542 = vrot.lane.b32.xlu1 %v2433_v32, %s7601_s19 }
 0x2cd   : > { %v1596_v62 = vadd.f32 %v1510_v55, %v1436_v56 }
 0x2ce   : > { %v3222_v57 = vld [vmem:[#allocation3 + $0x60] sm:$0xff]  ;;  %v1687_v40 = vld [vmem:[#allocation3 + $0x91] sm:$0xff]  ;;  %v1764_v58 = vpop.permute.xlu0 %1763  ;;  %v1758_v59 = vpop.permute.xlu1 %1757 }
 0x2cf   : > { %v3382_v61 = vadd.f32 %v8350_v2, %v3222_v57  ;;  %v1847_v6 = vadd.f32 %v1756_v54, %v1687_v40  ;;  %1628 = vst.msk [vmem:[#allocation3 + $0xca] sm:$0xff] %vm948_vm1, %v1596_v62 }
 0x2d0   : > { %3052 = vrot.lane.b32.xlu0 %v2432_v48, %s7603_s23  ;;  %2798 = vrot.lane.b32.xlu1 %v2433_v32, %s7602_s22 }
 0x2d1   : > { %3414 = vst.msk [vmem:[#allocation3 + $0x60] sm:$0xff] %vm948_vm1, %v3382_v61  ;;  %1879 = vst.msk [vmem:[#allocation3 + $0x91] sm:$0xff] %vm948_vm1, %v1847_v6 }
 0x2d2   : > { %v3223_v63 = vld [vmem:[#allocation3 + $0x68] sm:$0xff]  ;;  %v2012_v3 = vpop.permute.xlu0 %2011  ;;  %v1766_v7 = vpop.permute.xlu1 %1765 }
 0x2d3   : > { %v1691_v0 = vld [vmem:[#allocation3 + $0xc1] sm:$0xff]  ;;  %v1688_v1 = vld [vmem:[#allocation3 + $0x99] sm:$0xff]  ;;  %v3383_v8 = vadd.f32 %v8357_v19, %v3223_v63 }
 0x2d4   : > { %v1851_v9 = vadd.f32 %v1764_v58, %v1691_v0  ;;  %v1848_v27 = vadd.f32 %v1758_v59, %v1688_v1  ;;  %3308 = vrot.lane.b32.xlu0 %v2432_v48, %s7604_s24  ;;  %3054 = vrot.lane.b32.xlu1 %v2433_v32, %s7603_s23 }
 0x2d5   : > { %3415 = vst.msk [vmem:[#allocation3 + $0x68] sm:$0xff] %vm948_vm1, %v3383_v8 }
 0x2d6   : > { %1883 = vst.msk [vmem:[#allocation3 + $0xc1] sm:$0xff] %vm948_vm1, %v1851_v9  ;;  %1880 = vst.msk [vmem:[#allocation3 + $0x99] sm:$0xff] %vm948_vm1, %v1848_v27  ;;  %v1692_v2 = vld [vmem:[#allocation3 + $0xc9] sm:$0xff]  ;;  %v2020_v11 = vpop.permute.xlu0 %2019  ;;  %v2014_v14 = vpop.permute.xlu1 %2013 }
 0x2d7   : > { %v1852_v17 = vadd.f32 %v1766_v7, %v1692_v2 }
 0x2d8   : > { %v1943_v22 = vld [vmem:[#allocation3 + $0x90] sm:$0xff]  ;;  %1263 = vrot.lane.b32.xlu0 %v8400_v18, %s7596_s28  ;;  %3310 = vrot.lane.b32.xlu1 %v2433_v32, %s7604_s24 }
 0x2d9   : > { %v2103_v19 = vadd.f32 %v2012_v3, %v1943_v22  ;;  %1884 = vst.msk [vmem:[#allocation3 + $0xc9] sm:$0xff] %vm948_vm1, %v1852_v17 }
 0x2da   : > { %v2269_v31 = vpop.permute.xlu0 %2268  ;;  %v2022_v60 = vpop.permute.xlu1 %2021 }
 0x2db   : > { %2135 = vst.msk [vmem:[#allocation3 + $0x90] sm:$0xff] %vm948_vm1, %v2103_v19  ;;  %v2360_v4 = vadd.f32 %v2269_v31, %v2200_v23 }
 0x2dc   : > { %1519 = vrot.lane.b32.xlu0 %v8400_v18, %s7597_s10  ;;  %1265 = vrot.lane.b32.xlu1 %v8407_v5, %s7596_s28 }
 0x2dd   : > { %v1947_v28 = vld [vmem:[#allocation3 + $0xc0] sm:$0xff]  ;;  %v1944_v13 = vld [vmem:[#allocation3 + $0x98] sm:$0xff]  ;;  %2392 = vst.msk [vmem:[#allocation3 + $0x7c] sm:$0xff] %vm948_vm1, %v2360_v4 }
 0x2de   : > { %v2107_v30 = vadd.f32 %v2020_v11, %v1947_v28  ;;  %v2104_v33 = vadd.f32 %v2014_v14, %v1944_v13  ;;  %v2277_v35 = vpop.permute.xlu0 %2276  ;;  %v2271_v38 = vpop.permute.xlu1 %2270  ;;  %v8466_v13 = vld [vmem:[#allocation2 + $0x100] sm:$0xff] }
 0x2df   : > { %v2364_v39 = vadd.f32 %v2277_v35, %v2204_v34  ;;  %v2361_v41 = vadd.f32 %v2271_v38, %v2201_v10 }
 0x2e0   : > { %2139 = vst.msk [vmem:[#allocation3 + $0xc0] sm:$0xff] %vm948_vm1, %v2107_v30  ;;  %2136 = vst.msk [vmem:[#allocation3 + $0x98] sm:$0xff] %vm948_vm1, %v2104_v33  ;;  %v1948_v42 = vld [vmem:[#allocation3 + $0xc8] sm:$0xff]  ;;  %1775 = vrot.lane.b32.xlu0 %v8400_v18, %s7598_s11  ;;  %1521 = vrot.lane.b32.xlu1 %v8407_v5, %s7597_s10 }
 0x2e1   : > { %v2108_v43 = vadd.f32 %v2022_v60, %v1948_v42  ;;  %2396 = vst.msk [vmem:[#allocation3 + $0xac] sm:$0xff] %vm948_vm1, %v2364_v39  ;;  %2393 = vst.msk [vmem:[#allocation3 + $0x84] sm:$0xff] %vm948_vm1, %v2361_v41  ;;  %v1181_v41 = vld [vmem:[#allocation3 + $0xdb] sm:$0xff] }
 0x2e2   : > { %v2525_v44 = vpop.permute.xlu0 %2524  ;;  %v2279_v46 = vpop.permute.xlu1 %2278 }
 0x2e3   : > { %2140 = vst.msk [vmem:[#allocation3 + $0xc8] sm:$0xff] %vm948_vm1, %v2108_v43  ;;  %v2365_v47 = vadd.f32 %v2279_v46, %v2205_v45 }
 0x2e4   : > { %v2456_v48 = vld [vmem:[#allocation3 + $0x7b] sm:$0xff]  ;;  %2031 = vrot.lane.b32.xlu0 %v8400_v18, %s7599_s12  ;;  %1777 = vrot.lane.b32.xlu1 %v8407_v5, %s7598_s11 }
 0x2e5   : > { %v2616_v49 = vadd.f32 %v2525_v44, %v2456_v48  ;;  %2397 = vst.msk [vmem:[#allocation3 + $0xb4] sm:$0xff] %vm948_vm1, %v2365_v47 }
 0x2e6   : > { %v2533_v36 = vpop.permute.xlu0 %2532  ;;  %v2527_v52 = vpop.permute.xlu1 %2526 }
 0x2e7   : > { %v2202_v50 = vld [vmem:[#allocation3 + $0x94] sm:$0xff]  ;;  %v2203_v51 = vld [vmem:[#allocation3 + $0x9c] sm:$0xff]  ;;  %2648 = vst.msk [vmem:[#allocation3 + $0x7b] sm:$0xff] %vm948_vm1, %v2616_v49 }
 0x2e8   : > { %v2362_v53 = vadd.f32 %v8261_v15, %v2202_v50  ;;  %v2363_v54 = vadd.f32 %v8263_v16, %v2203_v51  ;;  %v2460_v55 = vld [vmem:[#allocation3 + $0xab] sm:$0xff]  ;;  %v2457_v32 = vld [vmem:[#allocation3 + $0x83] sm:$0xff]  ;;  %2288 = vrot.lane.b32.xlu0 %v8400_v18, %s7600_s18  ;;  %2033 = vrot.lane.b32.xlu1 %v8407_v5, %s7599_s12 }
 0x2e9   : > { %v2620_v56 = vadd.f32 %v2533_v36, %v2460_v55  ;;  %v2617_v62 = vadd.f32 %v2527_v52, %v2457_v32  ;;  %v1182_v52 = vld [vmem:[#allocation3 + $0xe3] sm:$0xff] }
 0x2ea   : > { %2394 = vst.msk [vmem:[#allocation3 + $0x94] sm:$0xff] %vm948_vm1, %v2362_v53  ;;  %2395 = vst.msk [vmem:[#allocation3 + $0x9c] sm:$0xff] %vm948_vm1, %v2363_v54  ;;  %v2781_v57 = vpop.permute.xlu0 %2780  ;;  %v2535_v15 = vpop.permute.xlu1 %2534 }
 0x2eb   : > { %2652 = vst.msk [vmem:[#allocation3 + $0xab] sm:$0xff] %vm948_vm1, %v2620_v56  ;;  %2649 = vst.msk [vmem:[#allocation3 + $0x83] sm:$0xff] %vm948_vm1, %v2617_v62 }
 0x2ec   : > { %v2461_v16 = vld [vmem:[#allocation3 + $0xb3] sm:$0xff]  ;;  %2544 = vrot.lane.b32.xlu0 %v8400_v18, %s7601_s19  ;;  %2290 = vrot.lane.b32.xlu1 %v8407_v5, %s7600_s18 }
 0x2ed   : > { %v2621_v40 = vadd.f32 %v2535_v15, %v2461_v16 }
 0x2ee   : > { %v2712_v58 = vld [vmem:[#allocation3 + $0x7a] sm:$0xff]  ;;  %v2789_v59 = vpop.permute.xlu0 %2788  ;;  %v2783_v61 = vpop.permute.xlu1 %2782 }
 0x2ef   : > { %v2872_v6 = vadd.f32 %v2781_v57, %v2712_v58  ;;  %2653 = vst.msk [vmem:[#allocation3 + $0xb3] sm:$0xff] %vm948_vm1, %v2621_v40 }
 0x2f0   : > { %2800 = vrot.lane.b32.xlu0 %v8400_v18, %s7602_s22  ;;  %2546 = vrot.lane.b32.xlu1 %v8407_v5, %s7601_s19 }
 0x2f1   : > { %v2458_v63 = vld [vmem:[#allocation3 + $0x93] sm:$0xff]  ;;  %v2459_v0 = vld [vmem:[#allocation3 + $0x9b] sm:$0xff]  ;;  %2904 = vst.msk [vmem:[#allocation3 + $0x7a] sm:$0xff] %vm948_vm1, %v2872_v6 }
 0x2f2   : > { %v2618_v1 = vadd.f32 %v8275_v24, %v2458_v63  ;;  %v2619_v3 = vadd.f32 %v8277_v25, %v2459_v0  ;;  %v2716_v7 = vld [vmem:[#allocation3 + $0xaa] sm:$0xff]  ;;  %v2713_v8 = vld [vmem:[#allocation3 + $0x82] sm:$0xff]  ;;  %v3037_v9 = vpop.permute.xlu0 %3036  ;;  %v2791_v27 = vpop.permute.xlu1 %2790 }
 0x2f3   : > { %v2876_v2 = vadd.f32 %v2789_v59, %v2716_v7  ;;  %v2873_v11 = vadd.f32 %v2783_v61, %v2713_v8 }
 0x2f4   : > { %2650 = vst.msk [vmem:[#allocation3 + $0x93] sm:$0xff] %vm948_vm1, %v2618_v1  ;;  %2651 = vst.msk [vmem:[#allocation3 + $0x9b] sm:$0xff] %vm948_vm1, %v2619_v3  ;;  %3056 = vrot.lane.b32.xlu0 %v8400_v18, %s7603_s23  ;;  %2802 = vrot.lane.b32.xlu1 %v8407_v5, %s7602_s22  ;;  %v2206_v3 = vld [vmem:[#allocation3 + $0xc4] sm:$0xff] }
 0x2f5   : > { %2908 = vst.msk [vmem:[#allocation3 + $0xaa] sm:$0xff] %vm948_vm1, %v2876_v2  ;;  %2905 = vst.msk [vmem:[#allocation3 + $0x82] sm:$0xff] %vm948_vm1, %v2873_v11 }
 0x2f6   : > { %v2717_v24 = vld [vmem:[#allocation3 + $0xb2] sm:$0xff]  ;;  %v3045_v25 = vpop.permute.xlu0 %3044  ;;  %v3039_v14 = vpop.permute.xlu1 %3038 }
 0x2f7   : > { %v2877_v17 = vadd.f32 %v2791_v27, %v2717_v24 }
 0x2f8   : > { %v2968_v22 = vld [vmem:[#allocation3 + $0x79] sm:$0xff]  ;;  %3312 = vrot.lane.b32.xlu0 %v8400_v18, %s7604_s24  ;;  %3058 = vrot.lane.b32.xlu1 %v8407_v5, %s7603_s23 }
 0x2f9   : > { %v3128_v19 = vadd.f32 %v3037_v9, %v2968_v22  ;;  %2909 = vst.msk [vmem:[#allocation3 + $0xb2] sm:$0xff] %vm948_vm1, %v2877_v17  ;;  %v2207_v9 = vld [vmem:[#allocation3 + $0xcc] sm:$0xff] }
 0x2fa   : > { %v3293_v31 = vpop.permute.xlu0 %3292  ;;  %v3047_v60 = vpop.permute.xlu1 %3046 }
 0x2fb   : > { %v2714_v23 = vld [vmem:[#allocation3 + $0x92] sm:$0xff]  ;;  %v2715_v4 = vld [vmem:[#allocation3 + $0x9a] sm:$0xff]  ;;  %3160 = vst.msk [vmem:[#allocation3 + $0x79] sm:$0xff] %vm948_vm1, %v3128_v19 }
 0x2fc   : > { %v2874_v28 = vadd.f32 %v8285_v12, %v2714_v23  ;;  %v2875_v30 = vadd.f32 %v8287_v26, %v2715_v4  ;;  %v2972_v33 = vld [vmem:[#allocation3 + $0xa9] sm:$0xff]  ;;  %v2969_v18 = vld [vmem:[#allocation3 + $0x81] sm:$0xff]  ;;  %1267 = vrot.lane.b32.xlu0 %v8466_v13, %s7596_s28  ;;  %3314 = vrot.lane.b32.xlu1 %v8407_v5, %s7604_s24 }
 0x2fd   : > { %v3132_v34 = vadd.f32 %v3045_v25, %v2972_v33  ;;  %v3129_v35 = vadd.f32 %v3039_v14, %v2969_v18  ;;  %v8477_v26 = vld [vmem:[#allocation2 + $0x110] sm:$0xff] }
 0x2fe   : > { %2906 = vst.msk [vmem:[#allocation3 + $0x92] sm:$0xff] %vm948_vm1, %v2874_v28  ;;  %2907 = vst.msk [vmem:[#allocation3 + $0x9a] sm:$0xff] %vm948_vm1, %v2875_v30  ;;  %v3301_v12 = vpop.permute.xlu0 %3300  ;;  %v3295_v10 = vpop.permute.xlu1 %3294 }
 0x2ff   : > { %3164 = vst.msk [vmem:[#allocation3 + $0xa9] sm:$0xff] %vm948_vm1, %v3132_v34  ;;  %3161 = vst.msk [vmem:[#allocation3 + $0x81] sm:$0xff] %vm948_vm1, %v3129_v35  ;;  %v8541_v34 = vld [vmem:[#allocation2 + $0x130] sm:$0xff] }
 0x300   : > { %v2973_v38 = vld [vmem:[#allocation3 + $0xb1] sm:$0xff]  ;;  %1523 = vrot.lane.b32.xlu0 %v8466_v13, %s7597_s10  ;;  %1269 = vrot.lane.b32.xlu1 %v8477_v26, %s7596_s28 }
 0x301   : > { %v3133_v5 = vadd.f32 %v3047_v60, %v2973_v38  ;;  %v8533_v60 = vld [vmem:[#allocation2 + $0x120] sm:$0xff] }
 0x302   : > { %v3224_v39 = vld [vmem:[#allocation3 + $0x78] sm:$0xff]  ;;  %v1256_v42 = vpop.permute.xlu0 %1255  ;;  %v3303_v43 = vpop.permute.xlu1 %3302 }
 0x303   : > { %v3384_v44 = vadd.f32 %v3293_v31, %v3224_v39  ;;  %3165 = vst.msk [vmem:[#allocation3 + $0xb1] sm:$0xff] %vm948_vm1, %v3133_v5  ;;  %v1341_v45 = vadd.f32 %v1256_v42, %v1181_v41 }
 0x304   : > { %1779 = vrot.lane.b32.xlu0 %v8466_v13, %s7598_s11  ;;  %1525 = vrot.lane.b32.xlu1 %v8477_v26, %s7597_s10 }
 0x305   : > { %v2970_v46 = vld [vmem:[#allocation3 + $0x91] sm:$0xff]  ;;  %v2971_v47 = vld [vmem:[#allocation3 + $0x99] sm:$0xff]  ;;  %3416 = vst.msk [vmem:[#allocation3 + $0x78] sm:$0xff] %vm948_vm1, %v3384_v44  ;;  %1373 = vst.msk [vmem:[#allocation3 + $0xdb] sm:$0xff] %vm948_vm1, %v1341_v45 }
 0x306   : > { %v3130_v48 = vadd.f32 %v8294_v29, %v2970_v46  ;;  %v3131_v49 = vadd.f32 %v8296_v20, %v2971_v47  ;;  %v3228_v50 = vld [vmem:[#allocation3 + $0xa8] sm:$0xff]  ;;  %v3225_v51 = vld [vmem:[#allocation3 + $0x80] sm:$0xff]  ;;  %v1512_v36 = vpop.permute.xlu0 %1511  ;;  %v1258_v53 = vpop.permute.xlu1 %1257 }
 0x307   : > { %v3388_v54 = vadd.f32 %v3301_v12, %v3228_v50  ;;  %v3385_v55 = vadd.f32 %v3295_v10, %v3225_v51  ;;  %v1342_v32 = vadd.f32 %v1258_v53, %v1182_v52  ;;  %v1184_v44 = vld [vmem:[#allocation3 + $0xfb] sm:$0xff] }
 0x308   : > { %3162 = vst.msk [vmem:[#allocation3 + $0x91] sm:$0xff] %vm948_vm1, %v3130_v48  ;;  %3163 = vst.msk [vmem:[#allocation3 + $0x99] sm:$0xff] %vm948_vm1, %v3131_v49  ;;  %2035 = vrot.lane.b32.xlu0 %v8466_v13, %s7599_s12  ;;  %1781 = vrot.lane.b32.xlu1 %v8477_v26, %s7598_s11 }
 0x309   : > { %3420 = vst.msk [vmem:[#allocation3 + $0xa8] sm:$0xff] %vm948_vm1, %v3388_v54  ;;  %3417 = vst.msk [vmem:[#allocation3 + $0x80] sm:$0xff] %vm948_vm1, %v3385_v55 }
 0x30a   : > { %1374 = vst.msk [vmem:[#allocation3 + $0xe3] sm:$0xff] %vm948_vm1, %v1342_v32  ;;  %v3229_v29 = vld [vmem:[#allocation3 + $0xb0] sm:$0xff]  ;;  %v1768_v20 = vpop.permute.xlu0 %1767  ;;  %v1514_v56 = vpop.permute.xlu1 %1513 }
 0x30b   : > { %v3389_v62 = vadd.f32 %v3303_v43, %v3229_v29 }
 0x30c   : > { %v1437_v57 = vld [vmem:[#allocation3 + $0xda] sm:$0xff]  ;;  %2292 = vrot.lane.b32.xlu0 %v8466_v13, %s7600_s18  ;;  %2037 = vrot.lane.b32.xlu1 %v8477_v26, %s7599_s12 }
 0x30d   : > { %3421 = vst.msk [vmem:[#allocation3 + $0xb0] sm:$0xff] %vm948_vm1, %v3389_v62  ;;  %v1597_v15 = vadd.f32 %v1512_v36, %v1437_v57 }
 0x30e   : > { %v2024_v16 = vpop.permute.xlu0 %2023  ;;  %v1770_v40 = vpop.permute.xlu1 %1769 }
 0x30f   : > { %v3226_v58 = vld [vmem:[#allocation3 + $0x90] sm:$0xff]  ;;  %v3227_v59 = vld [vmem:[#allocation3 + $0x98] sm:$0xff]  ;;  %1629 = vst.msk [vmem:[#allocation3 + $0xda] sm:$0xff] %vm948_vm1, %v1597_v15 }
 0x310   : > { %v3386_v61 = vadd.f32 %v8303_v21, %v3226_v58  ;;  %v3387_v6 = vadd.f32 %v8305_v37, %v3227_v59  ;;  %2548 = vrot.lane.b32.xlu0 %v8466_v13, %s7601_s19  ;;  %2294 = vrot.lane.b32.xlu1 %v8477_v26, %s7600_s18 }
 0x311   : > { %v1438_v63 = vld [vmem:[#allocation3 + $0xe2] sm:$0xff] }
 0x312   : > { %v1598_v0 = vadd.f32 %v1514_v56, %v1438_v63  ;;  %3418 = vst.msk [vmem:[#allocation3 + $0x90] sm:$0xff] %vm948_vm1, %v3386_v61  ;;  %3419 = vst.msk [vmem:[#allocation3 + $0x98] sm:$0xff] %vm948_vm1, %v3387_v6  ;;  %v2281_v1 = vpop.permute.xlu0 %2280  ;;  %v2026_v7 = vpop.permute.xlu1 %2025 }
 0x313   : > { %v2366_v21 = vadd.f32 %v2281_v1, %v2206_v3 }
 0x314   : > { %1630 = vst.msk [vmem:[#allocation3 + $0xe2] sm:$0xff] %vm948_vm1, %v1598_v0  ;;  %2804 = vrot.lane.b32.xlu0 %v8466_v13, %s7602_s22  ;;  %2550 = vrot.lane.b32.xlu1 %v8477_v26, %s7601_s19 }
 0x315   : > { %2398 = vst.msk [vmem:[#allocation3 + $0xc4] sm:$0xff] %vm948_vm1, %v2366_v21 }
 0x316   : > { %v1693_v37 = vld [vmem:[#allocation3 + $0xd9] sm:$0xff]  ;;  %v2537_v8 = vpop.permute.xlu0 %2536  ;;  %v2283_v27 = vpop.permute.xlu1 %2282 }
 0x317   : > { %v1853_v2 = vadd.f32 %v1768_v20, %v1693_v37  ;;  %v2367_v11 = vadd.f32 %v2283_v27, %v2207_v9 }
 0x318   : > { %3060 = vrot.lane.b32.xlu0 %v8466_v13, %s7603_s23  ;;  %2806 = vrot.lane.b32.xlu1 %v8477_v26, %s7602_s22 }
 0x319   : > { %1885 = vst.msk [vmem:[#allocation3 + $0xd9] sm:$0xff] %vm948_vm1, %v1853_v2  ;;  %2399 = vst.msk [vmem:[#allocation3 + $0xcc] sm:$0xff] %vm948_vm1, %v2367_v11 }
 0x31a   : > { %v2793_v25 = vpop.permute.xlu0 %2792  ;;  %v2539_v14 = vpop.permute.xlu1 %2538 }
 0x31b   : > { %v1694_v24 = vld [vmem:[#allocation3 + $0xe1] sm:$0xff] }
 0x31c   : > { %v1854_v17 = vadd.f32 %v1770_v40, %v1694_v24  ;;  %v2462_v22 = vld [vmem:[#allocation3 + $0xc3] sm:$0xff]  ;;  %3316 = vrot.lane.b32.xlu0 %v8466_v13, %s7604_s24  ;;  %3062 = vrot.lane.b32.xlu1 %v8477_v26, %s7603_s23 }
 0x31d   : > { %v2622_v19 = vadd.f32 %v2537_v8, %v2462_v22  ;;  %v8591_v24 = vld [vmem:[#allocation2 + $0x140] sm:$0xff] }
 0x31e   : > { %1886 = vst.msk [vmem:[#allocation3 + $0xe1] sm:$0xff] %vm948_vm1, %v1854_v17  ;;  %v3049_v23 = vpop.permute.xlu0 %3048  ;;  %v2795_v31 = vpop.permute.xlu1 %2794 }
 0x31f   : > { %2654 = vst.msk [vmem:[#allocation3 + $0xc3] sm:$0xff] %vm948_vm1, %v2622_v19 }
 0x320   : > { %v1949_v4 = vld [vmem:[#allocation3 + $0xd8] sm:$0xff]  ;;  %v2463_v28 = vld [vmem:[#allocation3 + $0xcb] sm:$0xff]  ;;  %1271 = vrot.lane.b32.xlu0 %v8533_v60, %s7596_s28  ;;  %3318 = vrot.lane.b32.xlu1 %v8477_v26, %s7604_s24 }
 0x321   : > { %v2109_v13 = vadd.f32 %v2024_v16, %v1949_v4  ;;  %v2623_v30 = vadd.f32 %v2539_v14, %v2463_v28  ;;  %v1183_v26 = vld [vmem:[#allocation3 + $0xf3] sm:$0xff] }
 0x322   : > { %v3305_v33 = vpop.permute.xlu0 %3304  ;;  %v3051_v18 = vpop.permute.xlu1 %3050 }
 0x323   : > { %2141 = vst.msk [vmem:[#allocation3 + $0xd8] sm:$0xff] %vm948_vm1, %v2109_v13  ;;  %2655 = vst.msk [vmem:[#allocation3 + $0xcb] sm:$0xff] %vm948_vm1, %v2623_v30  ;;  %v1185_v13 = vld [vmem:[#allocation3 + $0x10b] sm:$0xff] }
 0x324   : > { %1527 = vrot.lane.b32.xlu0 %v8533_v60, %s7597_s10  ;;  %1273 = vrot.lane.b32.xlu1 %v8541_v34, %s7596_s28 }
 0x325   : > { %v1950_v35 = vld [vmem:[#allocation3 + $0xe0] sm:$0xff] }
 0x326   : > { %v2110_v12 = vadd.f32 %v2026_v7, %v1950_v35  ;;  %v2718_v10 = vld [vmem:[#allocation3 + $0xc2] sm:$0xff]  ;;  %v1260_v38 = vpop.permute.xlu0 %1259  ;;  %v3307_v5 = vpop.permute.xlu1 %3306 }
 0x327   : > { %v2878_v39 = vadd.f32 %v2793_v25, %v2718_v10  ;;  %v1343_v41 = vadd.f32 %v1260_v38, %v1183_v26  ;;  %v1186_v10 = vld [vmem:[#allocation3 + $0x113] sm:$0xff] }
 0x328   : > { %2142 = vst.msk [vmem:[#allocation3 + $0xe0] sm:$0xff] %vm948_vm1, %v2110_v12  ;;  %1783 = vrot.lane.b32.xlu0 %v8533_v60, %s7598_s11  ;;  %1529 = vrot.lane.b32.xlu1 %v8541_v34, %s7597_s10 }
 0x329   : > { %2910 = vst.msk [vmem:[#allocation3 + $0xc2] sm:$0xff] %vm948_vm1, %v2878_v39  ;;  %1375 = vst.msk [vmem:[#allocation3 + $0xf3] sm:$0xff] %vm948_vm1, %v1343_v41 }
 0x32a   : > { %v2719_v42 = vld [vmem:[#allocation3 + $0xca] sm:$0xff]  ;;  %v1516_v43 = vpop.permute.xlu0 %1515  ;;  %v1262_v45 = vpop.permute.xlu1 %1261 }
 0x32b   : > { %v2879_v46 = vadd.f32 %v2795_v31, %v2719_v42  ;;  %v1344_v47 = vadd.f32 %v1262_v45, %v1184_v44  ;;  %v8599_v31 = vld [vmem:[#allocation2 + $0x150] sm:$0xff] }
 0x32c   : > { %2039 = vrot.lane.b32.xlu0 %v8533_v60, %s7599_s12  ;;  %1785 = vrot.lane.b32.xlu1 %v8541_v34, %s7598_s11 }
 0x32d   : > { %2911 = vst.msk [vmem:[#allocation3 + $0xca] sm:$0xff] %vm948_vm1, %v2879_v46  ;;  %1376 = vst.msk [vmem:[#allocation3 + $0xfb] sm:$0xff] %vm948_vm1, %v1344_v47 }
 0x32e   : > { %v1772_v48 = vpop.permute.xlu0 %1771  ;;  %v1518_v49 = vpop.permute.xlu1 %1517 }
 0x32f   : > { %v2208_v62 = vld [vmem:[#allocation3 + $0xdc] sm:$0xff]  ;;  %v2209_v59 = vld [vmem:[#allocation3 + $0xe4] sm:$0xff] }
 0x330   : > { %v2974_v50 = vld [vmem:[#allocation3 + $0xc1] sm:$0xff]  ;;  %v1439_v51 = vld [vmem:[#allocation3 + $0xf2] sm:$0xff]  ;;  %2296 = vrot.lane.b32.xlu0 %v8533_v60, %s7600_s18  ;;  %2041 = vrot.lane.b32.xlu1 %v8541_v34, %s7599_s12 }
 0x331   : > { %v3134_v36 = vadd.f32 %v3049_v23, %v2974_v50  ;;  %v1599_v52 = vadd.f32 %v1516_v43, %v1439_v51 }
 0x332   : > { %v2028_v53 = vpop.permute.xlu0 %2027  ;;  %v1774_v54 = vpop.permute.xlu1 %1773 }
 0x333   : > { %3166 = vst.msk [vmem:[#allocation3 + $0xc1] sm:$0xff] %vm948_vm1, %v3134_v36  ;;  %1631 = vst.msk [vmem:[#allocation3 + $0xf2] sm:$0xff] %vm948_vm1, %v1599_v52 }
 0x334   : > { %v2975_v55 = vld [vmem:[#allocation3 + $0xc9] sm:$0xff]  ;;  %v1440_v32 = vld [vmem:[#allocation3 + $0xfa] sm:$0xff]  ;;  %2552 = vrot.lane.b32.xlu0 %v8533_v60, %s7601_s19  ;;  %2298 = vrot.lane.b32.xlu1 %v8541_v34, %s7600_s18 }
 0x335   : > { %v3135_v29 = vadd.f32 %v3051_v18, %v2975_v55  ;;  %v1600_v20 = vadd.f32 %v1518_v49, %v1440_v32 }
 0x336   : > { %v2285_v56 = vpop.permute.xlu0 %2284  ;;  %v2030_v57 = vpop.permute.xlu1 %2029 }
 0x337   : > { %3167 = vst.msk [vmem:[#allocation3 + $0xc9] sm:$0xff] %vm948_vm1, %v3135_v29  ;;  %1632 = vst.msk [vmem:[#allocation3 + $0xfa] sm:$0xff] %vm948_vm1, %v1600_v20  ;;  %v2368_v15 = vadd.f32 %v2285_v56, %v2208_v62 }
 0x338   : > { %2808 = vrot.lane.b32.xlu0 %v8533_v60, %s7602_s22  ;;  %2554 = vrot.lane.b32.xlu1 %v8541_v34, %s7601_s19 }
 0x339   : > { %2400 = vst.msk [vmem:[#allocation3 + $0xdc] sm:$0xff] %vm948_vm1, %v2368_v15 }
 0x33a   : > { %v3230_v16 = vld [vmem:[#allocation3 + $0xc0] sm:$0xff]  ;;  %v1695_v40 = vld [vmem:[#allocation3 + $0xf1] sm:$0xff]  ;;  %v2541_v58 = vpop.permute.xlu0 %2540  ;;  %v2287_v61 = vpop.permute.xlu1 %2286 }
 0x33b   : > { %v3390_v6 = vadd.f32 %v3305_v33, %v3230_v16  ;;  %v1855_v63 = vadd.f32 %v1772_v48, %v1695_v40  ;;  %v2369_v0 = vadd.f32 %v2287_v61, %v2209_v59 }
 0x33c   : > { %3064 = vrot.lane.b32.xlu0 %v8533_v60, %s7603_s23  ;;  %2810 = vrot.lane.b32.xlu1 %v8541_v34, %s7602_s22 }
 0x33d   : > { %3422 = vst.msk [vmem:[#allocation3 + $0xc0] sm:$0xff] %vm948_vm1, %v3390_v6  ;;  %1887 = vst.msk [vmem:[#allocation3 + $0xf1] sm:$0xff] %vm948_vm1, %v1855_v63  ;;  %v8642_v63 = vld [vmem:[#allocation2 + $0x160] sm:$0xff] }
 0x33e   : > { %2401 = vst.msk [vmem:[#allocation3 + $0xe4] sm:$0xff] %vm948_vm1, %v2369_v0  ;;  %v3231_v1 = vld [vmem:[#allocation3 + $0xc8] sm:$0xff]  ;;  %v1696_v3 = vld [vmem:[#allocation3 + $0xf9] sm:$0xff]  ;;  %v2797_v7 = vpop.permute.xlu0 %2796  ;;  %v2543_v21 = vpop.permute.xlu1 %2542 }
 0x33f   : > { %v3391_v37 = vadd.f32 %v3307_v5, %v3231_v1  ;;  %v1856_v8 = vadd.f32 %v1774_v54, %v1696_v3 }
 0x340   : > { %v2464_v9 = vld [vmem:[#allocation3 + $0xdb] sm:$0xff]  ;;  %3320 = vrot.lane.b32.xlu0 %v8533_v60, %s7604_s24  ;;  %3066 = vrot.lane.b32.xlu1 %v8541_v34, %s7603_s23 }
 0x341   : > { %3423 = vst.msk [vmem:[#allocation3 + $0xc8] sm:$0xff] %vm948_vm1, %v3391_v37  ;;  %1888 = vst.msk [vmem:[#allocation3 + $0xf9] sm:$0xff] %vm948_vm1, %v1856_v8  ;;  %v2624_v27 = vadd.f32 %v2541_v58, %v2464_v9 }
 0x342   : > { %v3053_v2 = vpop.permute.xlu0 %3052  ;;  %v2799_v11 = vpop.permute.xlu1 %2798 }
 0x343   : > { %2656 = vst.msk [vmem:[#allocation3 + $0xdb] sm:$0xff] %vm948_vm1, %v2624_v27 }
 0x344   : > { %v1951_v25 = vld [vmem:[#allocation3 + $0xf0] sm:$0xff]  ;;  %1275 = vrot.lane.b32.xlu0 %v8591_v24, %s7596_s28  ;;  %3322 = vrot.lane.b32.xlu1 %v8541_v34, %s7604_s24 }
 0x345   : > { %v2465_v14 = vld [vmem:[#allocation3 + $0xe3] sm:$0xff]  ;;  %v2111_v17 = vadd.f32 %v2028_v53, %v1951_v25 }
 0x346   : > { %v2625_v22 = vadd.f32 %v2543_v21, %v2465_v14  ;;  %v3309_v19 = vpop.permute.xlu0 %3308  ;;  %v3055_v23 = vpop.permute.xlu1 %3054  ;;  %v8651_v21 = vld [vmem:[#allocation2 + $0x170] sm:$0xff] }
 0x347   : > { %2143 = vst.msk [vmem:[#allocation3 + $0xf0] sm:$0xff] %vm948_vm1, %v2111_v17  ;;  %v1187_v17 = vld [vmem:[#allocation3 + $0x123] sm:$0xff] }
 0x348   : > { %2657 = vst.msk [vmem:[#allocation3 + $0xe3] sm:$0xff] %vm948_vm1, %v2625_v22  ;;  %v1952_v60 = vld [vmem:[#allocation3 + $0xf8] sm:$0xff]  ;;  %1531 = vrot.lane.b32.xlu0 %v8591_v24, %s7597_s10  ;;  %1277 = vrot.lane.b32.xlu1 %v8599_v31, %s7596_s28 }
 0x349   : > { %v2112_v4 = vadd.f32 %v2030_v57, %v1952_v60 }
 0x34a   : > { %v2720_v28 = vld [vmem:[#allocation3 + $0xda] sm:$0xff]  ;;  %v1264_v30 = vpop.permute.xlu0 %1263  ;;  %v3311_v33 = vpop.permute.xlu1 %3310 }
 0x34b   : > { %2144 = vst.msk [vmem:[#allocation3 + $0xf8] sm:$0xff] %vm948_vm1, %v2112_v4  ;;  %v2880_v18 = vadd.f32 %v2797_v7, %v2720_v28  ;;  %v1345_v34 = vadd.f32 %v1264_v30, %v1185_v13  ;;  %v1188_v13 = vld [vmem:[#allocation3 + $0x12b] sm:$0xff] }
 0x34c   : > { %1787 = vrot.lane.b32.xlu0 %v8591_v24, %s7598_s11  ;;  %1533 = vrot.lane.b32.xlu1 %v8599_v31, %s7597_s10 }
 0x34d   : > { %2912 = vst.msk [vmem:[#allocation3 + $0xda] sm:$0xff] %vm948_vm1, %v2880_v18  ;;  %1377 = vst.msk [vmem:[#allocation3 + $0x10b] sm:$0xff] %vm948_vm1, %v1345_v34 }
 0x34e   : > { %v1520_v12 = vpop.permute.xlu0 %1519  ;;  %v1266_v26 = vpop.permute.xlu1 %1265 }
 0x34f   : > { %v2721_v35 = vld [vmem:[#allocation3 + $0xe2] sm:$0xff]  ;;  %v1346_v5 = vadd.f32 %v1266_v26, %v1186_v10 }
 0x350   : > { %v2881_v38 = vadd.f32 %v2799_v11, %v2721_v35  ;;  %2043 = vrot.lane.b32.xlu0 %v8591_v24, %s7599_s12  ;;  %1789 = vrot.lane.b32.xlu1 %v8599_v31, %s7598_s11 }
 0x351   : > { %1378 = vst.msk [vmem:[#allocation3 + $0x113] sm:$0xff] %vm948_vm1, %v1346_v5 }
 0x352   : > { %2913 = vst.msk [vmem:[#allocation3 + $0xe2] sm:$0xff] %vm948_vm1, %v2881_v38  ;;  %v1776_v39 = vpop.permute.xlu0 %1775  ;;  %v1522_v41 = vpop.permute.xlu1 %1521  ;;  %v2210_v52 = vld [vmem:[#allocation3 + $0xf4] sm:$0xff]  ;;  %v2211_v20 = vld [vmem:[#allocation3 + $0xfc] sm:$0xff] }
 0x354   : > { %v2976_v42 = vld [vmem:[#allocation3 + $0xd9] sm:$0xff]  ;;  %v1441_v43 = vld [vmem:[#allocation3 + $0x10a] sm:$0xff]  ;;  %2300 = vrot.lane.b32.xlu0 %v8591_v24, %s7600_s18  ;;  %2045 = vrot.lane.b32.xlu1 %v8599_v31, %s7599_s12 }
 0x355   : > { %v3136_v44 = vadd.f32 %v3053_v2, %v2976_v42  ;;  %v1601_v45 = vadd.f32 %v1520_v12, %v1441_v43 }
 0x356   : > { %v2032_v46 = vpop.permute.xlu0 %2031  ;;  %v1778_v47 = vpop.permute.xlu1 %1777 }
 0x357   : > { %3168 = vst.msk [vmem:[#allocation3 + $0xd9] sm:$0xff] %vm948_vm1, %v3136_v44  ;;  %1633 = vst.msk [vmem:[#allocation3 + $0x10a] sm:$0xff] %vm948_vm1, %v1601_v45 }
 0x358   : > { %v1442_v49 = vld [vmem:[#allocation3 + $0x112] sm:$0xff]  ;;  %2556 = vrot.lane.b32.xlu0 %v8591_v24, %s7601_s19  ;;  %2302 = vrot.lane.b32.xlu1 %v8599_v31, %s7600_s18 }
 0x359   : > { %v2977_v48 = vld [vmem:[#allocation3 + $0xe1] sm:$0xff]  ;;  %v1602_v51 = vadd.f32 %v1522_v41, %v1442_v49 }
 0x35a   : > { %v3137_v50 = vadd.f32 %v3055_v23, %v2977_v48  ;;  %v2289_v36 = vpop.permute.xlu0 %2288  ;;  %v2034_v53 = vpop.permute.xlu1 %2033 }
 0x35b   : > { %1634 = vst.msk [vmem:[#allocation3 + $0x112] sm:$0xff] %vm948_vm1, %v1602_v51  ;;  %v2370_v54 = vadd.f32 %v2289_v36, %v2210_v52 }
 0x35c   : > { %3169 = vst.msk [vmem:[#allocation3 + $0xe1] sm:$0xff] %vm948_vm1, %v3137_v50  ;;  %2812 = vrot.lane.b32.xlu0 %v8591_v24, %s7602_s22  ;;  %2558 = vrot.lane.b32.xlu1 %v8599_v31, %s7601_s19 }
 0x35d   : > { %2402 = vst.msk [vmem:[#allocation3 + $0xf4] sm:$0xff] %vm948_vm1, %v2370_v54 }
 0x35e   : > { %v3232_v55 = vld [vmem:[#allocation3 + $0xd8] sm:$0xff]  ;;  %v1697_v32 = vld [vmem:[#allocation3 + $0x109] sm:$0xff]  ;;  %v2545_v29 = vpop.permute.xlu0 %2544  ;;  %v2291_v56 = vpop.permute.xlu1 %2290 }
 0x35f   : > { %v3392_v62 = vadd.f32 %v3309_v19, %v3232_v55  ;;  %v1857_v57 = vadd.f32 %v1776_v39, %v1697_v32  ;;  %v2371_v15 = vadd.f32 %v2291_v56, %v2211_v20  ;;  %v8695_v32 = vld [vmem:[#allocation2 + $0x180] sm:$0xff] }
 0x360   : > { %3068 = vrot.lane.b32.xlu0 %v8591_v24, %s7603_s23  ;;  %2814 = vrot.lane.b32.xlu1 %v8599_v31, %s7602_s22 }
 0x361   : > { %3424 = vst.msk [vmem:[#allocation3 + $0xd8] sm:$0xff] %vm948_vm1, %v3392_v62  ;;  %1889 = vst.msk [vmem:[#allocation3 + $0x109] sm:$0xff] %vm948_vm1, %v1857_v57 }
 0x362   : > { %2403 = vst.msk [vmem:[#allocation3 + $0xfc] sm:$0xff] %vm948_vm1, %v2371_v15  ;;  %v1698_v40 = vld [vmem:[#allocation3 + $0x111] sm:$0xff]  ;;  %v2801_v58 = vpop.permute.xlu0 %2800  ;;  %v2547_v59 = vpop.permute.xlu1 %2546 }
 0x363   : > { %v3233_v16 = vld [vmem:[#allocation3 + $0xe0] sm:$0xff]  ;;  %v1858_v6 = vadd.f32 %v1778_v47, %v1698_v40 }
 0x364   : > { %v3393_v61 = vadd.f32 %v3311_v33, %v3233_v16  ;;  %v2466_v0 = vld [vmem:[#allocation3 + $0xf3] sm:$0xff]  ;;  %1279 = vrot.lane.b32.xlu0 %v8642_v63, %s7596_s28  ;;  %3070 = vrot.lane.b32.xlu1 %v8599_v31, %s7603_s23 }
 0x365   : > { %1890 = vst.msk [vmem:[#allocation3 + $0x111] sm:$0xff] %vm948_vm1, %v1858_v6  ;;  %v2626_v1 = vadd.f32 %v2545_v29, %v2466_v0  ;;  %v8705_v16 = vld [vmem:[#allocation2 + $0x190] sm:$0xff] }
 0x366   : > { %3425 = vst.msk [vmem:[#allocation3 + $0xe0] sm:$0xff] %vm948_vm1, %v3393_v61  ;;  %v3057_v3 = vpop.permute.xlu0 %3056  ;;  %v2803_v7 = vpop.permute.xlu1 %2802 }
 0x367   : > { %2658 = vst.msk [vmem:[#allocation3 + $0xf3] sm:$0xff] %vm948_vm1, %v2626_v1 }
 0x368   : > { %v1953_v37 = vld [vmem:[#allocation3 + $0x108] sm:$0xff]  ;;  %1535 = vrot.lane.b32.xlu0 %v8642_v63, %s7597_s10  ;;  %1281 = vrot.lane.b32.xlu1 %v8651_v21, %s7596_s28 }
 0x369   : > { %v2467_v8 = vld [vmem:[#allocation3 + $0xfb] sm:$0xff]  ;;  %v2113_v9 = vadd.f32 %v2032_v46, %v1953_v37 }
 0x36a   : > { %v2627_v27 = vadd.f32 %v2547_v59, %v2467_v8  ;;  %v3313_v2 = vpop.permute.xlu0 %3312  ;;  %v3059_v11 = vpop.permute.xlu1 %3058 }
 0x36b   : > { %2145 = vst.msk [vmem:[#allocation3 + $0x108] sm:$0xff] %vm948_vm1, %v2113_v9 }
 0x36c   : > { %2659 = vst.msk [vmem:[#allocation3 + $0xfb] sm:$0xff] %vm948_vm1, %v2627_v27  ;;  %v1954_v24 = vld [vmem:[#allocation3 + $0x110] sm:$0xff]  ;;  %1791 = vrot.lane.b32.xlu0 %v8642_v63, %s7598_s11  ;;  %1537 = vrot.lane.b32.xlu1 %v8651_v21, %s7597_s10 }
 0x36d   : > { %v2114_v25 = vadd.f32 %v2034_v53, %v1954_v24 }
 0x36e   : > { %v2722_v14 = vld [vmem:[#allocation3 + $0xf2] sm:$0xff]  ;;  %v1268_v22 = vpop.permute.xlu0 %1267  ;;  %v8663_v19 = vpop.permute.xlu1 %3314 }
 0x36f   : > { %2146 = vst.msk [vmem:[#allocation3 + $0x110] sm:$0xff] %vm948_vm1, %v2114_v25  ;;  %v2882_v23 = vadd.f32 %v2801_v58, %v2722_v14  ;;  %v1347_v60 = vadd.f32 %v1268_v22, %v1187_v17 }
 0x370   : > { %2047 = vrot.lane.b32.xlu0 %v8642_v63, %s7599_s12  ;;  %1793 = vrot.lane.b32.xlu1 %v8651_v21, %s7598_s11 }
 0x371   : > { %2914 = vst.msk [vmem:[#allocation3 + $0xf2] sm:$0xff] %vm948_vm1, %v2882_v23  ;;  %1379 = vst.msk [vmem:[#allocation3 + $0x123] sm:$0xff] %vm948_vm1, %v1347_v60 }
 0x372   : > { %v1524_v28 = vpop.permute.xlu0 %1523  ;;  %v1270_v30 = vpop.permute.xlu1 %1269 }
 0x373   : > { %v2723_v4 = vld [vmem:[#allocation3 + $0xfa] sm:$0xff]  ;;  %v1348_v18 = vadd.f32 %v1270_v30, %v1188_v13 }
 0x374   : > { %v2883_v33 = vadd.f32 %v2803_v7, %v2723_v4  ;;  %2304 = vrot.lane.b32.xlu0 %v8642_v63, %s7600_s18  ;;  %2049 = vrot.lane.b32.xlu1 %v8651_v21, %s7599_s12 }
 0x375   : > { %1380 = vst.msk [vmem:[#allocation3 + $0x12b] sm:$0xff] %vm948_vm1, %v1348_v18 }
 0x376   : > { %2915 = vst.msk [vmem:[#allocation3 + $0xfa] sm:$0xff] %vm948_vm1, %v2883_v33  ;;  %v1780_v34 = vpop.permute.xlu0 %1779  ;;  %v1526_v35 = vpop.permute.xlu1 %1525  ;;  %v2212_v46 = vld [vmem:[#allocation3 + $0x10c] sm:$0xff]  ;;  %v2213_v36 = vld [vmem:[#allocation3 + $0x114] sm:$0xff] }
 0x378   : > { %v2978_v12 = vld [vmem:[#allocation3 + $0xf1] sm:$0xff]  ;;  %v1443_v10 = vld [vmem:[#allocation3 + $0x122] sm:$0xff]  ;;  %2560 = vrot.lane.b32.xlu0 %v8642_v63, %s7601_s19  ;;  %2306 = vrot.lane.b32.xlu1 %v8651_v21, %s7600_s18 }
 0x379   : > { %v3138_v26 = vadd.f32 %v3057_v3, %v2978_v12  ;;  %v1603_v38 = vadd.f32 %v1524_v28, %v1443_v10 }
 0x37a   : > { %v2036_v5 = vpop.permute.xlu0 %2035  ;;  %v1782_v39 = vpop.permute.xlu1 %1781 }
 0x37b   : > { %3170 = vst.msk [vmem:[#allocation3 + $0xf1] sm:$0xff] %vm948_vm1, %v3138_v26  ;;  %1635 = vst.msk [vmem:[#allocation3 + $0x122] sm:$0xff] %vm948_vm1, %v1603_v38 }
 0x37c   : > { %v1444_v42 = vld [vmem:[#allocation3 + $0x12a] sm:$0xff]  ;;  %2816 = vrot.lane.b32.xlu0 %v8642_v63, %s7602_s22  ;;  %2562 = vrot.lane.b32.xlu1 %v8651_v21, %s7601_s19 }
 0x37d   : > { %v2979_v41 = vld [vmem:[#allocation3 + $0xf9] sm:$0xff]  ;;  %v1604_v44 = vadd.f32 %v1526_v35, %v1444_v42 }
 0x37e   : > { %v3139_v43 = vadd.f32 %v3059_v11, %v2979_v41  ;;  %v2293_v45 = vpop.permute.xlu0 %2292  ;;  %v2038_v47 = vpop.permute.xlu1 %2037 }
 0x37f   : > { %1636 = vst.msk [vmem:[#allocation3 + $0x12a] sm:$0xff] %vm948_vm1, %v1604_v44  ;;  %v2372_v48 = vadd.f32 %v2293_v45, %v2212_v46  ;;  %v8751_v44 = vld [vmem:[#allocation2 + $0x1a0] sm:$0xff] }
 0x380   : > { %3171 = vst.msk [vmem:[#allocation3 + $0xf9] sm:$0xff] %vm948_vm1, %v3139_v43  ;;  %3072 = vrot.lane.b32.xlu0 %v8642_v63, %s7603_s23  ;;  %2818 = vrot.lane.b32.xlu1 %v8651_v21, %s7602_s22 }
 0x381   : > { %2404 = vst.msk [vmem:[#allocation3 + $0x10c] sm:$0xff] %vm948_vm1, %v2372_v48 }
 0x382   : > { %v3234_v49 = vld [vmem:[#allocation3 + $0xf0] sm:$0xff]  ;;  %v1699_v50 = vld [vmem:[#allocation3 + $0x121] sm:$0xff]  ;;  %v2549_v51 = vpop.permute.xlu0 %2548  ;;  %v2295_v52 = vpop.permute.xlu1 %2294 }
 0x383   : > { %v3394_v53 = vadd.f32 %v3313_v2, %v3234_v49  ;;  %v1859_v54 = vadd.f32 %v1780_v34, %v1699_v50  ;;  %v2373_v55 = vadd.f32 %v2295_v52, %v2213_v36  ;;  %v1189_v2 = vld [vmem:[#allocation3 + $0x13b] sm:$0xff]  ;;  %v8758_v52 = vld [vmem:[#allocation2 + $0x1b0] sm:$0xff] }
 0x384   : > { %1283 = vrot.lane.b32.xlu0 %v8695_v32, %s7596_s28  ;;  %3074 = vrot.lane.b32.xlu1 %v8651_v21, %s7603_s23 }
 0x385   : > { %3426 = vst.msk [vmem:[#allocation3 + $0xf0] sm:$0xff] %vm948_vm1, %v3394_v53  ;;  %1891 = vst.msk [vmem:[#allocation3 + $0x121] sm:$0xff] %vm948_vm1, %v1859_v54 }
 0x386   : > { %2405 = vst.msk [vmem:[#allocation3 + $0x114] sm:$0xff] %vm948_vm1, %v2373_v55  ;;  %v1700_v20 = vld [vmem:[#allocation3 + $0x129] sm:$0xff]  ;;  %v2805_v56 = vpop.permute.xlu0 %2804  ;;  %v2551_v62 = vpop.permute.xlu1 %2550 }
 0x387   : > { %v3235_v29 = vld [vmem:[#allocation3 + $0xf8] sm:$0xff]  ;;  %v1860_v15 = vadd.f32 %v1782_v39, %v1700_v20 }
 0x388   : > { %v3395_v57 = vadd.f32 %v8663_v19, %v3235_v29  ;;  %v2468_v40 = vld [vmem:[#allocation3 + $0x10b] sm:$0xff]  ;;  %1539 = vrot.lane.b32.xlu0 %v8695_v32, %s7597_s10  ;;  %1285 = vrot.lane.b32.xlu1 %v8705_v16, %s7596_s28  ;;  %v1190_v19 = vld [vmem:[#allocation3 + $0x143] sm:$0xff] }
 0x389   : > { %1892 = vst.msk [vmem:[#allocation3 + $0x129] sm:$0xff] %vm948_vm1, %v1860_v15  ;;  %v2628_v58 = vadd.f32 %v2549_v51, %v2468_v40 }
 0x38a   : > { %3427 = vst.msk [vmem:[#allocation3 + $0xf8] sm:$0xff] %vm948_vm1, %v3395_v57  ;;  %v3061_v59 = vpop.permute.xlu0 %3060  ;;  %v2807_v61 = vpop.permute.xlu1 %2806 }
 0x38b   : > { %2660 = vst.msk [vmem:[#allocation3 + $0x10b] sm:$0xff] %vm948_vm1, %v2628_v58 }
 0x38c   : > { %v1955_v6 = vld [vmem:[#allocation3 + $0x120] sm:$0xff]  ;;  %1795 = vrot.lane.b32.xlu0 %v8695_v32, %s7598_s11  ;;  %1541 = vrot.lane.b32.xlu1 %v8705_v16, %s7597_s10 }
 0x38d   : > { %v2469_v0 = vld [vmem:[#allocation3 + $0x113] sm:$0xff]  ;;  %v2115_v1 = vadd.f32 %v2036_v5, %v1955_v6 }
 0x38e   : > { %v2629_v3 = vadd.f32 %v2551_v62, %v2469_v0  ;;  %v3317_v7 = vpop.permute.xlu0 %3316  ;;  %v3063_v37 = vpop.permute.xlu1 %3062 }
 0x38f   : > { %2147 = vst.msk [vmem:[#allocation3 + $0x120] sm:$0xff] %vm948_vm1, %v2115_v1 }
 0x390   : > { %2661 = vst.msk [vmem:[#allocation3 + $0x113] sm:$0xff] %vm948_vm1, %v2629_v3  ;;  %v1956_v8 = vld [vmem:[#allocation3 + $0x128] sm:$0xff]  ;;  %2051 = vrot.lane.b32.xlu0 %v8695_v32, %s7599_s12  ;;  %1797 = vrot.lane.b32.xlu1 %v8705_v16, %s7598_s11 }
 0x391   : > { %v2116_v9 = vadd.f32 %v2038_v47, %v1956_v8  ;;  %v1191_v8 = vld [vmem:[#allocation3 + $0x153] sm:$0xff] }
 0x392   : > { %v2724_v27 = vld [vmem:[#allocation3 + $0x10a] sm:$0xff]  ;;  %v1272_v11 = vpop.permute.xlu0 %1271  ;;  %v8724_v24 = vpop.permute.xlu1 %3318 }
 0x393   : > { %2148 = vst.msk [vmem:[#allocation3 + $0x128] sm:$0xff] %vm948_vm1, %v2116_v9  ;;  %v2884_v25 = vadd.f32 %v2805_v56, %v2724_v27  ;;  %v1349_v14 = vadd.f32 %v1272_v11, %v1189_v2 }
 0x394   : > { %2308 = vrot.lane.b32.xlu0 %v8695_v32, %s7600_s18  ;;  %2053 = vrot.lane.b32.xlu1 %v8705_v16, %s7599_s12 }
 0x395   : > { %2916 = vst.msk [vmem:[#allocation3 + $0x10a] sm:$0xff] %vm948_vm1, %v2884_v25  ;;  %1381 = vst.msk [vmem:[#allocation3 + $0x13b] sm:$0xff] %vm948_vm1, %v1349_v14  ;;  %v1192_v14 = vld [vmem:[#allocation3 + $0x15b] sm:$0xff] }
 0x396   : > { %v1528_v22 = vpop.permute.xlu0 %1527  ;;  %v1274_v23 = vpop.permute.xlu1 %1273 }
 0x397   : > { %v2725_v17 = vld [vmem:[#allocation3 + $0x112] sm:$0xff]  ;;  %v1350_v4 = vadd.f32 %v1274_v23, %v1190_v19 }
 0x398   : > { %v2885_v60 = vadd.f32 %v2807_v61, %v2725_v17  ;;  %2564 = vrot.lane.b32.xlu0 %v8695_v32, %s7601_s19  ;;  %2310 = vrot.lane.b32.xlu1 %v8705_v16, %s7600_s18 }
 0x399   : > { %1382 = vst.msk [vmem:[#allocation3 + $0x143] sm:$0xff] %vm948_vm1, %v1350_v4 }
 0x39a   : > { %2917 = vst.msk [vmem:[#allocation3 + $0x112] sm:$0xff] %vm948_vm1, %v2885_v60  ;;  %v1784_v28 = vpop.permute.xlu0 %1783  ;;  %v1530_v13 = vpop.permute.xlu1 %1529  ;;  %v2214_v41 = vld [vmem:[#allocation3 + $0x124] sm:$0xff]  ;;  %v2215_v48 = vld [vmem:[#allocation3 + $0x12c] sm:$0xff] }
 0x39c   : > { %v2980_v30 = vld [vmem:[#allocation3 + $0x109] sm:$0xff]  ;;  %v1445_v33 = vld [vmem:[#allocation3 + $0x13a] sm:$0xff]  ;;  %2820 = vrot.lane.b32.xlu0 %v8695_v32, %s7602_s22  ;;  %2566 = vrot.lane.b32.xlu1 %v8705_v16, %s7601_s19 }
 0x39d   : > { %v3140_v18 = vadd.f32 %v3061_v59, %v2980_v30  ;;  %v1605_v34 = vadd.f32 %v1528_v22, %v1445_v33 }
 0x39e   : > { %v2040_v35 = vpop.permute.xlu0 %2039  ;;  %v1786_v12 = vpop.permute.xlu1 %1785 }
 0x39f   : > { %3172 = vst.msk [vmem:[#allocation3 + $0x109] sm:$0xff] %vm948_vm1, %v3140_v18  ;;  %1637 = vst.msk [vmem:[#allocation3 + $0x13a] sm:$0xff] %vm948_vm1, %v1605_v34  ;;  %v8808_v34 = vld [vmem:[#allocation2 + $0x1c0] sm:$0xff] }
 0x3a0   : > { %v1446_v26 = vld [vmem:[#allocation3 + $0x142] sm:$0xff]  ;;  %3076 = vrot.lane.b32.xlu0 %v8695_v32, %s7603_s23  ;;  %2822 = vrot.lane.b32.xlu1 %v8705_v16, %s7602_s22 }
 0x3a1   : > { %v2981_v10 = vld [vmem:[#allocation3 + $0x111] sm:$0xff]  ;;  %v1606_v5 = vadd.f32 %v1530_v13, %v1446_v26 }
 0x3a2   : > { %v3141_v38 = vadd.f32 %v3063_v37, %v2981_v10  ;;  %v2297_v39 = vpop.permute.xlu0 %2296  ;;  %v2042_v42 = vpop.permute.xlu1 %2041 }
 0x3a3   : > { %1638 = vst.msk [vmem:[#allocation3 + $0x142] sm:$0xff] %vm948_vm1, %v1606_v5  ;;  %v2374_v43 = vadd.f32 %v2297_v39, %v2214_v41 }
 0x3a4   : > { %3173 = vst.msk [vmem:[#allocation3 + $0x111] sm:$0xff] %vm948_vm1, %v3141_v38  ;;  %1287 = vrot.lane.b32.xlu0 %v8751_v44, %s7596_s28  ;;  %3078 = vrot.lane.b32.xlu1 %v8705_v16, %s7603_s23 }
 0x3a5   : > { %2406 = vst.msk [vmem:[#allocation3 + $0x124] sm:$0xff] %vm948_vm1, %v2374_v43 }
 0x3a6   : > { %v3236_v45 = vld [vmem:[#allocation3 + $0x108] sm:$0xff]  ;;  %v1701_v46 = vld [vmem:[#allocation3 + $0x139] sm:$0xff]  ;;  %v2553_v47 = vpop.permute.xlu0 %2552  ;;  %v2299_v49 = vpop.permute.xlu1 %2298 }
 0x3a7   : > { %v3396_v50 = vadd.f32 %v3317_v7, %v3236_v45  ;;  %v1861_v51 = vadd.f32 %v1784_v28, %v1701_v46  ;;  %v2375_v36 = vadd.f32 %v2299_v49, %v2215_v48 }
 0x3a8   : > { %1543 = vrot.lane.b32.xlu0 %v8751_v44, %s7597_s10  ;;  %1289 = vrot.lane.b32.xlu1 %v8758_v52, %s7596_s28 }
 0x3a9   : > { %3428 = vst.msk [vmem:[#allocation3 + $0x108] sm:$0xff] %vm948_vm1, %v3396_v50  ;;  %1893 = vst.msk [vmem:[#allocation3 + $0x139] sm:$0xff] %vm948_vm1, %v1861_v51 }
 0x3aa   : > { %2407 = vst.msk [vmem:[#allocation3 + $0x12c] sm:$0xff] %vm948_vm1, %v2375_v36  ;;  %v1702_v54 = vld [vmem:[#allocation3 + $0x141] sm:$0xff]  ;;  %v2809_v55 = vpop.permute.xlu0 %2808  ;;  %v2555_v29 = vpop.permute.xlu1 %2554 }
 0x3ab   : > { %v3237_v53 = vld [vmem:[#allocation3 + $0x110] sm:$0xff]  ;;  %v1862_v56 = vadd.f32 %v1786_v12, %v1702_v54 }
 0x3ac   : > { %v3397_v20 = vadd.f32 %v8724_v24, %v3237_v53  ;;  %v2470_v62 = vld [vmem:[#allocation3 + $0x123] sm:$0xff]  ;;  %1799 = vrot.lane.b32.xlu0 %v8751_v44, %s7598_s11  ;;  %1545 = vrot.lane.b32.xlu1 %v8758_v52, %s7597_s10 }
 0x3ad   : > { %1894 = vst.msk [vmem:[#allocation3 + $0x141] sm:$0xff] %vm948_vm1, %v1862_v56  ;;  %v2630_v57 = vadd.f32 %v2553_v47, %v2470_v62 }
 0x3ae   : > { %3429 = vst.msk [vmem:[#allocation3 + $0x110] sm:$0xff] %vm948_vm1, %v3397_v20  ;;  %v3065_v15 = vpop.permute.xlu0 %3064  ;;  %v2811_v40 = vpop.permute.xlu1 %2810 }
 0x3af   : > { %2662 = vst.msk [vmem:[#allocation3 + $0x123] sm:$0xff] %vm948_vm1, %v2630_v57 }
 0x3b0   : > { %v1957_v58 = vld [vmem:[#allocation3 + $0x138] sm:$0xff]  ;;  %2055 = vrot.lane.b32.xlu0 %v8751_v44, %s7599_s12  ;;  %1801 = vrot.lane.b32.xlu1 %v8758_v52, %s7598_s11 }
 0x3b1   : > { %v2471_v59 = vld [vmem:[#allocation3 + $0x12b] sm:$0xff]  ;;  %v2117_v61 = vadd.f32 %v2040_v35, %v1957_v58 }
 0x3b2   : > { %v2631_v6 = vadd.f32 %v2555_v29, %v2471_v59  ;;  %v8779_v0 = vpop.permute.xlu0 %3320  ;;  %v3067_v1 = vpop.permute.xlu1 %3066 }
 0x3b3   : > { %2149 = vst.msk [vmem:[#allocation3 + $0x138] sm:$0xff] %vm948_vm1, %v2117_v61 }
 0x3b4   : > { %2663 = vst.msk [vmem:[#allocation3 + $0x12b] sm:$0xff] %vm948_vm1, %v2631_v6  ;;  %v1958_v3 = vld [vmem:[#allocation3 + $0x140] sm:$0xff]  ;;  %2312 = vrot.lane.b32.xlu0 %v8751_v44, %s7600_s18  ;;  %2057 = vrot.lane.b32.xlu1 %v8758_v52, %s7599_s12  ;;  %v1193_v6 = vld [vmem:[#allocation3 + $0x16b] sm:$0xff] }
 0x3b5   : > { %v2118_v7 = vadd.f32 %v2042_v42, %v1958_v3  ;;  %v8816_v42 = vld [vmem:[#allocation2 + $0x1d0] sm:$0xff] }
 0x3b6   : > { %v2726_v37 = vld [vmem:[#allocation3 + $0x122] sm:$0xff]  ;;  %v1276_v9 = vpop.permute.xlu0 %1275  ;;  %v8787_v27 = vpop.permute.xlu1 %3322 }
 0x3b7   : > { %2150 = vst.msk [vmem:[#allocation3 + $0x140] sm:$0xff] %vm948_vm1, %v2118_v7  ;;  %v2886_v2 = vadd.f32 %v2809_v55, %v2726_v37  ;;  %v1351_v11 = vadd.f32 %v1276_v9, %v1191_v8 }
 0x3b8   : > { %2568 = vrot.lane.b32.xlu0 %v8751_v44, %s7601_s19  ;;  %2314 = vrot.lane.b32.xlu1 %v8758_v52, %s7600_s18 }
 0x3b9   : > { %2918 = vst.msk [vmem:[#allocation3 + $0x122] sm:$0xff] %vm948_vm1, %v2886_v2  ;;  %1383 = vst.msk [vmem:[#allocation3 + $0x153] sm:$0xff] %vm948_vm1, %v1351_v11 }
 0x3ba   : > { %v1532_v25 = vpop.permute.xlu0 %1531  ;;  %v1278_v17 = vpop.permute.xlu1 %1277 }
 0x3bb   : > { %v2727_v24 = vld [vmem:[#allocation3 + $0x12a] sm:$0xff]  ;;  %v1352_v19 = vadd.f32 %v1278_v17, %v1192_v14 }
 0x3bc   : > { %v2887_v22 = vadd.f32 %v2811_v40, %v2727_v24  ;;  %2824 = vrot.lane.b32.xlu0 %v8751_v44, %s7602_s22  ;;  %2570 = vrot.lane.b32.xlu1 %v8758_v52, %s7601_s19 }
 0x3bd   : > { %1384 = vst.msk [vmem:[#allocation3 + $0x15b] sm:$0xff] %vm948_vm1, %v1352_v19 }
 0x3be   : > { %2919 = vst.msk [vmem:[#allocation3 + $0x12a] sm:$0xff] %vm948_vm1, %v2887_v22  ;;  %v1788_v23 = vpop.permute.xlu0 %1787  ;;  %v1534_v60 = vpop.permute.xlu1 %1533  ;;  %v2216_v5 = vld [vmem:[#allocation3 + $0x13c] sm:$0xff]  ;;  %v2217_v47 = vld [vmem:[#allocation3 + $0x144] sm:$0xff] }
 0x3c0   : > { %v2982_v4 = vld [vmem:[#allocation3 + $0x121] sm:$0xff]  ;;  %v1447_v28 = vld [vmem:[#allocation3 + $0x152] sm:$0xff]  ;;  %3080 = vrot.lane.b32.xlu0 %v8751_v44, %s7603_s23  ;;  %2826 = vrot.lane.b32.xlu1 %v8758_v52, %s7602_s22 }
 0x3c1   : > { %v3142_v13 = vadd.f32 %v3065_v15, %v2982_v4  ;;  %v1607_v30 = vadd.f32 %v1532_v25, %v1447_v28 }
 0x3c2   : > { %v2044_v33 = vpop.permute.xlu0 %2043  ;;  %v1790_v18 = vpop.permute.xlu1 %1789 }
 0x3c3   : > { %3174 = vst.msk [vmem:[#allocation3 + $0x121] sm:$0xff] %vm948_vm1, %v3142_v13  ;;  %1639 = vst.msk [vmem:[#allocation3 + $0x152] sm:$0xff] %vm948_vm1, %v1607_v30  ;;  %v8865_v30 = vld [vmem:[#allocation2 + $0x1e0] sm:$0xff] }
 0x3c4   : > { %v1448_v12 = vld [vmem:[#allocation3 + $0x15a] sm:$0xff]  ;;  %3082 = vrot.lane.b32.xlu1 %v8758_v52, %s7603_s23  ;;  %1291 = vrot.lane.b32.xlu0 %v8808_v34, %s7596_s28 }
 0x3c5   : > { %v2983_v35 = vld [vmem:[#allocation3 + $0x129] sm:$0xff]  ;;  %v1608_v26 = vadd.f32 %v1534_v60, %v1448_v12 }
 0x3c6   : > { %v3143_v10 = vadd.f32 %v3067_v1, %v2983_v35  ;;  %v2301_v38 = vpop.permute.xlu0 %2300  ;;  %v2046_v39 = vpop.permute.xlu1 %2045 }
 0x3c7   : > { %1640 = vst.msk [vmem:[#allocation3 + $0x15a] sm:$0xff] %vm948_vm1, %v1608_v26  ;;  %v2376_v41 = vadd.f32 %v2301_v38, %v2216_v5 }
 0x3c8   : > { %3175 = vst.msk [vmem:[#allocation3 + $0x129] sm:$0xff] %vm948_vm1, %v3143_v10  ;;  %1547 = vrot.lane.b32.xlu0 %v8808_v34, %s7597_s10  ;;  %1293 = vrot.lane.b32.xlu1 %v8816_v42, %s7596_s28 }
 0x3c9   : > { %2408 = vst.msk [vmem:[#allocation3 + $0x13c] sm:$0xff] %vm948_vm1, %v2376_v41 }
 0x3ca   : > { %v3238_v43 = vld [vmem:[#allocation3 + $0x120] sm:$0xff]  ;;  %v1703_v45 = vld [vmem:[#allocation3 + $0x151] sm:$0xff]  ;;  %v2557_v46 = vpop.permute.xlu0 %2556  ;;  %v2303_v48 = vpop.permute.xlu1 %2302 }
 0x3cb   : > { %v3398_v49 = vadd.f32 %v8779_v0, %v3238_v43  ;;  %v1863_v50 = vadd.f32 %v1788_v23, %v1703_v45  ;;  %v2377_v51 = vadd.f32 %v2303_v48, %v2217_v47  ;;  %v8879_v48 = vld [vmem:[#allocation2 + $0x1f0] sm:$0xff] }
 0x3cc   : > { %1803 = vrot.lane.b32.xlu0 %v8808_v34, %s7598_s11  ;;  %1549 = vrot.lane.b32.xlu1 %v8816_v42, %s7597_s10 }
 0x3cd   : > { %3430 = vst.msk [vmem:[#allocation3 + $0x120] sm:$0xff] %vm948_vm1, %v3398_v49  ;;  %1895 = vst.msk [vmem:[#allocation3 + $0x151] sm:$0xff] %vm948_vm1, %v1863_v50 }
 0x3ce   : > { %2409 = vst.msk [vmem:[#allocation3 + $0x144] sm:$0xff] %vm948_vm1, %v2377_v51  ;;  %v1704_v53 = vld [vmem:[#allocation3 + $0x159] sm:$0xff]  ;;  %v2813_v54 = vpop.permute.xlu0 %2812  ;;  %v2559_v55 = vpop.permute.xlu1 %2558 }
 0x3cf   : > { %v3239_v36 = vld [vmem:[#allocation3 + $0x128] sm:$0xff]  ;;  %v1864_v20 = vadd.f32 %v1790_v18, %v1704_v53 }
 0x3d0   : > { %v3399_v29 = vadd.f32 %v8787_v27, %v3239_v36  ;;  %v2472_v56 = vld [vmem:[#allocation3 + $0x13b] sm:$0xff]  ;;  %2059 = vrot.lane.b32.xlu0 %v8808_v34, %s7599_s12  ;;  %1805 = vrot.lane.b32.xlu1 %v8816_v42, %s7598_s11  ;;  %v1194_v27 = vld [vmem:[#allocation3 + $0x173] sm:$0xff] }
 0x3d1   : > { %1896 = vst.msk [vmem:[#allocation3 + $0x159] sm:$0xff] %vm948_vm1, %v1864_v20  ;;  %v2632_v62 = vadd.f32 %v2557_v46, %v2472_v56 }
 0x3d2   : > { %3431 = vst.msk [vmem:[#allocation3 + $0x128] sm:$0xff] %vm948_vm1, %v3399_v29  ;;  %v3069_v57 = vpop.permute.xlu0 %3068  ;;  %v2815_v15 = vpop.permute.xlu1 %2814 }
 0x3d3   : > { %2664 = vst.msk [vmem:[#allocation3 + $0x13b] sm:$0xff] %vm948_vm1, %v2632_v62 }
 0x3d4   : > { %v1959_v40 = vld [vmem:[#allocation3 + $0x150] sm:$0xff]  ;;  %2316 = vrot.lane.b32.xlu0 %v8808_v34, %s7600_s18  ;;  %2061 = vrot.lane.b32.xlu1 %v8816_v42, %s7599_s12 }
 0x3d5   : > { %v2473_v58 = vld [vmem:[#allocation3 + $0x143] sm:$0xff]  ;;  %v2119_v59 = vadd.f32 %v2044_v33, %v1959_v40 }
 0x3d6   : > { %v2633_v61 = vadd.f32 %v2559_v55, %v2473_v58  ;;  %v1280_v0 = vpop.permute.xlu0 %1279  ;;  %v3071_v1 = vpop.permute.xlu1 %3070 }
 0x3d7   : > { %2151 = vst.msk [vmem:[#allocation3 + $0x150] sm:$0xff] %vm948_vm1, %v2119_v59  ;;  %v1353_v3 = vadd.f32 %v1280_v0, %v1193_v6 }
 0x3d8   : > { %2665 = vst.msk [vmem:[#allocation3 + $0x143] sm:$0xff] %vm948_vm1, %v2633_v61  ;;  %v1960_v7 = vld [vmem:[#allocation3 + $0x158] sm:$0xff]  ;;  %2572 = vrot.lane.b32.xlu0 %v8808_v34, %s7601_s19  ;;  %2318 = vrot.lane.b32.xlu1 %v8816_v42, %s7600_s18 }
 0x3d9   : > { %v2120_v37 = vadd.f32 %v2046_v39, %v1960_v7  ;;  %1385 = vst.msk [vmem:[#allocation3 + $0x16b] sm:$0xff] %vm948_vm1, %v1353_v3 }
 0x3da   : > { %v2728_v8 = vld [vmem:[#allocation3 + $0x13a] sm:$0xff]  ;;  %v1536_v9 = vpop.permute.xlu0 %1535  ;;  %v1282_v2 = vpop.permute.xlu1 %1281 }
 0x3db   : > { %2152 = vst.msk [vmem:[#allocation3 + $0x158] sm:$0xff] %vm948_vm1, %v2120_v37  ;;  %v2888_v11 = vadd.f32 %v2813_v54, %v2728_v8  ;;  %v1354_v24 = vadd.f32 %v1282_v2, %v1194_v27 }
 0x3dc   : > { %2828 = vrot.lane.b32.xlu0 %v8808_v34, %s7602_s22  ;;  %2574 = vrot.lane.b32.xlu1 %v8816_v42, %s7601_s19 }
 0x3dd   : > { %2920 = vst.msk [vmem:[#allocation3 + $0x13a] sm:$0xff] %vm948_vm1, %v2888_v11  ;;  %1386 = vst.msk [vmem:[#allocation3 + $0x173] sm:$0xff] %vm948_vm1, %v1354_v24 }
 0x3de   : > { %v1792_v14 = vpop.permute.xlu0 %1791  ;;  %v1538_v17 = vpop.permute.xlu1 %1537 }
 0x3df   : > { %v2729_v25 = vld [vmem:[#allocation3 + $0x142] sm:$0xff] }
 0x3e0   : > { %v2889_v22 = vadd.f32 %v2815_v15, %v2729_v25  ;;  %v1449_v19 = vld [vmem:[#allocation3 + $0x16a] sm:$0xff]  ;;  %3084 = vrot.lane.b32.xlu0 %v8808_v34, %s7603_s23  ;;  %2830 = vrot.lane.b32.xlu1 %v8816_v42, %s7602_s22 }
 0x3e1   : > { %v1609_v23 = vadd.f32 %v1536_v9, %v1449_v19 }
 0x3e2   : > { %2921 = vst.msk [vmem:[#allocation3 + $0x142] sm:$0xff] %vm948_vm1, %v2889_v22  ;;  %v2048_v60 = vpop.permute.xlu0 %2047  ;;  %v1794_v4 = vpop.permute.xlu1 %1793  ;;  %v2218_v12 = vld [vmem:[#allocation3 + $0x154] sm:$0xff]  ;;  %v2219_v43 = vld [vmem:[#allocation3 + $0x15c] sm:$0xff] }
 0x3e3   : > { %1641 = vst.msk [vmem:[#allocation3 + $0x16a] sm:$0xff] %vm948_vm1, %v1609_v23 }
 0x3e4   : > { %v2984_v28 = vld [vmem:[#allocation3 + $0x139] sm:$0xff]  ;;  %3086 = vrot.lane.b32.xlu1 %v8816_v42, %s7603_s23  ;;  %1295 = vrot.lane.b32.xlu0 %v8865_v30, %s7596_s28 }
 0x3e5   : > { %v1450_v13 = vld [vmem:[#allocation3 + $0x172] sm:$0xff]  ;;  %v3144_v33 = vadd.f32 %v3069_v57, %v2984_v28  ;;  %v1195_v57 = vld [vmem:[#allocation3 + $0x183] sm:$0xff] }
 0x3e6   : > { %v1610_v18 = vadd.f32 %v1538_v17, %v1450_v13  ;;  %v2305_v35 = vpop.permute.xlu0 %2304  ;;  %v2050_v10 = vpop.permute.xlu1 %2049  ;;  %v8915_v17 = vld [vmem:[#allocation2 + $0x140] sm:$0xff] }
 0x3e7   : > { %3176 = vst.msk [vmem:[#allocation3 + $0x139] sm:$0xff] %vm948_vm1, %v3144_v33  ;;  %v2378_v26 = vadd.f32 %v2305_v35, %v2218_v12 }
 0x3e8   : > { %1642 = vst.msk [vmem:[#allocation3 + $0x172] sm:$0xff] %vm948_vm1, %v1610_v18  ;;  %3326 = vrot.lane.b32.xlu1 %v8599_v31, %s7604_s24  ;;  %1551 = vrot.lane.b32.xlu0 %v8865_v30, %s7597_s10 }
 0x3e9   : > { %v2985_v38 = vld [vmem:[#allocation3 + $0x141] sm:$0xff]  ;;  %2410 = vst.msk [vmem:[#allocation3 + $0x154] sm:$0xff] %vm948_vm1, %v2378_v26 }
 0x3ea   : > { %v3145_v5 = vadd.f32 %v3071_v1, %v2985_v38  ;;  %v1705_v39 = vld [vmem:[#allocation3 + $0x169] sm:$0xff]  ;;  %v2561_v41 = vpop.permute.xlu0 %2560  ;;  %v2307_v45 = vpop.permute.xlu1 %2306 }
 0x3eb   : > { %v1865_v46 = vadd.f32 %v1792_v14, %v1705_v39  ;;  %v2379_v47 = vadd.f32 %v2307_v45, %v2219_v43  ;;  %v1196_v1 = vld [vmem:[#allocation3 + $0x18b] sm:$0xff] }
 0x3ec   : > { %3177 = vst.msk [vmem:[#allocation3 + $0x141] sm:$0xff] %vm948_vm1, %v3145_v5  ;;  %1807 = vrot.lane.b32.xlu0 %v8865_v30, %s7598_s11  ;;  %1297 = vrot.lane.b32.xlu1 %v8879_v48, %s7596_s28 }
 0x3ed   : > { %1897 = vst.msk [vmem:[#allocation3 + $0x169] sm:$0xff] %vm948_vm1, %v1865_v46  ;;  %2411 = vst.msk [vmem:[#allocation3 + $0x15c] sm:$0xff] %vm948_vm1, %v2379_v47 }
 0x3ee   : > { %v2817_v49 = vpop.permute.xlu0 %2816  ;;  %v2563_v50 = vpop.permute.xlu1 %2562 }
 0x3ef   : > { %v1706_v31 = vld [vmem:[#allocation3 + $0x171] sm:$0xff] }
 0x3f0   : > { %v1866_v51 = vadd.f32 %v1794_v4, %v1706_v31  ;;  %v2474_v36 = vld [vmem:[#allocation3 + $0x153] sm:$0xff]  ;;  %2063 = vrot.lane.b32.xlu0 %v8865_v30, %s7599_s12  ;;  %1553 = vrot.lane.b32.xlu1 %v8879_v48, %s7597_s10 }
 0x3f1   : > { %v2634_v53 = vadd.f32 %v2561_v41, %v2474_v36 }
 0x3f2   : > { %1898 = vst.msk [vmem:[#allocation3 + $0x171] sm:$0xff] %vm948_vm1, %v1866_v51  ;;  %v3073_v54 = vpop.permute.xlu0 %3072  ;;  %v2819_v55 = vpop.permute.xlu1 %2818  ;;  %v1197_v51 = vld [vmem:[#allocation3 + $0x19b] sm:$0xff] }
 0x3f3   : > { %2666 = vst.msk [vmem:[#allocation3 + $0x153] sm:$0xff] %vm948_vm1, %v2634_v53 }
 0x3f4   : > { %v1961_v29 = vld [vmem:[#allocation3 + $0x168] sm:$0xff]  ;;  %v2475_v20 = vld [vmem:[#allocation3 + $0x15b] sm:$0xff]  ;;  %2320 = vrot.lane.b32.xlu0 %v8865_v30, %s7600_s18  ;;  %1809 = vrot.lane.b32.xlu1 %v8879_v48, %s7598_s11 }
 0x3f5   : > { %v2121_v56 = vadd.f32 %v2048_v60, %v1961_v29  ;;  %v2635_v62 = vadd.f32 %v2563_v50, %v2475_v20  ;;  %v1198_v20 = vld [vmem:[#allocation3 + $0x1a3] sm:$0xff] }
 0x3f6   : > { %v1284_v15 = vpop.permute.xlu0 %1283  ;;  %v3075_v40 = vpop.permute.xlu1 %3074 }
 0x3f7   : > { %2153 = vst.msk [vmem:[#allocation3 + $0x168] sm:$0xff] %vm948_vm1, %v2121_v56  ;;  %2667 = vst.msk [vmem:[#allocation3 + $0x15b] sm:$0xff] %vm948_vm1, %v2635_v62  ;;  %v1355_v58 = vadd.f32 %v1284_v15, %v1195_v57  ;;  %v8953_v15 = vld [vmem:[#allocation2] sm:$0xff] }
 0x3f8   : > { %2576 = vrot.lane.b32.xlu0 %v8865_v30, %s7601_s19  ;;  %2065 = vrot.lane.b32.xlu1 %v8879_v48, %s7599_s12 }
 0x3f9   : > { %v1962_v59 = vld [vmem:[#allocation3 + $0x170] sm:$0xff]  ;;  %1387 = vst.msk [vmem:[#allocation3 + $0x183] sm:$0xff] %vm948_vm1, %v1355_v58 }
 0x3fa   : > { %v2122_v61 = vadd.f32 %v2050_v10, %v1962_v59  ;;  %v2730_v6 = vld [vmem:[#allocation3 + $0x152] sm:$0xff]  ;;  %v1540_v0 = vpop.permute.xlu0 %1539  ;;  %v1286_v3 = vpop.permute.xlu1 %1285 }
 0x3fb   : > { %v2890_v7 = vadd.f32 %v2817_v49, %v2730_v6  ;;  %v1356_v37 = vadd.f32 %v1286_v3, %v1196_v1  ;;  %v8961_v6 = vld [vmem:[#allocation2 + $0x20] sm:$0xff] }
 0x3fc   : > { %2154 = vst.msk [vmem:[#allocation3 + $0x170] sm:$0xff] %vm948_vm1, %v2122_v61  ;;  %2832 = vrot.lane.b32.xlu0 %v8865_v30, %s7602_s22  ;;  %2322 = vrot.lane.b32.xlu1 %v8879_v48, %s7600_s18 }
 0x3fd   : > { %2922 = vst.msk [vmem:[#allocation3 + $0x152] sm:$0xff] %vm948_vm1, %v2890_v7  ;;  %1388 = vst.msk [vmem:[#allocation3 + $0x18b] sm:$0xff] %vm948_vm1, %v1356_v37 }
 0x3fe   : > { %v2731_v8 = vld [vmem:[#allocation3 + $0x15a] sm:$0xff]  ;;  %v1796_v9 = vpop.permute.xlu0 %1795  ;;  %v1542_v27 = vpop.permute.xlu1 %1541 }
 0x3ff   : > { %v2891_v2 = vadd.f32 %v2819_v55, %v2731_v8  ;;  %v8971_v8 = vld [vmem:[#allocation2 + $0x40] sm:$0xff] }
 0x400   : > { %v1451_v11 = vld [vmem:[#allocation3 + $0x182] sm:$0xff]  ;;  %3088 = vrot.lane.b32.xlu0 %v8865_v30, %s7603_s23  ;;  %2578 = vrot.lane.b32.xlu1 %v8879_v48, %s7601_s19 }
 0x401   : > { %2923 = vst.msk [vmem:[#allocation3 + $0x15a] sm:$0xff] %vm948_vm1, %v2891_v2  ;;  %v1611_v24 = vadd.f32 %v1540_v0, %v1451_v11  ;;  %v8963_v0 = vld [vmem:[#allocation2 + $0x10] sm:$0xff] }
 0x402   : > { %v2052_v25 = vpop.permute.xlu0 %2051  ;;  %v1798_v14 = vpop.permute.xlu1 %1797 }
 0x403   : > { %1643 = vst.msk [vmem:[#allocation3 + $0x182] sm:$0xff] %vm948_vm1, %v1611_v24  ;;  %v2220_v28 = vld [vmem:[#allocation3 + $0x16c] sm:$0xff]  ;;  %v2221_v26 = vld [vmem:[#allocation3 + $0x174] sm:$0xff] }
 0x404   : > { %v2986_v22 = vld [vmem:[#allocation3 + $0x151] sm:$0xff]  ;;  %3324 = vrot.lane.b32.xlu0 %v8915_v17, %s7604_s24  ;;  %2834 = vrot.lane.b32.xlu1 %v8879_v48, %s7602_s22 }
 0x405   : > { %v1452_v19 = vld [vmem:[#allocation3 + $0x18a] sm:$0xff]  ;;  %v3146_v23 = vadd.f32 %v3073_v54, %v2986_v22 }
 0x406   : > { %v1612_v60 = vadd.f32 %v1542_v27, %v1452_v19  ;;  %v2309_v4 = vpop.permute.xlu0 %2308  ;;  %v2054_v13 = vpop.permute.xlu1 %2053 }
 0x407   : > { %3178 = vst.msk [vmem:[#allocation3 + $0x151] sm:$0xff] %vm948_vm1, %v3146_v23  ;;  %v2380_v33 = vadd.f32 %v2309_v4, %v2220_v28  ;;  %v8981_v23 = vld [vmem:[#allocation2 + $0x60] sm:$0xff] }
 0x408   : > { %1644 = vst.msk [vmem:[#allocation3 + $0x18a] sm:$0xff] %vm948_vm1, %v1612_v60  ;;  %v2987_v18 = vld [vmem:[#allocation3 + $0x159] sm:$0xff]  ;;  %3328 = vrot.lane.b32.xlu0 %v8642_v63, %s7604_s24  ;;  %3090 = vrot.lane.b32.xlu1 %v8879_v48, %s7603_s23  ;;  %v8983_v60 = vld [vmem:[#allocation2 + $0x50] sm:$0xff] }
 0x409   : > { %v3147_v35 = vadd.f32 %v3075_v40, %v2987_v18  ;;  %2412 = vst.msk [vmem:[#allocation3 + $0x16c] sm:$0xff] %vm948_vm1, %v2380_v33 }
 0x40a   : > { %v1707_v12 = vld [vmem:[#allocation3 + $0x181] sm:$0xff]  ;;  %v2565_v10 = vpop.permute.xlu0 %2564  ;;  %v2311_v38 = vpop.permute.xlu1 %2310 }
 0x40b   : > { %3179 = vst.msk [vmem:[#allocation3 + $0x159] sm:$0xff] %vm948_vm1, %v3147_v35  ;;  %v1867_v5 = vadd.f32 %v1796_v9, %v1707_v12  ;;  %v2381_v39 = vadd.f32 %v2311_v38, %v2221_v26  ;;  %v8973_v9 = vld [vmem:[#allocation2 + $0x30] sm:$0xff]  ;;  %v8991_v26 = vld [vmem:[#allocation2 + $0x80] sm:$0xff] }
 0x40c   : > { %3332 = vrot.lane.b32.xlu0 %v8695_v32, %s7604_s24  ;;  %3330 = vrot.lane.b32.xlu1 %v8651_v21, %s7604_s24  ;;  %v8993_v38 = vld [vmem:[#allocation2 + $0x70] sm:$0xff] }
 0x40d   : > { %1899 = vst.msk [vmem:[#allocation3 + $0x181] sm:$0xff] %vm948_vm1, %v1867_v5  ;;  %2413 = vst.msk [vmem:[#allocation3 + $0x174] sm:$0xff] %vm948_vm1, %v2381_v39 }
 0x40e   : > { %v2821_v41 = vpop.permute.xlu0 %2820  ;;  %v2567_v43 = vpop.permute.xlu1 %2566 }
 0x40f   : > { %v1708_v63 = vld [vmem:[#allocation3 + $0x189] sm:$0xff] }
 0x410   : > { %v1868_v45 = vadd.f32 %v1798_v14, %v1708_v63  ;;  %v2476_v46 = vld [vmem:[#allocation3 + $0x16b] sm:$0xff]  ;;  %3336 = vrot.lane.b32.xlu0 %v8751_v44, %s7604_s24  ;;  %3334 = vrot.lane.b32.xlu1 %v8705_v16, %s7604_s24 }
 0x411   : > { %v2636_v32 = vadd.f32 %v2565_v10, %v2476_v46 }
 0x412   : > { %1900 = vst.msk [vmem:[#allocation3 + $0x189] sm:$0xff] %vm948_vm1, %v1868_v45  ;;  %v3077_v47 = vpop.permute.xlu0 %3076  ;;  %v2823_v21 = vpop.permute.xlu1 %2822  ;;  %v9003_v45 = vld [vmem:[#allocation2 + $0x90] sm:$0xff] }
 0x413   : > { %2668 = vst.msk [vmem:[#allocation3 + $0x16b] sm:$0xff] %vm948_vm1, %v2636_v32 }
 0x414   : > { %v1963_v31 = vld [vmem:[#allocation3 + $0x180] sm:$0xff]  ;;  %v2477_v49 = vld [vmem:[#allocation3 + $0x173] sm:$0xff]  ;;  %3340 = vrot.lane.b32.xlu0 %v8808_v34, %s7604_s24  ;;  %3338 = vrot.lane.b32.xlu1 %v8758_v52, %s7604_s24 }
 0x415   : > { %v2123_v50 = vadd.f32 %v2052_v25, %v1963_v31  ;;  %v2637_v44 = vadd.f32 %v2567_v43, %v2477_v49  ;;  %v9001_v43 = vld [vmem:[#allocation2 + $0xa0] sm:$0xff]  ;;  %v9013_v49 = vld [vmem:[#allocation2 + $0xb0] sm:$0xff] }
 0x416   : > { %v1288_v36 = vpop.permute.xlu0 %1287  ;;  %v3079_v16 = vpop.permute.xlu1 %3078  ;;  %v9011_v31 = vld [vmem:[#allocation2 + $0xc0] sm:$0xff] }
 0x417   : > { %2155 = vst.msk [vmem:[#allocation3 + $0x180] sm:$0xff] %vm948_vm1, %v2123_v50  ;;  %2669 = vst.msk [vmem:[#allocation3 + $0x173] sm:$0xff] %vm948_vm1, %v2637_v44  ;;  %v1357_v53 = vadd.f32 %v1288_v36, %v1197_v51 }
 0x418   : > { %3344 = vrot.lane.b32.xlu0 %v8865_v30, %s7604_s24  ;;  %3342 = vrot.lane.b32.xlu1 %v8816_v42, %s7604_s24 }
 0x419   : > { %v1964_v54 = vld [vmem:[#allocation3 + $0x188] sm:$0xff]  ;;  %1389 = vst.msk [vmem:[#allocation3 + $0x19b] sm:$0xff] %vm948_vm1, %v1357_v53 }
 0x41a   : > { %v2124_v55 = vadd.f32 %v2054_v13, %v1964_v54  ;;  %v2732_v52 = vld [vmem:[#allocation3 + $0x16a] sm:$0xff]  ;;  %v1544_v29 = vpop.permute.xlu0 %1543  ;;  %v1290_v56 = vpop.permute.xlu1 %1289  ;;  %v1199_v54 = vld [vmem:[#allocation3 + $0x1b3] sm:$0xff] }
 0x41b   : > { %v2892_v62 = vadd.f32 %v2821_v41, %v2732_v52  ;;  %v1358_v57 = vadd.f32 %v1290_v56, %v1198_v20  ;;  %v9021_v52 = vld [vmem:[#allocation2 + $0xe0] sm:$0xff] }
 0x41c   : > { %2156 = vst.msk [vmem:[#allocation3 + $0x188] sm:$0xff] %vm948_vm1, %v2124_v55  ;;  %3541 = vrot.lane.b32.xlu0 %v8953_v15, %s7605_s25  ;;  %3346 = vrot.lane.b32.xlu1 %v8879_v48, %s7604_s24 }
 0x41d   : > { %2924 = vst.msk [vmem:[#allocation3 + $0x16a] sm:$0xff] %vm948_vm1, %v2892_v62  ;;  %1390 = vst.msk [vmem:[#allocation3 + $0x1a3] sm:$0xff] %vm948_vm1, %v1358_v57 }
 0x41e   : > { %v2733_v40 = vld [vmem:[#allocation3 + $0x172] sm:$0xff]  ;;  %v1800_v58 = vpop.permute.xlu0 %1799  ;;  %v1546_v59 = vpop.permute.xlu1 %1545 }
 0x41f   : > { %v2893_v61 = vadd.f32 %v2823_v21, %v2733_v40 }
 0x420   : > { %v1453_v1 = vld [vmem:[#allocation3 + $0x19a] sm:$0xff]  ;;  %3545 = vrot.lane.b32.xlu0 %v8961_v6, %s7605_s25  ;;  %3543 = vrot.lane.b32.xlu1 %v8963_v0, %s7605_s25 }
 0x421   : > { %2925 = vst.msk [vmem:[#allocation3 + $0x172] sm:$0xff] %vm948_vm1, %v2893_v61  ;;  %v1613_v3 = vadd.f32 %v1544_v29, %v1453_v1  ;;  %v9023_v29 = vld [vmem:[#allocation2 + $0xd0] sm:$0xff]  ;;  %v9031_v1 = vld [vmem:[#allocation2 + $0x100] sm:$0xff] }
 0x422   : > { %v2056_v7 = vpop.permute.xlu0 %2055  ;;  %v1802_v37 = vpop.permute.xlu1 %1801 }
 0x423   : > { %1645 = vst.msk [vmem:[#allocation3 + $0x19a] sm:$0xff] %vm948_vm1, %v1613_v3  ;;  %v2222_v14 = vld [vmem:[#allocation3 + $0x184] sm:$0xff]  ;;  %v2223_v18 = vld [vmem:[#allocation3 + $0x18c] sm:$0xff] }
 0x424   : > { %v2988_v27 = vld [vmem:[#allocation3 + $0x169] sm:$0xff]  ;;  %3549 = vrot.lane.b32.xlu0 %v8971_v8, %s7605_s25  ;;  %3547 = vrot.lane.b32.xlu1 %v8973_v9, %s7605_s25 }
 0x425   : > { %v1454_v2 = vld [vmem:[#allocation3 + $0x1a2] sm:$0xff]  ;;  %v3148_v11 = vadd.f32 %v3077_v47, %v2988_v27  ;;  %v9033_v3 = vld [vmem:[#allocation2 + $0xf0] sm:$0xff] }
 0x426   : > { %v1614_v24 = vadd.f32 %v1546_v59, %v1454_v2  ;;  %v2313_v25 = vpop.permute.xlu0 %2312  ;;  %v2058_v22 = vpop.permute.xlu1 %2057 }
 0x427   : > { %3180 = vst.msk [vmem:[#allocation3 + $0x169] sm:$0xff] %vm948_vm1, %v3148_v11  ;;  %v2382_v19 = vadd.f32 %v2313_v25, %v2222_v14  ;;  %v9041_v11 = vld [vmem:[#allocation2 + $0x120] sm:$0xff] }
 0x428   : > { %1646 = vst.msk [vmem:[#allocation3 + $0x1a2] sm:$0xff] %vm948_vm1, %v1614_v24  ;;  %v2989_v4 = vld [vmem:[#allocation3 + $0x171] sm:$0xff]  ;;  %3553 = vrot.lane.b32.xlu0 %v8981_v23, %s7605_s25  ;;  %3551 = vrot.lane.b32.xlu1 %v8983_v60, %s7605_s25 }
 0x429   : > { %v3149_v28 = vadd.f32 %v3079_v16, %v2989_v4  ;;  %2414 = vst.msk [vmem:[#allocation3 + $0x184] sm:$0xff] %vm948_vm1, %v2382_v19  ;;  %v9043_v24 = vld [vmem:[#allocation2 + $0x110] sm:$0xff] }
 0x42a   : > { %v1709_v13 = vld [vmem:[#allocation3 + $0x199] sm:$0xff]  ;;  %v2569_v33 = vpop.permute.xlu0 %2568  ;;  %v2315_v35 = vpop.permute.xlu1 %2314  ;;  %v9051_v4 = vld [vmem:[#allocation2 + $0x130] sm:$0xff] }
 0x42b   : > { %3181 = vst.msk [vmem:[#allocation3 + $0x171] sm:$0xff] %vm948_vm1, %v3149_v28  ;;  %v1869_v12 = vadd.f32 %v1800_v58, %v1709_v13  ;;  %v2383_v10 = vadd.f32 %v2315_v35, %v2223_v18  ;;  %v1200_v58 = vld [vmem:[#allocation3 + $0x1bb] sm:$0xff] }
 0x42c   : > { %3557 = vrot.lane.b32.xlu0 %v8991_v26, %s7605_s25  ;;  %3555 = vrot.lane.b32.xlu1 %v8993_v38, %s7605_s25 }
 0x42d   : > { %1901 = vst.msk [vmem:[#allocation3 + $0x199] sm:$0xff] %vm948_vm1, %v1869_v12  ;;  %2415 = vst.msk [vmem:[#allocation3 + $0x18c] sm:$0xff] %vm948_vm1, %v2383_v10 }
 0x42e   : > { %v2825_v39 = vpop.permute.xlu0 %2824  ;;  %v2571_v63 = vpop.permute.xlu1 %2570 }
 0x42f   : > { %v1710_v5 = vld [vmem:[#allocation3 + $0x1a1] sm:$0xff] }
 0x430   : > { %v1870_v41 = vadd.f32 %v1802_v37, %v1710_v5  ;;  %v2478_v46 = vld [vmem:[#allocation3 + $0x183] sm:$0xff]  ;;  %3561 = vrot.lane.b32.xlu0 %v9001_v43, %s7605_s25  ;;  %3559 = vrot.lane.b32.xlu1 %v9003_v45, %s7605_s25 }
 0x431   : > { %v2638_v32 = vadd.f32 %v2569_v33, %v2478_v46 }
 0x432   : > { %1902 = vst.msk [vmem:[#allocation3 + $0x1a1] sm:$0xff] %vm948_vm1, %v1870_v41  ;;  %v3081_v47 = vpop.permute.xlu0 %3080  ;;  %v2827_v21 = vpop.permute.xlu1 %2826 }
 0x433   : > { %2670 = vst.msk [vmem:[#allocation3 + $0x183] sm:$0xff] %vm948_vm1, %v2638_v32 }
 0x434   : > { %v1965_v50 = vld [vmem:[#allocation3 + $0x198] sm:$0xff]  ;;  %v2479_v44 = vld [vmem:[#allocation3 + $0x18b] sm:$0xff]  ;;  %3565 = vrot.lane.b32.xlu0 %v9011_v31, %s7605_s25  ;;  %3563 = vrot.lane.b32.xlu1 %v9013_v49, %s7605_s25 }
 0x435   : > { %v2125_v51 = vadd.f32 %v2056_v7, %v1965_v50  ;;  %v2639_v36 = vadd.f32 %v2571_v63, %v2479_v44  ;;  %v9061_v63 = vld [vmem:[#allocation2 + $0x150] sm:$0xff] }
 0x436   : > { %v3083_v16 = vpop.permute.xlu1 %3082  ;;  %v1292_v53 = vpop.permute.xlu0 %1291 }
 0x437   : > { %2157 = vst.msk [vmem:[#allocation3 + $0x198] sm:$0xff] %vm948_vm1, %v2125_v51  ;;  %2671 = vst.msk [vmem:[#allocation3 + $0x18b] sm:$0xff] %vm948_vm1, %v2639_v36  ;;  %v1359_v55 = vadd.f32 %v1292_v53, %v1199_v54  ;;  %v9069_v36 = vld [vmem:[#allocation2 + $0x180] sm:$0xff]  ;;  %v9071_v53 = vld [vmem:[#allocation2 + $0x170] sm:$0xff] }
 0x438   : > { %3569 = vrot.lane.b32.xlu0 %v9021_v52, %s7605_s25  ;;  %3567 = vrot.lane.b32.xlu1 %v9023_v29, %s7605_s25 }
 0x439   : > { %v1966_v20 = vld [vmem:[#allocation3 + $0x1a0] sm:$0xff]  ;;  %1391 = vst.msk [vmem:[#allocation3 + $0x1b3] sm:$0xff] %vm948_vm1, %v1359_v55 }
 0x43a   : > { %v2126_v56 = vadd.f32 %v2058_v22, %v1966_v20  ;;  %v2734_v62 = vld [vmem:[#allocation3 + $0x182] sm:$0xff]  ;;  %v1548_v57 = vpop.permute.xlu0 %1547  ;;  %v1294_v40 = vpop.permute.xlu1 %1293 }
 0x43b   : > { %v2894_v59 = vadd.f32 %v2825_v39, %v2734_v62  ;;  %v1360_v61 = vadd.f32 %v1294_v40, %v1200_v58  ;;  %v9059_v39 = vld [vmem:[#allocation2 + $0x160] sm:$0xff]  ;;  %v9081_v62 = vld [vmem:[#allocation2 + $0x190] sm:$0xff] }
 0x43c   : > { %2158 = vst.msk [vmem:[#allocation3 + $0x1a0] sm:$0xff] %vm948_vm1, %v2126_v56  ;;  %3573 = vrot.lane.b32.xlu0 %v9031_v1, %s7605_s25  ;;  %3571 = vrot.lane.b32.xlu1 %v9033_v3, %s7605_s25  ;;  %v9079_v56 = vld [vmem:[#allocation2 + $0x1a0] sm:$0xff] }
 0x43d   : > { %2926 = vst.msk [vmem:[#allocation3 + $0x182] sm:$0xff] %vm948_vm1, %v2894_v59  ;;  %1392 = vst.msk [vmem:[#allocation3 + $0x1bb] sm:$0xff] %vm948_vm1, %v1360_v61  ;;  %v9089_v61 = vld [vmem:[#allocation2 + $0x1b0] sm:$0xff] }
 0x43e   : > { %v2735_v7 = vld [vmem:[#allocation3 + $0x18a] sm:$0xff]  ;;  %v1804_v37 = vpop.permute.xlu0 %1803  ;;  %v1550_v27 = vpop.permute.xlu1 %1549 }
 0x43f   : > { %v2895_v2 = vadd.f32 %v2827_v21, %v2735_v7 }
 0x440   : > { %v1455_v25 = vld [vmem:[#allocation3 + $0x1b2] sm:$0xff]  ;;  %3577 = vrot.lane.b32.xlu0 %v9041_v11, %s7605_s25  ;;  %3575 = vrot.lane.b32.xlu1 %v9043_v24, %s7605_s25 }
 0x441   : > { %2927 = vst.msk [vmem:[#allocation3 + $0x18a] sm:$0xff] %vm948_vm1, %v2895_v2  ;;  %v1615_v14 = vadd.f32 %v1548_v57, %v1455_v25 }
 0x442   : > { %v2060_v22 = vpop.permute.xlu0 %2059  ;;  %v1806_v19 = vpop.permute.xlu1 %1805 }
 0x443   : > { %1647 = vst.msk [vmem:[#allocation3 + $0x1b2] sm:$0xff] %vm948_vm1, %v1615_v14  ;;  %v2224_v35 = vld [vmem:[#allocation3 + $0x19c] sm:$0xff]  ;;  %v2225_v21 = vld [vmem:[#allocation3 + $0x1a4] sm:$0xff] }
 0x444   : > { %v2990_v28 = vld [vmem:[#allocation3 + $0x181] sm:$0xff]  ;;  %3581 = vrot.lane.b32.xlu0 %v8915_v17, %s7605_s25  ;;  %3579 = vrot.lane.b32.xlu1 %v9051_v4, %s7605_s25 }
 0x445   : > { %v1456_v13 = vld [vmem:[#allocation3 + $0x1ba] sm:$0xff]  ;;  %v3150_v33 = vadd.f32 %v3081_v47, %v2990_v28 }
 0x446   : > { %v1616_v18 = vadd.f32 %v1550_v27, %v1456_v13  ;;  %v2317_v12 = vpop.permute.xlu0 %2316  ;;  %v2062_v10 = vpop.permute.xlu1 %2061 }
 0x447   : > { %3182 = vst.msk [vmem:[#allocation3 + $0x181] sm:$0xff] %vm948_vm1, %v3150_v33  ;;  %v2384_v5 = vadd.f32 %v2317_v12, %v2224_v35  ;;  %v3241_v33 = vld [vmem:[#allocation3 + $0x140] sm:$0xff] }
 0x448   : > { %1648 = vst.msk [vmem:[#allocation3 + $0x1ba] sm:$0xff] %vm948_vm1, %v1616_v18  ;;  %v2991_v41 = vld [vmem:[#allocation3 + $0x189] sm:$0xff]  ;;  %3585 = vrot.lane.b32.xlu0 %v9059_v39, %s7605_s25  ;;  %3583 = vrot.lane.b32.xlu1 %v9061_v63, %s7605_s25 }
 0x449   : > { %v3151_v46 = vadd.f32 %v3083_v16, %v2991_v41  ;;  %2416 = vst.msk [vmem:[#allocation3 + $0x19c] sm:$0xff] %vm948_vm1, %v2384_v5  ;;  %v1202_v41 = vld [vmem:[#allocation3 + $0x1d3] sm:$0xff] }
 0x44a   : > { %v1711_v32 = vld [vmem:[#allocation3 + $0x1b1] sm:$0xff]  ;;  %v2573_v47 = vpop.permute.xlu0 %2572  ;;  %v2319_v50 = vpop.permute.xlu1 %2318 }
 0x44b   : > { %3183 = vst.msk [vmem:[#allocation3 + $0x189] sm:$0xff] %vm948_vm1, %v3151_v46  ;;  %v1871_v44 = vadd.f32 %v1804_v37, %v1711_v32  ;;  %v2385_v51 = vadd.f32 %v2319_v50, %v2225_v21 }
 0x44c   : > { %3589 = vrot.lane.b32.xlu0 %v9069_v36, %s7605_s25  ;;  %3587 = vrot.lane.b32.xlu1 %v9071_v53, %s7605_s25 }
 0x44d   : > { %1903 = vst.msk [vmem:[#allocation3 + $0x1b1] sm:$0xff] %vm948_vm1, %v1871_v44  ;;  %2417 = vst.msk [vmem:[#allocation3 + $0x1a4] sm:$0xff] %vm948_vm1, %v2385_v51 }
 0x44e   : > { %v2829_v54 = vpop.permute.xlu0 %2828  ;;  %v2575_v55 = vpop.permute.xlu1 %2574 }
 0x44f   : > { %v1712_v16 = vld [vmem:[#allocation3 + $0x1b9] sm:$0xff] }
 0x450   : > { %v1872_v20 = vadd.f32 %v1806_v19, %v1712_v16  ;;  %v2480_v57 = vld [vmem:[#allocation3 + $0x19b] sm:$0xff]  ;;  %3593 = vrot.lane.b32.xlu0 %v9079_v56, %s7605_s25  ;;  %3591 = vrot.lane.b32.xlu1 %v9081_v62, %s7605_s25  ;;  %v1201_v19 = vld [vmem:[#allocation3 + $0x1cb] sm:$0xff] }
 0x451   : > { %v2640_v40 = vadd.f32 %v2573_v47, %v2480_v57 }
 0x452   : > { %1904 = vst.msk [vmem:[#allocation3 + $0x1b9] sm:$0xff] %vm948_vm1, %v1872_v20  ;;  %v3085_v58 = vpop.permute.xlu0 %3084  ;;  %v2831_v59 = vpop.permute.xlu1 %2830 }
 0x453   : > { %2672 = vst.msk [vmem:[#allocation3 + $0x19b] sm:$0xff] %vm948_vm1, %v2640_v40 }
 0x454   : > { %v1967_v7 = vld [vmem:[#allocation3 + $0x1b0] sm:$0xff]  ;;  %v2481_v37 = vld [vmem:[#allocation3 + $0x1a3] sm:$0xff]  ;;  %3597 = vrot.lane.b32.xlu0 %v8808_v34, %s7605_s25  ;;  %3595 = vrot.lane.b32.xlu1 %v9089_v61, %s7605_s25 }
 0x455   : > { %v2127_v27 = vadd.f32 %v2060_v22, %v1967_v7  ;;  %v2641_v2 = vadd.f32 %v2575_v55, %v2481_v37 }
 0x456   : > { %v3087_v25 = vpop.permute.xlu1 %3086  ;;  %v1296_v14 = vpop.permute.xlu0 %1295 }
 0x457   : > { %2159 = vst.msk [vmem:[#allocation3 + $0x1b0] sm:$0xff] %vm948_vm1, %v2127_v27  ;;  %2673 = vst.msk [vmem:[#allocation3 + $0x1a3] sm:$0xff] %vm948_vm1, %v2641_v2  ;;  %v1361_v28 = vadd.f32 %v1296_v14, %v1201_v19 }
 0x458   : > { %3601 = vrot.lane.b32.xlu0 %v8865_v30, %s7605_s25  ;;  %3599 = vrot.lane.b32.xlu1 %v8816_v42, %s7605_s25 }
 0x459   : > { %v1968_v13 = vld [vmem:[#allocation3 + $0x1b8] sm:$0xff]  ;;  %1393 = vst.msk [vmem:[#allocation3 + $0x1cb] sm:$0xff] %vm948_vm1, %v1361_v28 }
 0x45a   : > { %v2128_v34 = vadd.f32 %v2062_v10, %v1968_v13  ;;  %v2736_v22 = vld [vmem:[#allocation3 + $0x19a] sm:$0xff]  ;;  %v3327_v18 = vpop.permute.xlu1 %3326  ;;  %v1552_v35 = vpop.permute.xlu0 %1551 }
 0x45b   : > { %v2896_v12 = vadd.f32 %v2829_v54, %v2736_v22  ;;  %v3401_v5 = vadd.f32 %v3327_v18, %v3241_v33 }
 0x45c   : > { %2160 = vst.msk [vmem:[#allocation3 + $0x1b8] sm:$0xff] %vm948_vm1, %v2128_v34  ;;  %3797 = vrot.lane.b32.xlu0 %v8953_v15, %s7606_s26  ;;  %3603 = vrot.lane.b32.xlu1 %v8879_v48, %s7605_s25 }
 0x45d   : > { %2928 = vst.msk [vmem:[#allocation3 + $0x19a] sm:$0xff] %vm948_vm1, %v2896_v12  ;;  %3433 = vst.msk [vmem:[#allocation3 + $0x140] sm:$0xff] %vm948_vm1, %v3401_v5 }
 0x45e   : > { %v2737_v42 = vld [vmem:[#allocation3 + $0x1a2] sm:$0xff]  ;;  %v1808_v30 = vpop.permute.xlu0 %1807  ;;  %v1298_v10 = vpop.permute.xlu1 %1297 }
 0x45f   : > { %v2897_v46 = vadd.f32 %v2831_v59, %v2737_v42  ;;  %v1362_v32 = vadd.f32 %v1298_v10, %v1202_v41  ;;  %v3240_v42 = vld [vmem:[#allocation3 + $0x138] sm:$0xff] }
 0x460   : > { %v1457_v47 = vld [vmem:[#allocation3 + $0x1ca] sm:$0xff]  ;;  %3801 = vrot.lane.b32.xlu0 %v8961_v6, %s7606_s26  ;;  %3799 = vrot.lane.b32.xlu1 %v8963_v0, %s7606_s26 }
 0x461   : > { %2929 = vst.msk [vmem:[#allocation3 + $0x1a2] sm:$0xff] %vm948_vm1, %v2897_v46  ;;  %v1617_v48 = vadd.f32 %v1552_v35, %v1457_v47  ;;  %1394 = vst.msk [vmem:[#allocation3 + $0x1d3] sm:$0xff] %vm948_vm1, %v1362_v32 }
 0x462   : > { %v2064_v21 = vpop.permute.xlu0 %2063  ;;  %v1554_v50 = vpop.permute.xlu1 %1553 }
 0x463   : > { %1649 = vst.msk [vmem:[#allocation3 + $0x1ca] sm:$0xff] %vm948_vm1, %v1617_v48  ;;  %v2226_v16 = vld [vmem:[#allocation3 + $0x1b4] sm:$0xff]  ;;  %v2227_v14 = vld [vmem:[#allocation3 + $0x1bc] sm:$0xff] }
 0x464   : > { %v2992_v44 = vld [vmem:[#allocation3 + $0x199] sm:$0xff]  ;;  %3805 = vrot.lane.b32.xlu0 %v8971_v8, %s7606_s26  ;;  %3803 = vrot.lane.b32.xlu1 %v8973_v9, %s7606_s26  ;;  %v3242_v48 = vld [vmem:[#allocation3 + $0x150] sm:$0xff] }
 0x465   : > { %v3152_v51 = vadd.f32 %v3085_v58, %v2992_v44 }
 0x466   : > { %v2321_v54 = vpop.permute.xlu0 %2320  ;;  %v1810_v55 = vpop.permute.xlu1 %1809 }
 0x467   : > { %3184 = vst.msk [vmem:[#allocation3 + $0x199] sm:$0xff] %vm948_vm1, %v3152_v51  ;;  %v2386_v20 = vadd.f32 %v2321_v54, %v2226_v16 }
 0x468   : > { %v2993_v57 = vld [vmem:[#allocation3 + $0x1a1] sm:$0xff]  ;;  %v1458_v40 = vld [vmem:[#allocation3 + $0x1d2] sm:$0xff]  ;;  %3809 = vrot.lane.b32.xlu0 %v8981_v23, %s7606_s26  ;;  %3807 = vrot.lane.b32.xlu1 %v8983_v60, %s7606_s26 }
 0x469   : > { %v3153_v59 = vadd.f32 %v3087_v25, %v2993_v57  ;;  %v1618_v7 = vadd.f32 %v1554_v50, %v1458_v40  ;;  %2418 = vst.msk [vmem:[#allocation3 + $0x1b4] sm:$0xff] %vm948_vm1, %v2386_v20  ;;  %v3243_v57 = vld [vmem:[#allocation3 + $0x158] sm:$0xff] }
 0x46a   : > { %v1713_v37 = vld [vmem:[#allocation3 + $0x1c9] sm:$0xff]  ;;  %v2577_v58 = vpop.permute.xlu0 %2576  ;;  %v2066_v27 = vpop.permute.xlu1 %2065 }
 0x46b   : > { %3185 = vst.msk [vmem:[#allocation3 + $0x1a1] sm:$0xff] %vm948_vm1, %v3153_v59  ;;  %v1873_v2 = vadd.f32 %v1808_v30, %v1713_v37  ;;  %1650 = vst.msk [vmem:[#allocation3 + $0x1d2] sm:$0xff] %vm948_vm1, %v1618_v7 }
 0x46c   : > { %3813 = vrot.lane.b32.xlu0 %v8991_v26, %s7606_s26  ;;  %3811 = vrot.lane.b32.xlu1 %v8993_v38, %s7606_s26 }
 0x46d   : > { %1905 = vst.msk [vmem:[#allocation3 + $0x1c9] sm:$0xff] %vm948_vm1, %v1873_v2  ;;  %v3245_v2 = vld [vmem:[#allocation3 + $0x170] sm:$0xff] }
 0x46e   : > { %v2833_v25 = vpop.permute.xlu0 %2832  ;;  %v2323_v19 = vpop.permute.xlu1 %2322 }
 0x46f   : > { %v2387_v28 = vadd.f32 %v2323_v19, %v2227_v14 }
 0x470   : > { %v2482_v13 = vld [vmem:[#allocation3 + $0x1b3] sm:$0xff]  ;;  %3817 = vrot.lane.b32.xlu0 %v9001_v43, %s7606_s26  ;;  %3815 = vrot.lane.b32.xlu1 %v9003_v45, %s7606_s26 }
 0x471   : > { %v2642_v34 = vadd.f32 %v2577_v58, %v2482_v13  ;;  %2419 = vst.msk [vmem:[#allocation3 + $0x1bc] sm:$0xff] %vm948_vm1, %v2387_v28  ;;  %v3246_v58 = vld [vmem:[#allocation3 + $0x180] sm:$0xff] }
 0x472   : > { %v1714_v22 = vld [vmem:[#allocation3 + $0x1d1] sm:$0xff]  ;;  %v3089_v33 = vpop.permute.xlu0 %3088  ;;  %v2579_v18 = vpop.permute.xlu1 %2578 }
 0x473   : > { %v1874_v35 = vadd.f32 %v1810_v55, %v1714_v22  ;;  %2674 = vst.msk [vmem:[#allocation3 + $0x1b3] sm:$0xff] %vm948_vm1, %v2642_v34  ;;  %v3244_v55 = vld [vmem:[#allocation3 + $0x168] sm:$0xff]  ;;  %v3248_v22 = vld [vmem:[#allocation3 + $0x198] sm:$0xff] }
 0x474   : > { %v1969_v12 = vld [vmem:[#allocation3 + $0x1c8] sm:$0xff]  ;;  %3821 = vrot.lane.b32.xlu0 %v9011_v31, %s7606_s26  ;;  %3819 = vrot.lane.b32.xlu1 %v9013_v49, %s7606_s26 }
 0x475   : > { %v2129_v5 = vadd.f32 %v2064_v21, %v1969_v12  ;;  %1906 = vst.msk [vmem:[#allocation3 + $0x1d1] sm:$0xff] %vm948_vm1, %v1874_v35  ;;  %v3247_v35 = vld [vmem:[#allocation3 + $0x188] sm:$0xff] }
 0x476   : > { %v3325_v30 = vpop.permute.xlu0 %3324  ;;  %v2835_v10 = vpop.permute.xlu1 %2834 }
 0x477   : > { %2161 = vst.msk [vmem:[#allocation3 + $0x1c8] sm:$0xff] %vm948_vm1, %v2129_v5  ;;  %v3400_v41 = vadd.f32 %v3325_v30, %v3240_v42 }
 0x478   : > { %v2483_v46 = vld [vmem:[#allocation3 + $0x1bb] sm:$0xff]  ;;  %3825 = vrot.lane.b32.xlu0 %v9021_v52, %s7606_s26  ;;  %3823 = vrot.lane.b32.xlu1 %v9023_v29, %s7606_s26 }
 0x479   : > { %v2643_v32 = vadd.f32 %v2579_v18, %v2483_v46  ;;  %3432 = vst.msk [vmem:[#allocation3 + $0x138] sm:$0xff] %vm948_vm1, %v3400_v41  ;;  %v3477_v46 = vld [vmem:[#allocation3 + $0x34] sm:$0xff] }
 0x47a   : > { %v2738_v47 = vld [vmem:[#allocation3 + $0x1b2] sm:$0xff]  ;;  %v3329_v21 = vpop.permute.xlu0 %3328  ;;  %v3091_v50 = vpop.permute.xlu1 %3090 }
 0x47b   : > { %v2898_v44 = vadd.f32 %v2833_v25, %v2738_v47  ;;  %2675 = vst.msk [vmem:[#allocation3 + $0x1bb] sm:$0xff] %vm948_vm1, %v2643_v32  ;;  %v3402_v51 = vadd.f32 %v3329_v21, %v3242_v48 }
 0x47c   : > { %v1970_v16 = vld [vmem:[#allocation3 + $0x1d0] sm:$0xff]  ;;  %3829 = vrot.lane.b32.xlu0 %v9031_v1, %s7606_s26  ;;  %3827 = vrot.lane.b32.xlu1 %v9033_v3, %s7606_s26 }
 0x47d   : > { %v2130_v54 = vadd.f32 %v2066_v27, %v1970_v16  ;;  %2930 = vst.msk [vmem:[#allocation3 + $0x1b2] sm:$0xff] %vm948_vm1, %v2898_v44  ;;  %3434 = vst.msk [vmem:[#allocation3 + $0x150] sm:$0xff] %vm948_vm1, %v3402_v51  ;;  %v3478_v16 = vld [vmem:[#allocation3 + $0x3c] sm:$0xff] }
 0x47e   : > { %v3333_v20 = vpop.permute.xlu0 %3332  ;;  %v3331_v40 = vpop.permute.xlu1 %3330 }
 0x47f   : > { %2162 = vst.msk [vmem:[#allocation3 + $0x1d0] sm:$0xff] %vm948_vm1, %v2130_v54  ;;  %v3404_v59 = vadd.f32 %v3333_v20, %v3244_v55  ;;  %v3403_v7 = vadd.f32 %v3331_v40, %v3243_v57  ;;  %v9190_v40 = vld [vmem:[#allocation2 + $0x1c0] sm:$0xff] }
 0x480   : > { %3833 = vrot.lane.b32.xlu0 %v9041_v11, %s7606_s26  ;;  %3831 = vrot.lane.b32.xlu1 %v9043_v24, %s7606_s26 }
 0x481   : > { %3436 = vst.msk [vmem:[#allocation3 + $0x168] sm:$0xff] %vm948_vm1, %v3404_v59  ;;  %3435 = vst.msk [vmem:[#allocation3 + $0x158] sm:$0xff] %vm948_vm1, %v3403_v7  ;;  %v3481_v7 = vld [vmem:[#allocation3 + $0x64] sm:$0xff] }
 0x482   : > { %v2739_v37 = vld [vmem:[#allocation3 + $0x1ba] sm:$0xff]  ;;  %v3337_v27 = vpop.permute.xlu0 %3336  ;;  %v3335_v25 = vpop.permute.xlu1 %3334 }
 0x483   : > { %v2899_v14 = vadd.f32 %v2835_v10, %v2739_v37  ;;  %v3406_v19 = vadd.f32 %v3337_v27, %v3246_v58  ;;  %v3405_v28 = vadd.f32 %v3335_v25, %v3245_v2  ;;  %v3480_v58 = vld [vmem:[#allocation3 + $0x54] sm:$0xff] }
 0x484   : > { %v2994_v13 = vld [vmem:[#allocation3 + $0x1b1] sm:$0xff]  ;;  %3837 = vrot.lane.b32.xlu0 %v8915_v17, %s7606_s26  ;;  %3835 = vrot.lane.b32.xlu1 %v9051_v4, %s7606_s26 }
 0x485   : > { %v3154_v34 = vadd.f32 %v3089_v33, %v2994_v13  ;;  %2931 = vst.msk [vmem:[#allocation3 + $0x1ba] sm:$0xff] %vm948_vm1, %v2899_v14  ;;  %3438 = vst.msk [vmem:[#allocation3 + $0x180] sm:$0xff] %vm948_vm1, %v3406_v19  ;;  %v3249_v33 = vld [vmem:[#allocation3 + $0x1a0] sm:$0xff] }
 0x486   : > { %3437 = vst.msk [vmem:[#allocation3 + $0x170] sm:$0xff] %vm948_vm1, %v3405_v28  ;;  %v3341_v18 = vpop.permute.xlu0 %3340  ;;  %v3339_v12 = vpop.permute.xlu1 %3338  ;;  %v9198_v19 = vld [vmem:[#allocation2 + $0x1e0] sm:$0xff]  ;;  %v9200_v28 = vld [vmem:[#allocation2 + $0x1d0] sm:$0xff] }
 0x487   : > { %3186 = vst.msk [vmem:[#allocation3 + $0x1b1] sm:$0xff] %vm948_vm1, %v3154_v34  ;;  %v3408_v5 = vadd.f32 %v3341_v18, %v3248_v22  ;;  %v3407_v42 = vadd.f32 %v3339_v12, %v3247_v35  ;;  %v3483_v13 = vld [vmem:[#allocation3 + $0x7c] sm:$0xff]  ;;  %v3482_v22 = vld [vmem:[#allocation3 + $0x6c] sm:$0xff] }
 0x488   : > { %3841 = vrot.lane.b32.xlu0 %v9059_v39, %s7606_s26  ;;  %3839 = vrot.lane.b32.xlu1 %v9061_v63, %s7606_s26 }
 0x489   : > { %3440 = vst.msk [vmem:[#allocation3 + $0x198] sm:$0xff] %vm948_vm1, %v3408_v5  ;;  %3439 = vst.msk [vmem:[#allocation3 + $0x188] sm:$0xff] %vm948_vm1, %v3407_v42  ;;  %v9209_v5 = vld [vmem:[#allocation2 + $0x1f0] sm:$0xff] }
 0x48a   : > { %v3345_v17 = vpop.permute.xlu0 %3344  ;;  %v3343_v30 = vpop.permute.xlu1 %3342  ;;  %v3485_v42 = vld [vmem:[#allocation3 + $0x94] sm:$0xff] }
 0x48b   : > { %v3409_v10 = vadd.f32 %v3343_v30, %v3249_v33  ;;  %v3484_v33 = vld [vmem:[#allocation3 + $0x84] sm:$0xff] }
 0x48c   : > { %v2995_v41 = vld [vmem:[#allocation3 + $0x1b9] sm:$0xff]  ;;  %3845 = vrot.lane.b32.xlu0 %v9069_v36, %s7606_s26  ;;  %3843 = vrot.lane.b32.xlu1 %v9071_v53, %s7606_s26 }
 0x48d   : > { %v3155_v32 = vadd.f32 %v3091_v50, %v2995_v41  ;;  %3441 = vst.msk [vmem:[#allocation3 + $0x1a0] sm:$0xff] %vm948_vm1, %v3409_v10  ;;  %v3479_v50 = vld [vmem:[#allocation3 + $0x4c] sm:$0xff] }
 0x48e   : > { %v3250_v47 = vld [vmem:[#allocation3 + $0x1b0] sm:$0xff]  ;;  %v3542_v48 = vpop.permute.xlu0 %3541  ;;  %v3347_v21 = vpop.permute.xlu1 %3346 }
 0x48f   : > { %3187 = vst.msk [vmem:[#allocation3 + $0x1b9] sm:$0xff] %vm948_vm1, %v3155_v32  ;;  %v3410_v44 = vadd.f32 %v3345_v17, %v3250_v47  ;;  %v3637_v51 = vadd.f32 %v3542_v48, %v3477_v46  ;;  %v3486_v32 = vld [vmem:[#allocation3 + $0x9c] sm:$0xff] }
 0x490   : > { %3849 = vrot.lane.b32.xlu0 %v9079_v56, %s7606_s26  ;;  %3847 = vrot.lane.b32.xlu1 %v9081_v62, %s7606_s26 }
 0x491   : > { %3442 = vst.msk [vmem:[#allocation3 + $0x1b0] sm:$0xff] %vm948_vm1, %v3410_v44  ;;  %3669 = vst.msk [vmem:[#allocation3 + $0x34] sm:$0xff] %vm948_vm1, %v3637_v51  ;;  %v3488_v44 = vld [vmem:[#allocation3 + $0xb4] sm:$0xff] }
 0x492   : > { %v3546_v54 = vpop.permute.xlu0 %3545  ;;  %v3544_v55 = vpop.permute.xlu1 %3543 }
 0x493   : > { %v3639_v20 = vadd.f32 %v3546_v54, %v3479_v50  ;;  %v3638_v57 = vadd.f32 %v3544_v55, %v3478_v16  ;;  %v3490_v54 = vld [vmem:[#allocation3 + $0xcc] sm:$0xff] }
 0x494   : > { %3853 = vrot.lane.b32.xlu0 %v9190_v40, %s7606_s26  ;;  %3851 = vrot.lane.b32.xlu1 %v9089_v61, %s7606_s26 }
 0x495   : > { %3671 = vst.msk [vmem:[#allocation3 + $0x4c] sm:$0xff] %vm948_vm1, %v3639_v20  ;;  %3670 = vst.msk [vmem:[#allocation3 + $0x3c] sm:$0xff] %vm948_vm1, %v3638_v57 }
 0x496   : > { %v3251_v59 = vld [vmem:[#allocation3 + $0x1b8] sm:$0xff]  ;;  %v3550_v37 = vpop.permute.xlu0 %3549  ;;  %v3548_v27 = vpop.permute.xlu1 %3547 }
 0x497   : > { %v3411_v2 = vadd.f32 %v3347_v21, %v3251_v59  ;;  %v3641_v25 = vadd.f32 %v3550_v37, %v3481_v7  ;;  %v3640_v14 = vadd.f32 %v3548_v27, %v3480_v58  ;;  %v3492_v59 = vld [vmem:[#allocation3 + $0xe4] sm:$0xff]  ;;  %v3494_v27 = vld [vmem:[#allocation3 + $0xfc] sm:$0xff] }
 0x498   : > { %3857 = vrot.lane.b32.xlu0 %v9198_v19, %s7606_s26  ;;  %3855 = vrot.lane.b32.xlu1 %v9200_v28, %s7606_s26 }
 0x499   : > { %3443 = vst.msk [vmem:[#allocation3 + $0x1b8] sm:$0xff] %vm948_vm1, %v3411_v2  ;;  %3673 = vst.msk [vmem:[#allocation3 + $0x64] sm:$0xff] %vm948_vm1, %v3641_v25 }
 0x49a   : > { %3672 = vst.msk [vmem:[#allocation3 + $0x54] sm:$0xff] %vm948_vm1, %v3640_v14  ;;  %v3554_v34 = vpop.permute.xlu0 %3553  ;;  %v3552_v18 = vpop.permute.xlu1 %3551 }
 0x49b   : > { %v3643_v35 = vadd.f32 %v3554_v34, %v3483_v13  ;;  %v3642_v12 = vadd.f32 %v3552_v18, %v3482_v22  ;;  %v3496_v13 = vld [vmem:[#allocation3 + $0x114] sm:$0xff] }
 0x49c   : > { %4053 = vrot.lane.b32.xlu0 %v8953_v15, %s7607_s5  ;;  %3859 = vrot.lane.b32.xlu1 %v9209_v5, %s7606_s26  ;;  %v3487_v15 = vld [vmem:[#allocation3 + $0xac] sm:$0xff] }
 0x49d   : > { %3675 = vst.msk [vmem:[#allocation3 + $0x7c] sm:$0xff] %vm948_vm1, %v3643_v35  ;;  %3674 = vst.msk [vmem:[#allocation3 + $0x6c] sm:$0xff] %vm948_vm1, %v3642_v12  ;;  %v3498_v35 = vld [vmem:[#allocation3 + $0x12c] sm:$0xff] }
 0x49e   : > { %v3558_v17 = vpop.permute.xlu0 %3557  ;;  %v3556_v30 = vpop.permute.xlu1 %3555 }
 0x49f   : > { %v3645_v10 = vadd.f32 %v3558_v17, %v3485_v42  ;;  %v3644_v41 = vadd.f32 %v3556_v30, %v3484_v33  ;;  %v3500_v33 = vld [vmem:[#allocation3 + $0x144] sm:$0xff] }
 0x4a0   : > { %4057 = vrot.lane.b32.xlu0 %v8961_v6, %s7607_s5  ;;  %4055 = vrot.lane.b32.xlu1 %v8963_v0, %s7607_s5  ;;  %v3489_v6 = vld [vmem:[#allocation3 + $0xc4] sm:$0xff] }
 0x4a1   : > { %3677 = vst.msk [vmem:[#allocation3 + $0x94] sm:$0xff] %vm948_vm1, %v3645_v10  ;;  %3676 = vst.msk [vmem:[#allocation3 + $0x84] sm:$0xff] %vm948_vm1, %v3644_v41 }
 0x4a2   : > { %v3562_v46 = vpop.permute.xlu0 %3561  ;;  %v3560_v47 = vpop.permute.xlu1 %3559 }
 0x4a3   : > { %v3647_v48 = vadd.f32 %v3562_v46, %v3487_v15  ;;  %v3646_v21 = vadd.f32 %v3560_v47, %v3486_v32  ;;  %v3502_v15 = vld [vmem:[#allocation3 + $0x15c] sm:$0xff] }
 0x4a4   : > { %4061 = vrot.lane.b32.xlu0 %v8971_v8, %s7607_s5  ;;  %4059 = vrot.lane.b32.xlu1 %v8973_v9, %s7607_s5  ;;  %v3491_v8 = vld [vmem:[#allocation3 + $0xdc] sm:$0xff] }
 0x4a5   : > { %3679 = vst.msk [vmem:[#allocation3 + $0xac] sm:$0xff] %vm948_vm1, %v3647_v48  ;;  %3678 = vst.msk [vmem:[#allocation3 + $0x9c] sm:$0xff] %vm948_vm1, %v3646_v21  ;;  %v9271_v48 = vld [vmem:[#allocation2 + $0x140] sm:$0xff]  ;;  %v3504_v21 = vld [vmem:[#allocation3 + $0x174] sm:$0xff] }
 0x4a6   : > { %v3566_v0 = vpop.permute.xlu0 %3565  ;;  %v3564_v51 = vpop.permute.xlu1 %3563 }
 0x4a7   : > { %v3649_v16 = vadd.f32 %v3566_v0, %v3489_v6  ;;  %v3648_v50 = vadd.f32 %v3564_v51, %v3488_v44  ;;  %v3507_v51 = vld [vmem:[#allocation3 + $0x19c] sm:$0xff] }
 0x4a8   : > { %4065 = vrot.lane.b32.xlu0 %v8981_v23, %s7607_s5  ;;  %4063 = vrot.lane.b32.xlu1 %v8983_v60, %s7607_s5  ;;  %v3493_v23 = vld [vmem:[#allocation3 + $0xf4] sm:$0xff] }
 0x4a9   : > { %3681 = vst.msk [vmem:[#allocation3 + $0xc4] sm:$0xff] %vm948_vm1, %v3649_v16  ;;  %3680 = vst.msk [vmem:[#allocation3 + $0xb4] sm:$0xff] %vm948_vm1, %v3648_v50  ;;  %v3506_v16 = vld [vmem:[#allocation3 + $0x18c] sm:$0xff] }
 0x4aa   : > { %v3570_v9 = vpop.permute.xlu0 %3569  ;;  %v3568_v55 = vpop.permute.xlu1 %3567 }
 0x4ab   : > { %v3651_v20 = vadd.f32 %v3570_v9, %v3491_v8  ;;  %v3650_v57 = vadd.f32 %v3568_v55, %v3490_v54  ;;  %v3508_v54 = vld [vmem:[#allocation3 + $0x1a4] sm:$0xff] }
 0x4ac   : > { %4069 = vrot.lane.b32.xlu0 %v8991_v26, %s7607_s5  ;;  %4067 = vrot.lane.b32.xlu1 %v8993_v38, %s7607_s5  ;;  %v3495_v26 = vld [vmem:[#allocation3 + $0x10c] sm:$0xff] }
 0x4ad   : > { %3683 = vst.msk [vmem:[#allocation3 + $0xdc] sm:$0xff] %vm948_vm1, %v3651_v20  ;;  %3682 = vst.msk [vmem:[#allocation3 + $0xcc] sm:$0xff] %vm948_vm1, %v3650_v57 }
 0x4ae   : > { %v3574_v60 = vpop.permute.xlu0 %3573  ;;  %v3572_v7 = vpop.permute.xlu1 %3571 }
 0x4af   : > { %v3653_v37 = vadd.f32 %v3574_v60, %v3493_v23  ;;  %v3652_v58 = vadd.f32 %v3572_v7, %v3492_v59  ;;  %v3734_v23 = vld [vmem:[#allocation3 + $0x3b] sm:$0xff] }
 0x4b0   : > { %4073 = vrot.lane.b32.xlu0 %v9001_v43, %s7607_s5  ;;  %4071 = vrot.lane.b32.xlu1 %v9003_v45, %s7607_s5  ;;  %v3497_v43 = vld [vmem:[#allocation3 + $0x124] sm:$0xff] }
 0x4b1   : > { %3685 = vst.msk [vmem:[#allocation3 + $0xf4] sm:$0xff] %vm948_vm1, %v3653_v37  ;;  %3684 = vst.msk [vmem:[#allocation3 + $0xe4] sm:$0xff] %vm948_vm1, %v3652_v58  ;;  %v3736_v37 = vld [vmem:[#allocation3 + $0x53] sm:$0xff] }
 0x4b2   : > { %v3578_v38 = vpop.permute.xlu0 %3577  ;;  %v3576_v2 = vpop.permute.xlu1 %3575 }
 0x4b3   : > { %v3655_v25 = vadd.f32 %v3578_v38, %v3495_v26  ;;  %v3654_v14 = vadd.f32 %v3576_v2, %v3494_v27  ;;  %v3738_v2 = vld [vmem:[#allocation3 + $0x6b] sm:$0xff] }
 0x4b4   : > { %4077 = vrot.lane.b32.xlu0 %v9011_v31, %s7607_s5  ;;  %4075 = vrot.lane.b32.xlu1 %v9013_v49, %s7607_s5  ;;  %v3499_v31 = vld [vmem:[#allocation3 + $0x13c] sm:$0xff] }
 0x4b5   : > { %3687 = vst.msk [vmem:[#allocation3 + $0x10c] sm:$0xff] %vm948_vm1, %v3655_v25  ;;  %3686 = vst.msk [vmem:[#allocation3 + $0xfc] sm:$0xff] %vm948_vm1, %v3654_v14 }
 0x4b6   : > { %v3582_v45 = vpop.permute.xlu0 %3581  ;;  %v3580_v34 = vpop.permute.xlu1 %3579 }
 0x4b7   : > { %v3657_v22 = vadd.f32 %v3582_v45, %v3497_v43  ;;  %v3656_v18 = vadd.f32 %v3580_v34, %v3496_v13  ;;  %v9309_v45 = vld [vmem:[#allocation2] sm:$0xff]  ;;  %v3741_v13 = vld [vmem:[#allocation3 + $0x93] sm:$0xff] }
 0x4b8   : > { %4081 = vrot.lane.b32.xlu0 %v9021_v52, %s7607_s5  ;;  %4079 = vrot.lane.b32.xlu1 %v9023_v29, %s7607_s5  ;;  %v3501_v29 = vld [vmem:[#allocation3 + $0x154] sm:$0xff] }
 0x4b9   : > { %3689 = vst.msk [vmem:[#allocation3 + $0x124] sm:$0xff] %vm948_vm1, %v3657_v22  ;;  %3688 = vst.msk [vmem:[#allocation3 + $0x114] sm:$0xff] %vm948_vm1, %v3656_v18  ;;  %v3740_v22 = vld [vmem:[#allocation3 + $0x83] sm:$0xff] }
 0x4ba   : > { %v3586_v49 = vpop.permute.xlu0 %3585  ;;  %v3584_v12 = vpop.permute.xlu1 %3583 }
 0x4bb   : > { %v3659_v42 = vadd.f32 %v3586_v49, %v3499_v31  ;;  %v3658_v17 = vadd.f32 %v3584_v12, %v3498_v35  ;;  %v9317_v35 = vld [vmem:[#allocation2 + $0x20] sm:$0xff]  ;;  %v9319_v12 = vld [vmem:[#allocation2 + $0x10] sm:$0xff] }
 0x4bc   : > { %4085 = vrot.lane.b32.xlu0 %v9031_v1, %s7607_s5  ;;  %4083 = vrot.lane.b32.xlu1 %v9033_v3, %s7607_s5  ;;  %v3503_v3 = vld [vmem:[#allocation3 + $0x16c] sm:$0xff] }
 0x4bd   : > { %3691 = vst.msk [vmem:[#allocation3 + $0x13c] sm:$0xff] %vm948_vm1, %v3659_v42  ;;  %3690 = vst.msk [vmem:[#allocation3 + $0x12c] sm:$0xff] %vm948_vm1, %v3658_v17  ;;  %v3743_v42 = vld [vmem:[#allocation3 + $0xab] sm:$0xff] }
 0x4be   : > { %v3590_v52 = vpop.permute.xlu0 %3589  ;;  %v3588_v30 = vpop.permute.xlu1 %3587 }
 0x4bf   : > { %v3661_v10 = vadd.f32 %v3590_v52, %v3501_v29  ;;  %v3660_v41 = vadd.f32 %v3588_v30, %v3500_v33  ;;  %v3742_v52 = vld [vmem:[#allocation3 + $0x9b] sm:$0xff] }
 0x4c0   : > { %4089 = vrot.lane.b32.xlu0 %v9041_v11, %s7607_s5  ;;  %4087 = vrot.lane.b32.xlu1 %v9043_v24, %s7607_s5  ;;  %v3505_v24 = vld [vmem:[#allocation3 + $0x184] sm:$0xff] }
 0x4c1   : > { %3693 = vst.msk [vmem:[#allocation3 + $0x154] sm:$0xff] %vm948_vm1, %v3661_v10  ;;  %3692 = vst.msk [vmem:[#allocation3 + $0x144] sm:$0xff] %vm948_vm1, %v3660_v41  ;;  %v9327_v10 = vld [vmem:[#allocation2 + $0x40] sm:$0xff]  ;;  %v9329_v41 = vld [vmem:[#allocation2 + $0x30] sm:$0xff] }
 0x4c2   : > { %v3594_v1 = vpop.permute.xlu0 %3593  ;;  %v3592_v46 = vpop.permute.xlu1 %3591 }
 0x4c3   : > { %v3663_v32 = vadd.f32 %v3594_v1, %v3503_v3  ;;  %v3662_v47 = vadd.f32 %v3592_v46, %v3502_v15  ;;  %v3745_v1 = vld [vmem:[#allocation3 + $0xc3] sm:$0xff]  ;;  %v3744_v15 = vld [vmem:[#allocation3 + $0xb3] sm:$0xff] }
 0x4c4   : > { %4093 = vrot.lane.b32.xlu0 %v9271_v48, %s7607_s5  ;;  %4091 = vrot.lane.b32.xlu1 %v9051_v4, %s7607_s5 }
 0x4c5   : > { %3695 = vst.msk [vmem:[#allocation3 + $0x16c] sm:$0xff] %vm948_vm1, %v3663_v32  ;;  %3694 = vst.msk [vmem:[#allocation3 + $0x15c] sm:$0xff] %vm948_vm1, %v3662_v47 }
 0x4c6   : > { %v3598_v11 = vpop.permute.xlu0 %3597  ;;  %v3596_v6 = vpop.permute.xlu1 %3595 }
 0x4c7   : > { %v3665_v0 = vadd.f32 %v3598_v11, %v3505_v24  ;;  %v3664_v44 = vadd.f32 %v3596_v6, %v3504_v21  ;;  %v9337_v11 = vld [vmem:[#allocation2 + $0x60] sm:$0xff]  ;;  %v9339_v24 = vld [vmem:[#allocation2 + $0x50] sm:$0xff] }
 0x4c8   : > { %4097 = vrot.lane.b32.xlu0 %v9059_v39, %s7607_s5  ;;  %4095 = vrot.lane.b32.xlu1 %v9061_v63, %s7607_s5  ;;  %v3733_v39 = vld [vmem:[#allocation3 + $0x33] sm:$0xff]  ;;  %v3747_v21 = vld [vmem:[#allocation3 + $0xdb] sm:$0xff] }
 0x4c9   : > { %3697 = vst.msk [vmem:[#allocation3 + $0x184] sm:$0xff] %vm948_vm1, %v3665_v0  ;;  %3696 = vst.msk [vmem:[#allocation3 + $0x174] sm:$0xff] %vm948_vm1, %v3664_v44  ;;  %v3746_v0 = vld [vmem:[#allocation3 + $0xcb] sm:$0xff] }
 0x4ca   : > { %v3602_v4 = vpop.permute.xlu0 %3601  ;;  %v3600_v50 = vpop.permute.xlu1 %3599 }
 0x4cb   : > { %v3667_v8 = vadd.f32 %v3602_v4, %v3507_v51  ;;  %v3666_v9 = vadd.f32 %v3600_v50, %v3506_v16  ;;  %v9347_v16 = vld [vmem:[#allocation2 + $0x80] sm:$0xff]  ;;  %v9349_v50 = vld [vmem:[#allocation2 + $0x70] sm:$0xff] }
 0x4cc   : > { %4101 = vrot.lane.b32.xlu0 %v9069_v36, %s7607_s5  ;;  %4099 = vrot.lane.b32.xlu1 %v9071_v53, %s7607_s5  ;;  %v3735_v36 = vld [vmem:[#allocation3 + $0x4b] sm:$0xff] }
 0x4cd   : > { %3699 = vst.msk [vmem:[#allocation3 + $0x19c] sm:$0xff] %vm948_vm1, %v3667_v8  ;;  %3698 = vst.msk [vmem:[#allocation3 + $0x18c] sm:$0xff] %vm948_vm1, %v3666_v9  ;;  %v3749_v8 = vld [vmem:[#allocation3 + $0xf3] sm:$0xff] }
 0x4ce   : > { %v3798_v63 = vpop.permute.xlu0 %3797  ;;  %v3604_v55 = vpop.permute.xlu1 %3603 }
 0x4cf   : > { %v3893_v20 = vadd.f32 %v3798_v63, %v3733_v39  ;;  %v3668_v57 = vadd.f32 %v3604_v55, %v3508_v54  ;;  %v3748_v39 = vld [vmem:[#allocation3 + $0xe3] sm:$0xff] }
 0x4d0   : > { %4105 = vrot.lane.b32.xlu0 %v9079_v56, %s7607_s5  ;;  %4103 = vrot.lane.b32.xlu1 %v9081_v62, %s7607_s5  ;;  %v3737_v56 = vld [vmem:[#allocation3 + $0x63] sm:$0xff] }
 0x4d1   : > { %3925 = vst.msk [vmem:[#allocation3 + $0x33] sm:$0xff] %vm948_vm1, %v3893_v20  ;;  %3700 = vst.msk [vmem:[#allocation3 + $0x1a4] sm:$0xff] %vm948_vm1, %v3668_v57  ;;  %v9357_v20 = vld [vmem:[#allocation2 + $0xa0] sm:$0xff]  ;;  %v9359_v57 = vld [vmem:[#allocation2 + $0x90] sm:$0xff] }
 0x4d2   : > { %v3802_v53 = vpop.permute.xlu0 %3801  ;;  %v3800_v60 = vpop.permute.xlu1 %3799 }
 0x4d3   : > { %v3895_v59 = vadd.f32 %v3802_v53, %v3735_v36  ;;  %v3894_v7 = vadd.f32 %v3800_v60, %v3734_v23  ;;  %v3751_v36 = vld [vmem:[#allocation3 + $0x10b] sm:$0xff]  ;;  %v3750_v23 = vld [vmem:[#allocation3 + $0xfb] sm:$0xff] }
 0x4d4   : > { %4109 = vrot.lane.b32.xlu0 %v9190_v40, %s7607_s5  ;;  %4107 = vrot.lane.b32.xlu1 %v9089_v61, %s7607_s5  ;;  %v3739_v61 = vld [vmem:[#allocation3 + $0x7b] sm:$0xff] }
 0x4d5   : > { %3927 = vst.msk [vmem:[#allocation3 + $0x4b] sm:$0xff] %vm948_vm1, %v3895_v59  ;;  %3926 = vst.msk [vmem:[#allocation3 + $0x3b] sm:$0xff] %vm948_vm1, %v3894_v7 }
 0x4d6   : > { %v3806_v62 = vpop.permute.xlu0 %3805  ;;  %v3804_v58 = vpop.permute.xlu1 %3803 }
 0x4d7   : > { %v3897_v26 = vadd.f32 %v3806_v62, %v3737_v56  ;;  %v3896_v38 = vadd.f32 %v3804_v58, %v3736_v37  ;;  %v9367_v56 = vld [vmem:[#allocation2 + $0xc0] sm:$0xff]  ;;  %v9369_v62 = vld [vmem:[#allocation2 + $0xb0] sm:$0xff] }
 0x4d8   : > { %4113 = vrot.lane.b32.xlu0 %v9198_v19, %s7607_s5  ;;  %4111 = vrot.lane.b32.xlu1 %v9200_v28, %s7607_s5  ;;  %v3753_v37 = vld [vmem:[#allocation3 + $0x123] sm:$0xff] }
 0x4d9   : > { %3929 = vst.msk [vmem:[#allocation3 + $0x63] sm:$0xff] %vm948_vm1, %v3897_v26  ;;  %3928 = vst.msk [vmem:[#allocation3 + $0x53] sm:$0xff] %vm948_vm1, %v3896_v38  ;;  %v3752_v26 = vld [vmem:[#allocation3 + $0x113] sm:$0xff] }
 0x4da   : > { %v3810_v27 = vpop.permute.xlu0 %3809  ;;  %v3808_v25 = vpop.permute.xlu1 %3807 }
 0x4db   : > { %v3899_v14 = vadd.f32 %v3810_v27, %v3739_v61  ;;  %v3898_v43 = vadd.f32 %v3808_v25, %v3738_v2  ;;  %v9377_v2 = vld [vmem:[#allocation2 + $0xe0] sm:$0xff]  ;;  %v9379_v25 = vld [vmem:[#allocation2 + $0xd0] sm:$0xff] }
 0x4dc   : > { %4309 = vrot.lane.b32.xlu0 %v9309_v45, %s7608_s6  ;;  %4115 = vrot.lane.b32.xlu1 %v9209_v5, %s7607_s5 }
 0x4dd   : > { %3931 = vst.msk [vmem:[#allocation3 + $0x7b] sm:$0xff] %vm948_vm1, %v3899_v14  ;;  %3930 = vst.msk [vmem:[#allocation3 + $0x6b] sm:$0xff] %vm948_vm1, %v3898_v43  ;;  %v3755_v14 = vld [vmem:[#allocation3 + $0x13b] sm:$0xff] }
 0x4de   : > { %v3814_v34 = vpop.permute.xlu0 %3813  ;;  %v3812_v18 = vpop.permute.xlu1 %3811 }
 0x4df   : > { %v3901_v31 = vadd.f32 %v3814_v34, %v3741_v13  ;;  %v3900_v49 = vadd.f32 %v3812_v18, %v3740_v22  ;;  %v3754_v13 = vld [vmem:[#allocation3 + $0x12b] sm:$0xff] }
 0x4e0   : > { %4313 = vrot.lane.b32.xlu0 %v9317_v35, %s7608_s6  ;;  %4311 = vrot.lane.b32.xlu1 %v9319_v12, %s7608_s6 }
 0x4e1   : > { %3933 = vst.msk [vmem:[#allocation3 + $0x93] sm:$0xff] %vm948_vm1, %v3901_v31  ;;  %3932 = vst.msk [vmem:[#allocation3 + $0x83] sm:$0xff] %vm948_vm1, %v3900_v49  ;;  %v9387_v31 = vld [vmem:[#allocation2 + $0x100] sm:$0xff]  ;;  %v9389_v49 = vld [vmem:[#allocation2 + $0xf0] sm:$0xff] }
 0x4e2   : > { %v3818_v17 = vpop.permute.xlu0 %3817  ;;  %v3816_v29 = vpop.permute.xlu1 %3815 }
 0x4e3   : > { %v3903_v33 = vadd.f32 %v3818_v17, %v3743_v42  ;;  %v3902_v30 = vadd.f32 %v3816_v29, %v3742_v52  ;;  %v3757_v17 = vld [vmem:[#allocation3 + $0x153] sm:$0xff]  ;;  %v3756_v52 = vld [vmem:[#allocation3 + $0x143] sm:$0xff] }
 0x4e4   : > { %4317 = vrot.lane.b32.xlu0 %v9327_v10, %s7608_s6  ;;  %4315 = vrot.lane.b32.xlu1 %v9329_v41, %s7608_s6 }
 0x4e5   : > { %3935 = vst.msk [vmem:[#allocation3 + $0xab] sm:$0xff] %vm948_vm1, %v3903_v33  ;;  %3934 = vst.msk [vmem:[#allocation3 + $0x9b] sm:$0xff] %vm948_vm1, %v3902_v30 }
 0x4e6   : > { %v3822_v3 = vpop.permute.xlu0 %3821  ;;  %v3820_v46 = vpop.permute.xlu1 %3819 }
 0x4e7   : > { %v3905_v32 = vadd.f32 %v3822_v3, %v3745_v1  ;;  %v3904_v47 = vadd.f32 %v3820_v46, %v3744_v15  ;;  %v9397_v1 = vld [vmem:[#allocation2 + $0x120] sm:$0xff]  ;;  %v9399_v3 = vld [vmem:[#allocation2 + $0x110] sm:$0xff] }
 0x4e8   : > { %4321 = vrot.lane.b32.xlu0 %v9337_v11, %s7608_s6  ;;  %4319 = vrot.lane.b32.xlu1 %v9339_v24, %s7608_s6  ;;  %v3759_v46 = vld [vmem:[#allocation3 + $0x16b] sm:$0xff] }
 0x4e9   : > { %3937 = vst.msk [vmem:[#allocation3 + $0xc3] sm:$0xff] %vm948_vm1, %v3905_v32  ;;  %3936 = vst.msk [vmem:[#allocation3 + $0xb3] sm:$0xff] %vm948_vm1, %v3904_v47  ;;  %v3758_v32 = vld [vmem:[#allocation3 + $0x15b] sm:$0xff] }
 0x4ea   : > { %v3826_v6 = vpop.permute.xlu0 %3825  ;;  %v3824_v44 = vpop.permute.xlu1 %3823 }
 0x4eb   : > { %v3907_v4 = vadd.f32 %v3826_v6, %v3747_v21  ;;  %v3906_v51 = vadd.f32 %v3824_v44, %v3746_v0  ;;  %v9407_v0 = vld [vmem:[#allocation2 + $0x130] sm:$0xff] }
 0x4ec   : > { %4325 = vrot.lane.b32.xlu0 %v9347_v16, %s7608_s6  ;;  %4323 = vrot.lane.b32.xlu1 %v9349_v50, %s7608_s6 }
 0x4ed   : > { %3939 = vst.msk [vmem:[#allocation3 + $0xdb] sm:$0xff] %vm948_vm1, %v3907_v4  ;;  %3938 = vst.msk [vmem:[#allocation3 + $0xcb] sm:$0xff] %vm948_vm1, %v3906_v51  ;;  %v3761_v4 = vld [vmem:[#allocation3 + $0x183] sm:$0xff]  ;;  %v3760_v51 = vld [vmem:[#allocation3 + $0x173] sm:$0xff] }
 0x4ee   : > { %v3830_v9 = vpop.permute.xlu0 %3829  ;;  %v3828_v63 = vpop.permute.xlu1 %3827 }
 0x4ef   : > { %v3909_v54 = vadd.f32 %v3830_v9, %v3749_v8  ;;  %v3908_v55 = vadd.f32 %v3828_v63, %v3748_v39  ;;  %v9415_v63 = vld [vmem:[#allocation2 + $0x160] sm:$0xff] }
 0x4f0   : > { %4329 = vrot.lane.b32.xlu0 %v9357_v20, %s7608_s6  ;;  %4327 = vrot.lane.b32.xlu1 %v9359_v57, %s7608_s6 }
 0x4f1   : > { %3941 = vst.msk [vmem:[#allocation3 + $0xf3] sm:$0xff] %vm948_vm1, %v3909_v54  ;;  %3940 = vst.msk [vmem:[#allocation3 + $0xe3] sm:$0xff] %vm948_vm1, %v3908_v55  ;;  %v9417_v54 = vld [vmem:[#allocation2 + $0x150] sm:$0xff] }
 0x4f2   : > { %v3834_v53 = vpop.permute.xlu0 %3833  ;;  %v3832_v60 = vpop.permute.xlu1 %3831 }
 0x4f3   : > { %v3911_v59 = vadd.f32 %v3834_v53, %v3751_v36  ;;  %v3910_v7 = vadd.f32 %v3832_v60, %v3750_v23  ;;  %v3763_v36 = vld [vmem:[#allocation3 + $0x19b] sm:$0xff]  ;;  %v3762_v53 = vld [vmem:[#allocation3 + $0x18b] sm:$0xff] }
 0x4f4   : > { %4333 = vrot.lane.b32.xlu0 %v9367_v56, %s7608_s6  ;;  %4331 = vrot.lane.b32.xlu1 %v9369_v62, %s7608_s6 }
 0x4f5   : > { %3943 = vst.msk [vmem:[#allocation3 + $0x10b] sm:$0xff] %vm948_vm1, %v3911_v59  ;;  %3942 = vst.msk [vmem:[#allocation3 + $0xfb] sm:$0xff] %vm948_vm1, %v3910_v7  ;;  %v9425_v7 = vld [vmem:[#allocation2 + $0x180] sm:$0xff] }
 0x4f6   : > { %v3838_v58 = vpop.permute.xlu0 %3837  ;;  %v3836_v38 = vpop.permute.xlu1 %3835 }
 0x4f7   : > { %v3913_v61 = vadd.f32 %v3838_v58, %v3753_v37  ;;  %v3912_v27 = vadd.f32 %v3836_v38, %v3752_v26  ;;  %v9427_v37 = vld [vmem:[#allocation2 + $0x170] sm:$0xff]  ;;  %v3764_v38 = vld [vmem:[#allocation3 + $0x1a3] sm:$0xff] }
 0x4f8   : > { %4337 = vrot.lane.b32.xlu0 %v9377_v2, %s7608_s6  ;;  %4335 = vrot.lane.b32.xlu1 %v9379_v25, %s7608_s6  ;;  %v3989_v58 = vld [vmem:[#allocation3 + $0x32] sm:$0xff] }
 0x4f9   : > { %3945 = vst.msk [vmem:[#allocation3 + $0x123] sm:$0xff] %vm948_vm1, %v3913_v61  ;;  %3944 = vst.msk [vmem:[#allocation3 + $0x113] sm:$0xff] %vm948_vm1, %v3912_v27 }
 0x4fa   : > { %v3842_v43 = vpop.permute.xlu0 %3841  ;;  %v3840_v34 = vpop.permute.xlu1 %3839 }
 0x4fb   : > { %v3915_v22 = vadd.f32 %v3842_v43, %v3755_v14  ;;  %v3914_v18 = vadd.f32 %v3840_v34, %v3754_v13  ;;  %v9435_v43 = vld [vmem:[#allocation2 + $0x1a0] sm:$0xff]  ;;  %v9437_v13 = vld [vmem:[#allocation2 + $0x190] sm:$0xff] }
 0x4fc   : > { %4341 = vrot.lane.b32.xlu0 %v9387_v31, %s7608_s6  ;;  %4339 = vrot.lane.b32.xlu1 %v9389_v49, %s7608_s6  ;;  %v3991_v34 = vld [vmem:[#allocation3 + $0x4a] sm:$0xff] }
 0x4fd   : > { %3947 = vst.msk [vmem:[#allocation3 + $0x13b] sm:$0xff] %vm948_vm1, %v3915_v22  ;;  %3946 = vst.msk [vmem:[#allocation3 + $0x12b] sm:$0xff] %vm948_vm1, %v3914_v18  ;;  %v3990_v18 = vld [vmem:[#allocation3 + $0x3a] sm:$0xff] }
 0x4fe   : > { %v3846_v42 = vpop.permute.xlu0 %3845  ;;  %v3844_v29 = vpop.permute.xlu1 %3843 }
 0x4ff   : > { %v3917_v33 = vadd.f32 %v3846_v42, %v3757_v17  ;;  %v3916_v30 = vadd.f32 %v3844_v29, %v3756_v52  ;;  %v9445_v29 = vld [vmem:[#allocation2 + $0x1b0] sm:$0xff] }
 0x500   : > { %4345 = vrot.lane.b32.xlu0 %v9397_v1, %s7608_s6  ;;  %4343 = vrot.lane.b32.xlu1 %v9399_v3, %s7608_s6 }
 0x501   : > { %3949 = vst.msk [vmem:[#allocation3 + $0x153] sm:$0xff] %vm948_vm1, %v3917_v33  ;;  %3948 = vst.msk [vmem:[#allocation3 + $0x143] sm:$0xff] %vm948_vm1, %v3916_v30  ;;  %v3993_v33 = vld [vmem:[#allocation3 + $0x62] sm:$0xff] }
 0x502   : > { %v3850_v15 = vpop.permute.xlu0 %3849  ;;  %v3848_v47 = vpop.permute.xlu1 %3847 }
 0x503   : > { %v3919_v21 = vadd.f32 %v3850_v15, %v3759_v46  ;;  %v3918_v6 = vadd.f32 %v3848_v47, %v3758_v32  ;;  %v3992_v15 = vld [vmem:[#allocation3 + $0x52] sm:$0xff] }
 0x504   : > { %4349 = vrot.lane.b32.xlu0 %v9271_v48, %s7608_s6  ;;  %4347 = vrot.lane.b32.xlu1 %v9407_v0, %s7608_s6 }
 0x505   : > { %3951 = vst.msk [vmem:[#allocation3 + $0x16b] sm:$0xff] %vm948_vm1, %v3919_v21  ;;  %3950 = vst.msk [vmem:[#allocation3 + $0x15b] sm:$0xff] %vm948_vm1, %v3918_v6  ;;  %v3994_v6 = vld [vmem:[#allocation3 + $0x6a] sm:$0xff] }
 0x506   : > { %v3854_v44 = vpop.permute.xlu0 %3853  ;;  %v3852_v8 = vpop.permute.xlu1 %3851 }
 0x507   : > { %v3921_v9 = vadd.f32 %v3854_v44, %v3761_v4  ;;  %v3920_v39 = vadd.f32 %v3852_v8, %v3760_v51  ;;  %v3996_v8 = vld [vmem:[#allocation3 + $0x82] sm:$0xff] }
 0x508   : > { %4353 = vrot.lane.b32.xlu0 %v9415_v63, %s7608_s6  ;;  %4351 = vrot.lane.b32.xlu1 %v9417_v54, %s7608_s6 }
 0x509   : > { %3953 = vst.msk [vmem:[#allocation3 + $0x183] sm:$0xff] %vm948_vm1, %v3921_v9  ;;  %3952 = vst.msk [vmem:[#allocation3 + $0x173] sm:$0xff] %vm948_vm1, %v3920_v39 }
 0x50a   : > { %v3858_v55 = vpop.permute.xlu0 %3857  ;;  %v3856_v23 = vpop.permute.xlu1 %3855 }
 0x50b   : > { %v3923_v60 = vadd.f32 %v3858_v55, %v3763_v36  ;;  %v3922_v59 = vadd.f32 %v3856_v23, %v3762_v53  ;;  %v3998_v53 = vld [vmem:[#allocation3 + $0x9a] sm:$0xff] }
 0x50c   : > { %4357 = vrot.lane.b32.xlu0 %v9425_v7, %s7608_s6  ;;  %4355 = vrot.lane.b32.xlu1 %v9427_v37, %s7608_s6 }
 0x50d   : > { %3955 = vst.msk [vmem:[#allocation3 + $0x19b] sm:$0xff] %vm948_vm1, %v3923_v60  ;;  %3954 = vst.msk [vmem:[#allocation3 + $0x18b] sm:$0xff] %vm948_vm1, %v3922_v59 }
 0x50e   : > { %v4054_v26 = vpop.permute.xlu0 %4053  ;;  %v3860_v61 = vpop.permute.xlu1 %3859 }
 0x50f   : > { %v4149_v27 = vadd.f32 %v4054_v26, %v3989_v58  ;;  %v3924_v14 = vadd.f32 %v3860_v61, %v3764_v38  ;;  %v4001_v58 = vld [vmem:[#allocation3 + $0xc2] sm:$0xff]  ;;  %v4000_v38 = vld [vmem:[#allocation3 + $0xb2] sm:$0xff] }
 0x510   : > { %4361 = vrot.lane.b32.xlu0 %v9435_v43, %s7608_s6  ;;  %4359 = vrot.lane.b32.xlu1 %v9437_v13, %s7608_s6 }
 0x511   : > { %4181 = vst.msk [vmem:[#allocation3 + $0x32] sm:$0xff] %vm948_vm1, %v4149_v27  ;;  %3956 = vst.msk [vmem:[#allocation3 + $0x1a3] sm:$0xff] %vm948_vm1, %v3924_v14 }
 0x512   : > { %v4058_v22 = vpop.permute.xlu0 %4057  ;;  %v4056_v42 = vpop.permute.xlu1 %4055 }
 0x513   : > { %v4151_v17 = vadd.f32 %v4058_v22, %v3991_v34  ;;  %v4150_v52 = vadd.f32 %v4056_v42, %v3990_v18  ;;  %v4003_v34 = vld [vmem:[#allocation3 + $0xda] sm:$0xff]  ;;  %v4002_v18 = vld [vmem:[#allocation3 + $0xca] sm:$0xff] }
 0x514   : > { %4365 = vrot.lane.b32.xlu0 %v9190_v40, %s7608_s6  ;;  %4363 = vrot.lane.b32.xlu1 %v9445_v29, %s7608_s6  ;;  %v3995_v40 = vld [vmem:[#allocation3 + $0x7a] sm:$0xff] }
 0x515   : > { %4183 = vst.msk [vmem:[#allocation3 + $0x4a] sm:$0xff] %vm948_vm1, %v4151_v17  ;;  %4182 = vst.msk [vmem:[#allocation3 + $0x3a] sm:$0xff] %vm948_vm1, %v4150_v52 }
 0x516   : > { %v4062_v30 = vpop.permute.xlu0 %4061  ;;  %v4060_v46 = vpop.permute.xlu1 %4059 }
 0x517   : > { %v4153_v32 = vadd.f32 %v4062_v30, %v3993_v33  ;;  %v4152_v47 = vadd.f32 %v4060_v46, %v3992_v15  ;;  %v4005_v33 = vld [vmem:[#allocation3 + $0xf2] sm:$0xff]  ;;  %v4004_v15 = vld [vmem:[#allocation3 + $0xe2] sm:$0xff] }
 0x518   : > { %4369 = vrot.lane.b32.xlu0 %v9198_v19, %s7608_s6  ;;  %4367 = vrot.lane.b32.xlu1 %v9200_v28, %s7608_s6  ;;  %v3997_v19 = vld [vmem:[#allocation3 + $0x92] sm:$0xff] }
 0x519   : > { %4185 = vst.msk [vmem:[#allocation3 + $0x62] sm:$0xff] %vm948_vm1, %v4153_v32  ;;  %4184 = vst.msk [vmem:[#allocation3 + $0x52] sm:$0xff] %vm948_vm1, %v4152_v47 }
 0x51a   : > { %v4066_v21 = vpop.permute.xlu0 %4065  ;;  %v4064_v44 = vpop.permute.xlu1 %4063 }
 0x51b   : > { %v4155_v4 = vadd.f32 %v4066_v21, %v3995_v40  ;;  %v4154_v51 = vadd.f32 %v4064_v44, %v3994_v6  ;;  %v4007_v40 = vld [vmem:[#allocation3 + $0x10a] sm:$0xff]  ;;  %v4006_v6 = vld [vmem:[#allocation3 + $0xfa] sm:$0xff] }
 0x51c   : > { %4565 = vrot.lane.b32.xlu0 %v9309_v45, %s7609_s15  ;;  %4371 = vrot.lane.b32.xlu1 %v9209_v5, %s7608_s6  ;;  %v3999_v5 = vld [vmem:[#allocation3 + $0xaa] sm:$0xff] }
 0x51d   : > { %4187 = vst.msk [vmem:[#allocation3 + $0x7a] sm:$0xff] %vm948_vm1, %v4155_v4  ;;  %4186 = vst.msk [vmem:[#allocation3 + $0x6a] sm:$0xff] %vm948_vm1, %v4154_v51 }
 0x51e   : > { %v4070_v28 = vpop.permute.xlu0 %4069  ;;  %v4068_v9 = vpop.permute.xlu1 %4067 }
 0x51f   : > { %v4157_v39 = vadd.f32 %v4070_v28, %v3997_v19  ;;  %v4156_v55 = vadd.f32 %v4068_v9, %v3996_v8  ;;  %v4009_v19 = vld [vmem:[#allocation3 + $0x122] sm:$0xff]  ;;  %v4008_v8 = vld [vmem:[#allocation3 + $0x112] sm:$0xff] }
 0x520   : > { %4569 = vrot.lane.b32.xlu0 %v9317_v35, %s7609_s15  ;;  %4567 = vrot.lane.b32.xlu1 %v9319_v12, %s7609_s15 }
 0x521   : > { %4189 = vst.msk [vmem:[#allocation3 + $0x92] sm:$0xff] %vm948_vm1, %v4157_v39  ;;  %4188 = vst.msk [vmem:[#allocation3 + $0x82] sm:$0xff] %vm948_vm1, %v4156_v55 }
 0x522   : > { %v4074_v36 = vpop.permute.xlu0 %4073  ;;  %v4072_v23 = vpop.permute.xlu1 %4071 }
 0x523   : > { %v4159_v60 = vadd.f32 %v4074_v36, %v3999_v5  ;;  %v4158_v59 = vadd.f32 %v4072_v23, %v3998_v53  ;;  %v4011_v5 = vld [vmem:[#allocation3 + $0x13a] sm:$0xff]  ;;  %v4010_v53 = vld [vmem:[#allocation3 + $0x12a] sm:$0xff] }
 0x524   : > { %4573 = vrot.lane.b32.xlu0 %v9327_v10, %s7609_s15  ;;  %4571 = vrot.lane.b32.xlu1 %v9329_v41, %s7609_s15 }
 0x525   : > { %4191 = vst.msk [vmem:[#allocation3 + $0xaa] sm:$0xff] %vm948_vm1, %v4159_v60  ;;  %4190 = vst.msk [vmem:[#allocation3 + $0x9a] sm:$0xff] %vm948_vm1, %v4158_v59 }
 0x526   : > { %v4078_v26 = vpop.permute.xlu0 %4077  ;;  %v4076_v61 = vpop.permute.xlu1 %4075 }
 0x527   : > { %v4161_v27 = vadd.f32 %v4078_v26, %v4001_v58  ;;  %v4160_v14 = vadd.f32 %v4076_v61, %v4000_v38  ;;  %v4013_v26 = vld [vmem:[#allocation3 + $0x152] sm:$0xff]  ;;  %v4012_v38 = vld [vmem:[#allocation3 + $0x142] sm:$0xff] }
 0x528   : > { %4577 = vrot.lane.b32.xlu0 %v9337_v11, %s7609_s15  ;;  %4575 = vrot.lane.b32.xlu1 %v9339_v24, %s7609_s15 }
 0x529   : > { %4193 = vst.msk [vmem:[#allocation3 + $0xc2] sm:$0xff] %vm948_vm1, %v4161_v27  ;;  %4192 = vst.msk [vmem:[#allocation3 + $0xb2] sm:$0xff] %vm948_vm1, %v4160_v14 }
 0x52a   : > { %v4082_v22 = vpop.permute.xlu0 %4081  ;;  %v4080_v42 = vpop.permute.xlu1 %4079 }
 0x52b   : > { %v4163_v17 = vadd.f32 %v4082_v22, %v4003_v34  ;;  %v4162_v52 = vadd.f32 %v4080_v42, %v4002_v18  ;;  %v4015_v22 = vld [vmem:[#allocation3 + $0x16a] sm:$0xff]  ;;  %v4014_v18 = vld [vmem:[#allocation3 + $0x15a] sm:$0xff] }
 0x52c   : > { %4581 = vrot.lane.b32.xlu0 %v9347_v16, %s7609_s15  ;;  %4579 = vrot.lane.b32.xlu1 %v9349_v50, %s7609_s15 }
 0x52d   : > { %4195 = vst.msk [vmem:[#allocation3 + $0xda] sm:$0xff] %vm948_vm1, %v4163_v17  ;;  %4194 = vst.msk [vmem:[#allocation3 + $0xca] sm:$0xff] %vm948_vm1, %v4162_v52 }
 0x52e   : > { %v4086_v30 = vpop.permute.xlu0 %4085  ;;  %v4084_v46 = vpop.permute.xlu1 %4083 }
 0x52f   : > { %v4165_v32 = vadd.f32 %v4086_v30, %v4005_v33  ;;  %v4164_v47 = vadd.f32 %v4084_v46, %v4004_v15  ;;  %v4017_v30 = vld [vmem:[#allocation3 + $0x182] sm:$0xff]  ;;  %v4016_v15 = vld [vmem:[#allocation3 + $0x172] sm:$0xff] }
 0x530   : > { %4585 = vrot.lane.b32.xlu0 %v9357_v20, %s7609_s15  ;;  %4583 = vrot.lane.b32.xlu1 %v9359_v57, %s7609_s15 }
 0x531   : > { %4197 = vst.msk [vmem:[#allocation3 + $0xf2] sm:$0xff] %vm948_vm1, %v4165_v32  ;;  %4196 = vst.msk [vmem:[#allocation3 + $0xe2] sm:$0xff] %vm948_vm1, %v4164_v47 }
 0x532   : > { %v4090_v21 = vpop.permute.xlu0 %4089  ;;  %v4088_v44 = vpop.permute.xlu1 %4087 }
 0x533   : > { %v4167_v4 = vadd.f32 %v4090_v21, %v4007_v40  ;;  %v4166_v51 = vadd.f32 %v4088_v44, %v4006_v6  ;;  %v4019_v40 = vld [vmem:[#allocation3 + $0x19a] sm:$0xff]  ;;  %v4018_v21 = vld [vmem:[#allocation3 + $0x18a] sm:$0xff] }
 0x534   : > { %4589 = vrot.lane.b32.xlu0 %v9367_v56, %s7609_s15  ;;  %4587 = vrot.lane.b32.xlu1 %v9369_v62, %s7609_s15 }
 0x535   : > { %4199 = vst.msk [vmem:[#allocation3 + $0x10a] sm:$0xff] %vm948_vm1, %v4167_v4  ;;  %4198 = vst.msk [vmem:[#allocation3 + $0xfa] sm:$0xff] %vm948_vm1, %v4166_v51  ;;  %v4245_v51 = vld [vmem:[#allocation3 + $0x31] sm:$0xff] }
 0x536   : > { %v4094_v28 = vpop.permute.xlu0 %4093  ;;  %v4092_v9 = vpop.permute.xlu1 %4091 }
 0x537   : > { %v4169_v39 = vadd.f32 %v4094_v28, %v4009_v19  ;;  %v4168_v55 = vadd.f32 %v4092_v9, %v4008_v8  ;;  %v4020_v28 = vld [vmem:[#allocation3 + $0x1a2] sm:$0xff] }
 0x538   : > { %4593 = vrot.lane.b32.xlu0 %v9377_v2, %s7609_s15  ;;  %4591 = vrot.lane.b32.xlu1 %v9379_v25, %s7609_s15 }
 0x539   : > { %4201 = vst.msk [vmem:[#allocation3 + $0x122] sm:$0xff] %vm948_vm1, %v4169_v39  ;;  %4200 = vst.msk [vmem:[#allocation3 + $0x112] sm:$0xff] %vm948_vm1, %v4168_v55  ;;  %v4247_v55 = vld [vmem:[#allocation3 + $0x49] sm:$0xff] }
 0x53a   : > { %v4098_v36 = vpop.permute.xlu0 %4097  ;;  %v4096_v23 = vpop.permute.xlu1 %4095 }
 0x53b   : > { %v4171_v60 = vadd.f32 %v4098_v36, %v4011_v5  ;;  %v4170_v59 = vadd.f32 %v4096_v23, %v4010_v53  ;;  %v4246_v36 = vld [vmem:[#allocation3 + $0x39] sm:$0xff] }
 0x53c   : > { %4597 = vrot.lane.b32.xlu0 %v9387_v31, %s7609_s15  ;;  %4595 = vrot.lane.b32.xlu1 %v9389_v49, %s7609_s15 }
 0x53d   : > { %4203 = vst.msk [vmem:[#allocation3 + $0x13a] sm:$0xff] %vm948_vm1, %v4171_v60  ;;  %4202 = vst.msk [vmem:[#allocation3 + $0x12a] sm:$0xff] %vm948_vm1, %v4170_v59  ;;  %v9543_v59 = vld [vmem:[#allocation2 + $0x1c0] sm:$0xff] }
 0x53e   : > { %v4102_v58 = vpop.permute.xlu0 %4101  ;;  %v4100_v61 = vpop.permute.xlu1 %4099 }
 0x53f   : > { %v4173_v27 = vadd.f32 %v4102_v58, %v4013_v26  ;;  %v4172_v14 = vadd.f32 %v4100_v61, %v4012_v38  ;;  %v4249_v58 = vld [vmem:[#allocation3 + $0x61] sm:$0xff]  ;;  %v4248_v38 = vld [vmem:[#allocation3 + $0x51] sm:$0xff] }
 0x540   : > { %4601 = vrot.lane.b32.xlu0 %v9397_v1, %s7609_s15  ;;  %4599 = vrot.lane.b32.xlu1 %v9399_v3, %s7609_s15 }
 0x541   : > { %4205 = vst.msk [vmem:[#allocation3 + $0x152] sm:$0xff] %vm948_vm1, %v4173_v27  ;;  %4204 = vst.msk [vmem:[#allocation3 + $0x142] sm:$0xff] %vm948_vm1, %v4172_v14 }
 0x542   : > { %v4106_v34 = vpop.permute.xlu0 %4105  ;;  %v4104_v42 = vpop.permute.xlu1 %4103 }
 0x543   : > { %v4175_v17 = vadd.f32 %v4106_v34, %v4015_v22  ;;  %v4174_v52 = vadd.f32 %v4104_v42, %v4014_v18  ;;  %v9551_v34 = vld [vmem:[#allocation2 + $0x1e0] sm:$0xff]  ;;  %v9553_v22 = vld [vmem:[#allocation2 + $0x1d0] sm:$0xff] }
 0x544   : > { %4605 = vrot.lane.b32.xlu0 %v9271_v48, %s7609_s15  ;;  %4603 = vrot.lane.b32.xlu1 %v9407_v0, %s7609_s15  ;;  %v4251_v18 = vld [vmem:[#allocation3 + $0x79] sm:$0xff] }
 0x545   : > { %4207 = vst.msk [vmem:[#allocation3 + $0x16a] sm:$0xff] %vm948_vm1, %v4175_v17  ;;  %4206 = vst.msk [vmem:[#allocation3 + $0x15a] sm:$0xff] %vm948_vm1, %v4174_v52  ;;  %v4250_v17 = vld [vmem:[#allocation3 + $0x69] sm:$0xff] }
 0x546   : > { %v4110_v33 = vpop.permute.xlu0 %4109  ;;  %v4108_v46 = vpop.permute.xlu1 %4107 }
 0x547   : > { %v4177_v32 = vadd.f32 %v4110_v33, %v4017_v30  ;;  %v4176_v47 = vadd.f32 %v4108_v46, %v4016_v15  ;;  %v9561_v15 = vld [vmem:[#allocation2 + $0x1f0] sm:$0xff] }
 0x548   : > { %4609 = vrot.lane.b32.xlu0 %v9415_v63, %s7609_s15  ;;  %4607 = vrot.lane.b32.xlu1 %v9417_v54, %s7609_s15  ;;  %v4253_v46 = vld [vmem:[#allocation3 + $0x91] sm:$0xff] }
 0x549   : > { %4209 = vst.msk [vmem:[#allocation3 + $0x182] sm:$0xff] %vm948_vm1, %v4177_v32  ;;  %4208 = vst.msk [vmem:[#allocation3 + $0x172] sm:$0xff] %vm948_vm1, %v4176_v47  ;;  %v4252_v47 = vld [vmem:[#allocation3 + $0x81] sm:$0xff] }
 0x54a   : > { %v4114_v48 = vpop.permute.xlu0 %4113  ;;  %v4112_v6 = vpop.permute.xlu1 %4111 }
 0x54b   : > { %v4179_v44 = vadd.f32 %v4114_v48, %v4019_v40  ;;  %v4178_v4 = vadd.f32 %v4112_v6, %v4018_v21 }
 0x54c   : > { %4613 = vrot.lane.b32.xlu0 %v9425_v7, %s7609_s15  ;;  %4611 = vrot.lane.b32.xlu1 %v9427_v37, %s7609_s15 }
 0x54d   : > { %4211 = vst.msk [vmem:[#allocation3 + $0x19a] sm:$0xff] %vm948_vm1, %v4179_v44  ;;  %4210 = vst.msk [vmem:[#allocation3 + $0x18a] sm:$0xff] %vm948_vm1, %v4178_v4  ;;  %v4254_v44 = vld [vmem:[#allocation3 + $0x99] sm:$0xff] }
 0x54e   : > { %v4310_v19 = vpop.permute.xlu0 %4309  ;;  %v4116_v8 = vpop.permute.xlu1 %4115 }
 0x54f   : > { %v4405_v9 = vadd.f32 %v4310_v19, %v4245_v51  ;;  %v4180_v39 = vadd.f32 %v4116_v8, %v4020_v28  ;;  %v4256_v28 = vld [vmem:[#allocation3 + $0xb1] sm:$0xff] }
 0x550   : > { %4617 = vrot.lane.b32.xlu0 %v9435_v43, %s7609_s15  ;;  %4615 = vrot.lane.b32.xlu1 %v9437_v13, %s7609_s15 }
 0x551   : > { %4437 = vst.msk [vmem:[#allocation3 + $0x31] sm:$0xff] %vm948_vm1, %v4405_v9  ;;  %4212 = vst.msk [vmem:[#allocation3 + $0x1a2] sm:$0xff] %vm948_vm1, %v4180_v39 }
 0x552   : > { %v4314_v5 = vpop.permute.xlu0 %4313  ;;  %v4312_v53 = vpop.permute.xlu1 %4311 }
 0x553   : > { %v4407_v23 = vadd.f32 %v4314_v5, %v4247_v55  ;;  %v4406_v60 = vadd.f32 %v4312_v53, %v4246_v36  ;;  %v4258_v55 = vld [vmem:[#allocation3 + $0xc9] sm:$0xff] }
 0x554   : > { %4621 = vrot.lane.b32.xlu0 %v9543_v59, %s7609_s15  ;;  %4619 = vrot.lane.b32.xlu1 %v9445_v29, %s7609_s15 }
 0x555   : > { %4439 = vst.msk [vmem:[#allocation3 + $0x49] sm:$0xff] %vm948_vm1, %v4407_v23  ;;  %4438 = vst.msk [vmem:[#allocation3 + $0x39] sm:$0xff] %vm948_vm1, %v4406_v60  ;;  %v4260_v23 = vld [vmem:[#allocation3 + $0xe1] sm:$0xff] }
 0x556   : > { %v4318_v26 = vpop.permute.xlu0 %4317  ;;  %v4316_v61 = vpop.permute.xlu1 %4315 }
 0x557   : > { %v4409_v27 = vadd.f32 %v4318_v26, %v4249_v58  ;;  %v4408_v14 = vadd.f32 %v4316_v61, %v4248_v38  ;;  %v4262_v38 = vld [vmem:[#allocation3 + $0xf9] sm:$0xff] }
 0x558   : > { %4625 = vrot.lane.b32.xlu0 %v9551_v34, %s7609_s15  ;;  %4623 = vrot.lane.b32.xlu1 %v9553_v22, %s7609_s15 }
 0x559   : > { %4441 = vst.msk [vmem:[#allocation3 + $0x61] sm:$0xff] %vm948_vm1, %v4409_v27  ;;  %4440 = vst.msk [vmem:[#allocation3 + $0x51] sm:$0xff] %vm948_vm1, %v4408_v14 }
 0x55a   : > { %v4322_v42 = vpop.permute.xlu0 %4321  ;;  %v4320_v52 = vpop.permute.xlu1 %4319 }
 0x55b   : > { %v4411_v33 = vadd.f32 %v4322_v42, %v4251_v18  ;;  %v4410_v30 = vadd.f32 %v4320_v52, %v4250_v17  ;;  %v4264_v18 = vld [vmem:[#allocation3 + $0x111] sm:$0xff] }
 0x55c   : > { %4822 = vrot.lane.b32.xlu0 %v9309_v45, %s7610_s27  ;;  %4627 = vrot.lane.b32.xlu1 %v9561_v15, %s7609_s15  ;;  %v4255_v45 = vld [vmem:[#allocation3 + $0xa9] sm:$0xff] }
 0x55d   : > { %4443 = vst.msk [vmem:[#allocation3 + $0x79] sm:$0xff] %vm948_vm1, %v4411_v33  ;;  %4442 = vst.msk [vmem:[#allocation3 + $0x69] sm:$0xff] %vm948_vm1, %v4410_v30  ;;  %v4266_v33 = vld [vmem:[#allocation3 + $0x129] sm:$0xff] }
 0x55e   : > { %v4326_v32 = vpop.permute.xlu0 %4325  ;;  %v4324_v48 = vpop.permute.xlu1 %4323 }
 0x55f   : > { %v4413_v40 = vadd.f32 %v4326_v32, %v4253_v46  ;;  %v4412_v21 = vadd.f32 %v4324_v48, %v4252_v47  ;;  %v4268_v47 = vld [vmem:[#allocation3 + $0x141] sm:$0xff] }
 0x560   : > { %4826 = vrot.lane.b32.xlu0 %v9317_v35, %s7610_s27  ;;  %4824 = vrot.lane.b32.xlu1 %v9319_v12, %s7610_s27  ;;  %v4257_v35 = vld [vmem:[#allocation3 + $0xc1] sm:$0xff] }
 0x561   : > { %4445 = vst.msk [vmem:[#allocation3 + $0x91] sm:$0xff] %vm948_vm1, %v4413_v40  ;;  %4444 = vst.msk [vmem:[#allocation3 + $0x81] sm:$0xff] %vm948_vm1, %v4412_v21 }
 0x562   : > { %v4330_v6 = vpop.permute.xlu0 %4329  ;;  %v4328_v4 = vpop.permute.xlu1 %4327 }
 0x563   : > { %v4415_v51 = vadd.f32 %v4330_v6, %v4255_v45  ;;  %v4414_v19 = vadd.f32 %v4328_v4, %v4254_v44  ;;  %v4270_v45 = vld [vmem:[#allocation3 + $0x159] sm:$0xff] }
 0x564   : > { %4830 = vrot.lane.b32.xlu0 %v9327_v10, %s7610_s27  ;;  %4828 = vrot.lane.b32.xlu1 %v9329_v41, %s7610_s27  ;;  %v4259_v10 = vld [vmem:[#allocation3 + $0xd9] sm:$0xff] }
 0x565   : > { %4447 = vst.msk [vmem:[#allocation3 + $0xa9] sm:$0xff] %vm948_vm1, %v4415_v51  ;;  %4446 = vst.msk [vmem:[#allocation3 + $0x99] sm:$0xff] %vm948_vm1, %v4414_v19  ;;  %v4745_v51 = vld [vmem:[#allocation2 + $0x140] sm:$0xff]  ;;  %v4272_v19 = vld [vmem:[#allocation3 + $0x171] sm:$0xff] }
 0x566   : > { %v4334_v12 = vpop.permute.xlu0 %4333  ;;  %v4332_v8 = vpop.permute.xlu1 %4331 }
 0x567   : > { %v4417_v9 = vadd.f32 %v4334_v12, %v4257_v35  ;;  %v4416_v39 = vadd.f32 %v4332_v8, %v4256_v28  ;;  %v4275_v8 = vld [vmem:[#allocation3 + $0x199] sm:$0xff] }
 0x568   : > { %4834 = vrot.lane.b32.xlu0 %v9337_v11, %s7610_s27  ;;  %4832 = vrot.lane.b32.xlu1 %v9339_v24, %s7610_s27  ;;  %v4261_v11 = vld [vmem:[#allocation3 + $0xf1] sm:$0xff] }
 0x569   : > { %4449 = vst.msk [vmem:[#allocation3 + $0xc1] sm:$0xff] %vm948_vm1, %v4417_v9  ;;  %4448 = vst.msk [vmem:[#allocation3 + $0xb1] sm:$0xff] %vm948_vm1, %v4416_v39  ;;  %v4274_v9 = vld [vmem:[#allocation3 + $0x189] sm:$0xff] }
 0x56a   : > { %v4338_v41 = vpop.permute.xlu0 %4337  ;;  %v4336_v5 = vpop.permute.xlu1 %4335 }
 0x56b   : > { %v4419_v36 = vadd.f32 %v4338_v41, %v4259_v10  ;;  %v4418_v53 = vadd.f32 %v4336_v5, %v4258_v55  ;;  %v4276_v55 = vld [vmem:[#allocation3 + $0x1a1] sm:$0xff] }
 0x56c   : > { %4838 = vrot.lane.b32.xlu0 %v9347_v16, %s7610_s27  ;;  %4836 = vrot.lane.b32.xlu1 %v9349_v50, %s7610_s27  ;;  %v4263_v16 = vld [vmem:[#allocation3 + $0x109] sm:$0xff] }
 0x56d   : > { %4451 = vst.msk [vmem:[#allocation3 + $0xd9] sm:$0xff] %vm948_vm1, %v4419_v36  ;;  %4450 = vst.msk [vmem:[#allocation3 + $0xc9] sm:$0xff] %vm948_vm1, %v4418_v53 }
 0x56e   : > { %v4342_v24 = vpop.permute.xlu0 %4341  ;;  %v4340_v60 = vpop.permute.xlu1 %4339 }
 0x56f   : > { %v4421_v58 = vadd.f32 %v4342_v24, %v4261_v11  ;;  %v4420_v26 = vadd.f32 %v4340_v60, %v4260_v23  ;;  %v4502_v11 = vld [vmem:[#allocation3 + $0x38] sm:$0xff] }
 0x570   : > { %4842 = vrot.lane.b32.xlu0 %v9357_v20, %s7610_s27  ;;  %4840 = vrot.lane.b32.xlu1 %v9359_v57, %s7610_s27  ;;  %v4265_v20 = vld [vmem:[#allocation3 + $0x121] sm:$0xff] }
 0x571   : > { %4453 = vst.msk [vmem:[#allocation3 + $0xf1] sm:$0xff] %vm948_vm1, %v4421_v58  ;;  %4452 = vst.msk [vmem:[#allocation3 + $0xe1] sm:$0xff] %vm948_vm1, %v4420_v26  ;;  %v4504_v58 = vld [vmem:[#allocation3 + $0x50] sm:$0xff] }
 0x572   : > { %v4346_v50 = vpop.permute.xlu0 %4345  ;;  %v4344_v61 = vpop.permute.xlu1 %4343 }
 0x573   : > { %v4423_v27 = vadd.f32 %v4346_v50, %v4263_v16  ;;  %v4422_v14 = vadd.f32 %v4344_v61, %v4262_v38  ;;  %v4506_v38 = vld [vmem:[#allocation3 + $0x68] sm:$0xff] }
 0x574   : > { %4846 = vrot.lane.b32.xlu0 %v9367_v56, %s7610_s27  ;;  %4844 = vrot.lane.b32.xlu1 %v9369_v62, %s7610_s27  ;;  %v4267_v56 = vld [vmem:[#allocation3 + $0x139] sm:$0xff] }
 0x575   : > { %4455 = vst.msk [vmem:[#allocation3 + $0x109] sm:$0xff] %vm948_vm1, %v4423_v27  ;;  %4454 = vst.msk [vmem:[#allocation3 + $0xf9] sm:$0xff] %vm948_vm1, %v4422_v14 }
 0x576   : > { %v4350_v57 = vpop.permute.xlu0 %4349  ;;  %v4348_v42 = vpop.permute.xlu1 %4347 }
 0x577   : > { %v4425_v17 = vadd.f32 %v4350_v57, %v4265_v20  ;;  %v4424_v52 = vadd.f32 %v4348_v42, %v4264_v18  ;;  %v9658_v20 = vld [vmem:[#allocation2 + $0x8] sm:$0xff]  ;;  %v4508_v57 = vld [vmem:[#allocation3 + $0x80] sm:$0xff] }
 0x578   : > { %4850 = vrot.lane.b32.xlu0 %v9377_v2, %s7610_s27  ;;  %4848 = vrot.lane.b32.xlu1 %v9379_v25, %s7610_s27  ;;  %v4269_v25 = vld [vmem:[#allocation3 + $0x151] sm:$0xff] }
 0x579   : > { %4457 = vst.msk [vmem:[#allocation3 + $0x121] sm:$0xff] %vm948_vm1, %v4425_v17  ;;  %4456 = vst.msk [vmem:[#allocation3 + $0x111] sm:$0xff] %vm948_vm1, %v4424_v52  ;;  %v9666_v52 = vld [vmem:[#allocation2 + $0x28] sm:$0xff] }
 0x57a   : > { %v4354_v62 = vpop.permute.xlu0 %4353  ;;  %v4352_v30 = vpop.permute.xlu1 %4351 }
 0x57b   : > { %v4427_v46 = vadd.f32 %v4354_v62, %v4267_v56  ;;  %v4426_v32 = vadd.f32 %v4352_v30, %v4266_v33  ;;  %v9668_v56 = vld [vmem:[#allocation2 + $0x18] sm:$0xff] }
 0x57c   : > { %4854 = vrot.lane.b32.xlu0 %v9387_v31, %s7610_s27  ;;  %4852 = vrot.lane.b32.xlu1 %v9389_v49, %s7610_s27  ;;  %v4271_v49 = vld [vmem:[#allocation3 + $0x169] sm:$0xff]  ;;  %v4510_v33 = vld [vmem:[#allocation3 + $0x98] sm:$0xff] }
 0x57d   : > { %4459 = vst.msk [vmem:[#allocation3 + $0x139] sm:$0xff] %vm948_vm1, %v4427_v46  ;;  %4458 = vst.msk [vmem:[#allocation3 + $0x129] sm:$0xff] %vm948_vm1, %v4426_v32 }
 0x57e   : > { %v4358_v2 = vpop.permute.xlu0 %4357  ;;  %v4356_v48 = vpop.permute.xlu1 %4355 }
 0x57f   : > { %v4429_v40 = vadd.f32 %v4358_v2, %v4269_v25  ;;  %v4428_v21 = vadd.f32 %v4356_v48, %v4268_v47  ;;  %v9676_v2 = vld [vmem:[#allocation2 + $0x48] sm:$0xff]  ;;  %v9678_v25 = vld [vmem:[#allocation2 + $0x38] sm:$0xff]  ;;  %v4513_v47 = vld [vmem:[#allocation3 + $0xc0] sm:$0xff] }
 0x580   : > { %4858 = vrot.lane.b32.xlu0 %v9397_v1, %s7610_s27  ;;  %4856 = vrot.lane.b32.xlu1 %v9399_v3, %s7610_s27  ;;  %v4273_v3 = vld [vmem:[#allocation3 + $0x181] sm:$0xff] }
 0x581   : > { %4461 = vst.msk [vmem:[#allocation3 + $0x151] sm:$0xff] %vm948_vm1, %v4429_v40  ;;  %4460 = vst.msk [vmem:[#allocation3 + $0x141] sm:$0xff] %vm948_vm1, %v4428_v21  ;;  %v4512_v40 = vld [vmem:[#allocation3 + $0xb0] sm:$0xff] }
 0x582   : > { %v4362_v31 = vpop.permute.xlu0 %4361  ;;  %v4360_v6 = vpop.permute.xlu1 %4359 }
 0x583   : > { %v4431_v44 = vadd.f32 %v4362_v31, %v4271_v49  ;;  %v4430_v4 = vadd.f32 %v4360_v6, %v4270_v45  ;;  %v9686_v45 = vld [vmem:[#allocation2 + $0x68] sm:$0xff]  ;;  %v9688_v6 = vld [vmem:[#allocation2 + $0x58] sm:$0xff] }
 0x584   : > { %4862 = vrot.lane.b32.xlu0 %v4745_v51, %s7610_s27  ;;  %4860 = vrot.lane.b32.xlu1 %v9407_v0, %s7610_s27  ;;  %v4514_v51 = vld [vmem:[#allocation3 + $0xc8] sm:$0xff] }
 0x585   : > { %4463 = vst.msk [vmem:[#allocation3 + $0x169] sm:$0xff] %vm948_vm1, %v4431_v44  ;;  %4462 = vst.msk [vmem:[#allocation3 + $0x159] sm:$0xff] %vm948_vm1, %v4430_v4  ;;  %v4515_v44 = vld [vmem:[#allocation3 + $0xd8] sm:$0xff] }
 0x586   : > { %v4366_v1 = vpop.permute.xlu0 %4365  ;;  %v4364_v35 = vpop.permute.xlu1 %4363 }
 0x587   : > { %v4433_v12 = vadd.f32 %v4366_v1, %v4273_v3  ;;  %v4432_v28 = vadd.f32 %v4364_v35, %v4272_v19  ;;  %v9696_v35 = vld [vmem:[#allocation2 + $0x88] sm:$0xff] }
 0x588   : > { %4866 = vrot.lane.b32.xlu0 %v9415_v63, %s7610_s27  ;;  %4864 = vrot.lane.b32.xlu1 %v9417_v54, %s7610_s27  ;;  %v4501_v63 = vld [vmem:[#allocation3 + $0x30] sm:$0xff] }
 0x589   : > { %4465 = vst.msk [vmem:[#allocation3 + $0x181] sm:$0xff] %vm948_vm1, %v4433_v12  ;;  %4464 = vst.msk [vmem:[#allocation3 + $0x171] sm:$0xff] %vm948_vm1, %v4432_v28  ;;  %v9698_v12 = vld [vmem:[#allocation2 + $0x78] sm:$0xff]  ;;  %v4517_v28 = vld [vmem:[#allocation3 + $0xf0] sm:$0xff] }
 0x58a   : > { %v4370_v0 = vpop.permute.xlu0 %4369  ;;  %v4368_v39 = vpop.permute.xlu1 %4367 }
 0x58b   : > { %v4435_v10 = vadd.f32 %v4370_v0, %v4275_v8  ;;  %v4434_v41 = vadd.f32 %v4368_v39, %v4274_v9  ;;  %v4516_v8 = vld [vmem:[#allocation3 + $0xe0] sm:$0xff] }
 0x58c   : > { %4870 = vrot.lane.b32.xlu0 %v9425_v7, %s7610_s27  ;;  %4868 = vrot.lane.b32.xlu1 %v9427_v37, %s7610_s27  ;;  %v4503_v7 = vld [vmem:[#allocation3 + $0x48] sm:$0xff] }
 0x58d   : > { %4467 = vst.msk [vmem:[#allocation3 + $0x199] sm:$0xff] %vm948_vm1, %v4435_v10  ;;  %4466 = vst.msk [vmem:[#allocation3 + $0x189] sm:$0xff] %vm948_vm1, %v4434_v41  ;;  %v9706_v41 = vld [vmem:[#allocation2 + $0xa8] sm:$0xff] }
 0x58e   : > { %v4566_v54 = vpop.permute.xlu0 %4565  ;;  %v4372_v5 = vpop.permute.xlu1 %4371 }
 0x58f   : > { %v4661_v36 = vadd.f32 %v4566_v54, %v4501_v63  ;;  %v4436_v53 = vadd.f32 %v4372_v5, %v4276_v55  ;;  %v9708_v63 = vld [vmem:[#allocation2 + $0x98] sm:$0xff]  ;;  %v4519_v54 = vld [vmem:[#allocation3 + $0x108] sm:$0xff] }
 0x590   : > { %4874 = vrot.lane.b32.xlu0 %v9435_v43, %s7610_s27  ;;  %4872 = vrot.lane.b32.xlu1 %v9437_v13, %s7610_s27  ;;  %v4505_v43 = vld [vmem:[#allocation3 + $0x60] sm:$0xff]  ;;  %v4518_v5 = vld [vmem:[#allocation3 + $0xf8] sm:$0xff] }
 0x591   : > { %4693 = vst.msk [vmem:[#allocation3 + $0x30] sm:$0xff] %vm948_vm1, %v4661_v36  ;;  %4468 = vst.msk [vmem:[#allocation3 + $0x1a1] sm:$0xff] %vm948_vm1, %v4436_v53 }
 0x592   : > { %v4570_v37 = vpop.permute.xlu0 %4569  ;;  %v4568_v24 = vpop.permute.xlu1 %4567 }
 0x593   : > { %v4663_v23 = vadd.f32 %v4570_v37, %v4503_v7  ;;  %v4662_v60 = vadd.f32 %v4568_v24, %v4502_v11  ;;  %v9716_v37 = vld [vmem:[#allocation2 + $0xc8] sm:$0xff]  ;;  %v9718_v11 = vld [vmem:[#allocation2 + $0xb8] sm:$0xff]  ;;  %v4521_v24 = vld [vmem:[#allocation3 + $0x120] sm:$0xff] }
 0x594   : > { %4878 = vrot.lane.b32.xlu0 %v9543_v59, %s7610_s27  ;;  %4876 = vrot.lane.b32.xlu1 %v9445_v29, %s7610_s27  ;;  %v4507_v29 = vld [vmem:[#allocation3 + $0x78] sm:$0xff] }
 0x595   : > { %4695 = vst.msk [vmem:[#allocation3 + $0x48] sm:$0xff] %vm948_vm1, %v4663_v23  ;;  %4694 = vst.msk [vmem:[#allocation3 + $0x38] sm:$0xff] %vm948_vm1, %v4662_v60  ;;  %v4520_v60 = vld [vmem:[#allocation3 + $0x110] sm:$0xff] }
 0x596   : > { %v4574_v13 = vpop.permute.xlu0 %4573  ;;  %v4572_v26 = vpop.permute.xlu1 %4571 }
 0x597   : > { %v4665_v16 = vadd.f32 %v4574_v13, %v4505_v43  ;;  %v4664_v50 = vadd.f32 %v4572_v26, %v4504_v58  ;;  %v9726_v26 = vld [vmem:[#allocation2 + $0xe8] sm:$0xff] }
 0x598   : > { %4882 = vrot.lane.b32.xlu0 %v9551_v34, %s7610_s27  ;;  %4880 = vrot.lane.b32.xlu1 %v9553_v22, %s7610_s27  ;;  %v4509_v34 = vld [vmem:[#allocation3 + $0x90] sm:$0xff] }
 0x599   : > { %4697 = vst.msk [vmem:[#allocation3 + $0x60] sm:$0xff] %vm948_vm1, %v4665_v16  ;;  %4696 = vst.msk [vmem:[#allocation3 + $0x50] sm:$0xff] %vm948_vm1, %v4664_v50  ;;  %v9728_v16 = vld [vmem:[#allocation2 + $0xd8] sm:$0xff] }
 0x59a   : > { %v4578_v59 = vpop.permute.xlu0 %4577  ;;  %v4576_v61 = vpop.permute.xlu1 %4575  ;;  %v4523_v50 = vld [vmem:[#allocation3 + $0x138] sm:$0xff] }
 0x59b   : > { %v4667_v27 = vadd.f32 %v4578_v59, %v4507_v29  ;;  %v4666_v14 = vadd.f32 %v4576_v61, %v4506_v38  ;;  %v4522_v59 = vld [vmem:[#allocation3 + $0x128] sm:$0xff] }
 0x59c   : > { %5206 = vrot.lane.b32.xlu0 %v9658_v20, %s7596_s28  ;;  %4884 = vrot.lane.b32.xlu1 %v9561_v15, %s7610_s27  ;;  %v4511_v15 = vld [vmem:[#allocation3 + $0xa8] sm:$0xff] }
 0x59d   : > { %4699 = vst.msk [vmem:[#allocation3 + $0x78] sm:$0xff] %vm948_vm1, %v4667_v27  ;;  %4698 = vst.msk [vmem:[#allocation3 + $0x68] sm:$0xff] %vm948_vm1, %v4666_v14  ;;  %v9736_v14 = vld [vmem:[#allocation2 + $0x108] sm:$0xff] }
 0x59e   : > { %v4582_v22 = vpop.permute.xlu0 %4581  ;;  %v4580_v18 = vpop.permute.xlu1 %4579 }
 0x59f   : > { %v4669_v42 = vadd.f32 %v4582_v22, %v4509_v34  ;;  %v4668_v17 = vadd.f32 %v4580_v18, %v4508_v57  ;;  %v9738_v34 = vld [vmem:[#allocation2 + $0xf8] sm:$0xff]  ;;  %v4525_v57 = vld [vmem:[#allocation3 + $0x150] sm:$0xff]  ;;  %v4524_v18 = vld [vmem:[#allocation3 + $0x140] sm:$0xff] }
 0x5a0   : > { %5210 = vrot.lane.b32.xlu0 %v9666_v52, %s7596_s28  ;;  %5208 = vrot.lane.b32.xlu1 %v9668_v56, %s7596_s28 }
 0x5a1   : > { %4701 = vst.msk [vmem:[#allocation3 + $0x90] sm:$0xff] %vm948_vm1, %v4669_v42  ;;  %4700 = vst.msk [vmem:[#allocation3 + $0x80] sm:$0xff] %vm948_vm1, %v4668_v17 }
 0x5a2   : > { %v4586_v62 = vpop.permute.xlu0 %4585  ;;  %v4584_v30 = vpop.permute.xlu1 %4583 }
 0x5a3   : > { %v4671_v46 = vadd.f32 %v4586_v62, %v4511_v15  ;;  %v4670_v32 = vadd.f32 %v4584_v30, %v4510_v33  ;;  %v9746_v62 = vld [vmem:[#allocation2 + $0x128] sm:$0xff]  ;;  %v9748_v33 = vld [vmem:[#allocation2 + $0x118] sm:$0xff] }
 0x5a4   : > { %5214 = vrot.lane.b32.xlu0 %v9676_v2, %s7596_s28  ;;  %5212 = vrot.lane.b32.xlu1 %v9678_v25, %s7596_s28 }
 0x5a5   : > { %4703 = vst.msk [vmem:[#allocation3 + $0xa8] sm:$0xff] %vm948_vm1, %v4671_v46  ;;  %4702 = vst.msk [vmem:[#allocation3 + $0x98] sm:$0xff] %vm948_vm1, %v4670_v32  ;;  %v4527_v46 = vld [vmem:[#allocation3 + $0x168] sm:$0xff]  ;;  %v4526_v32 = vld [vmem:[#allocation3 + $0x158] sm:$0xff] }
 0x5a6   : > { %v4590_v48 = vpop.permute.xlu0 %4589  ;;  %v4588_v21 = vpop.permute.xlu1 %4587 }
 0x5a7   : > { %v4673_v31 = vadd.f32 %v4590_v48, %v4513_v47  ;;  %v4672_v49 = vadd.f32 %v4588_v21, %v4512_v40  ;;  %v9756_v21 = vld [vmem:[#allocation2 + $0x148] sm:$0xff] }
 0x5a8   : > { %5218 = vrot.lane.b32.xlu0 %v9686_v45, %s7596_s28  ;;  %5216 = vrot.lane.b32.xlu1 %v9688_v6, %s7596_s28 }
 0x5a9   : > { %4705 = vst.msk [vmem:[#allocation3 + $0xc0] sm:$0xff] %vm948_vm1, %v4673_v31  ;;  %4704 = vst.msk [vmem:[#allocation3 + $0xb0] sm:$0xff] %vm948_vm1, %v4672_v49  ;;  %v9758_v31 = vld [vmem:[#allocation2 + $0x138] sm:$0xff] }
 0x5aa   : > { %v4594_v4 = vpop.permute.xlu0 %4593  ;;  %v4592_v1 = vpop.permute.xlu1 %4591 }
 0x5ab   : > { %v4675_v3 = vadd.f32 %v4594_v4, %v4515_v44  ;;  %v4674_v19 = vadd.f32 %v4592_v1, %v4514_v51  ;;  %v4529_v44 = vld [vmem:[#allocation3 + $0x180] sm:$0xff]  ;;  %v4528_v4 = vld [vmem:[#allocation3 + $0x170] sm:$0xff] }
 0x5ac   : > { %5222 = vrot.lane.b32.xlu0 %v9696_v35, %s7596_s28  ;;  %5220 = vrot.lane.b32.xlu1 %v9698_v12, %s7596_s28 }
 0x5ad   : > { %4707 = vst.msk [vmem:[#allocation3 + $0xd8] sm:$0xff] %vm948_vm1, %v4675_v3  ;;  %4706 = vst.msk [vmem:[#allocation3 + $0xc8] sm:$0xff] %vm948_vm1, %v4674_v19  ;;  %v9766_v19 = vld [vmem:[#allocation2 + $0x168] sm:$0xff] }
 0x5ae   : > { %v4598_v0 = vpop.permute.xlu0 %4597  ;;  %v4596_v9 = vpop.permute.xlu1 %4595 }
 0x5af   : > { %v4677_v39 = vadd.f32 %v4598_v0, %v4517_v28  ;;  %v4676_v10 = vadd.f32 %v4596_v9, %v4516_v8  ;;  %v9768_v28 = vld [vmem:[#allocation2 + $0x158] sm:$0xff]  ;;  %v4530_v9 = vld [vmem:[#allocation3 + $0x188] sm:$0xff] }
 0x5b0   : > { %5226 = vrot.lane.b32.xlu0 %v9706_v41, %s7596_s28  ;;  %5224 = vrot.lane.b32.xlu1 %v9708_v63, %s7596_s28  ;;  %v4531_v8 = vld [vmem:[#allocation3 + $0x198] sm:$0xff] }
 0x5b1   : > { %4709 = vst.msk [vmem:[#allocation3 + $0xf0] sm:$0xff] %vm948_vm1, %v4677_v39  ;;  %4708 = vst.msk [vmem:[#allocation3 + $0xe0] sm:$0xff] %vm948_vm1, %v4676_v10 }
 0x5b2   : > { %v4602_v55 = vpop.permute.xlu0 %4601  ;;  %v4600_v36 = vpop.permute.xlu1 %4599 }
 0x5b3   : > { %v4679_v53 = vadd.f32 %v4602_v55, %v4519_v54  ;;  %v4678_v7 = vadd.f32 %v4600_v36, %v4518_v5  ;;  %v9776_v55 = vld [vmem:[#allocation2 + $0x188] sm:$0xff]  ;;  %v9778_v5 = vld [vmem:[#allocation2 + $0x178] sm:$0xff] }
 0x5b4   : > { %5230 = vrot.lane.b32.xlu0 %v9716_v37, %s7596_s28  ;;  %5228 = vrot.lane.b32.xlu1 %v9718_v11, %s7596_s28  ;;  %v4758_v36 = vld [vmem:[#allocation3 + $0x1c] sm:$0xff] }
 0x5b5   : > { %4711 = vst.msk [vmem:[#allocation3 + $0x108] sm:$0xff] %vm948_vm1, %v4679_v53  ;;  %4710 = vst.msk [vmem:[#allocation3 + $0xf8] sm:$0xff] %vm948_vm1, %v4678_v7  ;;  %v4532_v7 = vld [vmem:[#allocation3 + $0x1a0] sm:$0xff] }
 0x5b6   : > { %v4606_v23 = vpop.permute.xlu0 %4605  ;;  %v4604_v43 = vpop.permute.xlu1 %4603 }
 0x5b7   : > { %v4681_v13 = vadd.f32 %v4606_v23, %v4521_v24  ;;  %v4680_v58 = vadd.f32 %v4604_v43, %v4520_v60  ;;  %v9788_v43 = vld [vmem:[#allocation2 + $0x1a8] sm:$0xff] }
 0x5b8   : > { %5234 = vrot.lane.b32.xlu0 %v9726_v26, %s7596_s28  ;;  %5232 = vrot.lane.b32.xlu1 %v9728_v16, %s7596_s28 }
 0x5b9   : > { %4713 = vst.msk [vmem:[#allocation3 + $0x120] sm:$0xff] %vm948_vm1, %v4681_v13  ;;  %4712 = vst.msk [vmem:[#allocation3 + $0x110] sm:$0xff] %vm948_vm1, %v4680_v58  ;;  %v9790_v13 = vld [vmem:[#allocation2 + $0x198] sm:$0xff]  ;;  %v4759_v58 = vld [vmem:[#allocation3 + $0x24] sm:$0xff] }
 0x5ba   : > { %v4610_v29 = vpop.permute.xlu0 %4609  ;;  %v4608_v38 = vpop.permute.xlu1 %4607 }
 0x5bb   : > { %v4683_v61 = vadd.f32 %v4610_v29, %v4523_v50  ;;  %v4682_v27 = vadd.f32 %v4608_v38, %v4522_v59  ;;  %v4760_v29 = vld [vmem:[#allocation3 + $0x34] sm:$0xff] }
 0x5bc   : > { %5238 = vrot.lane.b32.xlu0 %v9736_v14, %s7596_s28  ;;  %5236 = vrot.lane.b32.xlu1 %v9738_v34, %s7596_s28 }
 0x5bd   : > { %4715 = vst.msk [vmem:[#allocation3 + $0x138] sm:$0xff] %vm948_vm1, %v4683_v61  ;;  %4714 = vst.msk [vmem:[#allocation3 + $0x128] sm:$0xff] %vm948_vm1, %v4682_v27  ;;  %v9798_v27 = vld [vmem:[#allocation2 + $0x1c8] sm:$0xff] }
 0x5be   : > { %v4614_v22 = vpop.permute.xlu0 %4613  ;;  %v4612_v42 = vpop.permute.xlu1 %4611 }
 0x5bf   : > { %v4685_v17 = vadd.f32 %v4614_v22, %v4525_v57  ;;  %v4684_v15 = vadd.f32 %v4612_v42, %v4524_v18  ;;  %v9800_v22 = vld [vmem:[#allocation2 + $0x1b8] sm:$0xff]  ;;  %v4762_v18 = vld [vmem:[#allocation3 + $0x4c] sm:$0xff] }
 0x5c0   : > { %5242 = vrot.lane.b32.xlu0 %v9746_v62, %s7596_s28  ;;  %5240 = vrot.lane.b32.xlu1 %v9748_v33, %s7596_s28  ;;  %v4761_v42 = vld [vmem:[#allocation3 + $0x3c] sm:$0xff] }
 0x5c1   : > { %4717 = vst.msk [vmem:[#allocation3 + $0x150] sm:$0xff] %vm948_vm1, %v4685_v17  ;;  %4716 = vst.msk [vmem:[#allocation3 + $0x140] sm:$0xff] %vm948_vm1, %v4684_v15  ;;  %v4982_v15 = vld [vmem:[#allocation2 + $0x8] sm:$0xff] }
 0x5c2   : > { %v4618_v30 = vpop.permute.xlu0 %4617  ;;  %v4616_v47 = vpop.permute.xlu1 %4615 }
 0x5c3   : > { %v4687_v48 = vadd.f32 %v4618_v30, %v4527_v46  ;;  %v4686_v40 = vadd.f32 %v4616_v47, %v4526_v32  ;;  %v9813_v32 = vld [vmem:[#allocation2 + $0x1e8] sm:$0xff]  ;;  %v9815_v47 = vld [vmem:[#allocation2 + $0x1d8] sm:$0xff] }
 0x5c4   : > { %5246 = vrot.lane.b32.xlu0 %v9756_v21, %s7596_s28  ;;  %5244 = vrot.lane.b32.xlu1 %v9758_v31, %s7596_s28 }
 0x5c5   : > { %4719 = vst.msk [vmem:[#allocation3 + $0x168] sm:$0xff] %vm948_vm1, %v4687_v48  ;;  %4718 = vst.msk [vmem:[#allocation3 + $0x158] sm:$0xff] %vm948_vm1, %v4686_v40 }
 0x5c6   : > { %v4622_v49 = vpop.permute.xlu0 %4621  ;;  %v4620_v51 = vpop.permute.xlu1 %4619 }
 0x5c7   : > { %v4689_v1 = vadd.f32 %v4622_v49, %v4529_v44  ;;  %v4688_v3 = vadd.f32 %v4620_v51, %v4528_v4  ;;  %v4764_v51 = vld [vmem:[#allocation3 + $0x64] sm:$0xff] }
 0x5c8   : > { %5250 = vrot.lane.b32.xlu0 %v9766_v19, %s7596_s28  ;;  %5248 = vrot.lane.b32.xlu1 %v9768_v28, %s7596_s28 }
 0x5c9   : > { %4721 = vst.msk [vmem:[#allocation3 + $0x180] sm:$0xff] %vm948_vm1, %v4689_v1  ;;  %4720 = vst.msk [vmem:[#allocation3 + $0x170] sm:$0xff] %vm948_vm1, %v4688_v3  ;;  %v4763_v1 = vld [vmem:[#allocation3 + $0x54] sm:$0xff] }
 0x5ca   : > { %v4626_v0 = vpop.permute.xlu0 %4625  ;;  %v4624_v39 = vpop.permute.xlu1 %4623 }
 0x5cb   : > { %v4691_v10 = vadd.f32 %v4626_v0, %v4531_v8  ;;  %v4690_v54 = vadd.f32 %v4624_v39, %v4530_v9  ;;  %v4983_v0 = vld [vmem:[#allocation2 + $0x18] sm:$0xff] }
 0x5cc   : > { %5254 = vrot.lane.b32.xlu0 %v9776_v55, %s7596_s28  ;;  %5252 = vrot.lane.b32.xlu1 %v9778_v5, %s7596_s28  ;;  %v9828_v39 = vld [vmem:[#allocation2 + $0x1f8] sm:$0xff] }
 0x5cd   : > { %4723 = vst.msk [vmem:[#allocation3 + $0x198] sm:$0xff] %vm948_vm1, %v4691_v10  ;;  %4722 = vst.msk [vmem:[#allocation3 + $0x188] sm:$0xff] %vm948_vm1, %v4690_v54  ;;  %v4984_v10 = vld [vmem:[#allocation2 + $0x28] sm:$0xff] }
 0x5ce   : > { %v4823_v53 = vpop.permute.xlu0 %4822  ;;  %v4628_v24 = vpop.permute.xlu1 %4627 }
 0x5cf   : > { %v4918_v23 = vadd.f32 %v4823_v53, %v4758_v36  ;;  %v4692_v60 = vadd.f32 %v4628_v24, %v4532_v7 }
 0x5d0   : > { %5258 = vrot.lane.b32.xlu0 %v9788_v43, %s7596_s28  ;;  %5256 = vrot.lane.b32.xlu1 %v9790_v13, %s7596_s28 }
 0x5d1   : > { %4950 = vst.msk [vmem:[#allocation3 + $0x1c] sm:$0xff] %vm948_vm1, %v4918_v23  ;;  %4724 = vst.msk [vmem:[#allocation3 + $0x1a0] sm:$0xff] %vm948_vm1, %v4692_v60  ;;  %v4766_v23 = vld [vmem:[#allocation3 + $0x7c] sm:$0xff]  ;;  %v4765_v60 = vld [vmem:[#allocation3 + $0x6c] sm:$0xff] }
 0x5d2   : > { %v4827_v50 = vpop.permute.xlu0 %4826  ;;  %v4825_v59 = vpop.permute.xlu1 %4824 }
 0x5d3   : > { %v4920_v38 = vadd.f32 %v4827_v50, %v4760_v29  ;;  %v4919_v61 = vadd.f32 %v4825_v59, %v4759_v58  ;;  %v4985_v50 = vld [vmem:[#allocation2 + $0x38] sm:$0xff] }
 0x5d4   : > { %5262 = vrot.lane.b32.xlu0 %v9798_v27, %s7596_s28  ;;  %5260 = vrot.lane.b32.xlu1 %v9800_v22, %s7596_s28 }
 0x5d5   : > { %4952 = vst.msk [vmem:[#allocation3 + $0x34] sm:$0xff] %vm948_vm1, %v4920_v38  ;;  %4951 = vst.msk [vmem:[#allocation3 + $0x24] sm:$0xff] %vm948_vm1, %v4919_v61  ;;  %v4986_v38 = vld [vmem:[#allocation2 + $0x48] sm:$0xff] }
 0x5d6   : > { %v4831_v57 = vpop.permute.xlu0 %4830  ;;  %v4829_v17 = vpop.permute.xlu1 %4828 }
 0x5d7   : > { %v4922_v30 = vadd.f32 %v4831_v57, %v4762_v18  ;;  %v4921_v46 = vadd.f32 %v4829_v17, %v4761_v42 }
 0x5d8   : > { %v5014_v48 = vld [vmem:[#allocation3 + $0x1b] sm:$0xff]  ;;  %5266 = vrot.lane.b32.xlu0 %v9813_v32, %s7596_s28  ;;  %5264 = vrot.lane.b32.xlu1 %v9815_v47, %s7596_s28 }
 0x5d9   : > { %v7188_v40 = vld [vmem:[#allocation3 + $0x19a] sm:$0xff]  ;;  %v7189_v49 = vld [vmem:[#allocation3 + $0x1a2] sm:$0xff]  ;;  %v5046_v44 = vadd.f32 %v5014_v48, %v4982_v15  ;;  %4954 = vst.msk [vmem:[#allocation3 + $0x4c] sm:$0xff] %vm948_vm1, %v4922_v30  ;;  %4953 = vst.msk [vmem:[#allocation3 + $0x3c] sm:$0xff] %vm948_vm1, %v4921_v46 }
 0x5da   : > { %7220 = vst.msk [vmem:[%s9811_s16 + $0xf0] sm:$0xff] %vm948_vm1, %v7188_v40  ;;  %7221 = vst.msk [vmem:[%s9811_s16 + $0xf8] sm:$0xff] %vm948_vm1, %v7189_v49  ;;  %v4835_v4 = vpop.permute.xlu0 %4834  ;;  %v4833_v3 = vpop.permute.xlu1 %4832  ;;  %v4768_v15 = vld [vmem:[#allocation3 + $0x94] sm:$0xff]  ;;  %v4767_v30 = vld [vmem:[#allocation3 + $0x84] sm:$0xff] }
 0x5db   : > { %5078 = vst.msk [vmem:[#allocation3 + $0x1b] sm:$0xff] %vm948_vm1, %v5046_v44  ;;  %v4924_v8 = vadd.f32 %v4835_v4, %v4764_v51  ;;  %v4923_v9 = vadd.f32 %v4833_v3, %v4763_v1  ;;  %v4988_v48 = vld [vmem:[#allocation2 + $0x68] sm:$0xff]  ;;  %v4987_v44 = vld [vmem:[#allocation2 + $0x58] sm:$0xff] }
 0x5dc   : > { %v5016_v54 = vld [vmem:[#allocation3 + $0x33] sm:$0xff]  ;;  %v5015_v36 = vld [vmem:[#allocation3 + $0x23] sm:$0xff]  ;;  %5462 = vrot.lane.b32.xlu0 %v9658_v20, %s7597_s10  ;;  %5268 = vrot.lane.b32.xlu1 %v9828_v39, %s7596_s28 }
 0x5dd   : > { %v5048_v53 = vadd.f32 %v5016_v54, %v4984_v10  ;;  %v5047_v7 = vadd.f32 %v5015_v36, %v4983_v0  ;;  %4956 = vst.msk [vmem:[#allocation3 + $0x64] sm:$0xff] %vm948_vm1, %v4924_v8  ;;  %4955 = vst.msk [vmem:[#allocation3 + $0x54] sm:$0xff] %vm948_vm1, %v4923_v9  ;;  %v4770_v8 = vld [vmem:[#allocation3 + $0xac] sm:$0xff]  ;;  %v4769_v9 = vld [vmem:[#allocation3 + $0x9c] sm:$0xff] }
 0x5de   : > { %v4839_v24 = vpop.permute.xlu0 %4838  ;;  %v4837_v58 = vpop.permute.xlu1 %4836  ;;  %v4989_v54 = vld [vmem:[#allocation2 + $0x78] sm:$0xff] }
 0x5df   : > { %5080 = vst.msk [vmem:[#allocation3 + $0x33] sm:$0xff] %vm948_vm1, %v5048_v53  ;;  %5079 = vst.msk [vmem:[#allocation3 + $0x23] sm:$0xff] %vm948_vm1, %v5047_v7  ;;  %v4926_v29 = vadd.f32 %v4839_v24, %v4766_v23  ;;  %v4925_v59 = vadd.f32 %v4837_v58, %v4765_v60  ;;  %v4990_v7 = vld [vmem:[#allocation2 + $0x88] sm:$0xff] }
 0x5e0   : > { %v5018_v61 = vld [vmem:[#allocation3 + $0x4b] sm:$0xff]  ;;  %5466 = vrot.lane.b32.xlu0 %v9666_v52, %s7597_s10  ;;  %5464 = vrot.lane.b32.xlu1 %v9668_v56, %s7597_s10  ;;  %v5017_v57 = vld [vmem:[#allocation3 + $0x3b] sm:$0xff] }
 0x5e1   : > { %v5050_v18 = vadd.f32 %v5018_v61, %v4986_v38  ;;  %4958 = vst.msk [vmem:[#allocation3 + $0x7c] sm:$0xff] %vm948_vm1, %v4926_v29  ;;  %4957 = vst.msk [vmem:[#allocation3 + $0x6c] sm:$0xff] %vm948_vm1, %v4925_v59  ;;  %v5049_v42 = vadd.f32 %v5017_v57, %v4985_v50  ;;  %v4772_v29 = vld [vmem:[#allocation3 + $0xc4] sm:$0xff]  ;;  %v4771_v59 = vld [vmem:[#allocation3 + $0xb4] sm:$0xff] }
 0x5e2   : > { %v4843_v17 = vpop.permute.xlu0 %4842  ;;  %v4841_v46 = vpop.permute.xlu1 %4840  ;;  %v4991_v61 = vld [vmem:[#allocation2 + $0x98] sm:$0xff] }
 0x5e3   : > { %5082 = vst.msk [vmem:[#allocation3 + $0x4b] sm:$0xff] %vm948_vm1, %v5050_v18  ;;  %v4928_v40 = vadd.f32 %v4843_v17, %v4768_v15  ;;  %v4927_v49 = vadd.f32 %v4841_v46, %v4767_v30  ;;  %5081 = vst.msk [vmem:[#allocation3 + $0x3b] sm:$0xff] %vm948_vm1, %v5049_v42  ;;  %v4992_v42 = vld [vmem:[#allocation2 + $0xa8] sm:$0xff] }
 0x5e4   : > { %v5020_v4 = vld [vmem:[#allocation3 + $0x63] sm:$0xff]  ;;  %5470 = vrot.lane.b32.xlu0 %v9676_v2, %s7597_s10  ;;  %5468 = vrot.lane.b32.xlu1 %v9678_v25, %s7597_s10  ;;  %v5019_v51 = vld [vmem:[#allocation3 + $0x53] sm:$0xff] }
 0x5e5   : > { %v5052_v1 = vadd.f32 %v5020_v4, %v4988_v48  ;;  %4960 = vst.msk [vmem:[#allocation3 + $0x94] sm:$0xff] %vm948_vm1, %v4928_v40  ;;  %4959 = vst.msk [vmem:[#allocation3 + $0x84] sm:$0xff] %vm948_vm1, %v4927_v49  ;;  %v5051_v3 = vadd.f32 %v5019_v51, %v4987_v44  ;;  %v4774_v40 = vld [vmem:[#allocation3 + $0xdc] sm:$0xff]  ;;  %v4773_v49 = vld [vmem:[#allocation3 + $0xcc] sm:$0xff] }
 0x5e6   : > { %v4847_v0 = vpop.permute.xlu0 %4846  ;;  %v4845_v10 = vpop.permute.xlu1 %4844  ;;  %v4993_v4 = vld [vmem:[#allocation2 + $0xb8] sm:$0xff] }
 0x5e7   : > { %5084 = vst.msk [vmem:[#allocation3 + $0x63] sm:$0xff] %vm948_vm1, %v5052_v1  ;;  %v4930_v36 = vadd.f32 %v4847_v0, %v4770_v8  ;;  %v4929_v53 = vadd.f32 %v4845_v10, %v4769_v9  ;;  %5083 = vst.msk [vmem:[#allocation3 + $0x53] sm:$0xff] %vm948_vm1, %v5051_v3  ;;  %v4994_v3 = vld [vmem:[#allocation2 + $0xc8] sm:$0xff] }
 0x5e8   : > { %v5022_v24 = vld [vmem:[#allocation3 + $0x7b] sm:$0xff]  ;;  %5474 = vrot.lane.b32.xlu0 %v9686_v45, %s7597_s10  ;;  %5472 = vrot.lane.b32.xlu1 %v9688_v6, %s7597_s10  ;;  %v5021_v23 = vld [vmem:[#allocation3 + $0x6b] sm:$0xff] }
 0x5e9   : > { %v5054_v60 = vadd.f32 %v5022_v24, %v4990_v7  ;;  %4962 = vst.msk [vmem:[#allocation3 + $0xac] sm:$0xff] %vm948_vm1, %v4930_v36  ;;  %4961 = vst.msk [vmem:[#allocation3 + $0x9c] sm:$0xff] %vm948_vm1, %v4929_v53  ;;  %v5053_v58 = vadd.f32 %v5021_v23, %v4989_v54  ;;  %v4776_v36 = vld [vmem:[#allocation3 + $0xf4] sm:$0xff]  ;;  %v4775_v53 = vld [vmem:[#allocation3 + $0xe4] sm:$0xff] }
 0x5ea   : > { %v4851_v50 = vpop.permute.xlu0 %4850  ;;  %v4849_v38 = vpop.permute.xlu1 %4848  ;;  %v4995_v24 = vld [vmem:[#allocation2 + $0xd8] sm:$0xff] }
 0x5eb   : > { %5086 = vst.msk [vmem:[#allocation3 + $0x7b] sm:$0xff] %vm948_vm1, %v5054_v60  ;;  %v4932_v57 = vadd.f32 %v4851_v50, %v4772_v29  ;;  %v4931_v18 = vadd.f32 %v4849_v38, %v4771_v59  ;;  %5085 = vst.msk [vmem:[#allocation3 + $0x6b] sm:$0xff] %vm948_vm1, %v5053_v58  ;;  %v4996_v58 = vld [vmem:[#allocation2 + $0xe8] sm:$0xff] }
 0x5ec   : > { %v5024_v17 = vld [vmem:[#allocation3 + $0x93] sm:$0xff]  ;;  %5478 = vrot.lane.b32.xlu0 %v9696_v35, %s7597_s10  ;;  %5476 = vrot.lane.b32.xlu1 %v9698_v12, %s7597_s10  ;;  %v5023_v15 = vld [vmem:[#allocation3 + $0x83] sm:$0xff] }
 0x5ed   : > { %v5056_v30 = vadd.f32 %v5024_v17, %v4992_v42  ;;  %4964 = vst.msk [vmem:[#allocation3 + $0xc4] sm:$0xff] %vm948_vm1, %v4932_v57  ;;  %4963 = vst.msk [vmem:[#allocation3 + $0xb4] sm:$0xff] %vm948_vm1, %v4931_v18  ;;  %v5055_v46 = vadd.f32 %v5023_v15, %v4991_v61  ;;  %v4778_v57 = vld [vmem:[#allocation3 + $0x10c] sm:$0xff]  ;;  %v4777_v18 = vld [vmem:[#allocation3 + $0xfc] sm:$0xff] }
 0x5ee   : > { %v4855_v48 = vpop.permute.xlu0 %4854  ;;  %v4853_v44 = vpop.permute.xlu1 %4852  ;;  %v4997_v17 = vld [vmem:[#allocation2 + $0xf8] sm:$0xff] }
 0x5ef   : > { %5088 = vst.msk [vmem:[#allocation3 + $0x93] sm:$0xff] %vm948_vm1, %v5056_v30  ;;  %v4934_v51 = vadd.f32 %v4855_v48, %v4774_v40  ;;  %v4933_v1 = vadd.f32 %v4853_v44, %v4773_v49  ;;  %5087 = vst.msk [vmem:[#allocation3 + $0x83] sm:$0xff] %vm948_vm1, %v5055_v46  ;;  %v4998_v46 = vld [vmem:[#allocation2 + $0x108] sm:$0xff] }
 0x5f0   : > { %v5026_v0 = vld [vmem:[#allocation3 + $0xab] sm:$0xff]  ;;  %5482 = vrot.lane.b32.xlu0 %v9706_v41, %s7597_s10  ;;  %5480 = vrot.lane.b32.xlu1 %v9708_v63, %s7597_s10  ;;  %v5025_v8 = vld [vmem:[#allocation3 + $0x9b] sm:$0xff] }
 0x5f1   : > { %v5058_v9 = vadd.f32 %v5026_v0, %v4994_v3  ;;  %4966 = vst.msk [vmem:[#allocation3 + $0xdc] sm:$0xff] %vm948_vm1, %v4934_v51  ;;  %4965 = vst.msk [vmem:[#allocation3 + $0xcc] sm:$0xff] %vm948_vm1, %v4933_v1  ;;  %v5057_v10 = vadd.f32 %v5025_v8, %v4993_v4  ;;  %v4780_v51 = vld [vmem:[#allocation3 + $0x124] sm:$0xff]  ;;  %v4779_v1 = vld [vmem:[#allocation3 + $0x114] sm:$0xff] }
 0x5f2   : > { %v4859_v54 = vpop.permute.xlu0 %4858  ;;  %v4857_v7 = vpop.permute.xlu1 %4856  ;;  %v4999_v0 = vld [vmem:[#allocation2 + $0x118] sm:$0xff] }
 0x5f3   : > { %5090 = vst.msk [vmem:[#allocation3 + $0xab] sm:$0xff] %vm948_vm1, %v5058_v9  ;;  %v4936_v23 = vadd.f32 %v4859_v54, %v4776_v36  ;;  %v4935_v60 = vadd.f32 %v4857_v7, %v4775_v53  ;;  %5089 = vst.msk [vmem:[#allocation3 + $0x9b] sm:$0xff] %vm948_vm1, %v5057_v10  ;;  %v5000_v10 = vld [vmem:[#allocation2 + $0x128] sm:$0xff] }
 0x5f4   : > { %v5028_v50 = vld [vmem:[#allocation3 + $0xc3] sm:$0xff]  ;;  %5486 = vrot.lane.b32.xlu0 %v9716_v37, %s7597_s10  ;;  %5484 = vrot.lane.b32.xlu1 %v9718_v11, %s7597_s10  ;;  %v5027_v29 = vld [vmem:[#allocation3 + $0xb3] sm:$0xff] }
 0x5f5   : > { %v5060_v59 = vadd.f32 %v5028_v50, %v4996_v58  ;;  %4968 = vst.msk [vmem:[#allocation3 + $0xf4] sm:$0xff] %vm948_vm1, %v4936_v23  ;;  %4967 = vst.msk [vmem:[#allocation3 + $0xe4] sm:$0xff] %vm948_vm1, %v4935_v60  ;;  %v5059_v38 = vadd.f32 %v5027_v29, %v4995_v24  ;;  %v4782_v23 = vld [vmem:[#allocation3 + $0x13c] sm:$0xff]  ;;  %v4781_v60 = vld [vmem:[#allocation3 + $0x12c] sm:$0xff] }
 0x5f6   : > { %v4863_v61 = vpop.permute.xlu0 %4862  ;;  %v4861_v42 = vpop.permute.xlu1 %4860  ;;  %v5001_v50 = vld [vmem:[#allocation2 + $0x138] sm:$0xff] }
 0x5f7   : > { %5092 = vst.msk [vmem:[#allocation3 + $0xc3] sm:$0xff] %vm948_vm1, %v5060_v59  ;;  %v4938_v15 = vadd.f32 %v4863_v61, %v4778_v57  ;;  %v4937_v30 = vadd.f32 %v4861_v42, %v4777_v18  ;;  %5091 = vst.msk [vmem:[#allocation3 + $0xb3] sm:$0xff] %vm948_vm1, %v5059_v38  ;;  %v5002_v38 = vld [vmem:[#allocation2 + $0x148] sm:$0xff] }
 0x5f8   : > { %v5030_v48 = vld [vmem:[#allocation3 + $0xdb] sm:$0xff]  ;;  %5490 = vrot.lane.b32.xlu0 %v9726_v26, %s7597_s10  ;;  %5488 = vrot.lane.b32.xlu1 %v9728_v16, %s7597_s10  ;;  %v5029_v40 = vld [vmem:[#allocation3 + $0xcb] sm:$0xff] }
 0x5f9   : > { %v5062_v49 = vadd.f32 %v5030_v48, %v4998_v46  ;;  %4970 = vst.msk [vmem:[#allocation3 + $0x10c] sm:$0xff] %vm948_vm1, %v4938_v15  ;;  %4969 = vst.msk [vmem:[#allocation3 + $0xfc] sm:$0xff] %vm948_vm1, %v4937_v30  ;;  %v5061_v44 = vadd.f32 %v5029_v40, %v4997_v17  ;;  %v4784_v15 = vld [vmem:[#allocation3 + $0x154] sm:$0xff]  ;;  %v4783_v30 = vld [vmem:[#allocation3 + $0x144] sm:$0xff] }
 0x5fa   : > { %v4867_v4 = vpop.permute.xlu0 %4866  ;;  %v4865_v3 = vpop.permute.xlu1 %4864  ;;  %v5003_v48 = vld [vmem:[#allocation2 + $0x158] sm:$0xff] }
 0x5fb   : > { %5094 = vst.msk [vmem:[#allocation3 + $0xdb] sm:$0xff] %vm948_vm1, %v5062_v49  ;;  %v4940_v8 = vadd.f32 %v4867_v4, %v4780_v51  ;;  %v4939_v9 = vadd.f32 %v4865_v3, %v4779_v1  ;;  %5093 = vst.msk [vmem:[#allocation3 + $0xcb] sm:$0xff] %vm948_vm1, %v5061_v44  ;;  %v5004_v44 = vld [vmem:[#allocation2 + $0x168] sm:$0xff] }
 0x5fc   : > { %v5032_v54 = vld [vmem:[#allocation3 + $0xf3] sm:$0xff]  ;;  %5494 = vrot.lane.b32.xlu0 %v9736_v14, %s7597_s10  ;;  %5492 = vrot.lane.b32.xlu1 %v9738_v34, %s7597_s10  ;;  %v5031_v36 = vld [vmem:[#allocation3 + $0xe3] sm:$0xff] }
 0x5fd   : > { %v5064_v53 = vadd.f32 %v5032_v54, %v5000_v10  ;;  %4972 = vst.msk [vmem:[#allocation3 + $0x124] sm:$0xff] %vm948_vm1, %v4940_v8  ;;  %4971 = vst.msk [vmem:[#allocation3 + $0x114] sm:$0xff] %vm948_vm1, %v4939_v9  ;;  %v5063_v7 = vadd.f32 %v5031_v36, %v4999_v0  ;;  %v4786_v8 = vld [vmem:[#allocation3 + $0x16c] sm:$0xff]  ;;  %v4785_v9 = vld [vmem:[#allocation3 + $0x15c] sm:$0xff] }
 0x5fe   : > { %v4871_v24 = vpop.permute.xlu0 %4870  ;;  %v4869_v58 = vpop.permute.xlu1 %4868  ;;  %v5005_v54 = vld [vmem:[#allocation2 + $0x178] sm:$0xff] }
 0x5ff   : > { %5096 = vst.msk [vmem:[#allocation3 + $0xf3] sm:$0xff] %vm948_vm1, %v5064_v53  ;;  %v4942_v29 = vadd.f32 %v4871_v24, %v4782_v23  ;;  %v4941_v59 = vadd.f32 %v4869_v58, %v4781_v60  ;;  %5095 = vst.msk [vmem:[#allocation3 + $0xe3] sm:$0xff] %vm948_vm1, %v5063_v7  ;;  %v5006_v7 = vld [vmem:[#allocation2 + $0x188] sm:$0xff] }
 0x600   : > { %v5034_v61 = vld [vmem:[#allocation3 + $0x10b] sm:$0xff]  ;;  %5498 = vrot.lane.b32.xlu0 %v9746_v62, %s7597_s10  ;;  %5496 = vrot.lane.b32.xlu1 %v9748_v33, %s7597_s10  ;;  %v5033_v57 = vld [vmem:[#allocation3 + $0xfb] sm:$0xff] }
 0x601   : > { %v5066_v18 = vadd.f32 %v5034_v61, %v5002_v38  ;;  %4974 = vst.msk [vmem:[#allocation3 + $0x13c] sm:$0xff] %vm948_vm1, %v4942_v29  ;;  %4973 = vst.msk [vmem:[#allocation3 + $0x12c] sm:$0xff] %vm948_vm1, %v4941_v59  ;;  %v5065_v42 = vadd.f32 %v5033_v57, %v5001_v50  ;;  %v4788_v29 = vld [vmem:[#allocation3 + $0x184] sm:$0xff]  ;;  %v4787_v59 = vld [vmem:[#allocation3 + $0x174] sm:$0xff] }
 0x602   : > { %v4875_v17 = vpop.permute.xlu0 %4874  ;;  %v4873_v46 = vpop.permute.xlu1 %4872  ;;  %v5007_v61 = vld [vmem:[#allocation2 + $0x198] sm:$0xff] }
 0x603   : > { %5098 = vst.msk [vmem:[#allocation3 + $0x10b] sm:$0xff] %vm948_vm1, %v5066_v18  ;;  %v4944_v40 = vadd.f32 %v4875_v17, %v4784_v15  ;;  %v4943_v49 = vadd.f32 %v4873_v46, %v4783_v30  ;;  %5097 = vst.msk [vmem:[#allocation3 + $0xfb] sm:$0xff] %vm948_vm1, %v5065_v42  ;;  %v5008_v42 = vld [vmem:[#allocation2 + $0x1a8] sm:$0xff] }
 0x604   : > { %v5036_v4 = vld [vmem:[#allocation3 + $0x123] sm:$0xff]  ;;  %5502 = vrot.lane.b32.xlu0 %v9756_v21, %s7597_s10  ;;  %5500 = vrot.lane.b32.xlu1 %v9758_v31, %s7597_s10  ;;  %v5035_v51 = vld [vmem:[#allocation3 + $0x113] sm:$0xff] }
 0x605   : > { %v5068_v1 = vadd.f32 %v5036_v4, %v5004_v44  ;;  %4976 = vst.msk [vmem:[#allocation3 + $0x154] sm:$0xff] %vm948_vm1, %v4944_v40  ;;  %4975 = vst.msk [vmem:[#allocation3 + $0x144] sm:$0xff] %vm948_vm1, %v4943_v49  ;;  %v5067_v3 = vadd.f32 %v5035_v51, %v5003_v48  ;;  %v5142_v48 = vld [vmem:[#allocation3 + $0x1a] sm:$0xff]  ;;  %v4789_v49 = vld [vmem:[#allocation3 + $0x18c] sm:$0xff] }
 0x606   : > { %v4879_v0 = vpop.permute.xlu0 %4878  ;;  %v4877_v10 = vpop.permute.xlu1 %4876  ;;  %v5009_v4 = vld [vmem:[#allocation2 + $0x1b8] sm:$0xff] }
 0x607   : > { %5100 = vst.msk [vmem:[#allocation3 + $0x123] sm:$0xff] %vm948_vm1, %v5068_v1  ;;  %v4946_v36 = vadd.f32 %v4879_v0, %v4786_v8  ;;  %v4945_v53 = vadd.f32 %v4877_v10, %v4785_v9  ;;  %5099 = vst.msk [vmem:[#allocation3 + $0x113] sm:$0xff] %vm948_vm1, %v5067_v3  ;;  %v5010_v3 = vld [vmem:[#allocation2 + $0x1c8] sm:$0xff] }
 0x608   : > { %v5038_v24 = vld [vmem:[#allocation3 + $0x13b] sm:$0xff]  ;;  %5506 = vrot.lane.b32.xlu0 %v9766_v19, %s7597_s10  ;;  %5504 = vrot.lane.b32.xlu1 %v9768_v28, %s7597_s10  ;;  %v5037_v23 = vld [vmem:[#allocation3 + $0x12b] sm:$0xff] }
 0x609   : > { %v5070_v60 = vadd.f32 %v5038_v24, %v5006_v7  ;;  %4978 = vst.msk [vmem:[#allocation3 + $0x16c] sm:$0xff] %vm948_vm1, %v4946_v36  ;;  %4977 = vst.msk [vmem:[#allocation3 + $0x15c] sm:$0xff] %vm948_vm1, %v4945_v53  ;;  %v5069_v58 = vadd.f32 %v5037_v23, %v5005_v54  ;;  %v5144_v36 = vld [vmem:[#allocation3 + $0x32] sm:$0xff]  ;;  %v5143_v53 = vld [vmem:[#allocation3 + $0x22] sm:$0xff] }
 0x60a   : > { %v4883_v50 = vpop.permute.xlu0 %4882  ;;  %v4881_v38 = vpop.permute.xlu1 %4880 }
 0x60b   : > { %5102 = vst.msk [vmem:[#allocation3 + $0x13b] sm:$0xff] %vm948_vm1, %v5070_v60  ;;  %v4948_v57 = vadd.f32 %v4883_v50, %v4788_v29  ;;  %v4947_v18 = vadd.f32 %v4881_v38, %v4787_v59  ;;  %5101 = vst.msk [vmem:[#allocation3 + $0x12b] sm:$0xff] %vm948_vm1, %v5069_v58  ;;  %v5011_v60 = vld [vmem:[#allocation2 + $0x1d8] sm:$0xff] }
 0x60c   : > { %v5040_v17 = vld [vmem:[#allocation3 + $0x153] sm:$0xff]  ;;  %5510 = vrot.lane.b32.xlu0 %v9776_v55, %s7597_s10  ;;  %5508 = vrot.lane.b32.xlu1 %v9778_v5, %s7597_s10  ;;  %v5039_v15 = vld [vmem:[#allocation3 + $0x143] sm:$0xff] }
 0x60d   : > { %v5072_v30 = vadd.f32 %v5040_v17, %v5008_v42  ;;  %4980 = vst.msk [vmem:[#allocation3 + $0x184] sm:$0xff] %vm948_vm1, %v4948_v57  ;;  %4979 = vst.msk [vmem:[#allocation3 + $0x174] sm:$0xff] %vm948_vm1, %v4947_v18  ;;  %v5071_v46 = vadd.f32 %v5039_v15, %v5007_v61  ;;  %v5146_v61 = vld [vmem:[#allocation3 + $0x4a] sm:$0xff]  ;;  %v5145_v57 = vld [vmem:[#allocation3 + $0x3a] sm:$0xff] }
 0x60e   : > { %v5207_v40 = vpop.permute.xlu0 %5206  ;;  %v4885_v44 = vpop.permute.xlu1 %4884 }
 0x60f   : > { %5104 = vst.msk [vmem:[#allocation3 + $0x153] sm:$0xff] %vm948_vm1, %v5072_v30  ;;  %v5302_v51 = vadd.f32 %v5207_v40, %v5142_v48  ;;  %v4949_v1 = vadd.f32 %v4885_v44, %v4789_v49  ;;  %5103 = vst.msk [vmem:[#allocation3 + $0x143] sm:$0xff] %vm948_vm1, %v5071_v46  ;;  %v5148_v48 = vld [vmem:[#allocation3 + $0x62] sm:$0xff]  ;;  %v5147_v40 = vld [vmem:[#allocation3 + $0x52] sm:$0xff] }
 0x610   : > { %v5042_v0 = vld [vmem:[#allocation3 + $0x16b] sm:$0xff]  ;;  %5514 = vrot.lane.b32.xlu0 %v9788_v43, %s7597_s10  ;;  %5512 = vrot.lane.b32.xlu1 %v9790_v13, %s7597_s10  ;;  %v5041_v8 = vld [vmem:[#allocation3 + $0x15b] sm:$0xff] }
 0x611   : > { %v5074_v9 = vadd.f32 %v5042_v0, %v5010_v3  ;;  %5334 = vst.msk [vmem:[#allocation3 + $0x1a] sm:$0xff] %vm948_vm1, %v5302_v51  ;;  %4981 = vst.msk [vmem:[#allocation3 + $0x18c] sm:$0xff] %vm948_vm1, %v4949_v1  ;;  %v5073_v10 = vadd.f32 %v5041_v8, %v5009_v4  ;;  %v5150_v1 = vld [vmem:[#allocation3 + $0x7a] sm:$0xff]  ;;  %v5149_v3 = vld [vmem:[#allocation3 + $0x6a] sm:$0xff] }
 0x612   : > { %v5211_v54 = vpop.permute.xlu0 %5210  ;;  %v5209_v7 = vpop.permute.xlu1 %5208 }
 0x613   : > { %5106 = vst.msk [vmem:[#allocation3 + $0x16b] sm:$0xff] %vm948_vm1, %v5074_v9  ;;  %v5304_v24 = vadd.f32 %v5211_v54, %v5144_v36  ;;  %v5303_v23 = vadd.f32 %v5209_v7, %v5143_v53  ;;  %5105 = vst.msk [vmem:[#allocation3 + $0x15b] sm:$0xff] %vm948_vm1, %v5073_v10  ;;  %v5152_v10 = vld [vmem:[#allocation3 + $0x92] sm:$0xff]  ;;  %v5151_v54 = vld [vmem:[#allocation3 + $0x82] sm:$0xff] }
 0x614   : > { %5518 = vrot.lane.b32.xlu0 %v9798_v27, %s7597_s10  ;;  %5516 = vrot.lane.b32.xlu1 %v9800_v22, %s7597_s10  ;;  %v5044_v58 = vld [vmem:[#allocation3 + $0x183] sm:$0xff]  ;;  %v5043_v50 = vld [vmem:[#allocation3 + $0x173] sm:$0xff] }
 0x615   : > { %5336 = vst.msk [vmem:[#allocation3 + $0x32] sm:$0xff] %vm948_vm1, %v5304_v24  ;;  %5335 = vst.msk [vmem:[#allocation3 + $0x22] sm:$0xff] %vm948_vm1, %v5303_v23  ;;  %v5076_v29 = vadd.f32 %v9813_v32, %v5044_v58  ;;  %v5075_v59 = vadd.f32 %v5043_v50, %v5011_v60  ;;  %v5153_v24 = vld [vmem:[#allocation3 + $0x9a] sm:$0xff]  ;;  %v5155_v50 = vld [vmem:[#allocation3 + $0xb2] sm:$0xff] }
 0x616   : > { %v5215_v38 = vpop.permute.xlu0 %5214  ;;  %v5213_v18 = vpop.permute.xlu1 %5212 }
 0x617   : > { %v5306_v42 = vadd.f32 %v5215_v38, %v5146_v61  ;;  %v5305_v17 = vadd.f32 %v5213_v18, %v5145_v57  ;;  %5108 = vst.msk [vmem:[#allocation3 + $0x183] sm:$0xff] %vm948_vm1, %v5076_v29  ;;  %5107 = vst.msk [vmem:[#allocation3 + $0x173] sm:$0xff] %vm948_vm1, %v5075_v59  ;;  %v5157_v61 = vld [vmem:[#allocation3 + $0xca] sm:$0xff] }
 0x618   : > { %5522 = vrot.lane.b32.xlu0 %v9813_v32, %s7597_s10  ;;  %5520 = vrot.lane.b32.xlu1 %v9815_v47, %s7597_s10  ;;  %v5045_v15 = vld [vmem:[#allocation3 + $0x18b] sm:$0xff] }
 0x619   : > { %5338 = vst.msk [vmem:[#allocation3 + $0x4a] sm:$0xff] %vm948_vm1, %v5306_v42  ;;  %5337 = vst.msk [vmem:[#allocation3 + $0x3a] sm:$0xff] %vm948_vm1, %v5305_v17  ;;  %v5077_v30 = vadd.f32 %v9828_v39, %v5045_v15  ;;  %v5159_v17 = vld [vmem:[#allocation3 + $0xe2] sm:$0xff] }
 0x61a   : > { %v5219_v46 = vpop.permute.xlu0 %5218  ;;  %v5217_v49 = vpop.permute.xlu1 %5216 }
 0x61b   : > { %v5308_v44 = vadd.f32 %v5219_v46, %v5148_v48  ;;  %v5307_v4 = vadd.f32 %v5217_v49, %v5147_v40  ;;  %5109 = vst.msk [vmem:[#allocation3 + $0x18b] sm:$0xff] %vm948_vm1, %v5077_v30  ;;  %v5161_v48 = vld [vmem:[#allocation3 + $0xfa] sm:$0xff] }
 0x61c   : > { %5718 = vrot.lane.b32.xlu0 %v9658_v20, %s7598_s11  ;;  %5524 = vrot.lane.b32.xlu1 %v9828_v39, %s7597_s10 }
 0x61d   : > { %5340 = vst.msk [vmem:[#allocation3 + $0x62] sm:$0xff] %vm948_vm1, %v5308_v44  ;;  %5339 = vst.msk [vmem:[#allocation3 + $0x52] sm:$0xff] %vm948_vm1, %v5307_v4  ;;  %v5163_v4 = vld [vmem:[#allocation3 + $0x112] sm:$0xff] }
 0x61e   : > { %v5223_v51 = vpop.permute.xlu0 %5222  ;;  %v5221_v0 = vpop.permute.xlu1 %5220 }
 0x61f   : > { %v5310_v8 = vadd.f32 %v5223_v51, %v5150_v1  ;;  %v5309_v9 = vadd.f32 %v5221_v0, %v5149_v3  ;;  %v5165_v0 = vld [vmem:[#allocation3 + $0x12a] sm:$0xff] }
 0x620   : > { %5722 = vrot.lane.b32.xlu0 %v9666_v52, %s7598_s11  ;;  %5720 = vrot.lane.b32.xlu1 %v9668_v56, %s7598_s11  ;;  %v5154_v56 = vld [vmem:[#allocation3 + $0xaa] sm:$0xff] }
 0x621   : > { %5342 = vst.msk [vmem:[#allocation3 + $0x7a] sm:$0xff] %vm948_vm1, %v5310_v8  ;;  %5341 = vst.msk [vmem:[#allocation3 + $0x6a] sm:$0xff] %vm948_vm1, %v5309_v9 }
 0x622   : > { %v5227_v20 = vpop.permute.xlu0 %5226  ;;  %v5225_v36 = vpop.permute.xlu1 %5224 }
 0x623   : > { %v5312_v53 = vadd.f32 %v5227_v20, %v5152_v10  ;;  %v5311_v7 = vadd.f32 %v5225_v36, %v5151_v54  ;;  %v5167_v10 = vld [vmem:[#allocation3 + $0x142] sm:$0xff] }
 0x624   : > { %5726 = vrot.lane.b32.xlu0 %v9676_v2, %s7598_s11  ;;  %5724 = vrot.lane.b32.xlu1 %v9678_v25, %s7598_s11  ;;  %v5156_v25 = vld [vmem:[#allocation3 + $0xc2] sm:$0xff] }
 0x625   : > { %5344 = vst.msk [vmem:[#allocation3 + $0x92] sm:$0xff] %vm948_vm1, %v5312_v53  ;;  %5343 = vst.msk [vmem:[#allocation3 + $0x82] sm:$0xff] %vm948_vm1, %v5311_v7  ;;  %v5169_v7 = vld [vmem:[#allocation3 + $0x15a] sm:$0xff] }
 0x626   : > { %v5231_v52 = vpop.permute.xlu0 %5230  ;;  %v5229_v23 = vpop.permute.xlu1 %5228 }
 0x627   : > { %v5314_v60 = vadd.f32 %v5231_v52, %v5154_v56  ;;  %v5313_v58 = vadd.f32 %v5229_v23, %v5153_v24  ;;  %v5171_v23 = vld [vmem:[#allocation3 + $0x172] sm:$0xff] }
 0x628   : > { %5730 = vrot.lane.b32.xlu0 %v9686_v45, %s7598_s11  ;;  %5728 = vrot.lane.b32.xlu1 %v9688_v6, %s7598_s11  ;;  %v5158_v6 = vld [vmem:[#allocation3 + $0xda] sm:$0xff] }
 0x629   : > { %5346 = vst.msk [vmem:[#allocation3 + $0xaa] sm:$0xff] %vm948_vm1, %v5314_v60  ;;  %5345 = vst.msk [vmem:[#allocation3 + $0x9a] sm:$0xff] %vm948_vm1, %v5313_v58 }
 0x62a   : > { %v5235_v2 = vpop.permute.xlu0 %5234  ;;  %v5233_v29 = vpop.permute.xlu1 %5232 }
 0x62b   : > { %v5316_v59 = vadd.f32 %v5235_v2, %v5156_v25  ;;  %v5315_v38 = vadd.f32 %v5233_v29, %v5155_v50  ;;  %v5173_v50 = vld [vmem:[#allocation3 + $0x18a] sm:$0xff] }
 0x62c   : > { %5734 = vrot.lane.b32.xlu0 %v9696_v35, %s7598_s11  ;;  %5732 = vrot.lane.b32.xlu1 %v9698_v12, %s7598_s11  ;;  %v5160_v12 = vld [vmem:[#allocation3 + $0xf2] sm:$0xff] }
 0x62d   : > { %5348 = vst.msk [vmem:[#allocation3 + $0xc2] sm:$0xff] %vm948_vm1, %v5316_v59  ;;  %5347 = vst.msk [vmem:[#allocation3 + $0xb2] sm:$0xff] %vm948_vm1, %v5315_v38  ;;  %v5399_v38 = vld [vmem:[#allocation3 + $0x21] sm:$0xff] }
 0x62e   : > { %v5239_v45 = vpop.permute.xlu0 %5238  ;;  %v5237_v57 = vpop.permute.xlu1 %5236 }
 0x62f   : > { %v5318_v18 = vadd.f32 %v5239_v45, %v5158_v6  ;;  %v5317_v42 = vadd.f32 %v5237_v57, %v5157_v61  ;;  %v5401_v57 = vld [vmem:[#allocation3 + $0x39] sm:$0xff] }
 0x630   : > { %5738 = vrot.lane.b32.xlu0 %v9706_v41, %s7598_s11  ;;  %5736 = vrot.lane.b32.xlu1 %v9708_v63, %s7598_s11  ;;  %v5162_v63 = vld [vmem:[#allocation3 + $0x10a] sm:$0xff] }
 0x631   : > { %5350 = vst.msk [vmem:[#allocation3 + $0xda] sm:$0xff] %vm948_vm1, %v5318_v18  ;;  %5349 = vst.msk [vmem:[#allocation3 + $0xca] sm:$0xff] %vm948_vm1, %v5317_v42 }
 0x632   : > { %v5243_v35 = vpop.permute.xlu0 %5242  ;;  %v5241_v15 = vpop.permute.xlu1 %5240 }
 0x633   : > { %v5320_v30 = vadd.f32 %v5243_v35, %v5160_v12  ;;  %v5319_v46 = vadd.f32 %v5241_v15, %v5159_v17  ;;  %v5403_v12 = vld [vmem:[#allocation3 + $0x51] sm:$0xff] }
 0x634   : > { %5742 = vrot.lane.b32.xlu0 %v9716_v37, %s7598_s11  ;;  %5740 = vrot.lane.b32.xlu1 %v9718_v11, %s7598_s11  ;;  %v5164_v11 = vld [vmem:[#allocation3 + $0x122] sm:$0xff] }
 0x635   : > { %5352 = vst.msk [vmem:[#allocation3 + $0xf2] sm:$0xff] %vm948_vm1, %v5320_v30  ;;  %5351 = vst.msk [vmem:[#allocation3 + $0xe2] sm:$0xff] %vm948_vm1, %v5319_v46  ;;  %v10055_v46 = vld [vmem:[#allocation2 + $0x8] sm:$0xff] }
 0x636   : > { %v5247_v41 = vpop.permute.xlu0 %5246  ;;  %v5245_v40 = vpop.permute.xlu1 %5244 }
 0x637   : > { %v5322_v49 = vadd.f32 %v5247_v41, %v5162_v63  ;;  %v5321_v44 = vadd.f32 %v5245_v40, %v5161_v48  ;;  %v5405_v41 = vld [vmem:[#allocation3 + $0x69] sm:$0xff] }
 0x638   : > { %5746 = vrot.lane.b32.xlu0 %v9726_v26, %s7598_s11  ;;  %5744 = vrot.lane.b32.xlu1 %v9728_v16, %s7598_s11  ;;  %v5166_v16 = vld [vmem:[#allocation3 + $0x13a] sm:$0xff] }
 0x639   : > { %5354 = vst.msk [vmem:[#allocation3 + $0x10a] sm:$0xff] %vm948_vm1, %v5322_v49  ;;  %5353 = vst.msk [vmem:[#allocation3 + $0xfa] sm:$0xff] %vm948_vm1, %v5321_v44  ;;  %v10063_v49 = vld [vmem:[#allocation2 + $0x28] sm:$0xff]  ;;  %v10065_v44 = vld [vmem:[#allocation2 + $0x18] sm:$0xff] }
 0x63a   : > { %v5251_v37 = vpop.permute.xlu0 %5250  ;;  %v5249_v51 = vpop.permute.xlu1 %5248 }
 0x63b   : > { %v5324_v1 = vadd.f32 %v5251_v37, %v5164_v11  ;;  %v5323_v3 = vadd.f32 %v5249_v51, %v5163_v4  ;;  %v5408_v37 = vld [vmem:[#allocation3 + $0x91] sm:$0xff]  ;;  %v5407_v11 = vld [vmem:[#allocation3 + $0x81] sm:$0xff] }
 0x63c   : > { %5750 = vrot.lane.b32.xlu0 %v9736_v14, %s7598_s11  ;;  %5748 = vrot.lane.b32.xlu1 %v9738_v34, %s7598_s11  ;;  %v5168_v34 = vld [vmem:[#allocation3 + $0x152] sm:$0xff] }
 0x63d   : > { %5356 = vst.msk [vmem:[#allocation3 + $0x122] sm:$0xff] %vm948_vm1, %v5324_v1  ;;  %5355 = vst.msk [vmem:[#allocation3 + $0x112] sm:$0xff] %vm948_vm1, %v5323_v3  ;;  %v10073_v3 = vld [vmem:[#allocation2 + $0x48] sm:$0xff] }
 0x63e   : > { %v5255_v26 = vpop.permute.xlu0 %5254  ;;  %v5253_v8 = vpop.permute.xlu1 %5252 }
 0x63f   : > { %v5326_v9 = vadd.f32 %v5255_v26, %v5166_v16  ;;  %v5325_v20 = vadd.f32 %v5253_v8, %v5165_v0  ;;  %v10075_v26 = vld [vmem:[#allocation2 + $0x38] sm:$0xff]  ;;  %v5410_v0 = vld [vmem:[#allocation3 + $0xa9] sm:$0xff] }
 0x640   : > { %5754 = vrot.lane.b32.xlu0 %v9746_v62, %s7598_s11  ;;  %5752 = vrot.lane.b32.xlu1 %v9748_v33, %s7598_s11  ;;  %v5170_v33 = vld [vmem:[#allocation3 + $0x16a] sm:$0xff]  ;;  %v5409_v8 = vld [vmem:[#allocation3 + $0x99] sm:$0xff] }
 0x641   : > { %5358 = vst.msk [vmem:[#allocation3 + $0x13a] sm:$0xff] %vm948_vm1, %v5326_v9  ;;  %5357 = vst.msk [vmem:[#allocation3 + $0x12a] sm:$0xff] %vm948_vm1, %v5325_v20 }
 0x642   : > { %v5259_v14 = vpop.permute.xlu0 %5258  ;;  %v5257_v54 = vpop.permute.xlu1 %5256 }
 0x643   : > { %v5328_v36 = vadd.f32 %v5259_v14, %v5168_v34  ;;  %v5327_v53 = vadd.f32 %v5257_v54, %v5167_v10  ;;  %v10083_v34 = vld [vmem:[#allocation2 + $0x68] sm:$0xff]  ;;  %v10085_v10 = vld [vmem:[#allocation2 + $0x58] sm:$0xff] }
 0x644   : > { %5758 = vrot.lane.b32.xlu0 %v9756_v21, %s7598_s11  ;;  %5756 = vrot.lane.b32.xlu1 %v9758_v31, %s7598_s11  ;;  %v5172_v31 = vld [vmem:[#allocation3 + $0x182] sm:$0xff] }
 0x645   : > { %5360 = vst.msk [vmem:[#allocation3 + $0x152] sm:$0xff] %vm948_vm1, %v5328_v36  ;;  %5359 = vst.msk [vmem:[#allocation3 + $0x142] sm:$0xff] %vm948_vm1, %v5327_v53  ;;  %v5412_v36 = vld [vmem:[#allocation3 + $0xc1] sm:$0xff]  ;;  %v5411_v53 = vld [vmem:[#allocation3 + $0xb1] sm:$0xff] }
 0x646   : > { %v5263_v62 = vpop.permute.xlu0 %5262  ;;  %v5261_v52 = vpop.permute.xlu1 %5260 }
 0x647   : > { %v5330_v56 = vadd.f32 %v5263_v62, %v5170_v33  ;;  %v5329_v24 = vadd.f32 %v5261_v52, %v5169_v7  ;;  %v10093_v52 = vld [vmem:[#allocation2 + $0x88] sm:$0xff] }
 0x648   : > { %5762 = vrot.lane.b32.xlu0 %v9766_v19, %s7598_s11  ;;  %5760 = vrot.lane.b32.xlu1 %v9768_v28, %s7598_s11  ;;  %v5398_v19 = vld [vmem:[#allocation3 + $0x19] sm:$0xff] }
 0x649   : > { %5362 = vst.msk [vmem:[#allocation3 + $0x16a] sm:$0xff] %vm948_vm1, %v5330_v56  ;;  %5361 = vst.msk [vmem:[#allocation3 + $0x15a] sm:$0xff] %vm948_vm1, %v5329_v24  ;;  %v10095_v56 = vld [vmem:[#allocation2 + $0x78] sm:$0xff] }
 0x64a   : > { %v5267_v21 = vpop.permute.xlu0 %5266  ;;  %v5265_v60 = vpop.permute.xlu1 %5264 }
 0x64b   : > { %v5332_v58 = vadd.f32 %v5267_v21, %v5172_v31  ;;  %v5331_v2 = vadd.f32 %v5265_v60, %v5171_v23  ;;  %v5414_v21 = vld [vmem:[#allocation3 + $0xd9] sm:$0xff]  ;;  %v5413_v31 = vld [vmem:[#allocation3 + $0xc9] sm:$0xff] }
 0x64c   : > { %5766 = vrot.lane.b32.xlu0 %v9776_v55, %s7598_s11  ;;  %5764 = vrot.lane.b32.xlu1 %v9778_v5, %s7598_s11  ;;  %v5400_v5 = vld [vmem:[#allocation3 + $0x31] sm:$0xff] }
 0x64d   : > { %5364 = vst.msk [vmem:[#allocation3 + $0x182] sm:$0xff] %vm948_vm1, %v5332_v58  ;;  %5363 = vst.msk [vmem:[#allocation3 + $0x172] sm:$0xff] %vm948_vm1, %v5331_v2  ;;  %v10103_v2 = vld [vmem:[#allocation2 + $0xa8] sm:$0xff] }
 0x64e   : > { %v5463_v28 = vpop.permute.xlu0 %5462  ;;  %v5269_v25 = vpop.permute.xlu1 %5268 }
 0x64f   : > { %v5558_v29 = vadd.f32 %v5463_v28, %v5398_v19  ;;  %v5333_v59 = vadd.f32 %v5269_v25, %v5173_v50  ;;  %v10105_v19 = vld [vmem:[#allocation2 + $0x98] sm:$0xff]  ;;  %v5415_v50 = vld [vmem:[#allocation3 + $0xe1] sm:$0xff] }
 0x650   : > { %5770 = vrot.lane.b32.xlu0 %v9788_v43, %s7598_s11  ;;  %5768 = vrot.lane.b32.xlu1 %v9790_v13, %s7598_s11  ;;  %v5402_v13 = vld [vmem:[#allocation3 + $0x49] sm:$0xff]  ;;  %v5416_v25 = vld [vmem:[#allocation3 + $0xf1] sm:$0xff] }
 0x651   : > { %5590 = vst.msk [vmem:[#allocation3 + $0x19] sm:$0xff] %vm948_vm1, %v5558_v29  ;;  %5365 = vst.msk [vmem:[#allocation3 + $0x18a] sm:$0xff] %vm948_vm1, %v5333_v59 }
 0x652   : > { %v5467_v55 = vpop.permute.xlu0 %5466  ;;  %v5465_v45 = vpop.permute.xlu1 %5464 }
 0x653   : > { %v5560_v6 = vadd.f32 %v5467_v55, %v5400_v5  ;;  %v5559_v61 = vadd.f32 %v5465_v45, %v5399_v38  ;;  %v10113_v5 = vld [vmem:[#allocation2 + $0xc8] sm:$0xff]  ;;  %v10115_v38 = vld [vmem:[#allocation2 + $0xb8] sm:$0xff] }
 0x654   : > { %5774 = vrot.lane.b32.xlu0 %v9798_v27, %s7598_s11  ;;  %5772 = vrot.lane.b32.xlu1 %v9800_v22, %s7598_s11  ;;  %v5404_v22 = vld [vmem:[#allocation3 + $0x61] sm:$0xff] }
 0x655   : > { %5592 = vst.msk [vmem:[#allocation3 + $0x31] sm:$0xff] %vm948_vm1, %v5560_v6  ;;  %5591 = vst.msk [vmem:[#allocation3 + $0x21] sm:$0xff] %vm948_vm1, %v5559_v61  ;;  %v5418_v6 = vld [vmem:[#allocation3 + $0x109] sm:$0xff]  ;;  %v5417_v61 = vld [vmem:[#allocation3 + $0xf9] sm:$0xff] }
 0x656   : > { %v5471_v43 = vpop.permute.xlu0 %5470  ;;  %v5469_v18 = vpop.permute.xlu1 %5468 }
 0x657   : > { %v5562_v42 = vadd.f32 %v5471_v43, %v5402_v13  ;;  %v5561_v35 = vadd.f32 %v5469_v18, %v5401_v57  ;;  %v10123_v18 = vld [vmem:[#allocation2 + $0xe8] sm:$0xff] }
 0x658   : > { %5778 = vrot.lane.b32.xlu0 %v9813_v32, %s7598_s11  ;;  %5776 = vrot.lane.b32.xlu1 %v9815_v47, %s7598_s11  ;;  %v5406_v47 = vld [vmem:[#allocation3 + $0x79] sm:$0xff] }
 0x659   : > { %5594 = vst.msk [vmem:[#allocation3 + $0x49] sm:$0xff] %vm948_vm1, %v5562_v42  ;;  %5593 = vst.msk [vmem:[#allocation3 + $0x39] sm:$0xff] %vm948_vm1, %v5561_v35  ;;  %v10125_v42 = vld [vmem:[#allocation2 + $0xd8] sm:$0xff] }
 0x65a   : > { %v5475_v27 = vpop.permute.xlu0 %5474  ;;  %v5473_v17 = vpop.permute.xlu1 %5472 }
 0x65b   : > { %v5564_v15 = vadd.f32 %v5475_v27, %v5404_v22  ;;  %v5563_v30 = vadd.f32 %v5473_v17, %v5403_v12  ;;  %v5420_v27 = vld [vmem:[#allocation3 + $0x121] sm:$0xff]  ;;  %v5419_v22 = vld [vmem:[#allocation3 + $0x111] sm:$0xff] }
 0x65c   : > { %5974 = vrot.lane.b32.xlu0 %v10055_v46, %s7599_s12  ;;  %5780 = vrot.lane.b32.xlu1 %v9828_v39, %s7598_s11 }
 0x65d   : > { %5596 = vst.msk [vmem:[#allocation3 + $0x61] sm:$0xff] %vm948_vm1, %v5564_v15  ;;  %5595 = vst.msk [vmem:[#allocation3 + $0x51] sm:$0xff] %vm948_vm1, %v5563_v30  ;;  %v10133_v30 = vld [vmem:[#allocation2 + $0x108] sm:$0xff] }
 0x65e   : > { %v5479_v32 = vpop.permute.xlu0 %5478  ;;  %v5477_v63 = vpop.permute.xlu1 %5476 }
 0x65f   : > { %v5566_v48 = vadd.f32 %v5479_v32, %v5406_v47  ;;  %v5565_v40 = vadd.f32 %v5477_v63, %v5405_v41  ;;  %v10135_v32 = vld [vmem:[#allocation2 + $0xf8] sm:$0xff]  ;;  %v5421_v63 = vld [vmem:[#allocation3 + $0x129] sm:$0xff] }
 0x660   : > { %5978 = vrot.lane.b32.xlu0 %v10063_v49, %s7599_s12  ;;  %5976 = vrot.lane.b32.xlu1 %v10065_v44, %s7599_s12  ;;  %v5422_v41 = vld [vmem:[#allocation3 + $0x139] sm:$0xff] }
 0x661   : > { %5598 = vst.msk [vmem:[#allocation3 + $0x79] sm:$0xff] %vm948_vm1, %v5566_v48  ;;  %5597 = vst.msk [vmem:[#allocation3 + $0x69] sm:$0xff] %vm948_vm1, %v5565_v40 }
 0x662   : > { %v5483_v39 = vpop.permute.xlu0 %5482  ;;  %v5481_v4 = vpop.permute.xlu1 %5480 }
 0x663   : > { %v5568_v51 = vadd.f32 %v5483_v39, %v5408_v37  ;;  %v5567_v1 = vadd.f32 %v5481_v4, %v5407_v11  ;;  %v10143_v37 = vld [vmem:[#allocation2 + $0x128] sm:$0xff]  ;;  %v10145_v11 = vld [vmem:[#allocation2 + $0x118] sm:$0xff] }
 0x664   : > { %5982 = vrot.lane.b32.xlu0 %v10073_v3, %s7599_s12  ;;  %5980 = vrot.lane.b32.xlu1 %v10075_v26, %s7599_s12 }
 0x665   : > { %5600 = vst.msk [vmem:[#allocation3 + $0x91] sm:$0xff] %vm948_vm1, %v5568_v51  ;;  %5599 = vst.msk [vmem:[#allocation3 + $0x81] sm:$0xff] %vm948_vm1, %v5567_v1  ;;  %v5424_v51 = vld [vmem:[#allocation3 + $0x151] sm:$0xff]  ;;  %v5423_v1 = vld [vmem:[#allocation3 + $0x141] sm:$0xff] }
 0x666   : > { %v5487_v16 = vpop.permute.xlu0 %5486  ;;  %v5485_v9 = vpop.permute.xlu1 %5484 }
 0x667   : > { %v5570_v20 = vadd.f32 %v5487_v16, %v5410_v0  ;;  %v5569_v14 = vadd.f32 %v5485_v9, %v5409_v8  ;;  %v10153_v9 = vld [vmem:[#allocation2 + $0x148] sm:$0xff] }
 0x668   : > { %5986 = vrot.lane.b32.xlu0 %v10083_v34, %s7599_s12  ;;  %5984 = vrot.lane.b32.xlu1 %v10085_v10, %s7599_s12 }
 0x669   : > { %5602 = vst.msk [vmem:[#allocation3 + $0xa9] sm:$0xff] %vm948_vm1, %v5570_v20  ;;  %5601 = vst.msk [vmem:[#allocation3 + $0x99] sm:$0xff] %vm948_vm1, %v5569_v14  ;;  %v10155_v20 = vld [vmem:[#allocation2 + $0x138] sm:$0xff] }
 0x66a   : > { %v5491_v54 = vpop.permute.xlu0 %5490  ;;  %v5489_v62 = vpop.permute.xlu1 %5488 }
 0x66b   : > { %v5572_v33 = vadd.f32 %v5491_v54, %v5412_v36  ;;  %v5571_v7 = vadd.f32 %v5489_v62, %v5411_v53  ;;  %v5426_v54 = vld [vmem:[#allocation3 + $0x169] sm:$0xff]  ;;  %v5425_v36 = vld [vmem:[#allocation3 + $0x159] sm:$0xff] }
 0x66c   : > { %5990 = vrot.lane.b32.xlu0 %v10093_v52, %s7599_s12  ;;  %5988 = vrot.lane.b32.xlu1 %v10095_v56, %s7599_s12 }
 0x66d   : > { %5604 = vst.msk [vmem:[#allocation3 + $0xc1] sm:$0xff] %vm948_vm1, %v5572_v33  ;;  %5603 = vst.msk [vmem:[#allocation3 + $0xb1] sm:$0xff] %vm948_vm1, %v5571_v7  ;;  %v10163_v7 = vld [vmem:[#allocation2 + $0x168] sm:$0xff] }
 0x66e   : > { %v5495_v24 = vpop.permute.xlu0 %5494  ;;  %v5493_v23 = vpop.permute.xlu1 %5492 }
 0x66f   : > { %v5574_v60 = vadd.f32 %v5495_v24, %v5414_v21  ;;  %v5573_v58 = vadd.f32 %v5493_v23, %v5413_v31  ;;  %v10165_v24 = vld [vmem:[#allocation2 + $0x158] sm:$0xff]  ;;  %v5428_v31 = vld [vmem:[#allocation3 + $0x181] sm:$0xff] }
 0x670   : > { %5994 = vrot.lane.b32.xlu0 %v10103_v2, %s7599_s12  ;;  %5992 = vrot.lane.b32.xlu1 %v10105_v19, %s7599_s12  ;;  %v5427_v23 = vld [vmem:[#allocation3 + $0x171] sm:$0xff] }
 0x671   : > { %5606 = vst.msk [vmem:[#allocation3 + $0xd9] sm:$0xff] %vm948_vm1, %v5574_v60  ;;  %5605 = vst.msk [vmem:[#allocation3 + $0xc9] sm:$0xff] %vm948_vm1, %v5573_v58 }
 0x672   : > { %v5499_v28 = vpop.permute.xlu0 %5498  ;;  %v5497_v29 = vpop.permute.xlu1 %5496 }
 0x673   : > { %v5576_v59 = vadd.f32 %v5499_v28, %v5416_v25  ;;  %v5575_v55 = vadd.f32 %v5497_v29, %v5415_v50  ;;  %v10173_v25 = vld [vmem:[#allocation2 + $0x188] sm:$0xff]  ;;  %v10175_v50 = vld [vmem:[#allocation2 + $0x178] sm:$0xff] }
 0x674   : > { %5998 = vrot.lane.b32.xlu0 %v10113_v5, %s7599_s12  ;;  %5996 = vrot.lane.b32.xlu1 %v10115_v38, %s7599_s12  ;;  %v5654_v29 = vld [vmem:[#allocation3 + $0x18] sm:$0xff] }
 0x675   : > { %5608 = vst.msk [vmem:[#allocation3 + $0xf1] sm:$0xff] %vm948_vm1, %v5576_v59  ;;  %5607 = vst.msk [vmem:[#allocation3 + $0xe1] sm:$0xff] %vm948_vm1, %v5575_v55 }
 0x676   : > { %v5503_v45 = vpop.permute.xlu0 %5502  ;;  %v5501_v43 = vpop.permute.xlu1 %5500 }
 0x677   : > { %v5578_v13 = vadd.f32 %v5503_v45, %v5418_v6  ;;  %v5577_v57 = vadd.f32 %v5501_v43, %v5417_v61  ;;  %v5429_v45 = vld [vmem:[#allocation3 + $0x189] sm:$0xff] }
 0x678   : > { %6002 = vrot.lane.b32.xlu0 %v10123_v18, %s7599_s12  ;;  %6000 = vrot.lane.b32.xlu1 %v10125_v42, %s7599_s12  ;;  %v10183_v43 = vld [vmem:[#allocation2 + $0x1a8] sm:$0xff] }
 0x679   : > { %5610 = vst.msk [vmem:[#allocation3 + $0x109] sm:$0xff] %vm948_vm1, %v5578_v13  ;;  %5609 = vst.msk [vmem:[#allocation3 + $0xf9] sm:$0xff] %vm948_vm1, %v5577_v57  ;;  %v10185_v13 = vld [vmem:[#allocation2 + $0x198] sm:$0xff] }
 0x67a   : > { %v5507_v35 = vpop.permute.xlu0 %5506  ;;  %v5505_v12 = vpop.permute.xlu1 %5504 }
 0x67b   : > { %v5580_v17 = vadd.f32 %v5507_v35, %v5420_v27  ;;  %v5579_v15 = vadd.f32 %v5505_v12, %v5419_v22  ;;  %v5656_v35 = vld [vmem:[#allocation3 + $0x30] sm:$0xff]  ;;  %v5655_v27 = vld [vmem:[#allocation3 + $0x20] sm:$0xff] }
 0x67c   : > { %6006 = vrot.lane.b32.xlu0 %v10133_v30, %s7599_s12  ;;  %6004 = vrot.lane.b32.xlu1 %v10135_v32, %s7599_s12 }
 0x67d   : > { %5612 = vst.msk [vmem:[#allocation3 + $0x121] sm:$0xff] %vm948_vm1, %v5580_v17  ;;  %5611 = vst.msk [vmem:[#allocation3 + $0x111] sm:$0xff] %vm948_vm1, %v5579_v15  ;;  %v10193_v15 = vld [vmem:[#allocation2 + $0x1c8] sm:$0xff] }
 0x67e   : > { %v5511_v47 = vpop.permute.xlu0 %5510  ;;  %v5509_v48 = vpop.permute.xlu1 %5508 }
 0x67f   : > { %v5582_v40 = vadd.f32 %v5511_v47, %v5422_v41  ;;  %v5581_v39 = vadd.f32 %v5509_v48, %v5421_v63  ;;  %v10195_v47 = vld [vmem:[#allocation2 + $0x1b8] sm:$0xff]  ;;  %v5658_v63 = vld [vmem:[#allocation3 + $0x48] sm:$0xff] }
 0x680   : > { %6010 = vrot.lane.b32.xlu0 %v10143_v37, %s7599_s12  ;;  %6008 = vrot.lane.b32.xlu1 %v10145_v11, %s7599_s12  ;;  %v5657_v48 = vld [vmem:[#allocation3 + $0x38] sm:$0xff] }
 0x681   : > { %5614 = vst.msk [vmem:[#allocation3 + $0x139] sm:$0xff] %vm948_vm1, %v5582_v40  ;;  %5613 = vst.msk [vmem:[#allocation3 + $0x129] sm:$0xff] %vm948_vm1, %v5581_v39 }
 0x682   : > { %v5515_v4 = vpop.permute.xlu0 %5514  ;;  %v5513_v16 = vpop.permute.xlu1 %5512 }
 0x683   : > { %v5584_v0 = vadd.f32 %v5515_v4, %v5424_v51  ;;  %v5583_v8 = vadd.f32 %v5513_v16, %v5423_v1  ;;  %v10203_v51 = vld [vmem:[#allocation2 + $0x1e8] sm:$0xff]  ;;  %v10205_v1 = vld [vmem:[#allocation2 + $0x1d8] sm:$0xff] }
 0x684   : > { %6014 = vrot.lane.b32.xlu0 %v10153_v9, %s7599_s12  ;;  %6012 = vrot.lane.b32.xlu1 %v10155_v20, %s7599_s12 }
 0x685   : > { %5616 = vst.msk [vmem:[#allocation3 + $0x151] sm:$0xff] %vm948_vm1, %v5584_v0  ;;  %5615 = vst.msk [vmem:[#allocation3 + $0x141] sm:$0xff] %vm948_vm1, %v5583_v8  ;;  %v5660_v0 = vld [vmem:[#allocation3 + $0x60] sm:$0xff]  ;;  %v5659_v8 = vld [vmem:[#allocation3 + $0x50] sm:$0xff] }
 0x686   : > { %v5519_v14 = vpop.permute.xlu0 %5518  ;;  %v5517_v53 = vpop.permute.xlu1 %5516 }
 0x687   : > { %v5586_v62 = vadd.f32 %v5519_v14, %v5426_v54  ;;  %v5585_v33 = vadd.f32 %v5517_v53, %v5425_v36  ;;  %v10213_v53 = vld [vmem:[#allocation2 + $0x1f8] sm:$0xff] }
 0x688   : > { %6018 = vrot.lane.b32.xlu0 %v10163_v7, %s7599_s12  ;;  %6016 = vrot.lane.b32.xlu1 %v10165_v24, %s7599_s12 }
 0x689   : > { %5618 = vst.msk [vmem:[#allocation3 + $0x169] sm:$0xff] %vm948_vm1, %v5586_v62  ;;  %5617 = vst.msk [vmem:[#allocation3 + $0x159] sm:$0xff] %vm948_vm1, %v5585_v33  ;;  %v5662_v33 = vld [vmem:[#allocation3 + $0x78] sm:$0xff] }
 0x68a   : > { %v5523_v21 = vpop.permute.xlu0 %5522  ;;  %v5521_v60 = vpop.permute.xlu1 %5520 }
 0x68b   : > { %v5588_v58 = vadd.f32 %v5523_v21, %v5428_v31  ;;  %v5587_v28 = vadd.f32 %v5521_v60, %v5427_v23  ;;  %v5661_v21 = vld [vmem:[#allocation3 + $0x68] sm:$0xff] }
 0x68c   : > { %6022 = vrot.lane.b32.xlu0 %v10173_v25, %s7599_s12  ;;  %6020 = vrot.lane.b32.xlu1 %v10175_v50, %s7599_s12 }
 0x68d   : > { %5620 = vst.msk [vmem:[#allocation3 + $0x181] sm:$0xff] %vm948_vm1, %v5588_v58  ;;  %5619 = vst.msk [vmem:[#allocation3 + $0x171] sm:$0xff] %vm948_vm1, %v5587_v28  ;;  %v5664_v28 = vld [vmem:[#allocation3 + $0x90] sm:$0xff] }
 0x68e   : > { %v5719_v59 = vpop.permute.xlu0 %5718  ;;  %v5525_v55 = vpop.permute.xlu1 %5524 }
 0x68f   : > { %v5814_v6 = vadd.f32 %v5719_v59, %v5654_v29  ;;  %v5589_v61 = vadd.f32 %v5525_v55, %v5429_v45  ;;  %v5663_v29 = vld [vmem:[#allocation3 + $0x80] sm:$0xff] }
 0x690   : > { %6026 = vrot.lane.b32.xlu0 %v10183_v43, %s7599_s12  ;;  %6024 = vrot.lane.b32.xlu1 %v10185_v13, %s7599_s12 }
 0x691   : > { %5846 = vst.msk [vmem:[#allocation3 + $0x18] sm:$0xff] %vm948_vm1, %v5814_v6  ;;  %5621 = vst.msk [vmem:[#allocation3 + $0x189] sm:$0xff] %vm948_vm1, %v5589_v61  ;;  %v5666_v61 = vld [vmem:[#allocation3 + $0xa8] sm:$0xff] }
 0x692   : > { %v5723_v57 = vpop.permute.xlu0 %5722  ;;  %v5721_v22 = vpop.permute.xlu1 %5720 }
 0x693   : > { %v5816_v12 = vadd.f32 %v5723_v57, %v5656_v35  ;;  %v5815_v17 = vadd.f32 %v5721_v22, %v5655_v27  ;;  %v5665_v57 = vld [vmem:[#allocation3 + $0x98] sm:$0xff] }
 0x694   : > { %6030 = vrot.lane.b32.xlu0 %v10193_v15, %s7599_s12  ;;  %6028 = vrot.lane.b32.xlu1 %v10195_v47, %s7599_s12 }
 0x695   : > { %5848 = vst.msk [vmem:[#allocation3 + $0x30] sm:$0xff] %vm948_vm1, %v5816_v12  ;;  %5847 = vst.msk [vmem:[#allocation3 + $0x20] sm:$0xff] %vm948_vm1, %v5815_v17  ;;  %v5668_v17 = vld [vmem:[#allocation3 + $0xc0] sm:$0xff] }
 0x696   : > { %v5727_v41 = vpop.permute.xlu0 %5726  ;;  %v5725_v40 = vpop.permute.xlu1 %5724 }
 0x697   : > { %v5818_v39 = vadd.f32 %v5727_v41, %v5658_v63  ;;  %v5817_v4 = vadd.f32 %v5725_v40, %v5657_v48  ;;  %v5667_v41 = vld [vmem:[#allocation3 + $0xb0] sm:$0xff] }
 0x698   : > { %6034 = vrot.lane.b32.xlu0 %v10203_v51, %s7599_s12  ;;  %6032 = vrot.lane.b32.xlu1 %v10205_v1, %s7599_s12 }
 0x699   : > { %5850 = vst.msk [vmem:[#allocation3 + $0x48] sm:$0xff] %vm948_vm1, %v5818_v39  ;;  %5849 = vst.msk [vmem:[#allocation3 + $0x38] sm:$0xff] %vm948_vm1, %v5817_v4  ;;  %v5670_v4 = vld [vmem:[#allocation3 + $0xd8] sm:$0xff] }
 0x69a   : > { %v5731_v16 = vpop.permute.xlu0 %5730  ;;  %v5729_v14 = vpop.permute.xlu1 %5728 }
 0x69b   : > { %v5820_v54 = vadd.f32 %v5731_v16, %v5660_v0  ;;  %v5819_v36 = vadd.f32 %v5729_v14, %v5659_v8  ;;  %v5669_v16 = vld [vmem:[#allocation3 + $0xc8] sm:$0xff] }
 0x69c   : > { %6230 = vrot.lane.b32.xlu0 %v10055_v46, %s7600_s18  ;;  %6036 = vrot.lane.b32.xlu1 %v10213_v53, %s7599_s12 }
 0x69d   : > { %5852 = vst.msk [vmem:[#allocation3 + $0x60] sm:$0xff] %vm948_vm1, %v5820_v54  ;;  %5851 = vst.msk [vmem:[#allocation3 + $0x50] sm:$0xff] %vm948_vm1, %v5819_v36  ;;  %v5672_v36 = vld [vmem:[#allocation3 + $0xf0] sm:$0xff] }
 0x69e   : > { %v5735_v62 = vpop.permute.xlu0 %5734  ;;  %v5733_v31 = vpop.permute.xlu1 %5732 }
 0x69f   : > { %v5822_v23 = vadd.f32 %v5735_v62, %v5662_v33  ;;  %v5821_v60 = vadd.f32 %v5733_v31, %v5661_v21  ;;  %v5671_v62 = vld [vmem:[#allocation3 + $0xe0] sm:$0xff] }
 0x6a0   : > { %6234 = vrot.lane.b32.xlu0 %v10063_v49, %s7600_s18  ;;  %6232 = vrot.lane.b32.xlu1 %v10065_v44, %s7600_s18 }
 0x6a1   : > { %5854 = vst.msk [vmem:[#allocation3 + $0x78] sm:$0xff] %vm948_vm1, %v5822_v23  ;;  %5853 = vst.msk [vmem:[#allocation3 + $0x68] sm:$0xff] %vm948_vm1, %v5821_v60  ;;  %v5674_v60 = vld [vmem:[#allocation3 + $0x108] sm:$0xff] }
 0x6a2   : > { %v5739_v58 = vpop.permute.xlu0 %5738  ;;  %v5737_v59 = vpop.permute.xlu1 %5736 }
 0x6a3   : > { %v5824_v55 = vadd.f32 %v5739_v58, %v5664_v28  ;;  %v5823_v45 = vadd.f32 %v5737_v59, %v5663_v29  ;;  %v5673_v58 = vld [vmem:[#allocation3 + $0xf8] sm:$0xff] }
 0x6a4   : > { %6238 = vrot.lane.b32.xlu0 %v10073_v3, %s7600_s18  ;;  %6236 = vrot.lane.b32.xlu1 %v10075_v26, %s7600_s18 }
 0x6a5   : > { %5856 = vst.msk [vmem:[#allocation3 + $0x90] sm:$0xff] %vm948_vm1, %v5824_v55  ;;  %5855 = vst.msk [vmem:[#allocation3 + $0x80] sm:$0xff] %vm948_vm1, %v5823_v45  ;;  %v5676_v45 = vld [vmem:[#allocation3 + $0x120] sm:$0xff] }
 0x6a6   : > { %v5743_v6 = vpop.permute.xlu0 %5742  ;;  %v5741_v35 = vpop.permute.xlu1 %5740 }
 0x6a7   : > { %v5826_v27 = vadd.f32 %v5743_v6, %v5666_v61  ;;  %v5825_v22 = vadd.f32 %v5741_v35, %v5665_v57  ;;  %v5675_v6 = vld [vmem:[#allocation3 + $0x110] sm:$0xff] }
 0x6a8   : > { %6242 = vrot.lane.b32.xlu0 %v10083_v34, %s7600_s18  ;;  %6240 = vrot.lane.b32.xlu1 %v10085_v10, %s7600_s18 }
 0x6a9   : > { %5858 = vst.msk [vmem:[#allocation3 + $0xa8] sm:$0xff] %vm948_vm1, %v5826_v27  ;;  %5857 = vst.msk [vmem:[#allocation3 + $0x98] sm:$0xff] %vm948_vm1, %v5825_v22  ;;  %v5678_v22 = vld [vmem:[#allocation3 + $0x138] sm:$0xff] }
 0x6aa   : > { %v5747_v12 = vpop.permute.xlu0 %5746  ;;  %v5745_v63 = vpop.permute.xlu1 %5744 }
 0x6ab   : > { %v5828_v48 = vadd.f32 %v5747_v12, %v5668_v17  ;;  %v5827_v40 = vadd.f32 %v5745_v63, %v5667_v41  ;;  %v5677_v12 = vld [vmem:[#allocation3 + $0x128] sm:$0xff] }
 0x6ac   : > { %6246 = vrot.lane.b32.xlu0 %v10093_v52, %s7600_s18  ;;  %6244 = vrot.lane.b32.xlu1 %v10095_v56, %s7600_s18 }
 0x6ad   : > { %5860 = vst.msk [vmem:[#allocation3 + $0xc0] sm:$0xff] %vm948_vm1, %v5828_v48  ;;  %5859 = vst.msk [vmem:[#allocation3 + $0xb0] sm:$0xff] %vm948_vm1, %v5827_v40  ;;  %v5680_v40 = vld [vmem:[#allocation3 + $0x150] sm:$0xff] }
 0x6ae   : > { %v5751_v39 = vpop.permute.xlu0 %5750  ;;  %v5749_v0 = vpop.permute.xlu1 %5748 }
 0x6af   : > { %v5830_v8 = vadd.f32 %v5751_v39, %v5670_v4  ;;  %v5829_v14 = vadd.f32 %v5749_v0, %v5669_v16  ;;  %v5679_v39 = vld [vmem:[#allocation3 + $0x140] sm:$0xff] }
 0x6b0   : > { %6250 = vrot.lane.b32.xlu0 %v10103_v2, %s7600_s18  ;;  %6248 = vrot.lane.b32.xlu1 %v10105_v19, %s7600_s18 }
 0x6b1   : > { %5862 = vst.msk [vmem:[#allocation3 + $0xd8] sm:$0xff] %vm948_vm1, %v5830_v8  ;;  %5861 = vst.msk [vmem:[#allocation3 + $0xc8] sm:$0xff] %vm948_vm1, %v5829_v14  ;;  %v5682_v14 = vld [vmem:[#allocation3 + $0x168] sm:$0xff] }
 0x6b2   : > { %v5755_v54 = vpop.permute.xlu0 %5754  ;;  %v5753_v33 = vpop.permute.xlu1 %5752 }
 0x6b3   : > { %v5832_v21 = vadd.f32 %v5755_v54, %v5672_v36  ;;  %v5831_v31 = vadd.f32 %v5753_v33, %v5671_v62  ;;  %v5681_v54 = vld [vmem:[#allocation3 + $0x158] sm:$0xff] }
 0x6b4   : > { %6254 = vrot.lane.b32.xlu0 %v10113_v5, %s7600_s18  ;;  %6252 = vrot.lane.b32.xlu1 %v10115_v38, %s7600_s18 }
 0x6b5   : > { %5864 = vst.msk [vmem:[#allocation3 + $0xf0] sm:$0xff] %vm948_vm1, %v5832_v21  ;;  %5863 = vst.msk [vmem:[#allocation3 + $0xe0] sm:$0xff] %vm948_vm1, %v5831_v31  ;;  %v5684_v31 = vld [vmem:[#allocation3 + $0x180] sm:$0xff] }
 0x6b6   : > { %v5759_v23 = vpop.permute.xlu0 %5758  ;;  %v5757_v28 = vpop.permute.xlu1 %5756 }
 0x6b7   : > { %v5834_v29 = vadd.f32 %v5759_v23, %v5674_v60  ;;  %v5833_v59 = vadd.f32 %v5757_v28, %v5673_v58  ;;  %v5683_v23 = vld [vmem:[#allocation3 + $0x170] sm:$0xff] }
 0x6b8   : > { %6258 = vrot.lane.b32.xlu0 %v10123_v18, %s7600_s18  ;;  %6256 = vrot.lane.b32.xlu1 %v10125_v42, %s7600_s18 }
 0x6b9   : > { %5866 = vst.msk [vmem:[#allocation3 + $0x108] sm:$0xff] %vm948_vm1, %v5834_v29  ;;  %5865 = vst.msk [vmem:[#allocation3 + $0xf8] sm:$0xff] %vm948_vm1, %v5833_v59  ;;  %v5910_v29 = vld [vmem:[#allocation3 + $0x4] sm:$0xff] }
 0x6ba   : > { %v5763_v55 = vpop.permute.xlu0 %5762  ;;  %v5761_v61 = vpop.permute.xlu1 %5760 }
 0x6bb   : > { %v5836_v57 = vadd.f32 %v5763_v55, %v5676_v45  ;;  %v5835_v35 = vadd.f32 %v5761_v61, %v5675_v6  ;;  %v5685_v45 = vld [vmem:[#allocation3 + $0x188] sm:$0xff] }
 0x6bc   : > { %6262 = vrot.lane.b32.xlu0 %v10133_v30, %s7600_s18  ;;  %6260 = vrot.lane.b32.xlu1 %v10135_v32, %s7600_s18 }
 0x6bd   : > { %5868 = vst.msk [vmem:[#allocation3 + $0x120] sm:$0xff] %vm948_vm1, %v5836_v57  ;;  %5867 = vst.msk [vmem:[#allocation3 + $0x110] sm:$0xff] %vm948_vm1, %v5835_v35  ;;  %v5911_v57 = vld [vmem:[#allocation3 + $0xc] sm:$0xff] }
 0x6be   : > { %v5767_v27 = vpop.permute.xlu0 %5766  ;;  %v5765_v17 = vpop.permute.xlu1 %5764 }
 0x6bf   : > { %v5838_v41 = vadd.f32 %v5767_v27, %v5678_v22  ;;  %v5837_v63 = vadd.f32 %v5765_v17, %v5677_v12  ;;  %v5912_v27 = vld [vmem:[#allocation3 + $0x1c] sm:$0xff] }
 0x6c0   : > { %6266 = vrot.lane.b32.xlu0 %v10143_v37, %s7600_s18  ;;  %6264 = vrot.lane.b32.xlu1 %v10145_v11, %s7600_s18 }
 0x6c1   : > { %5870 = vst.msk [vmem:[#allocation3 + $0x138] sm:$0xff] %vm948_vm1, %v5838_v41  ;;  %5869 = vst.msk [vmem:[#allocation3 + $0x128] sm:$0xff] %vm948_vm1, %v5837_v63  ;;  %v5914_v63 = vld [vmem:[#allocation3 + $0x34] sm:$0xff] }
 0x6c2   : > { %v5771_v48 = vpop.permute.xlu0 %5770  ;;  %v5769_v4 = vpop.permute.xlu1 %5768 }
 0x6c3   : > { %v5840_v16 = vadd.f32 %v5771_v48, %v5680_v40  ;;  %v5839_v0 = vadd.f32 %v5769_v4, %v5679_v39  ;;  %v5913_v48 = vld [vmem:[#allocation3 + $0x24] sm:$0xff] }
 0x6c4   : > { %6270 = vrot.lane.b32.xlu0 %v10153_v9, %s7600_s18  ;;  %6268 = vrot.lane.b32.xlu1 %v10155_v20, %s7600_s18 }
 0x6c5   : > { %5872 = vst.msk [vmem:[#allocation3 + $0x150] sm:$0xff] %vm948_vm1, %v5840_v16  ;;  %5871 = vst.msk [vmem:[#allocation3 + $0x140] sm:$0xff] %vm948_vm1, %v5839_v0 }
 0x6c6   : > { %v5775_v8 = vpop.permute.xlu0 %5774  ;;  %v5773_v36 = vpop.permute.xlu1 %5772 }
 0x6c7   : > { %v5842_v62 = vadd.f32 %v5775_v8, %v5682_v14  ;;  %v5841_v33 = vadd.f32 %v5773_v36, %v5681_v54  ;;  %v5916_v14 = vld [vmem:[#allocation3 + $0x4c] sm:$0xff]  ;;  %v5915_v54 = vld [vmem:[#allocation3 + $0x3c] sm:$0xff] }
 0x6c8   : > { %6274 = vrot.lane.b32.xlu0 %v10163_v7, %s7600_s18  ;;  %6272 = vrot.lane.b32.xlu1 %v10165_v24, %s7600_s18 }
 0x6c9   : > { %5874 = vst.msk [vmem:[#allocation3 + $0x168] sm:$0xff] %vm948_vm1, %v5842_v62  ;;  %5873 = vst.msk [vmem:[#allocation3 + $0x158] sm:$0xff] %vm948_vm1, %v5841_v33 }
 0x6ca   : > { %v5779_v21 = vpop.permute.xlu0 %5778  ;;  %v5777_v60 = vpop.permute.xlu1 %5776 }
 0x6cb   : > { %v5844_v58 = vadd.f32 %v5779_v21, %v5684_v31  ;;  %v5843_v28 = vadd.f32 %v5777_v60, %v5683_v23  ;;  %v5918_v31 = vld [vmem:[#allocation3 + $0x64] sm:$0xff]  ;;  %v5917_v23 = vld [vmem:[#allocation3 + $0x54] sm:$0xff] }
 0x6cc   : > { %6278 = vrot.lane.b32.xlu0 %v10173_v25, %s7600_s18  ;;  %6276 = vrot.lane.b32.xlu1 %v10175_v50, %s7600_s18 }
 0x6cd   : > { %5876 = vst.msk [vmem:[#allocation3 + $0x180] sm:$0xff] %vm948_vm1, %v5844_v58  ;;  %5875 = vst.msk [vmem:[#allocation3 + $0x170] sm:$0xff] %vm948_vm1, %v5843_v28 }
 0x6ce   : > { %v5975_v59 = vpop.permute.xlu0 %5974  ;;  %v5781_v55 = vpop.permute.xlu1 %5780 }
 0x6cf   : > { %v6070_v6 = vadd.f32 %v5975_v59, %v5910_v29  ;;  %v5845_v61 = vadd.f32 %v5781_v55, %v5685_v45  ;;  %v5920_v29 = vld [vmem:[#allocation3 + $0x7c] sm:$0xff]  ;;  %v5919_v59 = vld [vmem:[#allocation3 + $0x6c] sm:$0xff] }
 0x6d0   : > { %6282 = vrot.lane.b32.xlu0 %v10183_v43, %s7600_s18  ;;  %6280 = vrot.lane.b32.xlu1 %v10185_v13, %s7600_s18 }
 0x6d1   : > { %6102 = vst.msk [vmem:[#allocation3 + $0x4] sm:$0xff] %vm948_vm1, %v6070_v6  ;;  %5877 = vst.msk [vmem:[#allocation3 + $0x188] sm:$0xff] %vm948_vm1, %v5845_v61  ;;  %v5921_v61 = vld [vmem:[#allocation3 + $0x84] sm:$0xff] }
 0x6d2   : > { %v5979_v35 = vpop.permute.xlu0 %5978  ;;  %v5977_v22 = vpop.permute.xlu1 %5976 }
 0x6d3   : > { %v6072_v12 = vadd.f32 %v5979_v35, %v5912_v27  ;;  %v6071_v17 = vadd.f32 %v5977_v22, %v5911_v57  ;;  %v5923_v22 = vld [vmem:[#allocation3 + $0x9c] sm:$0xff] }
 0x6d4   : > { %6286 = vrot.lane.b32.xlu0 %v10193_v15, %s7600_s18  ;;  %6284 = vrot.lane.b32.xlu1 %v10195_v47, %s7600_s18 }
 0x6d5   : > { %6104 = vst.msk [vmem:[#allocation3 + $0x1c] sm:$0xff] %vm948_vm1, %v6072_v12  ;;  %6103 = vst.msk [vmem:[#allocation3 + $0xc] sm:$0xff] %vm948_vm1, %v6071_v17 }
 0x6d6   : > { %v5983_v41 = vpop.permute.xlu0 %5982  ;;  %v5981_v40 = vpop.permute.xlu1 %5980 }
 0x6d7   : > { %v6074_v39 = vadd.f32 %v5983_v41, %v5914_v63  ;;  %v6073_v4 = vadd.f32 %v5981_v40, %v5913_v48  ;;  %v5925_v63 = vld [vmem:[#allocation3 + $0xb4] sm:$0xff] }
 0x6d8   : > { %v7186_v16 = vld [vmem:[#allocation3 + $0x182] sm:$0xff]  ;;  %v7187_v0 = vld [vmem:[#allocation3 + $0x18a] sm:$0xff]  ;;  %6290 = vrot.lane.b32.xlu0 %v10203_v51, %s7600_s18  ;;  %6288 = vrot.lane.b32.xlu1 %v10205_v1, %s7600_s18 }
 0x6d9   : > { %7218 = vst.msk [vmem:[%s9811_s16 + $0xe0] sm:$0xff] %vm948_vm1, %v7186_v16  ;;  %7219 = vst.msk [vmem:[%s9811_s16 + $0xe8] sm:$0xff] %vm948_vm1, %v7187_v0 }
 0x6da   : > { %6106 = vst.msk [vmem:[#allocation3 + $0x34] sm:$0xff] %vm948_vm1, %v6074_v39  ;;  %6105 = vst.msk [vmem:[#allocation3 + $0x24] sm:$0xff] %vm948_vm1, %v6073_v4  ;;  %v5987_v8 = vpop.permute.xlu0 %5986  ;;  %v5985_v36 = vpop.permute.xlu1 %5984  ;;  %v5927_v4 = vld [vmem:[#allocation3 + $0xcc] sm:$0xff] }
 0x6db   : > { %v6076_v62 = vadd.f32 %v5987_v8, %v5916_v14  ;;  %v6075_v33 = vadd.f32 %v5985_v36, %v5915_v54  ;;  %v5929_v14 = vld [vmem:[#allocation3 + $0xe4] sm:$0xff] }
 0x6dc   : > { %6486 = vrot.lane.b32.xlu0 %v10055_v46, %s7601_s19  ;;  %6292 = vrot.lane.b32.xlu1 %v10213_v53, %s7600_s18 }
 0x6dd   : > { %6108 = vst.msk [vmem:[#allocation3 + $0x4c] sm:$0xff] %vm948_vm1, %v6076_v62  ;;  %6107 = vst.msk [vmem:[#allocation3 + $0x3c] sm:$0xff] %vm948_vm1, %v6075_v33  ;;  %v5931_v33 = vld [vmem:[#allocation3 + $0xfc] sm:$0xff] }
 0x6de   : > { %v5991_v21 = vpop.permute.xlu0 %5990  ;;  %v5989_v60 = vpop.permute.xlu1 %5988 }
 0x6df   : > { %v6078_v58 = vadd.f32 %v5991_v21, %v5918_v31  ;;  %v6077_v28 = vadd.f32 %v5989_v60, %v5917_v23  ;;  %v5933_v60 = vld [vmem:[#allocation3 + $0x114] sm:$0xff] }
 0x6e0   : > { %6490 = vrot.lane.b32.xlu0 %v10063_v49, %s7601_s19  ;;  %6488 = vrot.lane.b32.xlu1 %v10065_v44, %s7601_s19  ;;  %v5922_v44 = vld [vmem:[#allocation3 + $0x94] sm:$0xff] }
 0x6e1   : > { %6110 = vst.msk [vmem:[#allocation3 + $0x64] sm:$0xff] %vm948_vm1, %v6078_v58  ;;  %6109 = vst.msk [vmem:[#allocation3 + $0x54] sm:$0xff] %vm948_vm1, %v6077_v28 }
 0x6e2   : > { %v5995_v46 = vpop.permute.xlu0 %5994  ;;  %v5993_v55 = vpop.permute.xlu1 %5992 }
 0x6e3   : > { %v6080_v45 = vadd.f32 %v5995_v46, %v5920_v29  ;;  %v6079_v6 = vadd.f32 %v5993_v55, %v5919_v59  ;;  %v5935_v29 = vld [vmem:[#allocation3 + $0x12c] sm:$0xff] }
 0x6e4   : > { %6494 = vrot.lane.b32.xlu0 %v10073_v3, %s7601_s19  ;;  %6492 = vrot.lane.b32.xlu1 %v10075_v26, %s7601_s19  ;;  %v5924_v26 = vld [vmem:[#allocation3 + $0xac] sm:$0xff] }
 0x6e5   : > { %6112 = vst.msk [vmem:[#allocation3 + $0x7c] sm:$0xff] %vm948_vm1, %v6080_v45  ;;  %6111 = vst.msk [vmem:[#allocation3 + $0x6c] sm:$0xff] %vm948_vm1, %v6079_v6  ;;  %v5937_v6 = vld [vmem:[#allocation3 + $0x144] sm:$0xff] }
 0x6e6   : > { %v5999_v49 = vpop.permute.xlu0 %5998  ;;  %v5997_v57 = vpop.permute.xlu1 %5996 }
 0x6e7   : > { %v6082_v35 = vadd.f32 %v5999_v49, %v5922_v44  ;;  %v6081_v27 = vadd.f32 %v5997_v57, %v5921_v61  ;;  %v5939_v57 = vld [vmem:[#allocation3 + $0x15c] sm:$0xff] }
 0x6e8   : > { %6498 = vrot.lane.b32.xlu0 %v10083_v34, %s7601_s19  ;;  %6496 = vrot.lane.b32.xlu1 %v10085_v10, %s7601_s19  ;;  %v5926_v10 = vld [vmem:[#allocation3 + $0xc4] sm:$0xff] }
 0x6e9   : > { %6114 = vst.msk [vmem:[#allocation3 + $0x94] sm:$0xff] %vm948_vm1, %v6082_v35  ;;  %6113 = vst.msk [vmem:[#allocation3 + $0x84] sm:$0xff] %vm948_vm1, %v6081_v27 }
 0x6ea   : > { %v6003_v3 = vpop.permute.xlu0 %6002  ;;  %v6001_v12 = vpop.permute.xlu1 %6000 }
 0x6eb   : > { %v6084_v17 = vadd.f32 %v6003_v3, %v5924_v26  ;;  %v6083_v41 = vadd.f32 %v6001_v12, %v5923_v22  ;;  %v5941_v26 = vld [vmem:[#allocation3 + $0x174] sm:$0xff] }
 0x6ec   : > { %6502 = vrot.lane.b32.xlu0 %v10093_v52, %s7601_s19  ;;  %6500 = vrot.lane.b32.xlu1 %v10095_v56, %s7601_s19  ;;  %v5928_v56 = vld [vmem:[#allocation3 + $0xdc] sm:$0xff] }
 0x6ed   : > { %6116 = vst.msk [vmem:[#allocation3 + $0xac] sm:$0xff] %vm948_vm1, %v6084_v17  ;;  %6115 = vst.msk [vmem:[#allocation3 + $0x9c] sm:$0xff] %vm948_vm1, %v6083_v41  ;;  %v6167_v41 = vld [vmem:[#allocation3 + $0xb] sm:$0xff] }
 0x6ee   : > { %v6007_v34 = vpop.permute.xlu0 %6006  ;;  %v6005_v48 = vpop.permute.xlu1 %6004 }
 0x6ef   : > { %v6086_v40 = vadd.f32 %v6007_v34, %v5926_v10  ;;  %v6085_v39 = vadd.f32 %v6005_v48, %v5925_v63  ;;  %v6169_v48 = vld [vmem:[#allocation3 + $0x23] sm:$0xff] }
 0x6f0   : > { %6506 = vrot.lane.b32.xlu0 %v10103_v2, %s7601_s19  ;;  %6504 = vrot.lane.b32.xlu1 %v10105_v19, %s7601_s19  ;;  %v5930_v19 = vld [vmem:[#allocation3 + $0xf4] sm:$0xff] }
 0x6f1   : > { %6118 = vst.msk [vmem:[#allocation3 + $0xc4] sm:$0xff] %vm948_vm1, %v6086_v40  ;;  %6117 = vst.msk [vmem:[#allocation3 + $0xb4] sm:$0xff] %vm948_vm1, %v6085_v39 }
 0x6f2   : > { %v6011_v52 = vpop.permute.xlu0 %6010  ;;  %v6009_v16 = vpop.permute.xlu1 %6008 }
 0x6f3   : > { %v6088_v0 = vadd.f32 %v6011_v52, %v5928_v56  ;;  %v6087_v8 = vadd.f32 %v6009_v16, %v5927_v4  ;;  %v6171_v56 = vld [vmem:[#allocation3 + $0x3b] sm:$0xff] }
 0x6f4   : > { %6510 = vrot.lane.b32.xlu0 %v10113_v5, %s7601_s19  ;;  %6508 = vrot.lane.b32.xlu1 %v10115_v38, %s7601_s19  ;;  %v5932_v38 = vld [vmem:[#allocation3 + $0x10c] sm:$0xff] }
 0x6f5   : > { %6120 = vst.msk [vmem:[#allocation3 + $0xdc] sm:$0xff] %vm948_vm1, %v6088_v0  ;;  %6119 = vst.msk [vmem:[#allocation3 + $0xcc] sm:$0xff] %vm948_vm1, %v6087_v8  ;;  %v10411_v8 = vld [vmem:[#allocation2 + $0x8] sm:$0xff] }
 0x6f6   : > { %v6015_v2 = vpop.permute.xlu0 %6014  ;;  %v6013_v54 = vpop.permute.xlu1 %6012 }
 0x6f7   : > { %v6090_v36 = vadd.f32 %v6015_v2, %v5930_v19  ;;  %v6089_v62 = vadd.f32 %v6013_v54, %v5929_v14  ;;  %v6173_v2 = vld [vmem:[#allocation3 + $0x53] sm:$0xff] }
 0x6f8   : > { %6514 = vrot.lane.b32.xlu0 %v10123_v18, %s7601_s19  ;;  %6512 = vrot.lane.b32.xlu1 %v10125_v42, %s7601_s19  ;;  %v5934_v42 = vld [vmem:[#allocation3 + $0x124] sm:$0xff] }
 0x6f9   : > { %6122 = vst.msk [vmem:[#allocation3 + $0xf4] sm:$0xff] %vm948_vm1, %v6090_v36  ;;  %6121 = vst.msk [vmem:[#allocation3 + $0xe4] sm:$0xff] %vm948_vm1, %v6089_v62  ;;  %v10419_v36 = vld [vmem:[#allocation2 + $0x28] sm:$0xff]  ;;  %v10421_v62 = vld [vmem:[#allocation2 + $0x18] sm:$0xff] }
 0x6fa   : > { %v6019_v5 = vpop.permute.xlu0 %6018  ;;  %v6017_v21 = vpop.permute.xlu1 %6016 }
 0x6fb   : > { %v6092_v31 = vadd.f32 %v6019_v5, %v5932_v38  ;;  %v6091_v23 = vadd.f32 %v6017_v21, %v5931_v33  ;;  %v6176_v5 = vld [vmem:[#allocation3 + $0x7b] sm:$0xff]  ;;  %v6175_v38 = vld [vmem:[#allocation3 + $0x6b] sm:$0xff] }
 0x6fc   : > { %6518 = vrot.lane.b32.xlu0 %v10133_v30, %s7601_s19  ;;  %6516 = vrot.lane.b32.xlu1 %v10135_v32, %s7601_s19  ;;  %v5936_v32 = vld [vmem:[#allocation3 + $0x13c] sm:$0xff] }
 0x6fd   : > { %6124 = vst.msk [vmem:[#allocation3 + $0x10c] sm:$0xff] %vm948_vm1, %v6092_v31  ;;  %6123 = vst.msk [vmem:[#allocation3 + $0xfc] sm:$0xff] %vm948_vm1, %v6091_v23  ;;  %v10429_v23 = vld [vmem:[#allocation2 + $0x48] sm:$0xff] }
 0x6fe   : > { %v6023_v18 = vpop.permute.xlu0 %6022  ;;  %v6021_v58 = vpop.permute.xlu1 %6020 }
 0x6ff   : > { %v6094_v28 = vadd.f32 %v6023_v18, %v5934_v42  ;;  %v6093_v46 = vadd.f32 %v6021_v58, %v5933_v60  ;;  %v10431_v18 = vld [vmem:[#allocation2 + $0x38] sm:$0xff]  ;;  %v6177_v58 = vld [vmem:[#allocation3 + $0x83] sm:$0xff] }
 0x700   : > { %6522 = vrot.lane.b32.xlu0 %v10143_v37, %s7601_s19  ;;  %6520 = vrot.lane.b32.xlu1 %v10145_v11, %s7601_s19  ;;  %v5938_v11 = vld [vmem:[#allocation3 + $0x154] sm:$0xff] }
 0x701   : > { %6126 = vst.msk [vmem:[#allocation3 + $0x124] sm:$0xff] %vm948_vm1, %v6094_v28  ;;  %6125 = vst.msk [vmem:[#allocation3 + $0x114] sm:$0xff] %vm948_vm1, %v6093_v46  ;;  %v6178_v60 = vld [vmem:[#allocation3 + $0x93] sm:$0xff] }
 0x702   : > { %v6027_v30 = vpop.permute.xlu0 %6026  ;;  %v6025_v59 = vpop.permute.xlu1 %6024 }
 0x703   : > { %v6096_v55 = vadd.f32 %v6027_v30, %v5936_v32  ;;  %v6095_v45 = vadd.f32 %v6025_v59, %v5935_v29  ;;  %v10439_v32 = vld [vmem:[#allocation2 + $0x68] sm:$0xff]  ;;  %v10441_v29 = vld [vmem:[#allocation2 + $0x58] sm:$0xff] }
 0x704   : > { %6526 = vrot.lane.b32.xlu0 %v10153_v9, %s7601_s19  ;;  %6524 = vrot.lane.b32.xlu1 %v10155_v20, %s7601_s19  ;;  %v5940_v20 = vld [vmem:[#allocation3 + $0x16c] sm:$0xff] }
 0x705   : > { %6128 = vst.msk [vmem:[#allocation3 + $0x13c] sm:$0xff] %vm948_vm1, %v6096_v55  ;;  %6127 = vst.msk [vmem:[#allocation3 + $0x12c] sm:$0xff] %vm948_vm1, %v6095_v45  ;;  %v6180_v55 = vld [vmem:[#allocation3 + $0xab] sm:$0xff]  ;;  %v6179_v45 = vld [vmem:[#allocation3 + $0x9b] sm:$0xff] }
 0x706   : > { %v6031_v37 = vpop.permute.xlu0 %6030  ;;  %v6029_v49 = vpop.permute.xlu1 %6028 }
 0x707   : > { %v6098_v44 = vadd.f32 %v6031_v37, %v5938_v11  ;;  %v6097_v61 = vadd.f32 %v6029_v49, %v5937_v6  ;;  %v10449_v49 = vld [vmem:[#allocation2 + $0x88] sm:$0xff] }
 0x708   : > { %6530 = vrot.lane.b32.xlu0 %v10163_v7, %s7601_s19  ;;  %6528 = vrot.lane.b32.xlu1 %v10165_v24, %s7601_s19  ;;  %v6166_v7 = vld [vmem:[#allocation3 + $0x3] sm:$0xff] }
 0x709   : > { %6130 = vst.msk [vmem:[#allocation3 + $0x154] sm:$0xff] %vm948_vm1, %v6098_v44  ;;  %6129 = vst.msk [vmem:[#allocation3 + $0x144] sm:$0xff] %vm948_vm1, %v6097_v61  ;;  %v10451_v44 = vld [vmem:[#allocation2 + $0x78] sm:$0xff] }
 0x70a   : > { %v6035_v9 = vpop.permute.xlu0 %6034  ;;  %v6033_v35 = vpop.permute.xlu1 %6032 }
 0x70b   : > { %v6100_v27 = vadd.f32 %v6035_v9, %v5940_v20  ;;  %v6099_v3 = vadd.f32 %v6033_v35, %v5939_v57  ;;  %v6182_v9 = vld [vmem:[#allocation3 + $0xc3] sm:$0xff]  ;;  %v6181_v20 = vld [vmem:[#allocation3 + $0xb3] sm:$0xff] }
 0x70c   : > { %6534 = vrot.lane.b32.xlu0 %v10173_v25, %s7601_s19  ;;  %6532 = vrot.lane.b32.xlu1 %v10175_v50, %s7601_s19  ;;  %v6168_v50 = vld [vmem:[#allocation3 + $0x1b] sm:$0xff] }
 0x70d   : > { %6132 = vst.msk [vmem:[#allocation3 + $0x16c] sm:$0xff] %vm948_vm1, %v6100_v27  ;;  %6131 = vst.msk [vmem:[#allocation3 + $0x15c] sm:$0xff] %vm948_vm1, %v6099_v3  ;;  %v10459_v3 = vld [vmem:[#allocation2 + $0xa8] sm:$0xff] }
 0x70e   : > { %v6231_v24 = vpop.permute.xlu0 %6230  ;;  %v6037_v22 = vpop.permute.xlu1 %6036 }
 0x70f   : > { %v6326_v12 = vadd.f32 %v6231_v24, %v6166_v7  ;;  %v6101_v17 = vadd.f32 %v6037_v22, %v5941_v26  ;;  %v10461_v7 = vld [vmem:[#allocation2 + $0x98] sm:$0xff]  ;;  %v6183_v22 = vld [vmem:[#allocation3 + $0xcb] sm:$0xff] }
 0x710   : > { %6538 = vrot.lane.b32.xlu0 %v10183_v43, %s7601_s19  ;;  %6536 = vrot.lane.b32.xlu1 %v10185_v13, %s7601_s19  ;;  %v6170_v13 = vld [vmem:[#allocation3 + $0x33] sm:$0xff]  ;;  %v6184_v26 = vld [vmem:[#allocation3 + $0xdb] sm:$0xff] }
 0x711   : > { %6358 = vst.msk [vmem:[#allocation3 + $0x3] sm:$0xff] %vm948_vm1, %v6326_v12  ;;  %6133 = vst.msk [vmem:[#allocation3 + $0x174] sm:$0xff] %vm948_vm1, %v6101_v17 }
 0x712   : > { %v6235_v25 = vpop.permute.xlu0 %6234  ;;  %v6233_v34 = vpop.permute.xlu1 %6232 }
 0x713   : > { %v6328_v10 = vadd.f32 %v6235_v25, %v6168_v50  ;;  %v6327_v63 = vadd.f32 %v6233_v34, %v6167_v41  ;;  %v10469_v50 = vld [vmem:[#allocation2 + $0xc8] sm:$0xff]  ;;  %v10471_v41 = vld [vmem:[#allocation2 + $0xb8] sm:$0xff] }
 0x714   : > { %6542 = vrot.lane.b32.xlu0 %v10193_v15, %s7601_s19  ;;  %6540 = vrot.lane.b32.xlu1 %v10195_v47, %s7601_s19  ;;  %v6172_v47 = vld [vmem:[#allocation3 + $0x4b] sm:$0xff] }
 0x715   : > { %6360 = vst.msk [vmem:[#allocation3 + $0x1b] sm:$0xff] %vm948_vm1, %v6328_v10  ;;  %6359 = vst.msk [vmem:[#allocation3 + $0xb] sm:$0xff] %vm948_vm1, %v6327_v63  ;;  %v6186_v10 = vld [vmem:[#allocation3 + $0xf3] sm:$0xff]  ;;  %v6185_v63 = vld [vmem:[#allocation3 + $0xe3] sm:$0xff] }
 0x716   : > { %v6239_v43 = vpop.permute.xlu0 %6238  ;;  %v6237_v40 = vpop.permute.xlu1 %6236 }
 0x717   : > { %v6330_v39 = vadd.f32 %v6239_v43, %v6170_v13  ;;  %v6329_v52 = vadd.f32 %v6237_v40, %v6169_v48  ;;  %v10479_v40 = vld [vmem:[#allocation2 + $0xe8] sm:$0xff] }
 0x718   : > { %6546 = vrot.lane.b32.xlu0 %v10203_v51, %s7601_s19  ;;  %6544 = vrot.lane.b32.xlu1 %v10205_v1, %s7601_s19  ;;  %v6174_v1 = vld [vmem:[#allocation3 + $0x63] sm:$0xff] }
 0x719   : > { %6362 = vst.msk [vmem:[#allocation3 + $0x33] sm:$0xff] %vm948_vm1, %v6330_v39  ;;  %6361 = vst.msk [vmem:[#allocation3 + $0x23] sm:$0xff] %vm948_vm1, %v6329_v52  ;;  %v10481_v39 = vld [vmem:[#allocation2 + $0xd8] sm:$0xff] }
 0x71a   : > { %v6243_v15 = vpop.permute.xlu0 %6242  ;;  %v6241_v4 = vpop.permute.xlu1 %6240 }
 0x71b   : > { %v6332_v16 = vadd.f32 %v6243_v15, %v6172_v47  ;;  %v6331_v0 = vadd.f32 %v6241_v4, %v6171_v56  ;;  %v6188_v15 = vld [vmem:[#allocation3 + $0x10b] sm:$0xff]  ;;  %v6187_v47 = vld [vmem:[#allocation3 + $0xfb] sm:$0xff] }
 0x71c   : > { %6742 = vrot.lane.b32.xlu0 %v10411_v8, %s7602_s22  ;;  %6548 = vrot.lane.b32.xlu1 %v10213_v53, %s7601_s19 }
 0x71d   : > { %6364 = vst.msk [vmem:[#allocation3 + $0x4b] sm:$0xff] %vm948_vm1, %v6332_v16  ;;  %6363 = vst.msk [vmem:[#allocation3 + $0x3b] sm:$0xff] %vm948_vm1, %v6331_v0  ;;  %v10489_v0 = vld [vmem:[#allocation2 + $0x108] sm:$0xff] }
 0x71e   : > { %v6247_v51 = vpop.permute.xlu0 %6246  ;;  %v6245_v19 = vpop.permute.xlu1 %6244 }
 0x71f   : > { %v6334_v14 = vadd.f32 %v6247_v51, %v6174_v1  ;;  %v6333_v54 = vadd.f32 %v6245_v19, %v6173_v2  ;;  %v10491_v51 = vld [vmem:[#allocation2 + $0xf8] sm:$0xff]  ;;  %v6190_v2 = vld [vmem:[#allocation3 + $0x123] sm:$0xff] }
 0x720   : > { %6746 = vrot.lane.b32.xlu0 %v10419_v36, %s7602_s22  ;;  %6744 = vrot.lane.b32.xlu1 %v10421_v62, %s7602_s22  ;;  %v6189_v19 = vld [vmem:[#allocation3 + $0x113] sm:$0xff] }
 0x721   : > { %6366 = vst.msk [vmem:[#allocation3 + $0x63] sm:$0xff] %vm948_vm1, %v6334_v14  ;;  %6365 = vst.msk [vmem:[#allocation3 + $0x53] sm:$0xff] %vm948_vm1, %v6333_v54 }
 0x722   : > { %v6251_v53 = vpop.permute.xlu0 %6250  ;;  %v6249_v33 = vpop.permute.xlu1 %6248 }
 0x723   : > { %v6336_v21 = vadd.f32 %v6251_v53, %v6176_v5  ;;  %v6335_v31 = vadd.f32 %v6249_v33, %v6175_v38  ;;  %v10499_v5 = vld [vmem:[#allocation2 + $0x128] sm:$0xff]  ;;  %v10501_v38 = vld [vmem:[#allocation2 + $0x118] sm:$0xff] }
 0x724   : > { %6750 = vrot.lane.b32.xlu0 %v10429_v23, %s7602_s22  ;;  %6748 = vrot.lane.b32.xlu1 %v10431_v18, %s7602_s22 }
 0x725   : > { %6368 = vst.msk [vmem:[#allocation3 + $0x7b] sm:$0xff] %vm948_vm1, %v6336_v21  ;;  %6367 = vst.msk [vmem:[#allocation3 + $0x6b] sm:$0xff] %vm948_vm1, %v6335_v31  ;;  %v6192_v21 = vld [vmem:[#allocation3 + $0x13b] sm:$0xff]  ;;  %v6191_v31 = vld [vmem:[#allocation3 + $0x12b] sm:$0xff] }
 0x726   : > { %v6255_v42 = vpop.permute.xlu0 %6254  ;;  %v6253_v28 = vpop.permute.xlu1 %6252 }
 0x727   : > { %v6338_v46 = vadd.f32 %v6255_v42, %v6178_v60  ;;  %v6337_v30 = vadd.f32 %v6253_v28, %v6177_v58  ;;  %v10509_v28 = vld [vmem:[#allocation2 + $0x148] sm:$0xff] }
 0x728   : > { %6754 = vrot.lane.b32.xlu0 %v10439_v32, %s7602_s22  ;;  %6752 = vrot.lane.b32.xlu1 %v10441_v29, %s7602_s22 }
 0x729   : > { %6370 = vst.msk [vmem:[#allocation3 + $0x93] sm:$0xff] %vm948_vm1, %v6338_v46  ;;  %6369 = vst.msk [vmem:[#allocation3 + $0x83] sm:$0xff] %vm948_vm1, %v6337_v30  ;;  %v10511_v46 = vld [vmem:[#allocation2 + $0x138] sm:$0xff] }
 0x72a   : > { %v6259_v59 = vpop.permute.xlu0 %6258  ;;  %v6257_v37 = vpop.permute.xlu1 %6256 }
 0x72b   : > { %v6340_v11 = vadd.f32 %v6259_v59, %v6180_v55  ;;  %v6339_v6 = vadd.f32 %v6257_v37, %v6179_v45  ;;  %v6194_v59 = vld [vmem:[#allocation3 + $0x153] sm:$0xff]  ;;  %v6193_v55 = vld [vmem:[#allocation3 + $0x143] sm:$0xff] }
 0x72c   : > { %6758 = vrot.lane.b32.xlu0 %v10449_v49, %s7602_s22  ;;  %6756 = vrot.lane.b32.xlu1 %v10451_v44, %s7602_s22 }
 0x72d   : > { %6372 = vst.msk [vmem:[#allocation3 + $0xab] sm:$0xff] %vm948_vm1, %v6340_v11  ;;  %6371 = vst.msk [vmem:[#allocation3 + $0x9b] sm:$0xff] %vm948_vm1, %v6339_v6  ;;  %v10519_v6 = vld [vmem:[#allocation2 + $0x168] sm:$0xff] }
 0x72e   : > { %v6263_v61 = vpop.permute.xlu0 %6262  ;;  %v6261_v57 = vpop.permute.xlu1 %6260 }
 0x72f   : > { %v6342_v35 = vadd.f32 %v6263_v61, %v6182_v9  ;;  %v6341_v27 = vadd.f32 %v6261_v57, %v6181_v20  ;;  %v10521_v61 = vld [vmem:[#allocation2 + $0x158] sm:$0xff]  ;;  %v6196_v20 = vld [vmem:[#allocation3 + $0x16b] sm:$0xff] }
 0x730   : > { %6762 = vrot.lane.b32.xlu0 %v10459_v3, %s7602_s22  ;;  %6760 = vrot.lane.b32.xlu1 %v10461_v7, %s7602_s22  ;;  %v6195_v57 = vld [vmem:[#allocation3 + $0x15b] sm:$0xff] }
 0x731   : > { %6374 = vst.msk [vmem:[#allocation3 + $0xc3] sm:$0xff] %vm948_vm1, %v6342_v35  ;;  %6373 = vst.msk [vmem:[#allocation3 + $0xb3] sm:$0xff] %vm948_vm1, %v6341_v27 }
 0x732   : > { %v6267_v24 = vpop.permute.xlu0 %6266  ;;  %v6265_v12 = vpop.permute.xlu1 %6264 }
 0x733   : > { %v6344_v17 = vadd.f32 %v6267_v24, %v6184_v26  ;;  %v6343_v25 = vadd.f32 %v6265_v12, %v6183_v22  ;;  %v10529_v26 = vld [vmem:[#allocation2 + $0x188] sm:$0xff]  ;;  %v10531_v22 = vld [vmem:[#allocation2 + $0x178] sm:$0xff] }
 0x734   : > { %6766 = vrot.lane.b32.xlu0 %v10469_v50, %s7602_s22  ;;  %6764 = vrot.lane.b32.xlu1 %v10471_v41, %s7602_s22  ;;  %v6422_v12 = vld [vmem:[#allocation3 + $0x2] sm:$0xff] }
 0x735   : > { %6376 = vst.msk [vmem:[#allocation3 + $0xdb] sm:$0xff] %vm948_vm1, %v6344_v17  ;;  %6375 = vst.msk [vmem:[#allocation3 + $0xcb] sm:$0xff] %vm948_vm1, %v6343_v25  ;;  %v6197_v25 = vld [vmem:[#allocation3 + $0x173] sm:$0xff] }
 0x736   : > { %v6271_v34 = vpop.permute.xlu0 %6270  ;;  %v6269_v43 = vpop.permute.xlu1 %6268 }
 0x737   : > { %v6346_v13 = vadd.f32 %v6271_v34, %v6186_v10  ;;  %v6345_v48 = vadd.f32 %v6269_v43, %v6185_v63  ;;  %v10539_v43 = vld [vmem:[#allocation2 + $0x1a8] sm:$0xff] }
 0x738   : > { %6770 = vrot.lane.b32.xlu0 %v10479_v40, %s7602_s22  ;;  %6768 = vrot.lane.b32.xlu1 %v10481_v39, %s7602_s22 }
 0x739   : > { %6378 = vst.msk [vmem:[#allocation3 + $0xf3] sm:$0xff] %vm948_vm1, %v6346_v13  ;;  %6377 = vst.msk [vmem:[#allocation3 + $0xe3] sm:$0xff] %vm948_vm1, %v6345_v48  ;;  %v10541_v13 = vld [vmem:[#allocation2 + $0x198] sm:$0xff] }
 0x73a   : > { %v6275_v52 = vpop.permute.xlu0 %6274  ;;  %v6273_v56 = vpop.permute.xlu1 %6272 }
 0x73b   : > { %v6348_v4 = vadd.f32 %v6275_v52, %v6188_v15  ;;  %v6347_v16 = vadd.f32 %v6273_v56, %v6187_v47  ;;  %v6424_v52 = vld [vmem:[#allocation3 + $0x1a] sm:$0xff]  ;;  %v6423_v15 = vld [vmem:[#allocation3 + $0xa] sm:$0xff] }
 0x73c   : > { %6774 = vrot.lane.b32.xlu0 %v10489_v0, %s7602_s22  ;;  %6772 = vrot.lane.b32.xlu1 %v10491_v51, %s7602_s22 }
 0x73d   : > { %6380 = vst.msk [vmem:[#allocation3 + $0x10b] sm:$0xff] %vm948_vm1, %v6348_v4  ;;  %6379 = vst.msk [vmem:[#allocation3 + $0xfb] sm:$0xff] %vm948_vm1, %v6347_v16  ;;  %v10549_v16 = vld [vmem:[#allocation2 + $0x1c8] sm:$0xff] }
 0x73e   : > { %v6279_v1 = vpop.permute.xlu0 %6278  ;;  %v6277_v14 = vpop.permute.xlu1 %6276 }
 0x73f   : > { %v6350_v54 = vadd.f32 %v6279_v1, %v6190_v2  ;;  %v6349_v53 = vadd.f32 %v6277_v14, %v6189_v19  ;;  %v10551_v1 = vld [vmem:[#allocation2 + $0x1b8] sm:$0xff]  ;;  %v6425_v14 = vld [vmem:[#allocation3 + $0x22] sm:$0xff] }
 0x740   : > { %6778 = vrot.lane.b32.xlu0 %v10499_v5, %s7602_s22  ;;  %6776 = vrot.lane.b32.xlu1 %v10501_v38, %s7602_s22  ;;  %v6426_v19 = vld [vmem:[#allocation3 + $0x32] sm:$0xff] }
 0x741   : > { %6382 = vst.msk [vmem:[#allocation3 + $0x123] sm:$0xff] %vm948_vm1, %v6350_v54  ;;  %6381 = vst.msk [vmem:[#allocation3 + $0x113] sm:$0xff] %vm948_vm1, %v6349_v53 }
 0x742   : > { %v6283_v33 = vpop.permute.xlu0 %6282  ;;  %v6281_v42 = vpop.permute.xlu1 %6280 }
 0x743   : > { %v6352_v60 = vadd.f32 %v6283_v33, %v6192_v21  ;;  %v6351_v58 = vadd.f32 %v6281_v42, %v6191_v31  ;;  %v10559_v21 = vld [vmem:[#allocation2 + $0x1e8] sm:$0xff]  ;;  %v10561_v31 = vld [vmem:[#allocation2 + $0x1d8] sm:$0xff] }
 0x744   : > { %6782 = vrot.lane.b32.xlu0 %v10509_v28, %s7602_s22  ;;  %6780 = vrot.lane.b32.xlu1 %v10511_v46, %s7602_s22 }
 0x745   : > { %6384 = vst.msk [vmem:[#allocation3 + $0x13b] sm:$0xff] %vm948_vm1, %v6352_v60  ;;  %6383 = vst.msk [vmem:[#allocation3 + $0x12b] sm:$0xff] %vm948_vm1, %v6351_v58  ;;  %v6428_v60 = vld [vmem:[#allocation3 + $0x4a] sm:$0xff]  ;;  %v6427_v58 = vld [vmem:[#allocation3 + $0x3a] sm:$0xff] }
 0x746   : > { %v6287_v30 = vpop.permute.xlu0 %6286  ;;  %v6285_v45 = vpop.permute.xlu1 %6284 }
 0x747   : > { %v6354_v37 = vadd.f32 %v6287_v30, %v6194_v59  ;;  %v6353_v11 = vadd.f32 %v6285_v45, %v6193_v55  ;;  %v10569_v45 = vld [vmem:[#allocation2 + $0x1f8] sm:$0xff] }
 0x748   : > { %6786 = vrot.lane.b32.xlu0 %v10519_v6, %s7602_s22  ;;  %6784 = vrot.lane.b32.xlu1 %v10521_v61, %s7602_s22 }
 0x749   : > { %6386 = vst.msk [vmem:[#allocation3 + $0x153] sm:$0xff] %vm948_vm1, %v6354_v37  ;;  %6385 = vst.msk [vmem:[#allocation3 + $0x143] sm:$0xff] %vm948_vm1, %v6353_v11  ;;  %v6430_v11 = vld [vmem:[#allocation3 + $0x62] sm:$0xff] }
 0x74a   : > { %v6291_v9 = vpop.permute.xlu0 %6290  ;;  %v6289_v35 = vpop.permute.xlu1 %6288 }
 0x74b   : > { %v6356_v27 = vadd.f32 %v6291_v9, %v6196_v20  ;;  %v6355_v24 = vadd.f32 %v6289_v35, %v6195_v57  ;;  %v6429_v9 = vld [vmem:[#allocation3 + $0x52] sm:$0xff] }
 0x74c   : > { %6790 = vrot.lane.b32.xlu0 %v10529_v26, %s7602_s22  ;;  %6788 = vrot.lane.b32.xlu1 %v10531_v22, %s7602_s22 }
 0x74d   : > { %6388 = vst.msk [vmem:[#allocation3 + $0x16b] sm:$0xff] %vm948_vm1, %v6356_v27  ;;  %6387 = vst.msk [vmem:[#allocation3 + $0x15b] sm:$0xff] %vm948_vm1, %v6355_v24  ;;  %v6432_v27 = vld [vmem:[#allocation3 + $0x7a] sm:$0xff]  ;;  %v6431_v24 = vld [vmem:[#allocation3 + $0x6a] sm:$0xff] }
 0x74e   : > { %v6487_v17 = vpop.permute.xlu0 %6486  ;;  %v6293_v34 = vpop.permute.xlu1 %6292 }
 0x74f   : > { %v6582_v10 = vadd.f32 %v6487_v17, %v6422_v12  ;;  %v6357_v63 = vadd.f32 %v6293_v34, %v6197_v25  ;;  %v6433_v34 = vld [vmem:[#allocation3 + $0x82] sm:$0xff] }
 0x750   : > { %6794 = vrot.lane.b32.xlu0 %v10539_v43, %s7602_s22  ;;  %6792 = vrot.lane.b32.xlu1 %v10541_v13, %s7602_s22 }
 0x751   : > { %6614 = vst.msk [vmem:[#allocation3 + $0x2] sm:$0xff] %vm948_vm1, %v6582_v10  ;;  %6389 = vst.msk [vmem:[#allocation3 + $0x173] sm:$0xff] %vm948_vm1, %v6357_v63 }
 0x752   : > { %v6491_v48 = vpop.permute.xlu0 %6490  ;;  %v6489_v47 = vpop.permute.xlu1 %6488 }
 0x753   : > { %v6584_v56 = vadd.f32 %v6491_v48, %v6424_v52  ;;  %v6583_v4 = vadd.f32 %v6489_v47, %v6423_v15  ;;  %v6435_v52 = vld [vmem:[#allocation3 + $0x9a] sm:$0xff] }
 0x754   : > { %6798 = vrot.lane.b32.xlu0 %v10549_v16, %s7602_s22  ;;  %6796 = vrot.lane.b32.xlu1 %v10551_v1, %s7602_s22 }
 0x755   : > { %6616 = vst.msk [vmem:[#allocation3 + $0x1a] sm:$0xff] %vm948_vm1, %v6584_v56  ;;  %6615 = vst.msk [vmem:[#allocation3 + $0xa] sm:$0xff] %vm948_vm1, %v6583_v4  ;;  %v6437_v4 = vld [vmem:[#allocation3 + $0xb2] sm:$0xff] }
 0x756   : > { %v6495_v2 = vpop.permute.xlu0 %6494  ;;  %v6493_v54 = vpop.permute.xlu1 %6492 }
 0x757   : > { %v6586_v53 = vadd.f32 %v6495_v2, %v6426_v19  ;;  %v6585_v33 = vadd.f32 %v6493_v54, %v6425_v14  ;;  %v6439_v54 = vld [vmem:[#allocation3 + $0xca] sm:$0xff] }
 0x758   : > { %6802 = vrot.lane.b32.xlu0 %v10559_v21, %s7602_s22  ;;  %6800 = vrot.lane.b32.xlu1 %v10561_v31, %s7602_s22 }
 0x759   : > { %6618 = vst.msk [vmem:[#allocation3 + $0x32] sm:$0xff] %vm948_vm1, %v6586_v53  ;;  %6617 = vst.msk [vmem:[#allocation3 + $0x22] sm:$0xff] %vm948_vm1, %v6585_v33 }
 0x75a   : > { %v6499_v42 = vpop.permute.xlu0 %6498  ;;  %v6497_v30 = vpop.permute.xlu1 %6496 }
 0x75b   : > { %v6588_v59 = vadd.f32 %v6499_v42, %v6428_v60  ;;  %v6587_v55 = vadd.f32 %v6497_v30, %v6427_v58  ;;  %v6441_v60 = vld [vmem:[#allocation3 + $0xe2] sm:$0xff] }
 0x75c   : > { %7006 = vrot.lane.b32.xlu0 %v10429_v23, %s7603_s23  ;;  %6804 = vrot.lane.b32.xlu1 %v10569_v45, %s7602_s22 }
 0x75d   : > { %6620 = vst.msk [vmem:[#allocation3 + $0x4a] sm:$0xff] %vm948_vm1, %v6588_v59  ;;  %6619 = vst.msk [vmem:[#allocation3 + $0x3a] sm:$0xff] %vm948_vm1, %v6587_v55  ;;  %v6443_v55 = vld [vmem:[#allocation3 + $0xfa] sm:$0xff] }
 0x75e   : > { %v6503_v37 = vpop.permute.xlu0 %6502  ;;  %v6501_v20 = vpop.permute.xlu1 %6500 }
 0x75f   : > { %v6590_v57 = vadd.f32 %v6503_v37, %v6430_v11  ;;  %v6589_v35 = vadd.f32 %v6501_v20, %v6429_v9  ;;  %v6445_v20 = vld [vmem:[#allocation3 + $0x112] sm:$0xff] }
 0x760   : > { %7010 = vrot.lane.b32.xlu0 %v10439_v32, %s7603_s23  ;;  %7008 = vrot.lane.b32.xlu1 %v10441_v29, %s7603_s23  ;;  %v6434_v29 = vld [vmem:[#allocation3 + $0x92] sm:$0xff] }
 0x761   : > { %6622 = vst.msk [vmem:[#allocation3 + $0x62] sm:$0xff] %vm948_vm1, %v6590_v57  ;;  %6621 = vst.msk [vmem:[#allocation3 + $0x52] sm:$0xff] %vm948_vm1, %v6589_v35 }
 0x762   : > { %v6507_v23 = vpop.permute.xlu0 %6506  ;;  %v6505_v12 = vpop.permute.xlu1 %6504 }
 0x763   : > { %v6592_v17 = vadd.f32 %v6507_v23, %v6432_v27  ;;  %v6591_v25 = vadd.f32 %v6505_v12, %v6431_v24  ;;  %v6447_v27 = vld [vmem:[#allocation3 + $0x12a] sm:$0xff] }
 0x764   : > { %7014 = vrot.lane.b32.xlu0 %v10449_v49, %s7603_s23  ;;  %7012 = vrot.lane.b32.xlu1 %v10451_v44, %s7603_s23  ;;  %v6436_v44 = vld [vmem:[#allocation3 + $0xaa] sm:$0xff] }
 0x765   : > { %6624 = vst.msk [vmem:[#allocation3 + $0x7a] sm:$0xff] %vm948_vm1, %v6592_v17  ;;  %6623 = vst.msk [vmem:[#allocation3 + $0x6a] sm:$0xff] %vm948_vm1, %v6591_v25  ;;  %v6449_v25 = vld [vmem:[#allocation3 + $0x142] sm:$0xff] }
 0x766   : > { %v6511_v32 = vpop.permute.xlu0 %6510  ;;  %v6509_v10 = vpop.permute.xlu1 %6508 }
 0x767   : > { %v6594_v63 = vadd.f32 %v6511_v32, %v6434_v29  ;;  %v6593_v48 = vadd.f32 %v6509_v10, %v6433_v34  ;;  %v6451_v10 = vld [vmem:[#allocation3 + $0x15a] sm:$0xff] }
 0x768   : > { %7018 = vrot.lane.b32.xlu0 %v10459_v3, %s7603_s23  ;;  %7016 = vrot.lane.b32.xlu1 %v10461_v7, %s7603_s23  ;;  %v6438_v7 = vld [vmem:[#allocation3 + $0xc2] sm:$0xff] }
 0x769   : > { %6626 = vst.msk [vmem:[#allocation3 + $0x92] sm:$0xff] %vm948_vm1, %v6594_v63  ;;  %6625 = vst.msk [vmem:[#allocation3 + $0x82] sm:$0xff] %vm948_vm1, %v6593_v48 }
 0x76a   : > { %v6515_v49 = vpop.permute.xlu0 %6514  ;;  %v6513_v15 = vpop.permute.xlu1 %6512 }
 0x76b   : > { %v6596_v47 = vadd.f32 %v6515_v49, %v6436_v44  ;;  %v6595_v56 = vadd.f32 %v6513_v15, %v6435_v52  ;;  %v6453_v44 = vld [vmem:[#allocation3 + $0x172] sm:$0xff] }
 0x76c   : > { %7022 = vrot.lane.b32.xlu0 %v10469_v50, %s7603_s23  ;;  %7020 = vrot.lane.b32.xlu1 %v10471_v41, %s7603_s23  ;;  %v6440_v41 = vld [vmem:[#allocation3 + $0xda] sm:$0xff] }
 0x76d   : > { %6628 = vst.msk [vmem:[#allocation3 + $0xaa] sm:$0xff] %vm948_vm1, %v6596_v47  ;;  %6627 = vst.msk [vmem:[#allocation3 + $0x9a] sm:$0xff] %vm948_vm1, %v6595_v56  ;;  %v6679_v56 = vld [vmem:[#allocation3 + $0x9] sm:$0xff] }
 0x76e   : > { %v6519_v3 = vpop.permute.xlu0 %6518  ;;  %v6517_v2 = vpop.permute.xlu1 %6516 }
 0x76f   : > { %v6598_v19 = vadd.f32 %v6519_v3, %v6438_v7  ;;  %v6597_v14 = vadd.f32 %v6517_v2, %v6437_v4  ;;  %v6681_v2 = vld [vmem:[#allocation3 + $0x21] sm:$0xff] }
 0x770   : > { %7026 = vrot.lane.b32.xlu0 %v10479_v40, %s7603_s23  ;;  %7024 = vrot.lane.b32.xlu1 %v10481_v39, %s7603_s23  ;;  %v6442_v39 = vld [vmem:[#allocation3 + $0xf2] sm:$0xff] }
 0x771   : > { %6630 = vst.msk [vmem:[#allocation3 + $0xc2] sm:$0xff] %vm948_vm1, %v6598_v19  ;;  %6629 = vst.msk [vmem:[#allocation3 + $0xb2] sm:$0xff] %vm948_vm1, %v6597_v14 }
 0x772   : > { %v6523_v50 = vpop.permute.xlu0 %6522  ;;  %v6521_v53 = vpop.permute.xlu1 %6520 }
 0x773   : > { %v6600_v33 = vadd.f32 %v6523_v50, %v6440_v41  ;;  %v6599_v42 = vadd.f32 %v6521_v53, %v6439_v54  ;;  %v6683_v41 = vld [vmem:[#allocation3 + $0x39] sm:$0xff] }
 0x774   : > { %7030 = vrot.lane.b32.xlu0 %v10489_v0, %s7603_s23  ;;  %7028 = vrot.lane.b32.xlu1 %v10491_v51, %s7603_s23  ;;  %v6444_v51 = vld [vmem:[#allocation3 + $0x10a] sm:$0xff] }
 0x775   : > { %6632 = vst.msk [vmem:[#allocation3 + $0xda] sm:$0xff] %vm948_vm1, %v6600_v33  ;;  %6631 = vst.msk [vmem:[#allocation3 + $0xca] sm:$0xff] %vm948_vm1, %v6599_v42  ;;  %v6686_v42 = vld [vmem:[#allocation3 + $0x61] sm:$0xff] }
 0x776   : > { %v6527_v40 = vpop.permute.xlu0 %6526  ;;  %v6525_v58 = vpop.permute.xlu1 %6524 }
 0x777   : > { %v6602_v30 = vadd.f32 %v6527_v40, %v6442_v39  ;;  %v6601_v59 = vadd.f32 %v6525_v58, %v6441_v60 }
 0x778   : > { %7034 = vrot.lane.b32.xlu0 %v10499_v5, %s7603_s23  ;;  %7032 = vrot.lane.b32.xlu1 %v10501_v38, %s7603_s23  ;;  %v6446_v38 = vld [vmem:[#allocation3 + $0x122] sm:$0xff] }
 0x779   : > { %6634 = vst.msk [vmem:[#allocation3 + $0xf2] sm:$0xff] %vm948_vm1, %v6602_v30  ;;  %6633 = vst.msk [vmem:[#allocation3 + $0xe2] sm:$0xff] %vm948_vm1, %v6601_v59  ;;  %v6688_v30 = vld [vmem:[#allocation3 + $0x79] sm:$0xff]  ;;  %v6687_v59 = vld [vmem:[#allocation3 + $0x69] sm:$0xff] }
 0x77a   : > { %v6531_v0 = vpop.permute.xlu0 %6530  ;;  %v6529_v37 = vpop.permute.xlu1 %6528 }
 0x77b   : > { %v6604_v11 = vadd.f32 %v6531_v0, %v6444_v51  ;;  %v6603_v9 = vadd.f32 %v6529_v37, %v6443_v55  ;;  %v6690_v37 = vld [vmem:[#allocation3 + $0x91] sm:$0xff] }
 0x77c   : > { %7038 = vrot.lane.b32.xlu0 %v10509_v28, %s7603_s23  ;;  %7036 = vrot.lane.b32.xlu1 %v10511_v46, %s7603_s23  ;;  %v6448_v46 = vld [vmem:[#allocation3 + $0x13a] sm:$0xff] }
 0x77d   : > { %6636 = vst.msk [vmem:[#allocation3 + $0x10a] sm:$0xff] %vm948_vm1, %v6604_v11  ;;  %6635 = vst.msk [vmem:[#allocation3 + $0xfa] sm:$0xff] %vm948_vm1, %v6603_v9  ;;  %v6689_v11 = vld [vmem:[#allocation3 + $0x81] sm:$0xff] }
 0x77e   : > { %v6535_v5 = vpop.permute.xlu0 %6534  ;;  %v6533_v57 = vpop.permute.xlu1 %6532 }
 0x77f   : > { %v6606_v35 = vadd.f32 %v6535_v5, %v6446_v38  ;;  %v6605_v23 = vadd.f32 %v6533_v57, %v6445_v20  ;;  %v6692_v57 = vld [vmem:[#allocation3 + $0xa9] sm:$0xff] }
 0x780   : > { %7042 = vrot.lane.b32.xlu0 %v10519_v6, %s7603_s23  ;;  %7040 = vrot.lane.b32.xlu1 %v10521_v61, %s7603_s23  ;;  %v6450_v61 = vld [vmem:[#allocation3 + $0x152] sm:$0xff] }
 0x781   : > { %6638 = vst.msk [vmem:[#allocation3 + $0x122] sm:$0xff] %vm948_vm1, %v6606_v35  ;;  %6637 = vst.msk [vmem:[#allocation3 + $0x112] sm:$0xff] %vm948_vm1, %v6605_v23  ;;  %v6691_v35 = vld [vmem:[#allocation3 + $0x99] sm:$0xff] }
 0x782   : > { %v6539_v28 = vpop.permute.xlu0 %6538  ;;  %v6537_v24 = vpop.permute.xlu1 %6536 }
 0x783   : > { %v6608_v12 = vadd.f32 %v6539_v28, %v6448_v46  ;;  %v6607_v17 = vadd.f32 %v6537_v24, %v6447_v27  ;;  %v6694_v24 = vld [vmem:[#allocation3 + $0xc1] sm:$0xff] }
 0x784   : > { %7046 = vrot.lane.b32.xlu0 %v10529_v26, %s7603_s23  ;;  %7044 = vrot.lane.b32.xlu1 %v10531_v22, %s7603_s23  ;;  %v6452_v22 = vld [vmem:[#allocation3 + $0x16a] sm:$0xff] }
 0x785   : > { %6640 = vst.msk [vmem:[#allocation3 + $0x13a] sm:$0xff] %vm948_vm1, %v6608_v12  ;;  %6639 = vst.msk [vmem:[#allocation3 + $0x12a] sm:$0xff] %vm948_vm1, %v6607_v17  ;;  %v6693_v12 = vld [vmem:[#allocation3 + $0xb1] sm:$0xff] }
 0x786   : > { %v6543_v6 = vpop.permute.xlu0 %6542  ;;  %v6541_v32 = vpop.permute.xlu1 %6540 }
 0x787   : > { %v6610_v29 = vadd.f32 %v6543_v6, %v6450_v61  ;;  %v6609_v34 = vadd.f32 %v6541_v32, %v6449_v25  ;;  %v6696_v32 = vld [vmem:[#allocation3 + $0xd9] sm:$0xff] }
 0x788   : > { %7050 = vrot.lane.b32.xlu0 %v10539_v43, %s7603_s23  ;;  %7048 = vrot.lane.b32.xlu1 %v10541_v13, %s7603_s23  ;;  %v6678_v43 = vld [vmem:[#allocation3 + $0x1] sm:$0xff] }
 0x789   : > { %6642 = vst.msk [vmem:[#allocation3 + $0x152] sm:$0xff] %vm948_vm1, %v6610_v29  ;;  %6641 = vst.msk [vmem:[#allocation3 + $0x142] sm:$0xff] %vm948_vm1, %v6609_v34  ;;  %v6695_v29 = vld [vmem:[#allocation3 + $0xc9] sm:$0xff] }
 0x78a   : > { %v6547_v26 = vpop.permute.xlu0 %6546  ;;  %v6545_v63 = vpop.permute.xlu1 %6544 }
 0x78b   : > { %v6612_v48 = vadd.f32 %v6547_v26, %v6452_v22  ;;  %v6611_v49 = vadd.f32 %v6545_v63, %v6451_v10  ;;  %v6698_v63 = vld [vmem:[#allocation3 + $0xf1] sm:$0xff] }
 0x78c   : > { %7054 = vrot.lane.b32.xlu0 %v10549_v16, %s7603_s23  ;;  %7052 = vrot.lane.b32.xlu1 %v10551_v1, %s7603_s23  ;;  %v6680_v1 = vld [vmem:[#allocation3 + $0x19] sm:$0xff] }
 0x78d   : > { %6644 = vst.msk [vmem:[#allocation3 + $0x16a] sm:$0xff] %vm948_vm1, %v6612_v48  ;;  %6643 = vst.msk [vmem:[#allocation3 + $0x15a] sm:$0xff] %vm948_vm1, %v6611_v49  ;;  %v6697_v48 = vld [vmem:[#allocation3 + $0xe1] sm:$0xff] }
 0x78e   : > { %v6743_v13 = vpop.permute.xlu0 %6742  ;;  %v6549_v52 = vpop.permute.xlu1 %6548 }
 0x78f   : > { %v6838_v15 = vadd.f32 %v6743_v13, %v6678_v43  ;;  %v6613_v47 = vadd.f32 %v6549_v52, %v6453_v44  ;;  %v6700_v52 = vld [vmem:[#allocation3 + $0x109] sm:$0xff] }
 0x790   : > { %7058 = vrot.lane.b32.xlu0 %v10559_v21, %s7603_s23  ;;  %7056 = vrot.lane.b32.xlu1 %v10561_v31, %s7603_s23  ;;  %v6682_v31 = vld [vmem:[#allocation3 + $0x31] sm:$0xff] }
 0x791   : > { %6870 = vst.msk [vmem:[#allocation3 + $0x1] sm:$0xff] %vm948_vm1, %v6838_v15  ;;  %6645 = vst.msk [vmem:[#allocation3 + $0x172] sm:$0xff] %vm948_vm1, %v6613_v47  ;;  %v6699_v15 = vld [vmem:[#allocation3 + $0xf9] sm:$0xff] }
 0x792   : > { %v6747_v16 = vpop.permute.xlu0 %6746  ;;  %v6745_v3 = vpop.permute.xlu1 %6744 }
 0x793   : > { %v6840_v7 = vadd.f32 %v6747_v16, %v6680_v1  ;;  %v6839_v4 = vadd.f32 %v6745_v3, %v6679_v56  ;;  %v6702_v3 = vld [vmem:[#allocation3 + $0x121] sm:$0xff] }
 0x794   : > { %6998 = vrot.lane.b32.xlu0 %v10411_v8, %s7603_s23  ;;  %7060 = vrot.lane.b32.xlu1 %v10569_v45, %s7603_s23  ;;  %v6684_v45 = vld [vmem:[#allocation3 + $0x49] sm:$0xff] }
 0x795   : > { %6872 = vst.msk [vmem:[#allocation3 + $0x19] sm:$0xff] %vm948_vm1, %v6840_v7  ;;  %6871 = vst.msk [vmem:[#allocation3 + $0x9] sm:$0xff] %vm948_vm1, %v6839_v4  ;;  %v6701_v7 = vld [vmem:[#allocation3 + $0x111] sm:$0xff] }
 0x796   : > { %v6751_v21 = vpop.permute.xlu0 %6750  ;;  %v6749_v19 = vpop.permute.xlu1 %6748 }
 0x797   : > { %v6842_v14 = vadd.f32 %v6751_v21, %v6682_v31  ;;  %v6841_v50 = vadd.f32 %v6749_v19, %v6681_v2  ;;  %v6704_v19 = vld [vmem:[#allocation3 + $0x139] sm:$0xff] }
 0x798   : > { %7002 = vrot.lane.b32.xlu0 %v10419_v36, %s7603_s23  ;;  %7000 = vrot.lane.b32.xlu1 %v10421_v62, %s7603_s23  ;;  %v6685_v62 = vld [vmem:[#allocation3 + $0x51] sm:$0xff] }
 0x799   : > { %6874 = vst.msk [vmem:[#allocation3 + $0x31] sm:$0xff] %vm948_vm1, %v6842_v14  ;;  %6873 = vst.msk [vmem:[#allocation3 + $0x21] sm:$0xff] %vm948_vm1, %v6841_v50  ;;  %v6703_v14 = vld [vmem:[#allocation3 + $0x129] sm:$0xff] }
 0x79a   : > { %v6755_v8 = vpop.permute.xlu0 %6754  ;;  %v6753_v54 = vpop.permute.xlu1 %6752 }
 0x79b   : > { %v6844_v53 = vadd.f32 %v6755_v8, %v6684_v45  ;;  %v6843_v33 = vadd.f32 %v6753_v54, %v6683_v41  ;;  %v6706_v54 = vld [vmem:[#allocation3 + $0x151] sm:$0xff] }
 0x79c   : > { %7004 = vrot.lane.b32.xlu1 %v10431_v18, %s7603_s23 }
 0x79d   : > { %6876 = vst.msk [vmem:[#allocation3 + $0x49] sm:$0xff] %vm948_vm1, %v6844_v53  ;;  %6875 = vst.msk [vmem:[#allocation3 + $0x39] sm:$0xff] %vm948_vm1, %v6843_v33  ;;  %v6705_v53 = vld [vmem:[#allocation3 + $0x141] sm:$0xff] }
 0x79e   : > { %v6759_v36 = vpop.permute.xlu0 %6758  ;;  %v6757_v40 = vpop.permute.xlu1 %6756 }
 0x79f   : > { %v6846_v39 = vadd.f32 %v6759_v36, %v6686_v42  ;;  %v6845_v60 = vadd.f32 %v6757_v40, %v6685_v62  ;;  %v6708_v40 = vld [vmem:[#allocation3 + $0x169] sm:$0xff] }
 0x7a1   : > { %6878 = vst.msk [vmem:[#allocation3 + $0x61] sm:$0xff] %vm948_vm1, %v6846_v39  ;;  %6877 = vst.msk [vmem:[#allocation3 + $0x51] sm:$0xff] %vm948_vm1, %v6845_v60  ;;  %v6707_v39 = vld [vmem:[#allocation3 + $0x159] sm:$0xff] }
 0x7a2   : > { %v6763_v58 = vpop.permute.xlu0 %6762  ;;  %v6761_v0 = vpop.permute.xlu1 %6760 }
 0x7a3   : > { %v6848_v51 = vadd.f32 %v6763_v58, %v6688_v30  ;;  %v6847_v18 = vadd.f32 %v6761_v0, %v6687_v59  ;;  %v6938_v0 = vld [vmem:[#allocation3 + $0x30] sm:$0xff] }
 0x7a5   : > { %6880 = vst.msk [vmem:[#allocation3 + $0x79] sm:$0xff] %vm948_vm1, %v6848_v51  ;;  %6879 = vst.msk [vmem:[#allocation3 + $0x69] sm:$0xff] %vm948_vm1, %v6847_v18  ;;  %v6709_v51 = vld [vmem:[#allocation3 + $0x171] sm:$0xff] }
 0x7a6   : > { %v6767_v55 = vpop.permute.xlu0 %6766  ;;  %v6765_v9 = vpop.permute.xlu1 %6764 }
 0x7a7   : > { %v6850_v5 = vadd.f32 %v6767_v55, %v6690_v37  ;;  %v6849_v38 = vadd.f32 %v6765_v9, %v6689_v11  ;;  %v6940_v9 = vld [vmem:[#allocation3 + $0x48] sm:$0xff] }
 0x7a9   : > { %6882 = vst.msk [vmem:[#allocation3 + $0x91] sm:$0xff] %vm948_vm1, %v6850_v5  ;;  %6881 = vst.msk [vmem:[#allocation3 + $0x81] sm:$0xff] %vm948_vm1, %v6849_v38  ;;  %v6939_v5 = vld [vmem:[#allocation3 + $0x38] sm:$0xff] }
 0x7aa   : > { %v6771_v20 = vpop.permute.xlu0 %6770  ;;  %v6769_v23 = vpop.permute.xlu1 %6768 }
 0x7ab   : > { %v6852_v28 = vadd.f32 %v6771_v20, %v6692_v57  ;;  %v6851_v46 = vadd.f32 %v6769_v23, %v6691_v35  ;;  %v6942_v23 = vld [vmem:[#allocation3 + $0x60] sm:$0xff] }
 0x7ad   : > { %6884 = vst.msk [vmem:[#allocation3 + $0xa9] sm:$0xff] %vm948_vm1, %v6852_v28  ;;  %6883 = vst.msk [vmem:[#allocation3 + $0x99] sm:$0xff] %vm948_vm1, %v6851_v46  ;;  %v6941_v28 = vld [vmem:[#allocation3 + $0x50] sm:$0xff] }
 0x7ae   : > { %v6775_v27 = vpop.permute.xlu0 %6774  ;;  %v6773_v17 = vpop.permute.xlu1 %6772 }
 0x7af   : > { %v6854_v6 = vadd.f32 %v6775_v27, %v6694_v24  ;;  %v6853_v61 = vadd.f32 %v6773_v17, %v6693_v12  ;;  %v6944_v17 = vld [vmem:[#allocation3 + $0x78] sm:$0xff] }
 0x7b1   : > { %6886 = vst.msk [vmem:[#allocation3 + $0xc1] sm:$0xff] %vm948_vm1, %v6854_v6  ;;  %6885 = vst.msk [vmem:[#allocation3 + $0xb1] sm:$0xff] %vm948_vm1, %v6853_v61  ;;  %v6943_v6 = vld [vmem:[#allocation3 + $0x68] sm:$0xff] }
 0x7b2   : > { %v6779_v25 = vpop.permute.xlu0 %6778  ;;  %v6777_v34 = vpop.permute.xlu1 %6776 }
 0x7b3   : > { %v6856_v26 = vadd.f32 %v6779_v25, %v6696_v32  ;;  %v6855_v22 = vadd.f32 %v6777_v34, %v6695_v29 }
 0x7b5   : > { %6888 = vst.msk [vmem:[#allocation3 + $0xd9] sm:$0xff] %vm948_vm1, %v6856_v26  ;;  %6887 = vst.msk [vmem:[#allocation3 + $0xc9] sm:$0xff] %vm948_vm1, %v6855_v22  ;;  %v6946_v22 = vld [vmem:[#allocation3 + $0x90] sm:$0xff] }
 0x7b6   : > { %v6783_v10 = vpop.permute.xlu0 %6782  ;;  %v6781_v49 = vpop.permute.xlu1 %6780 }
 0x7b7   : > { %v6858_v43 = vadd.f32 %v6783_v10, %v6698_v63  ;;  %v6857_v13 = vadd.f32 %v6781_v49, %v6697_v48  ;;  %v6945_v10 = vld [vmem:[#allocation3 + $0x80] sm:$0xff] }
 0x7b9   : > { %6890 = vst.msk [vmem:[#allocation3 + $0xf1] sm:$0xff] %vm948_vm1, %v6858_v43  ;;  %6889 = vst.msk [vmem:[#allocation3 + $0xe1] sm:$0xff] %vm948_vm1, %v6857_v13 }
 0x7ba   : > { %v6787_v44 = vpop.permute.xlu0 %6786  ;;  %v6785_v47 = vpop.permute.xlu1 %6784 }
 0x7bb   : > { %v6860_v16 = vadd.f32 %v6787_v44, %v6700_v52  ;;  %v6859_v1 = vadd.f32 %v6785_v47, %v6699_v15  ;;  %v6948_v52 = vld [vmem:[#allocation3 + $0xa8] sm:$0xff]  ;;  %v6947_v15 = vld [vmem:[#allocation3 + $0x98] sm:$0xff] }
 0x7bd   : > { %6892 = vst.msk [vmem:[#allocation3 + $0x109] sm:$0xff] %vm948_vm1, %v6860_v16  ;;  %6891 = vst.msk [vmem:[#allocation3 + $0xf9] sm:$0xff] %vm948_vm1, %v6859_v1 }
 0x7be   : > { %v6791_v56 = vpop.permute.xlu0 %6790  ;;  %v6789_v4 = vpop.permute.xlu1 %6788 }
 0x7bf   : > { %v6862_v21 = vadd.f32 %v6791_v56, %v6702_v3  ;;  %v6861_v31 = vadd.f32 %v6789_v4, %v6701_v7  ;;  %v6950_v4 = vld [vmem:[#allocation3 + $0xc0] sm:$0xff] }
 0x7c1   : > { %6894 = vst.msk [vmem:[#allocation3 + $0x121] sm:$0xff] %vm948_vm1, %v6862_v21  ;;  %6893 = vst.msk [vmem:[#allocation3 + $0x111] sm:$0xff] %vm948_vm1, %v6861_v31  ;;  %v6949_v21 = vld [vmem:[#allocation3 + $0xb0] sm:$0xff] }
 0x7c2   : > { %v6795_v2 = vpop.permute.xlu0 %6794  ;;  %v6793_v50 = vpop.permute.xlu1 %6792 }
 0x7c3   : > { %v6864_v8 = vadd.f32 %v6795_v2, %v6704_v19  ;;  %v6863_v45 = vadd.f32 %v6793_v50, %v6703_v14 }
 0x7c5   : > { %6896 = vst.msk [vmem:[#allocation3 + $0x139] sm:$0xff] %vm948_vm1, %v6864_v8  ;;  %6895 = vst.msk [vmem:[#allocation3 + $0x129] sm:$0xff] %vm948_vm1, %v6863_v45  ;;  %v6952_v45 = vld [vmem:[#allocation3 + $0xd8] sm:$0xff] }
 0x7c6   : > { %v6799_v41 = vpop.permute.xlu0 %6798  ;;  %v6797_v33 = vpop.permute.xlu1 %6796 }
 0x7c7   : > { %v6866_v36 = vadd.f32 %v6799_v41, %v6706_v54  ;;  %v6865_v42 = vadd.f32 %v6797_v33, %v6705_v53  ;;  %v6951_v41 = vld [vmem:[#allocation3 + $0xc8] sm:$0xff] }
 0x7c9   : > { %6898 = vst.msk [vmem:[#allocation3 + $0x151] sm:$0xff] %vm948_vm1, %v6866_v36  ;;  %6897 = vst.msk [vmem:[#allocation3 + $0x141] sm:$0xff] %vm948_vm1, %v6865_v42 }
 0x7ca   : > { %v6803_v62 = vpop.permute.xlu0 %6802  ;;  %v6801_v60 = vpop.permute.xlu1 %6800 }
 0x7cb   : > { %v6868_v58 = vadd.f32 %v6803_v62, %v6708_v40  ;;  %v6867_v30 = vadd.f32 %v6801_v60, %v6707_v39  ;;  %v6954_v40 = vld [vmem:[#allocation3 + $0xf0] sm:$0xff]  ;;  %v6953_v39 = vld [vmem:[#allocation3 + $0xe0] sm:$0xff] }
 0x7cd   : > { %6900 = vst.msk [vmem:[#allocation3 + $0x169] sm:$0xff] %vm948_vm1, %v6868_v58  ;;  %6899 = vst.msk [vmem:[#allocation3 + $0x159] sm:$0xff] %vm948_vm1, %v6867_v30 }
 0x7ce   : > { %v7007_v59 = vpop.permute.xlu0 %7006  ;;  %v6805_v18 = vpop.permute.xlu1 %6804 }
 0x7cf   : > { %v7098_v55 = vadd.f32 %v7007_v59, %v6938_v0  ;;  %v6869_v37 = vadd.f32 %v6805_v18, %v6709_v51  ;;  %v6956_v18 = vld [vmem:[#allocation3 + $0x108] sm:$0xff] }
 0x7d1   : > { %7130 = vst.msk [vmem:[#allocation3 + $0x30] sm:$0xff] %vm948_vm1, %v7098_v55  ;;  %6901 = vst.msk [vmem:[#allocation3 + $0x171] sm:$0xff] %vm948_vm1, %v6869_v37  ;;  %v6955_v55 = vld [vmem:[#allocation3 + $0xf8] sm:$0xff] }
 0x7d2   : > { %v7011_v11 = vpop.permute.xlu0 %7010  ;;  %v7009_v38 = vpop.permute.xlu1 %7008 }
 0x7d3   : > { %v7100_v20 = vadd.f32 %v7011_v11, %v6940_v9  ;;  %v7099_v57 = vadd.f32 %v7009_v38, %v6939_v5 }
 0x7d5   : > { %7132 = vst.msk [vmem:[#allocation3 + $0x48] sm:$0xff] %vm948_vm1, %v7100_v20  ;;  %7131 = vst.msk [vmem:[#allocation3 + $0x38] sm:$0xff] %vm948_vm1, %v7099_v57  ;;  %v6958_v57 = vld [vmem:[#allocation3 + $0x120] sm:$0xff] }
 0x7d6   : > { %v7015_v35 = vpop.permute.xlu0 %7014  ;;  %v7013_v46 = vpop.permute.xlu1 %7012 }
 0x7d7   : > { %v7102_v27 = vadd.f32 %v7015_v35, %v6942_v23  ;;  %v7101_v24 = vadd.f32 %v7013_v46, %v6941_v28  ;;  %v6957_v35 = vld [vmem:[#allocation3 + $0x110] sm:$0xff] }
 0x7d9   : > { %7134 = vst.msk [vmem:[#allocation3 + $0x60] sm:$0xff] %vm948_vm1, %v7102_v27  ;;  %7133 = vst.msk [vmem:[#allocation3 + $0x50] sm:$0xff] %vm948_vm1, %v7101_v24 }
 0x7da   : > { %v7019_v12 = vpop.permute.xlu0 %7018  ;;  %v7017_v61 = vpop.permute.xlu1 %7016 }
 0x7db   : > { %v7104_v25 = vadd.f32 %v7019_v12, %v6944_v17  ;;  %v7103_v32 = vadd.f32 %v7017_v61, %v6943_v6  ;;  %v6960_v17 = vld [vmem:[#allocation3 + $0x138] sm:$0xff]  ;;  %v6959_v6 = vld [vmem:[#allocation3 + $0x128] sm:$0xff] }
 0x7dc   : > { %v7158_v29 = vld [vmem:[#allocation3 + $0x32] sm:$0xff]  ;;  %v7159_v34 = vld [vmem:[#allocation3 + $0x3a] sm:$0xff] }
 0x7dd   : > { %7190 = vst.msk [vmem:[%s9811_s16] sm:$0xff] %vm948_vm1, %v7158_v29  ;;  %7191 = vst.msk [vmem:[%s9811_s16 + $0x8] sm:$0xff] %vm948_vm1, %v7159_v34 }
 0x7de   : > { %7136 = vst.msk [vmem:[#allocation3 + $0x78] sm:$0xff] %vm948_vm1, %v7104_v25  ;;  %7135 = vst.msk [vmem:[#allocation3 + $0x68] sm:$0xff] %vm948_vm1, %v7103_v32  ;;  %v7023_v26 = vpop.permute.xlu0 %7022  ;;  %v7021_v63 = vpop.permute.xlu1 %7020 }
 0x7df   : > { %v7106_v48 = vadd.f32 %v7023_v26, %v6946_v22  ;;  %v7105_v49 = vadd.f32 %v7021_v63, %v6945_v10  ;;  %v6962_v22 = vld [vmem:[#allocation3 + $0x150] sm:$0xff]  ;;  %v6961_v10 = vld [vmem:[#allocation3 + $0x140] sm:$0xff] }
 0x7e0   : > { %v7160_v43 = vld [vmem:[#allocation3 + $0x4a] sm:$0xff]  ;;  %v7161_v13 = vld [vmem:[#allocation3 + $0x52] sm:$0xff] }
 0x7e1   : > { %7192 = vst.msk [vmem:[%s9811_s16 + $0x10] sm:$0xff] %vm948_vm1, %v7160_v43  ;;  %7193 = vst.msk [vmem:[%s9811_s16 + $0x18] sm:$0xff] %vm948_vm1, %v7161_v13 }
 0x7e2   : > { %7138 = vst.msk [vmem:[#allocation3 + $0x90] sm:$0xff] %vm948_vm1, %v7106_v48  ;;  %7137 = vst.msk [vmem:[#allocation3 + $0x80] sm:$0xff] %vm948_vm1, %v7105_v49  ;;  %v7027_v44 = vpop.permute.xlu0 %7026  ;;  %v7025_v47 = vpop.permute.xlu1 %7024 }
 0x7e3   : > { %v7108_v16 = vadd.f32 %v7027_v44, %v6948_v52  ;;  %v7107_v1 = vadd.f32 %v7025_v47, %v6947_v15  ;;  %v6964_v52 = vld [vmem:[#allocation3 + $0x168] sm:$0xff]  ;;  %v6963_v15 = vld [vmem:[#allocation3 + $0x158] sm:$0xff] }
 0x7e5   : > { %v7162_v56 = vld [vmem:[#allocation3 + $0x62] sm:$0xff]  ;;  %v7163_v3 = vld [vmem:[#allocation3 + $0x6a] sm:$0xff]  ;;  %7140 = vst.msk [vmem:[#allocation3 + $0xa8] sm:$0xff] %vm948_vm1, %v7108_v16  ;;  %7139 = vst.msk [vmem:[#allocation3 + $0x98] sm:$0xff] %vm948_vm1, %v7107_v1 }
 0x7e6   : > { %7194 = vst.msk [vmem:[%s9811_s16 + $0x20] sm:$0xff] %vm948_vm1, %v7162_v56  ;;  %7195 = vst.msk [vmem:[%s9811_s16 + $0x28] sm:$0xff] %vm948_vm1, %v7163_v3  ;;  %v7031_v7 = vpop.permute.xlu0 %7030  ;;  %v7029_v31 = vpop.permute.xlu1 %7028 }
 0x7e7   : > { %v7110_v2 = vadd.f32 %v7031_v7, %v6950_v4  ;;  %v7109_v19 = vadd.f32 %v7029_v31, %v6949_v21  ;;  %v6934_v7 = vld [vmem:[#allocation3] sm:$0xff]  ;;  %v6965_v21 = vld [vmem:[#allocation3 + $0x170] sm:$0xff] }
 0x7e9   : > { %v7164_v14 = vld [vmem:[#allocation3 + $0x7a] sm:$0xff]  ;;  %v7165_v50 = vld [vmem:[#allocation3 + $0x82] sm:$0xff]  ;;  %7142 = vst.msk [vmem:[#allocation3 + $0xc0] sm:$0xff] %vm948_vm1, %v7110_v2  ;;  %7141 = vst.msk [vmem:[#allocation3 + $0xb0] sm:$0xff] %vm948_vm1, %v7109_v19 }
 0x7ea   : > { %7196 = vst.msk [vmem:[%s9811_s16 + $0x30] sm:$0xff] %vm948_vm1, %v7164_v14  ;;  %7197 = vst.msk [vmem:[%s9811_s16 + $0x38] sm:$0xff] %vm948_vm1, %v7165_v50  ;;  %v7035_v8 = vpop.permute.xlu0 %7034  ;;  %v7033_v54 = vpop.permute.xlu1 %7032 }
 0x7eb   : > { %v7112_v53 = vadd.f32 %v7035_v8, %v6952_v45  ;;  %v7111_v33 = vadd.f32 %v7033_v54, %v6951_v41  ;;  %v6936_v45 = vld [vmem:[#allocation3 + $0x18] sm:$0xff]  ;;  %v6935_v41 = vld [vmem:[#allocation3 + $0x8] sm:$0xff] }
 0x7ec   : > { %v7166_v36 = vld [vmem:[#allocation3 + $0x92] sm:$0xff]  ;;  %v7167_v42 = vld [vmem:[#allocation3 + $0x9a] sm:$0xff] }
 0x7ed   : > { %7198 = vst.msk [vmem:[%s9811_s16 + $0x40] sm:$0xff] %vm948_vm1, %v7166_v36  ;;  %7199 = vst.msk [vmem:[%s9811_s16 + $0x48] sm:$0xff] %vm948_vm1, %v7167_v42 }
 0x7ee   : > { %7144 = vst.msk [vmem:[#allocation3 + $0xd8] sm:$0xff] %vm948_vm1, %v7112_v53  ;;  %7143 = vst.msk [vmem:[#allocation3 + $0xc8] sm:$0xff] %vm948_vm1, %v7111_v33  ;;  %v7039_v62 = vpop.permute.xlu0 %7038  ;;  %v7037_v60 = vpop.permute.xlu1 %7036 }
 0x7ef   : > { %v7114_v58 = vadd.f32 %v7039_v62, %v6954_v40  ;;  %v7113_v30 = vadd.f32 %v7037_v60, %v6953_v39  ;;  %v6937_v62 = vld [vmem:[#allocation3 + $0x20] sm:$0xff] }
 0x7f0   : > { %v7168_v59 = vld [vmem:[#allocation3 + $0xaa] sm:$0xff]  ;;  %v7169_v0 = vld [vmem:[#allocation3 + $0xb2] sm:$0xff] }
 0x7f1   : > { %7200 = vst.msk [vmem:[%s9811_s16 + $0x50] sm:$0xff] %vm948_vm1, %v7168_v59  ;;  %7201 = vst.msk [vmem:[%s9811_s16 + $0x58] sm:$0xff] %vm948_vm1, %v7169_v0 }
 0x7f2   : > { %7146 = vst.msk [vmem:[#allocation3 + $0xf0] sm:$0xff] %vm948_vm1, %v7114_v58  ;;  %7145 = vst.msk [vmem:[#allocation3 + $0xe0] sm:$0xff] %vm948_vm1, %v7113_v30  ;;  %v7043_v51 = vpop.permute.xlu0 %7042  ;;  %v7041_v37 = vpop.permute.xlu1 %7040 }
 0x7f3   : > { %v7116_v11 = vadd.f32 %v7043_v51, %v6956_v18  ;;  %v7115_v9 = vadd.f32 %v7041_v37, %v6955_v55 }
 0x7f5   : > { %v7170_v5 = vld [vmem:[#allocation3 + $0xc2] sm:$0xff]  ;;  %v7171_v38 = vld [vmem:[#allocation3 + $0xca] sm:$0xff]  ;;  %7148 = vst.msk [vmem:[#allocation3 + $0x108] sm:$0xff] %vm948_vm1, %v7116_v11  ;;  %7147 = vst.msk [vmem:[#allocation3 + $0xf8] sm:$0xff] %vm948_vm1, %v7115_v9 }
 0x7f6   : > { %7202 = vst.msk [vmem:[%s9811_s16 + $0x60] sm:$0xff] %vm948_vm1, %v7170_v5  ;;  %7203 = vst.msk [vmem:[%s9811_s16 + $0x68] sm:$0xff] %vm948_vm1, %v7171_v38  ;;  %v7047_v20 = vpop.permute.xlu0 %7046  ;;  %v7045_v23 = vpop.permute.xlu1 %7044 }
 0x7f7   : > { %v7118_v28 = vadd.f32 %v7047_v20, %v6958_v57  ;;  %v7117_v46 = vadd.f32 %v7045_v23, %v6957_v35 }
 0x7f9   : > { %v7172_v27 = vld [vmem:[#allocation3 + $0xda] sm:$0xff]  ;;  %v7173_v24 = vld [vmem:[#allocation3 + $0xe2] sm:$0xff]  ;;  %7150 = vst.msk [vmem:[#allocation3 + $0x120] sm:$0xff] %vm948_vm1, %v7118_v28  ;;  %7149 = vst.msk [vmem:[#allocation3 + $0x110] sm:$0xff] %vm948_vm1, %v7117_v46 }
 0x7fa   : > { %7204 = vst.msk [vmem:[%s9811_s16 + $0x70] sm:$0xff] %vm948_vm1, %v7172_v27  ;;  %7205 = vst.msk [vmem:[%s9811_s16 + $0x78] sm:$0xff] %vm948_vm1, %v7173_v24  ;;  %v7051_v12 = vpop.permute.xlu0 %7050  ;;  %v7049_v61 = vpop.permute.xlu1 %7048 }
 0x7fb   : > { %v7120_v25 = vadd.f32 %v7051_v12, %v6960_v17  ;;  %v7119_v32 = vadd.f32 %v7049_v61, %v6959_v6 }
 0x7fc   : > { %v7174_v29 = vld [vmem:[#allocation3 + $0xf2] sm:$0xff]  ;;  %v7175_v34 = vld [vmem:[#allocation3 + $0xfa] sm:$0xff] }
 0x7fd   : > { %7206 = vst.msk [vmem:[%s9811_s16 + $0x80] sm:$0xff] %vm948_vm1, %v7174_v29  ;;  %7207 = vst.msk [vmem:[%s9811_s16 + $0x88] sm:$0xff] %vm948_vm1, %v7175_v34 }
 0x7fe   : > { %7152 = vst.msk [vmem:[#allocation3 + $0x138] sm:$0xff] %vm948_vm1, %v7120_v25  ;;  %7151 = vst.msk [vmem:[#allocation3 + $0x128] sm:$0xff] %vm948_vm1, %v7119_v32  ;;  %v7055_v26 = vpop.permute.xlu0 %7054  ;;  %v7053_v63 = vpop.permute.xlu1 %7052 }
 0x7ff   : > { %v7122_v48 = vadd.f32 %v7055_v26, %v6962_v22  ;;  %v7121_v49 = vadd.f32 %v7053_v63, %v6961_v10 }
 0x800   : > { %v7176_v43 = vld [vmem:[#allocation3 + $0x10a] sm:$0xff]  ;;  %v7177_v13 = vld [vmem:[#allocation3 + $0x112] sm:$0xff] }
 0x801   : > { %7208 = vst.msk [vmem:[%s9811_s16 + $0x90] sm:$0xff] %vm948_vm1, %v7176_v43  ;;  %7209 = vst.msk [vmem:[%s9811_s16 + $0x98] sm:$0xff] %vm948_vm1, %v7177_v13 }
 0x802   : > { %7154 = vst.msk [vmem:[#allocation3 + $0x150] sm:$0xff] %vm948_vm1, %v7122_v48  ;;  %7153 = vst.msk [vmem:[#allocation3 + $0x140] sm:$0xff] %vm948_vm1, %v7121_v49  ;;  %v7059_v44 = vpop.permute.xlu0 %7058  ;;  %v7057_v47 = vpop.permute.xlu1 %7056 }
 0x803   : > { %v7124_v16 = vadd.f32 %v7059_v44, %v6964_v52  ;;  %v7123_v1 = vadd.f32 %v7057_v47, %v6963_v15 }
 0x805   : > { %v7178_v56 = vld [vmem:[#allocation3 + $0x122] sm:$0xff]  ;;  %v7179_v3 = vld [vmem:[#allocation3 + $0x12a] sm:$0xff]  ;;  %7156 = vst.msk [vmem:[#allocation3 + $0x168] sm:$0xff] %vm948_vm1, %v7124_v16  ;;  %7155 = vst.msk [vmem:[#allocation3 + $0x158] sm:$0xff] %vm948_vm1, %v7123_v1 }
 0x806   : > { %7210 = vst.msk [vmem:[%s9811_s16 + $0xa0] sm:$0xff] %vm948_vm1, %v7178_v56  ;;  %7211 = vst.msk [vmem:[%s9811_s16 + $0xa8] sm:$0xff] %vm948_vm1, %v7179_v3  ;;  %v6999_v4 = vpop.permute.xlu0 %6998  ;;  %v7061_v31 = vpop.permute.xlu1 %7060 }
 0x807   : > { %v7094_v2 = vadd.f32 %v6999_v4, %v6934_v7  ;;  %v7125_v19 = vadd.f32 %v7061_v31, %v6965_v21 }
 0x809   : > { %v7180_v14 = vld [vmem:[#allocation3 + $0x13a] sm:$0xff]  ;;  %v7181_v50 = vld [vmem:[#allocation3 + $0x142] sm:$0xff]  ;;  %7126 = vst.msk [vmem:[#allocation3] sm:$0xff] %vm948_vm1, %v7094_v2  ;;  %7157 = vst.msk [vmem:[#allocation3 + $0x170] sm:$0xff] %vm948_vm1, %v7125_v19 }
 0x80a   : > { %7212 = vst.msk [vmem:[%s9811_s16 + $0xb0] sm:$0xff] %vm948_vm1, %v7180_v14  ;;  %7213 = vst.msk [vmem:[%s9811_s16 + $0xb8] sm:$0xff] %vm948_vm1, %v7181_v50  ;;  %v7003_v8 = vpop.permute.xlu0 %7002  ;;  %v7001_v54 = vpop.permute.xlu1 %7000 }
 0x80b   : > { %v7096_v53 = vadd.f32 %v7003_v8, %v6936_v45  ;;  %v7095_v33 = vadd.f32 %v7001_v54, %v6935_v41 }
 0x80c   : > { %v7182_v36 = vld [vmem:[#allocation3 + $0x152] sm:$0xff]  ;;  %v7183_v42 = vld [vmem:[#allocation3 + $0x15a] sm:$0xff] }
 0x80d   : > { %7214 = vst.msk [vmem:[%s9811_s16 + $0xc0] sm:$0xff] %vm948_vm1, %v7182_v36  ;;  %7215 = vst.msk [vmem:[%s9811_s16 + $0xc8] sm:$0xff] %vm948_vm1, %v7183_v42 }
 0x80e   : > { %7128 = vst.msk [vmem:[#allocation3 + $0x18] sm:$0xff] %vm948_vm1, %v7096_v53  ;;  %7127 = vst.msk [vmem:[#allocation3 + $0x8] sm:$0xff] %vm948_vm1, %v7095_v33  ;;  %v7005_v40 = vpop.permute.xlu1 %7004 }
 0x80f   : > { %v7097_v39 = vadd.f32 %v7005_v40, %v6937_v62 }
 0x810   : > { %v7184_v60 = vld [vmem:[#allocation3 + $0x16a] sm:$0xff]  ;;  %v7185_v58 = vld [vmem:[#allocation3 + $0x172] sm:$0xff] }
 0x811   : > { %7216 = vst.msk [vmem:[%s9811_s16 + $0xd0] sm:$0xff] %vm948_vm1, %v7184_v60  ;;  %7217 = vst.msk [vmem:[%s9811_s16 + $0xd8] sm:$0xff] %vm948_vm1, %v7185_v58 }
 0x812   : > { %7129 = vst.msk [vmem:[#allocation3 + $0x20] sm:$0xff] %vm948_vm1, %v7097_v39 }
 0x813 PF: > { %p13_p9 = scmp.ge.s32.totalorder %s7653_s17, 4   ;;  %s10806_s12 = smov %s7581_s13 }
 0x814   : > { %s10807_s13 = smov %s7585_s14  ;;  %s10808_s14 = smov %s7663_s20 }
 0x815   : > { %s10809_s15 = smov %s7653_s17  ;;  %15 = sbr.rel (!%p13_p9) target bundleno = 3 (0x3), region = 76 }
 0x81a   :  { %7243 = vsyncpa [#allocation5], 1 }
 0x81b   :  { %7245 = vsyncpa [#allocation5 + $0x1], 1 }

</bundles_post_ra>
